<compile_context>
chip_gen: v5e
topology: v5e:2x2
jax: 0.10.0
libtpu: 0.0.40
codegen_flags: <defaults>
</compile_context>

<pallas_src>
import functools
import math

import jax
import jax.numpy as jnp
from jax.experimental import pallas as pl
from jax.experimental.pallas import tpu as pltpu


# ----------------------------------------------------------------------------
# Shared math helpers (used inside the kernel and in the pure-JAX reference)
# ----------------------------------------------------------------------------
def _layer_norm(t, gamma, beta, eps):
    mu = jnp.mean(t, axis=-1, keepdims=True)
    var = jnp.mean(jnp.square(t - mu), axis=-1, keepdims=True)
    return (t - mu) * jax.lax.rsqrt(var + eps) * gamma + beta


def _gelu_tanh(t):
    # TODO(synk): PyTorch nn.GELU() default is the exact erf form; the tanh
    # approximation (max abs divergence ~1e-3 vs erf) is used so it lowers
    # cleanly on the TPU VPU/EUP. The JAX reference below uses the same form.
    c = math.sqrt(2.0 / math.pi)
    return 0.5 * t * (1.0 + jnp.tanh(c * (t + 0.044715 * t * t * t)))


# ----------------------------------------------------------------------------
# Fused Encoder kernel: one grid step = Bb batch elements (M = Bb*N rows)
# ----------------------------------------------------------------------------
def _encoder_kernel(
    x_ref,
    wq_ref, wk_ref, wv_ref, wo_ref,
    ln1_g_ref, ln1_b_ref, ln2_g_ref, ln2_b_ref,
    w1_ref, b1_ref, w2_ref, b2_ref,
    o_ref,
    *, num_heads, head_dim, seq_len, block_batch, inv_scale, ln_eps, compute_dtype,
):
    f32 = jnp.float32
    cdt = compute_dtype
    # Explicit HIGHEST precision only matters for the f32 path (multi-pass MXU);
    # bf16 operands are single-pass anyway.
    prec = (jax.lax.Precision.HIGHEST
            if jnp.dtype(compute_dtype) == jnp.dtype(jnp.float32) else None)
    # Contract last dim of activations with last dim of torch-layout (out, in)
    # weights: x @ W^T (MXU-native transposed-RHS form, no host transpose).
    dn_t = (((1,), (1,)), ((), ()))

    def mm(a, w_ref):
        return jax.lax.dot_general(a.astype(cdt), w_ref[...], dn_t,
                                   precision=prec, preferred_element_type=f32)

    H, hd, N, Bb = num_heads, head_dim, seq_len, block_batch

    x = x_ref[...].astype(f32)                     # (M, dim), lane-dense

    # Projections on the full (M, dim) slab: tall-M matmuls, f32 accumulation.
    q = mm(x, wq_ref) * inv_scale                  # fold 1/sqrt(hd) into q
    k = mm(x, wk_ref)
    v = mm(x, wv_ref)

    def split_heads(t):
        # (M, dim) -> (H, M, hd): one-time layout shuffle (static lane slices
        # + major-axis stack); replaces per-head masked slices in the hot loop.
        return jnp.stack([t[:, h * hd:(h + 1) * hd] for h in range(H)],
                         axis=0).astype(cdt)

    qh, kh, vh = split_heads(q), split_heads(k), split_heads(v)

    # Attention stays per batch element (no cross-batch mixing); heads batched.
    ctx_rows = []
    for b in range(Bb):                            # Bb is small & static
        lo = b * N
        qb = qh[:, lo:lo + N, :]                   # (H, N, hd) sublane slice
        kb = kh[:, lo:lo + N, :]
        vb = vh[:, lo:lo + N, :]
        s = jnp.einsum("hqd,hkd->hqk", qb, kb,
                       precision=prec, preferred_element_type=f32)   # (H, N, N)
        s = s - jnp.max(s, axis=-1, keepdims=True)
        p = jnp.exp(s)
        p = p / jnp.sum(p, axis=-1, keepdims=True)  # exact (not approx) softmax
        # TODO(synk): training-mode attention dropout not implemented (eval identity).
        ctx_rows.append(jnp.einsum("hqk,hkd->hqd", p.astype(cdt), vb,
                                   precision=prec, preferred_element_type=f32))
    ctx = ctx_rows[0] if Bb == 1 else jnp.concatenate(ctx_rows, axis=1)  # (H, M, hd)

    # Merge heads back to a lane-dense (M, dim) slab: single concat, no masked
    # scatter into scratch, then one full-K W_o matmul.
    attn = jnp.concatenate([ctx[h] for h in range(H)], axis=-1)          # (M, dim)
    attn = mm(attn, wo_ref)

    # residual (post-attention dropout = identity in eval) + LayerNorm1 (f32)
    x1 = _layer_norm(x + attn, ln1_g_ref[...], ln1_b_ref[...], ln_eps)

    # MLP: Linear -> GELU -> Linear (+ eval-mode dropout); elementwise math f32
    h1 = mm(x1, w1_ref) + b1_ref[...]
    h1 = _gelu_tanh(h1)
    mlp = mm(h1, w2_ref) + b2_ref[...]

    # residual + LayerNorm2
    o_ref[...] = _layer_norm(x1 + mlp, ln2_g_ref[...], ln2_b_ref[...],
                             ln_eps).astype(o_ref.dtype)


# ----------------------------------------------------------------------------
# Wrapper
# ----------------------------------------------------------------------------
def _choose_block_batch(B, N, max_rows=512):
    """Largest divisor of B with Bb*N <= max_rows: flattening Bb*N into the
    matmul M dimension raises MXU fill and amortizes per-grid-step overhead."""
    best = 1
    for d in range(1, B + 1):
        if B % d == 0 and d * N <= max_rows:
            best = d
    return best


def encoder_forward(x, params, num_heads, *, compute_dtype=jnp.bfloat16,
                    block_batch=None):
    """x: (B, N, dim); params hold torch-layout (out, in) weights + 1-D LN/bias.

    compute_dtype: dtype of the MXU operands (bf16 recommended on v6e/v7x);
    accumulation, softmax, LayerNorm, residuals stay f32.
    """
    B, N, dim = x.shape
    assert dim % num_heads == 0
    hidden = params["mlp_w1"].shape[0]
    head_dim = dim // num_heads
    inv_scale = 1.0 / math.sqrt(head_dim)

    Bb = block_batch if block_batch is not None else _choose_block_batch(B, N)
    assert B % Bb == 0
    M = Bb * N
    assert M % 8 == 0, "Bb*N rows must be sublane-aligned"

    wdt = compute_dtype
    row = lambda p: p.reshape(1, -1).astype(jnp.float32)   # 1-D -> lane-dense (1, D)
    full = lambda shape: pl.BlockSpec(shape, lambda i: (0, 0))

    # Host-side: flatten (B, N, dim) -> (B*N, dim) so the kernel works on a
    # lane-dense 2-D slab and the output store is a full-lane (M, dim) block.
    x2d = x.reshape(B * N, dim)

    kernel = functools.partial(
        _encoder_kernel,
        num_heads=num_heads, head_dim=head_dim, seq_len=N, block_batch=Bb,
        inv_scale=inv_scale, ln_eps=1e-12,        # matches nn.LayerNorm(eps=1e-12)
        compute_dtype=compute_dtype,
    )

    out2d = pl.pallas_call(
        kernel,
        out_shape=jax.ShapeDtypeStruct((B * N, dim), x.dtype),
        grid=(B // Bb,),
        in_specs=[
            pl.BlockSpec((M, dim), lambda i: (i, 0)),        # x rows for this step
            full((dim, dim)),                                # W_q
            full((dim, dim)),                                # W_k
            full((dim, dim)),                                # W_v
            full((dim, dim)),                                # W_o
            full((1, dim)),                                  # ln1 gamma
            full((1, dim)),                                  # ln1 beta
            full((1, dim)),                                  # ln2 gamma
            full((1, dim)),                                  # ln2 beta
            full((hidden, dim)),                             # mlp W1
            full((1, hidden)),                               # mlp b1
            full((dim, hidden)),                             # mlp W2
            full((1, dim)),                                  # mlp b2
        ],
        out_specs=pl.BlockSpec((M, dim), lambda i: (i, 0)),
        compiler_params=pltpu.CompilerParams(
            dimension_semantics=("parallel",),
            # Explicit budget (v7x has only 64 MiB physical VMEM).
            vmem_limit_bytes=48 * 1024 * 1024,
        ),
    )(
        x2d,
        params["W_q"].astype(wdt), params["W_k"].astype(wdt),
        params["W_v"].astype(wdt), params["W_o"].astype(wdt),
        row(params["ln1_g"]), row(params["ln1_b"]),
        row(params["ln2_g"]), row(params["ln2_b"]),
        params["mlp_w1"].astype(wdt), row(params["mlp_b1"]),
        params["mlp_w2"].astype(wdt), row(params["mlp_b2"]),
    )
    return out2d.reshape(B, N, dim)


# ----------------------------------------------------------------------------
# Pure-JAX reference (mirrors the PyTorch Encoder.forward, dropout in eval mode)
# ----------------------------------------------------------------------------
def reference(x, params, num_heads, eps=1e-12):
    B, N, dim = x.shape
    hd = dim // num_heads
    scale = math.sqrt(hd)

    q = x @ params["W_q"].T
    k = x @ params["W_k"].T
    v = x @ params["W_v"].T
    q = q.reshape(B, N, num_heads, hd).transpose(0, 2, 1, 3)
    k = k.reshape(B, N, num_heads, hd).transpose(0, 2, 1, 3)
    v = v.reshape(B, N, num_heads, hd).transpose(0, 2, 1, 3)

    scores = jnp.einsum("bhqd,bhkd->bhqk", q, k) / scale
    probs = jax.nn.softmax(scores, axis=-1)
    attn = jnp.einsum("bhqk,bhkd->bhqd", probs, v)
    attn = attn.transpose(0, 2, 1, 3).reshape(B, N, dim)
    attn = attn @ params["W_o"].T

    x1 = _layer_norm(x + attn, params["ln1_g"], params["ln1_b"], eps)
    h = x1 @ params["mlp_w1"].T + params["mlp_b1"]
    mlp = _gelu_tanh(h) @ params["mlp_w2"].T + params["mlp_b2"]
    return _layer_norm(x1 + mlp, params["ln2_g"], params["ln2_b"], eps)


if __name__ == "__main__":
    # Full-precision matmuls for the XLA reference (kernel f32 path pins
    # precision=HIGHEST explicitly on its dot_generals).
    jax.config.update("jax_default_matmul_precision", "highest")

    # Small shapes consistent with the module: (batch, num_tokens, dim)
    batch, num_tokens, dim, num_heads, hidden_dim = 2, 16, 128, 8, 256

    key = jax.random.PRNGKey(0)
    keys = jax.random.split(key, 13)
    s_in = 1.0 / math.sqrt(dim)
    s_hid = 1.0 / math.sqrt(hidden_dim)

    params = {
        "W_q": jax.random.normal(keys[1], (dim, dim), jnp.float32) * s_in,
        "W_k": jax.random.normal(keys[2], (dim, dim), jnp.float32) * s_in,
        "W_v": jax.random.normal(keys[3], (dim, dim), jnp.float32) * s_in,
        "W_o": jax.random.normal(keys[4], (dim, dim), jnp.float32) * s_in,
        "ln1_g": 1.0 + 0.1 * jax.random.normal(keys[5], (dim,), jnp.float32),
        "ln1_b": 0.1 * jax.random.normal(keys[6], (dim,), jnp.float32),
        "ln2_g": 1.0 + 0.1 * jax.random.normal(keys[7], (dim,), jnp.float32),
        "ln2_b": 0.1 * jax.random.normal(keys[8], (dim,), jnp.float32),
        "mlp_w1": jax.random.normal(keys[9], (hidden_dim, dim), jnp.float32) * s_in,
        "mlp_b1": 0.1 * jax.random.normal(keys[10], (hidden_dim,), jnp.float32),
        "mlp_w2": jax.random.normal(keys[11], (dim, hidden_dim), jnp.float32) * s_hid,
        "mlp_b2": 0.1 * jax.random.normal(keys[12], (dim,), jnp.float32),
    }
    x = jax.random.normal(keys[0], (batch, num_tokens, dim), jnp.float32)

    ref = reference(x, params, num_heads)

    # 1) f32 compute path: exact softmax division + matching GELU/eps in the
    #    reference -> tight tolerance (re-tightened per the perf review).
    out_f32 = jax.block_until_ready(
        encoder_forward(x, params, num_heads, compute_dtype=jnp.float32))
    assert out_f32.shape == (batch, num_tokens, dim)
    err_f32 = float(jnp.max(jnp.abs(out_f32 - ref)))
    assert err_f32 < 1e-4, f"f32 kernel mismatch vs reference (max abs err {err_f32})"

    # 2) bf16 MXU-operand path (perf configuration for v6e/v7x): f32 accumulation,
    #    f32 softmax/LayerNorm/residuals; looser tolerance from bf16 operands only.
    out_bf16 = jax.block_until_ready(
        encoder_forward(x, params, num_heads, compute_dtype=jnp.bfloat16))
    err_bf16 = float(jnp.max(jnp.abs(out_bf16 - ref)))
    assert err_bf16 < 1e-1, f"bf16 kernel mismatch vs reference (max abs err {err_bf16})"

    print("KERNEL_OK")
</pallas_src>

<mosaic_0001>
module attributes {stable_mosaic.version = 11 : i64} {
  func.func @_encoder_kernel(%arg0: i32, %arg1: memref<32x128xf32, #tpu.memory_space<vmem>>, %arg2: memref<128x128xf32, #tpu.memory_space<vmem>>, %arg3: memref<128x128xf32, #tpu.memory_space<vmem>>, %arg4: memref<128x128xf32, #tpu.memory_space<vmem>>, %arg5: memref<128x128xf32, #tpu.memory_space<vmem>>, %arg6: memref<1x128xf32, #tpu.memory_space<vmem>>, %arg7: memref<1x128xf32, #tpu.memory_space<vmem>>, %arg8: memref<1x128xf32, #tpu.memory_space<vmem>>, %arg9: memref<1x128xf32, #tpu.memory_space<vmem>>, %arg10: memref<256x128xf32, #tpu.memory_space<vmem>>, %arg11: memref<1x256xf32, #tpu.memory_space<vmem>>, %arg12: memref<128x256xf32, #tpu.memory_space<vmem>>, %arg13: memref<1x128xf32, #tpu.memory_space<vmem>>, %arg14: memref<32x128xf32, #tpu.memory_space<vmem>>) attributes {dimension_semantics = [#tpu.dimension_semantics<parallel>], iteration_bounds = array<i64: 1>, scalar_prefetch = 0 : i64, scratch_operands = 0 : i64, tpu.core_type = #tpu.core_type<tc>, window_params = [{transform_indices = @transform_0, window_bounds = array<i64: 32, 128>}, {pipeline_mode = #tpu.pipeline_mode<synchronous>, transform_indices = @transform_1, window_bounds = array<i64: 128, 128>}, {pipeline_mode = #tpu.pipeline_mode<synchronous>, transform_indices = @transform_2, window_bounds = array<i64: 128, 128>}, {pipeline_mode = #tpu.pipeline_mode<synchronous>, transform_indices = @transform_3, window_bounds = array<i64: 128, 128>}, {pipeline_mode = #tpu.pipeline_mode<synchronous>, transform_indices = @transform_4, window_bounds = array<i64: 128, 128>}, {pipeline_mode = #tpu.pipeline_mode<synchronous>, transform_indices = @transform_5, window_bounds = array<i64: 1, 128>}, {pipeline_mode = #tpu.pipeline_mode<synchronous>, transform_indices = @transform_6, window_bounds = array<i64: 1, 128>}, {pipeline_mode = #tpu.pipeline_mode<synchronous>, transform_indices = @transform_7, window_bounds = array<i64: 1, 128>}, {pipeline_mode = #tpu.pipeline_mode<synchronous>, transform_indices = @transform_8, window_bounds = array<i64: 1, 128>}, {pipeline_mode = #tpu.pipeline_mode<synchronous>, transform_indices = @transform_9, window_bounds = array<i64: 256, 128>}, {pipeline_mode = #tpu.pipeline_mode<synchronous>, transform_indices = @transform_10, window_bounds = array<i64: 1, 256>}, {pipeline_mode = #tpu.pipeline_mode<synchronous>, transform_indices = @transform_11, window_bounds = array<i64: 128, 256>}, {pipeline_mode = #tpu.pipeline_mode<synchronous>, transform_indices = @transform_12, window_bounds = array<i64: 1, 128>}, {transform_indices = @transform_13, window_bounds = array<i64: 32, 128>}]} {
    %c0 = arith.constant 0 : index
    %c0_0 = arith.constant 0 : index
    %0 = vector.load %arg1[%c0, %c0_0] : memref<32x128xf32, #tpu.memory_space<vmem>>, vector<32x128xf32>
    %c0_1 = arith.constant 0 : index
    %c0_2 = arith.constant 0 : index
    %1 = vector.load %arg2[%c0_1, %c0_2] : memref<128x128xf32, #tpu.memory_space<vmem>>, vector<128x128xf32>
    %cst = arith.constant dense<0.000000e+00> : vector<32x128xf32>
    %2 = tpu.matmul %0, %1, %cst {dimension_numbers = #tpu.dot_dimension_numbers<[1], [1], [0], [0], [0, 0, 1, 0], [], []>, precision = #tpu.contract_precision<fp32>} : vector<32x128xf32>, vector<128x128xf32>, vector<32x128xf32> -> vector<32x128xf32>
    %cst_3 = arith.constant 2.500000e-01 : f32
    %3 = vector.broadcast %cst_3 : f32 to vector<32x128xf32>
    %4 = arith.mulf %2, %3 : vector<32x128xf32>
    %c0_4 = arith.constant 0 : index
    %c0_5 = arith.constant 0 : index
    %5 = vector.load %arg3[%c0_4, %c0_5] : memref<128x128xf32, #tpu.memory_space<vmem>>, vector<128x128xf32>
    %cst_6 = arith.constant dense<0.000000e+00> : vector<32x128xf32>
    %6 = tpu.matmul %0, %5, %cst_6 {dimension_numbers = #tpu.dot_dimension_numbers<[1], [1], [0], [0], [0, 0, 1, 0], [], []>, precision = #tpu.contract_precision<fp32>} : vector<32x128xf32>, vector<128x128xf32>, vector<32x128xf32> -> vector<32x128xf32>
    %c0_7 = arith.constant 0 : index
    %c0_8 = arith.constant 0 : index
    %7 = vector.load %arg4[%c0_7, %c0_8] : memref<128x128xf32, #tpu.memory_space<vmem>>, vector<128x128xf32>
    %cst_9 = arith.constant dense<0.000000e+00> : vector<32x128xf32>
    %8 = tpu.matmul %0, %7, %cst_9 {dimension_numbers = #tpu.dot_dimension_numbers<[1], [1], [0], [0], [0, 0, 1, 0], [], []>, precision = #tpu.contract_precision<fp32>} : vector<32x128xf32>, vector<128x128xf32>, vector<32x128xf32> -> vector<32x128xf32>
    %9 = vector.extract_strided_slice %4 {offsets = [0, 0], sizes = [32, 16], strides = [1, 1]} : vector<32x128xf32> to vector<32x16xf32>
    %10 = vector.extract_strided_slice %4 {offsets = [0, 16], sizes = [32, 16], strides = [1, 1]} : vector<32x128xf32> to vector<32x16xf32>
    %11 = vector.extract_strided_slice %4 {offsets = [0, 32], sizes = [32, 16], strides = [1, 1]} : vector<32x128xf32> to vector<32x16xf32>
    %12 = vector.extract_strided_slice %4 {offsets = [0, 48], sizes = [32, 16], strides = [1, 1]} : vector<32x128xf32> to vector<32x16xf32>
    %13 = vector.extract_strided_slice %4 {offsets = [0, 64], sizes = [32, 16], strides = [1, 1]} : vector<32x128xf32> to vector<32x16xf32>
    %14 = vector.extract_strided_slice %4 {offsets = [0, 80], sizes = [32, 16], strides = [1, 1]} : vector<32x128xf32> to vector<32x16xf32>
    %15 = vector.extract_strided_slice %4 {offsets = [0, 96], sizes = [32, 16], strides = [1, 1]} : vector<32x128xf32> to vector<32x16xf32>
    %16 = vector.extract_strided_slice %4 {offsets = [0, 112], sizes = [32, 16], strides = [1, 1]} : vector<32x128xf32> to vector<32x16xf32>
    %17 = vector.shape_cast %9 : vector<32x16xf32> to vector<1x32x16xf32>
    %18 = vector.shape_cast %10 : vector<32x16xf32> to vector<1x32x16xf32>
    %19 = vector.shape_cast %11 : vector<32x16xf32> to vector<1x32x16xf32>
    %20 = vector.shape_cast %12 : vector<32x16xf32> to vector<1x32x16xf32>
    %21 = vector.shape_cast %13 : vector<32x16xf32> to vector<1x32x16xf32>
    %22 = vector.shape_cast %14 : vector<32x16xf32> to vector<1x32x16xf32>
    %23 = vector.shape_cast %15 : vector<32x16xf32> to vector<1x32x16xf32>
    %24 = vector.shape_cast %16 : vector<32x16xf32> to vector<1x32x16xf32>
    %25 = tpu.concatenate %17, %18, %19, %20, %21, %22, %23, %24 in 0 : vector<1x32x16xf32>, vector<1x32x16xf32>, vector<1x32x16xf32>, vector<1x32x16xf32>, vector<1x32x16xf32>, vector<1x32x16xf32>, vector<1x32x16xf32>, vector<1x32x16xf32> -> vector<8x32x16xf32>
    %26 = vector.extract_strided_slice %6 {offsets = [0, 0], sizes = [32, 16], strides = [1, 1]} : vector<32x128xf32> to vector<32x16xf32>
    %27 = vector.extract_strided_slice %6 {offsets = [0, 16], sizes = [32, 16], strides = [1, 1]} : vector<32x128xf32> to vector<32x16xf32>
    %28 = vector.extract_strided_slice %6 {offsets = [0, 32], sizes = [32, 16], strides = [1, 1]} : vector<32x128xf32> to vector<32x16xf32>
    %29 = vector.extract_strided_slice %6 {offsets = [0, 48], sizes = [32, 16], strides = [1, 1]} : vector<32x128xf32> to vector<32x16xf32>
    %30 = vector.extract_strided_slice %6 {offsets = [0, 64], sizes = [32, 16], strides = [1, 1]} : vector<32x128xf32> to vector<32x16xf32>
    %31 = vector.extract_strided_slice %6 {offsets = [0, 80], sizes = [32, 16], strides = [1, 1]} : vector<32x128xf32> to vector<32x16xf32>
    %32 = vector.extract_strided_slice %6 {offsets = [0, 96], sizes = [32, 16], strides = [1, 1]} : vector<32x128xf32> to vector<32x16xf32>
    %33 = vector.extract_strided_slice %6 {offsets = [0, 112], sizes = [32, 16], strides = [1, 1]} : vector<32x128xf32> to vector<32x16xf32>
    %34 = vector.shape_cast %26 : vector<32x16xf32> to vector<1x32x16xf32>
    %35 = vector.shape_cast %27 : vector<32x16xf32> to vector<1x32x16xf32>
    %36 = vector.shape_cast %28 : vector<32x16xf32> to vector<1x32x16xf32>
    %37 = vector.shape_cast %29 : vector<32x16xf32> to vector<1x32x16xf32>
    %38 = vector.shape_cast %30 : vector<32x16xf32> to vector<1x32x16xf32>
    %39 = vector.shape_cast %31 : vector<32x16xf32> to vector<1x32x16xf32>
    %40 = vector.shape_cast %32 : vector<32x16xf32> to vector<1x32x16xf32>
    %41 = vector.shape_cast %33 : vector<32x16xf32> to vector<1x32x16xf32>
    %42 = tpu.concatenate %34, %35, %36, %37, %38, %39, %40, %41 in 0 : vector<1x32x16xf32>, vector<1x32x16xf32>, vector<1x32x16xf32>, vector<1x32x16xf32>, vector<1x32x16xf32>, vector<1x32x16xf32>, vector<1x32x16xf32>, vector<1x32x16xf32> -> vector<8x32x16xf32>
    %43 = vector.extract_strided_slice %8 {offsets = [0, 0], sizes = [32, 16], strides = [1, 1]} : vector<32x128xf32> to vector<32x16xf32>
    %44 = vector.extract_strided_slice %8 {offsets = [0, 16], sizes = [32, 16], strides = [1, 1]} : vector<32x128xf32> to vector<32x16xf32>
    %45 = vector.extract_strided_slice %8 {offsets = [0, 32], sizes = [32, 16], strides = [1, 1]} : vector<32x128xf32> to vector<32x16xf32>
    %46 = vector.extract_strided_slice %8 {offsets = [0, 48], sizes = [32, 16], strides = [1, 1]} : vector<32x128xf32> to vector<32x16xf32>
    %47 = vector.extract_strided_slice %8 {offsets = [0, 64], sizes = [32, 16], strides = [1, 1]} : vector<32x128xf32> to vector<32x16xf32>
    %48 = vector.extract_strided_slice %8 {offsets = [0, 80], sizes = [32, 16], strides = [1, 1]} : vector<32x128xf32> to vector<32x16xf32>
    %49 = vector.extract_strided_slice %8 {offsets = [0, 96], sizes = [32, 16], strides = [1, 1]} : vector<32x128xf32> to vector<32x16xf32>
    %50 = vector.extract_strided_slice %8 {offsets = [0, 112], sizes = [32, 16], strides = [1, 1]} : vector<32x128xf32> to vector<32x16xf32>
    %51 = vector.shape_cast %43 : vector<32x16xf32> to vector<1x32x16xf32>
    %52 = vector.shape_cast %44 : vector<32x16xf32> to vector<1x32x16xf32>
    %53 = vector.shape_cast %45 : vector<32x16xf32> to vector<1x32x16xf32>
    %54 = vector.shape_cast %46 : vector<32x16xf32> to vector<1x32x16xf32>
    %55 = vector.shape_cast %47 : vector<32x16xf32> to vector<1x32x16xf32>
    %56 = vector.shape_cast %48 : vector<32x16xf32> to vector<1x32x16xf32>
    %57 = vector.shape_cast %49 : vector<32x16xf32> to vector<1x32x16xf32>
    %58 = vector.shape_cast %50 : vector<32x16xf32> to vector<1x32x16xf32>
    %59 = tpu.concatenate %51, %52, %53, %54, %55, %56, %57, %58 in 0 : vector<1x32x16xf32>, vector<1x32x16xf32>, vector<1x32x16xf32>, vector<1x32x16xf32>, vector<1x32x16xf32>, vector<1x32x16xf32>, vector<1x32x16xf32>, vector<1x32x16xf32> -> vector<8x32x16xf32>
    %60 = vector.extract_strided_slice %25 {offsets = [0, 0, 0], sizes = [8, 16, 16], strides = [1, 1, 1]} : vector<8x32x16xf32> to vector<8x16x16xf32>
    %61 = vector.extract_strided_slice %42 {offsets = [0, 0, 0], sizes = [8, 16, 16], strides = [1, 1, 1]} : vector<8x32x16xf32> to vector<8x16x16xf32>
    %62 = vector.extract_strided_slice %59 {offsets = [0, 0, 0], sizes = [8, 16, 16], strides = [1, 1, 1]} : vector<8x32x16xf32> to vector<8x16x16xf32>
    "tpu.trace_start"() <{level = 10 : i32, message = "hqd,hkd->hqk"}> : () -> ()
    %cst_10 = arith.constant dense<0.000000e+00> : vector<8x16x16xf32>
    %63 = tpu.matmul %60, %61, %cst_10 {dimension_numbers = #tpu.dot_dimension_numbers<[2], [2], [1], [1], [0, 0, 0, 1, 1, 1], [0], [0]>, precision = #tpu.contract_precision<fp32>} : vector<8x16x16xf32>, vector<8x16x16xf32>, vector<8x16x16xf32> -> vector<8x16x16xf32>
    "tpu.trace_stop"() : () -> ()
    %cst_11 = arith.constant dense<0xFF800000> : vector<8x16xf32>
    %64 = vector.multi_reduction <maximumf>, %63, %cst_11 [2] : vector<8x16x16xf32> to vector<8x16xf32>
    %65 = vector.shape_cast %64 : vector<8x16xf32> to vector<8x16x1xf32>
    %66 = vector.broadcast %65 : vector<8x16x1xf32> to vector<8x16x16xf32>
    %67 = arith.subf %63, %66 : vector<8x16x16xf32>
    %68 = math.exp %67 : vector<8x16x16xf32>
    %cst_12 = arith.constant dense<0.000000e+00> : vector<8x16xf32>
    %69 = vector.multi_reduction <add>, %68, %cst_12 [2] : vector<8x16x16xf32> to vector<8x16xf32>
    %70 = vector.shape_cast %69 : vector<8x16xf32> to vector<8x16x1xf32>
    %71 = vector.broadcast %70 : vector<8x16x1xf32> to vector<8x16x16xf32>
    %72 = arith.divf %68, %71 : vector<8x16x16xf32>
    "tpu.trace_start"() <{level = 10 : i32, message = "hqk,hkd->hqd"}> : () -> ()
    %cst_13 = arith.constant dense<0.000000e+00> : vector<8x16x16xf32>
    %73 = tpu.matmul %72, %62, %cst_13 {dimension_numbers = #tpu.dot_dimension_numbers<[2], [1], [1], [2], [0, 0, 0, 1, 1, 2], [0], [0]>, precision = #tpu.contract_precision<fp32>} : vector<8x16x16xf32>, vector<8x16x16xf32>, vector<8x16x16xf32> -> vector<8x16x16xf32>
    "tpu.trace_stop"() : () -> ()
    %74 = vector.extract_strided_slice %25 {offsets = [0, 16, 0], sizes = [8, 16, 16], strides = [1, 1, 1]} : vector<8x32x16xf32> to vector<8x16x16xf32>
    %75 = vector.extract_strided_slice %42 {offsets = [0, 16, 0], sizes = [8, 16, 16], strides = [1, 1, 1]} : vector<8x32x16xf32> to vector<8x16x16xf32>
    %76 = vector.extract_strided_slice %59 {offsets = [0, 16, 0], sizes = [8, 16, 16], strides = [1, 1, 1]} : vector<8x32x16xf32> to vector<8x16x16xf32>
    "tpu.trace_start"() <{level = 10 : i32, message = "hqd,hkd->hqk"}> : () -> ()
    %cst_14 = arith.constant dense<0.000000e+00> : vector<8x16x16xf32>
    %77 = tpu.matmul %74, %75, %cst_14 {dimension_numbers = #tpu.dot_dimension_numbers<[2], [2], [1], [1], [0, 0, 0, 1, 1, 1], [0], [0]>, precision = #tpu.contract_precision<fp32>} : vector<8x16x16xf32>, vector<8x16x16xf32>, vector<8x16x16xf32> -> vector<8x16x16xf32>
    "tpu.trace_stop"() : () -> ()
    %cst_15 = arith.constant dense<0xFF800000> : vector<8x16xf32>
    %78 = vector.multi_reduction <maximumf>, %77, %cst_15 [2] : vector<8x16x16xf32> to vector<8x16xf32>
    %79 = vector.shape_cast %78 : vector<8x16xf32> to vector<8x16x1xf32>
    %80 = vector.broadcast %79 : vector<8x16x1xf32> to vector<8x16x16xf32>
    %81 = arith.subf %77, %80 : vector<8x16x16xf32>
    %82 = math.exp %81 : vector<8x16x16xf32>
    %cst_16 = arith.constant dense<0.000000e+00> : vector<8x16xf32>
    %83 = vector.multi_reduction <add>, %82, %cst_16 [2] : vector<8x16x16xf32> to vector<8x16xf32>
    %84 = vector.shape_cast %83 : vector<8x16xf32> to vector<8x16x1xf32>
    %85 = vector.broadcast %84 : vector<8x16x1xf32> to vector<8x16x16xf32>
    %86 = arith.divf %82, %85 : vector<8x16x16xf32>
    "tpu.trace_start"() <{level = 10 : i32, message = "hqk,hkd->hqd"}> : () -> ()
    %cst_17 = arith.constant dense<0.000000e+00> : vector<8x16x16xf32>
    %87 = tpu.matmul %86, %76, %cst_17 {dimension_numbers = #tpu.dot_dimension_numbers<[2], [1], [1], [2], [0, 0, 0, 1, 1, 2], [0], [0]>, precision = #tpu.contract_precision<fp32>} : vector<8x16x16xf32>, vector<8x16x16xf32>, vector<8x16x16xf32> -> vector<8x16x16xf32>
    "tpu.trace_stop"() : () -> ()
    %88 = tpu.concatenate %73, %87 in 1 : vector<8x16x16xf32>, vector<8x16x16xf32> -> vector<8x32x16xf32>
    %89 = vector.extract_strided_slice %88 {offsets = [0, 0, 0], sizes = [1, 32, 16], strides = [1, 1, 1]} : vector<8x32x16xf32> to vector<1x32x16xf32>
    %90 = vector.shape_cast %89 : vector<1x32x16xf32> to vector<32x16xf32>
    %91 = vector.extract_strided_slice %88 {offsets = [1, 0, 0], sizes = [1, 32, 16], strides = [1, 1, 1]} : vector<8x32x16xf32> to vector<1x32x16xf32>
    %92 = vector.shape_cast %91 : vector<1x32x16xf32> to vector<32x16xf32>
    %93 = vector.extract_strided_slice %88 {offsets = [2, 0, 0], sizes = [1, 32, 16], strides = [1, 1, 1]} : vector<8x32x16xf32> to vector<1x32x16xf32>
    %94 = vector.shape_cast %93 : vector<1x32x16xf32> to vector<32x16xf32>
    %95 = vector.extract_strided_slice %88 {offsets = [3, 0, 0], sizes = [1, 32, 16], strides = [1, 1, 1]} : vector<8x32x16xf32> to vector<1x32x16xf32>
    %96 = vector.shape_cast %95 : vector<1x32x16xf32> to vector<32x16xf32>
    %97 = vector.extract_strided_slice %88 {offsets = [4, 0, 0], sizes = [1, 32, 16], strides = [1, 1, 1]} : vector<8x32x16xf32> to vector<1x32x16xf32>
    %98 = vector.shape_cast %97 : vector<1x32x16xf32> to vector<32x16xf32>
    %99 = vector.extract_strided_slice %88 {offsets = [5, 0, 0], sizes = [1, 32, 16], strides = [1, 1, 1]} : vector<8x32x16xf32> to vector<1x32x16xf32>
    %100 = vector.shape_cast %99 : vector<1x32x16xf32> to vector<32x16xf32>
    %101 = vector.extract_strided_slice %88 {offsets = [6, 0, 0], sizes = [1, 32, 16], strides = [1, 1, 1]} : vector<8x32x16xf32> to vector<1x32x16xf32>
    %102 = vector.shape_cast %101 : vector<1x32x16xf32> to vector<32x16xf32>
    %103 = vector.extract_strided_slice %88 {offsets = [7, 0, 0], sizes = [1, 32, 16], strides = [1, 1, 1]} : vector<8x32x16xf32> to vector<1x32x16xf32>
    %104 = vector.shape_cast %103 : vector<1x32x16xf32> to vector<32x16xf32>
    %105 = tpu.concatenate %90, %92, %94, %96, %98, %100, %102, %104 in 1 : vector<32x16xf32>, vector<32x16xf32>, vector<32x16xf32>, vector<32x16xf32>, vector<32x16xf32>, vector<32x16xf32>, vector<32x16xf32>, vector<32x16xf32> -> vector<32x128xf32>
    %c0_18 = arith.constant 0 : index
    %c0_19 = arith.constant 0 : index
    %106 = vector.load %arg5[%c0_18, %c0_19] : memref<128x128xf32, #tpu.memory_space<vmem>>, vector<128x128xf32>
    %cst_20 = arith.constant dense<0.000000e+00> : vector<32x128xf32>
    %107 = tpu.matmul %105, %106, %cst_20 {dimension_numbers = #tpu.dot_dimension_numbers<[1], [1], [0], [0], [0, 0, 1, 0], [], []>, precision = #tpu.contract_precision<fp32>} : vector<32x128xf32>, vector<128x128xf32>, vector<32x128xf32> -> vector<32x128xf32>
    %108 = arith.addf %0, %107 : vector<32x128xf32>
    %c0_21 = arith.constant 0 : index
    %c0_22 = arith.constant 0 : index
    %109 = vector.load %arg6[%c0_21, %c0_22] : memref<1x128xf32, #tpu.memory_space<vmem>>, vector<1x128xf32>
    %c0_23 = arith.constant 0 : index
    %c0_24 = arith.constant 0 : index
    %110 = vector.load %arg7[%c0_23, %c0_24] : memref<1x128xf32, #tpu.memory_space<vmem>>, vector<1x128xf32>
    %cst_25 = arith.constant dense<0.000000e+00> : vector<32xf32>
    %111 = vector.multi_reduction <add>, %108, %cst_25 [1] : vector<32x128xf32> to vector<32xf32>
    %112 = vector.shape_cast %111 : vector<32xf32> to vector<32x1xf32>
    %cst_26 = arith.constant 1.280000e+02 : f32
    %113 = vector.broadcast %cst_26 : f32 to vector<32x1xf32>
    %114 = arith.divf %112, %113 : vector<32x1xf32>
    %115 = vector.broadcast %114 : vector<32x1xf32> to vector<32x128xf32>
    %116 = arith.subf %108, %115 : vector<32x128xf32>
    %117 = arith.mulf %116, %116 : vector<32x128xf32>
    %cst_27 = arith.constant dense<0.000000e+00> : vector<32xf32>
    %118 = vector.multi_reduction <add>, %117, %cst_27 [1] : vector<32x128xf32> to vector<32xf32>
    %119 = vector.shape_cast %118 : vector<32xf32> to vector<32x1xf32>
    %cst_28 = arith.constant 1.280000e+02 : f32
    %120 = vector.broadcast %cst_28 : f32 to vector<32x1xf32>
    %121 = arith.divf %119, %120 : vector<32x1xf32>
    %122 = vector.broadcast %114 : vector<32x1xf32> to vector<32x128xf32>
    %123 = arith.subf %108, %122 : vector<32x128xf32>
    %cst_29 = arith.constant 9.99999996E-13 : f32
    %124 = vector.broadcast %cst_29 : f32 to vector<32x1xf32>
    %125 = arith.addf %121, %124 : vector<32x1xf32>
    %126 = math.rsqrt %125 : vector<32x1xf32>
    %127 = vector.broadcast %126 : vector<32x1xf32> to vector<32x128xf32>
    %128 = arith.mulf %123, %127 : vector<32x128xf32>
    %129 = vector.broadcast %109 : vector<1x128xf32> to vector<32x128xf32>
    %130 = arith.mulf %128, %129 : vector<32x128xf32>
    %131 = vector.broadcast %110 : vector<1x128xf32> to vector<32x128xf32>
    %132 = arith.addf %130, %131 : vector<32x128xf32>
    %c0_30 = arith.constant 0 : index
    %c0_31 = arith.constant 0 : index
    %133 = vector.load %arg10[%c0_30, %c0_31] : memref<256x128xf32, #tpu.memory_space<vmem>>, vector<256x128xf32>
    %cst_32 = arith.constant dense<0.000000e+00> : vector<32x256xf32>
    %134 = tpu.matmul %132, %133, %cst_32 {dimension_numbers = #tpu.dot_dimension_numbers<[1], [1], [0], [0], [0, 0, 1, 0], [], []>, precision = #tpu.contract_precision<fp32>} : vector<32x128xf32>, vector<256x128xf32>, vector<32x256xf32> -> vector<32x256xf32>
    %c0_33 = arith.constant 0 : index
    %c0_34 = arith.constant 0 : index
    %135 = vector.load %arg11[%c0_33, %c0_34] : memref<1x256xf32, #tpu.memory_space<vmem>>, vector<1x256xf32>
    %136 = vector.broadcast %135 : vector<1x256xf32> to vector<32x256xf32>
    %137 = arith.addf %134, %136 : vector<32x256xf32>
    %cst_35 = arith.constant 5.000000e-01 : f32
    %138 = vector.broadcast %cst_35 : f32 to vector<32x256xf32>
    %139 = arith.mulf %138, %137 : vector<32x256xf32>
    %cst_36 = arith.constant 4.471500e-02 : f32
    %140 = vector.broadcast %cst_36 : f32 to vector<32x256xf32>
    %141 = arith.mulf %140, %137 : vector<32x256xf32>
    %142 = arith.mulf %141, %137 : vector<32x256xf32>
    %143 = arith.mulf %142, %137 : vector<32x256xf32>
    %144 = arith.addf %137, %143 : vector<32x256xf32>
    %cst_37 = arith.constant 0.797884583 : f32
    %145 = vector.broadcast %cst_37 : f32 to vector<32x256xf32>
    %146 = arith.mulf %145, %144 : vector<32x256xf32>
    %147 = math.tanh %146 : vector<32x256xf32>
    %cst_38 = arith.constant 1.000000e+00 : f32
    %148 = vector.broadcast %cst_38 : f32 to vector<32x256xf32>
    %149 = arith.addf %148, %147 : vector<32x256xf32>
    %150 = arith.mulf %139, %149 : vector<32x256xf32>
    %c0_39 = arith.constant 0 : index
    %c0_40 = arith.constant 0 : index
    %151 = vector.load %arg12[%c0_39, %c0_40] : memref<128x256xf32, #tpu.memory_space<vmem>>, vector<128x256xf32>
    %cst_41 = arith.constant dense<0.000000e+00> : vector<32x128xf32>
    %152 = tpu.matmul %150, %151, %cst_41 {dimension_numbers = #tpu.dot_dimension_numbers<[1], [1], [0], [0], [0, 0, 1, 0], [], []>, precision = #tpu.contract_precision<fp32>} : vector<32x256xf32>, vector<128x256xf32>, vector<32x128xf32> -> vector<32x128xf32>
    %c0_42 = arith.constant 0 : index
    %c0_43 = arith.constant 0 : index
    %153 = vector.load %arg13[%c0_42, %c0_43] : memref<1x128xf32, #tpu.memory_space<vmem>>, vector<1x128xf32>
    %154 = vector.broadcast %153 : vector<1x128xf32> to vector<32x128xf32>
    %155 = arith.addf %152, %154 : vector<32x128xf32>
    %156 = arith.addf %132, %155 : vector<32x128xf32>
    %c0_44 = arith.constant 0 : index
    %c0_45 = arith.constant 0 : index
    %157 = vector.load %arg8[%c0_44, %c0_45] : memref<1x128xf32, #tpu.memory_space<vmem>>, vector<1x128xf32>
    %c0_46 = arith.constant 0 : index
    %c0_47 = arith.constant 0 : index
    %158 = vector.load %arg9[%c0_46, %c0_47] : memref<1x128xf32, #tpu.memory_space<vmem>>, vector<1x128xf32>
    %cst_48 = arith.constant dense<0.000000e+00> : vector<32xf32>
    %159 = vector.multi_reduction <add>, %156, %cst_48 [1] : vector<32x128xf32> to vector<32xf32>
    %160 = vector.shape_cast %159 : vector<32xf32> to vector<32x1xf32>
    %cst_49 = arith.constant 1.280000e+02 : f32
    %161 = vector.broadcast %cst_49 : f32 to vector<32x1xf32>
    %162 = arith.divf %160, %161 : vector<32x1xf32>
    %163 = vector.broadcast %162 : vector<32x1xf32> to vector<32x128xf32>
    %164 = arith.subf %156, %163 : vector<32x128xf32>
    %165 = arith.mulf %164, %164 : vector<32x128xf32>
    %cst_50 = arith.constant dense<0.000000e+00> : vector<32xf32>
    %166 = vector.multi_reduction <add>, %165, %cst_50 [1] : vector<32x128xf32> to vector<32xf32>
    %167 = vector.shape_cast %166 : vector<32xf32> to vector<32x1xf32>
    %cst_51 = arith.constant 1.280000e+02 : f32
    %168 = vector.broadcast %cst_51 : f32 to vector<32x1xf32>
    %169 = arith.divf %167, %168 : vector<32x1xf32>
    %170 = vector.broadcast %162 : vector<32x1xf32> to vector<32x128xf32>
    %171 = arith.subf %156, %170 : vector<32x128xf32>
    %cst_52 = arith.constant 9.99999996E-13 : f32
    %172 = vector.broadcast %cst_52 : f32 to vector<32x1xf32>
    %173 = arith.addf %169, %172 : vector<32x1xf32>
    %174 = math.rsqrt %173 : vector<32x1xf32>
    %175 = vector.broadcast %174 : vector<32x1xf32> to vector<32x128xf32>
    %176 = arith.mulf %171, %175 : vector<32x128xf32>
    %177 = vector.broadcast %157 : vector<1x128xf32> to vector<32x128xf32>
    %178 = arith.mulf %176, %177 : vector<32x128xf32>
    %179 = vector.broadcast %158 : vector<1x128xf32> to vector<32x128xf32>
    %180 = arith.addf %178, %179 : vector<32x128xf32>
    %c0_53 = arith.constant 0 : index
    %c0_54 = arith.constant 0 : index
    %181 = vector.load %arg14[%c0_53, %c0_54] : memref<32x128xf32, #tpu.memory_space<vmem>>, vector<32x128xf32>
    tpu.vector_store %arg14[%c0_53, %c0_54], %180 {strides = array<i32>} : memref<32x128xf32, #tpu.memory_space<vmem>>, vector<32x128xf32>,
    return
  }
  func.func @transform_0(%arg0: i32) -> (i32, i32) {
    %c0_i32 = arith.constant 0 : i32
    %c0_i32_0 = arith.constant 0 : i32
    return %arg0, %c0_i32 : i32, i32
  }
  func.func @transform_1(%arg0: i32) -> (i32, i32) {
    %c0_i32 = arith.constant 0 : i32
    %c0_i32_0 = arith.constant 0 : i32
    %c0_i32_1 = arith.constant 0 : i32
    return %c0_i32, %c0_i32_0 : i32, i32
  }
  func.func @transform_2(%arg0: i32) -> (i32, i32) {
    %c0_i32 = arith.constant 0 : i32
    %c0_i32_0 = arith.constant 0 : i32
    %c0_i32_1 = arith.constant 0 : i32
    return %c0_i32, %c0_i32_0 : i32, i32
  }
  func.func @transform_3(%arg0: i32) -> (i32, i32) {
    %c0_i32 = arith.constant 0 : i32
    %c0_i32_0 = arith.constant 0 : i32
    %c0_i32_1 = arith.constant 0 : i32
    return %c0_i32, %c0_i32_0 : i32, i32
  }
  func.func @transform_4(%arg0: i32) -> (i32, i32) {
    %c0_i32 = arith.constant 0 : i32
    %c0_i32_0 = arith.constant 0 : i32
    %c0_i32_1 = arith.constant 0 : i32
    return %c0_i32, %c0_i32_0 : i32, i32
  }
  func.func @transform_5(%arg0: i32) -> (i32, i32) {
    %c0_i32 = arith.constant 0 : i32
    %c0_i32_0 = arith.constant 0 : i32
    %c0_i32_1 = arith.constant 0 : i32
    return %c0_i32, %c0_i32_0 : i32, i32
  }
  func.func @transform_6(%arg0: i32) -> (i32, i32) {
    %c0_i32 = arith.constant 0 : i32
    %c0_i32_0 = arith.constant 0 : i32
    %c0_i32_1 = arith.constant 0 : i32
    return %c0_i32, %c0_i32_0 : i32, i32
  }
  func.func @transform_7(%arg0: i32) -> (i32, i32) {
    %c0_i32 = arith.constant 0 : i32
    %c0_i32_0 = arith.constant 0 : i32
    %c0_i32_1 = arith.constant 0 : i32
    return %c0_i32, %c0_i32_0 : i32, i32
  }
  func.func @transform_8(%arg0: i32) -> (i32, i32) {
    %c0_i32 = arith.constant 0 : i32
    %c0_i32_0 = arith.constant 0 : i32
    %c0_i32_1 = arith.constant 0 : i32
    return %c0_i32, %c0_i32_0 : i32, i32
  }
  func.func @transform_9(%arg0: i32) -> (i32, i32) {
    %c0_i32 = arith.constant 0 : i32
    %c0_i32_0 = arith.constant 0 : i32
    %c0_i32_1 = arith.constant 0 : i32
    return %c0_i32, %c0_i32_0 : i32, i32
  }
  func.func @transform_10(%arg0: i32) -> (i32, i32) {
    %c0_i32 = arith.constant 0 : i32
    %c0_i32_0 = arith.constant 0 : i32
    %c0_i32_1 = arith.constant 0 : i32
    return %c0_i32, %c0_i32_0 : i32, i32
  }
  func.func @transform_11(%arg0: i32) -> (i32, i32) {
    %c0_i32 = arith.constant 0 : i32
    %c0_i32_0 = arith.constant 0 : i32
    %c0_i32_1 = arith.constant 0 : i32
    return %c0_i32, %c0_i32_0 : i32, i32
  }
  func.func @transform_12(%arg0: i32) -> (i32, i32) {
    %c0_i32 = arith.constant 0 : i32
    %c0_i32_0 = arith.constant 0 : i32
    %c0_i32_1 = arith.constant 0 : i32
    return %c0_i32, %c0_i32_0 : i32, i32
  }
  func.func @transform_13(%arg0: i32) -> (i32, i32) {
    %c0_i32 = arith.constant 0 : i32
    %c0_i32_0 = arith.constant 0 : i32
    return %arg0, %c0_i32 : i32, i32
  }
}

</mosaic_0001>

<bundles_post_ra>
// kernel: tpu_custom_call.1
= control target key start
LH: loop header
LB: loop body
LE: loop exit
PB: predicated region body
PF: predicated region fallthrough
CT: control target
= control target key end

     0   :  { %18 = vsyncpa [#allocation3], 0  ;;  %s17301_s0 = inlined_call_operand.hbm [shape: f32[32,128], index: 0, kind: input, shape index: {}]   ;;  %s17302_s1 = inlined_call_operand.hbm [shape: f32[128,128], index: 1, kind: input, shape index: {}]   ;;  %s17303_s2 = inlined_call_operand.hbm [shape: f32[128,128], index: 2, kind: input, shape index: {}]   ;;  %s17304_s3 = inlined_call_operand.hbm [shape: f32[128,128], index: 3, kind: input, shape index: {}]   ;;  %s17305_s4 = inlined_call_operand.hbm [shape: f32[128,128], index: 4, kind: input, shape index: {}]   ;;  %s17306_s5 = inlined_call_operand.vmem [shape: f32[1,128], index: 5, kind: input, shape index: {}]   ;;  %s17307_s6 = inlined_call_operand.vmem [shape: f32[1,128], index: 6, kind: input, shape index: {}]   ;;  %s17308_s7 = inlined_call_operand.vmem [shape: f32[1,128], index: 7, kind: input, shape index: {}]   ;;  %s17309_s8 = inlined_call_operand.vmem [shape: f32[1,128], index: 8, kind: input, shape index: {}]   ;;  %s17310_s9 = inlined_call_operand.hbm [shape: f32[256,128], index: 9, kind: input, shape index: {}]   ;;  %s17311_s10 = inlined_call_operand.vmem [shape: f32[1,256], index: 10, kind: input, shape index: {}]   ;;  %s17312_s11 = inlined_call_operand.hbm [shape: f32[128,256], index: 11, kind: input, shape index: {}]   ;;  %s17313_s12 = inlined_call_operand.vmem [shape: f32[1,128], index: 12, kind: input, shape index: {}]   ;;  %s17314_s13 = inlined_call_operand.hbm [shape: f32[32,128], index: 13, kind: output, shape index: {}]  }
   0x1   :  { %19 = vsyncpa [#allocation6], 0 }
   0x2   :  { %20 = vsyncpa [#allocation9], 0 }
   0x3   :  { %21 = vsyncpa [#allocation12], 0 }
   0x4   :  { %22 = vsyncpa [#allocation4], 0  ;;  %s40_s27 = sshll.u32 %s17302_s1, 4  ;;  %s11896_s28 = smov [#allocation5]   ;;  %s41_s27 = int_to_ptr.hbm [resolvable:$true] %s40_s27 }
   0x5   :  { %s42_s29 = sshll.u32 %s11896_s28, 4  ;;  %s66_s15 = sshll.u32 %s17304_s3, 4  ;;  %s43_s29 = int_to_ptr.vmem [resolvable:$true] %s42_s29  ;;  %s67_s15 = int_to_ptr.hbm [resolvable:$true] %s66_s15 }
   0x6   :  { %s11897_s16 = smov 128   ;;  %s11898_s17 = smov 8  }
   0x7   :  { %48 = dma.hbm_to_vmem [thread:$0]  %s41_s27, 2048, %s43_s29, [#allocation6], %s11897_s16, %s11897_s16, %s11898_s17  }
   0x8   :  { %s11899_s18 = smov [#allocation8]   ;;  %s100_s1 = sshll.u32 %s17310_s9, 4  ;;  %s101_s1 = int_to_ptr.hbm [resolvable:$true] %s100_s1 }
   0x9   :  { %s68_s19 = sshll.u32 %s11899_s18, 4  ;;  %s27_s23 = sshll.u32 %s17301_s0, 4  ;;  %s69_s19 = int_to_ptr.vmem [resolvable:$true] %s68_s19  ;;  %s28_s23 = int_to_ptr.hbm [resolvable:$true] %s27_s23 }
   0xa   :  { %74 = dma.hbm_to_vmem [thread:$0]  %s67_s15, 2048, %s69_s19, [#allocation9], %s11897_s16, %s11897_s16, %s11898_s17  }
   0xb   :  { %s11900_s24 = smov [#allocation11]   ;;  %s11901_s26 = smov [#allocation2]  }
   0xc   :  { %s102_s25 = sshll.u32 %s11900_s24, 4  ;;  %s29_s9 = sshll.u32 %s11901_s26, 4  ;;  %s103_s25 = int_to_ptr.vmem [resolvable:$true] %s102_s25  ;;  %s30_s9 = int_to_ptr.vmem [resolvable:$true] %s29_s9 }
   0xd   :  { %108 = dma.hbm_to_vmem [thread:$0]  %s101_s1, 4096, %s103_s25, [#allocation12], %s11897_s16, %s11897_s16, %s11898_s17  }
   0xe   :  { %s53_s29 = sshll.u32 %s17303_s2, 4  ;;  %s79_s14 = sshll.u32 %s17305_s4, 4  ;;  %s54_s29 = int_to_ptr.hbm [resolvable:$true] %s53_s29  ;;  %s80_s14 = int_to_ptr.hbm [resolvable:$true] %s79_s14 }
   0xf   :  { %35 = dma.hbm_to_vmem [thread:$0]  %s28_s23, 512, %s30_s9, [#allocation3], %s11897_s16, %s11897_s16, %s11898_s17  }
  0x10   :  { %s11902_s15 = smov [#allocation7]   ;;  %s11903_s19 = smov [#allocation10]  }
  0x11   :  { %s55_s18 = sshll.u32 %s11902_s15, 4  ;;  %s81_s2 = sshll.u32 %s11903_s19, 4  ;;  %s56_s18 = int_to_ptr.vmem [resolvable:$true] %s55_s18  ;;  %s82_s2 = int_to_ptr.vmem [resolvable:$true] %s81_s2 }
  0x12   :  { %61 = dma.hbm_to_vmem [thread:$0]  %s54_s29, 2048, %s56_s18, [#allocation6], %s11897_s16, %s11897_s16, %s11898_s17  }
  0x13   :  { %s115_s1 = sshll.u32 %s17312_s11, 4  ;;  %s11904_s4 = smov [#allocation13]   ;;  %s116_s1 = int_to_ptr.hbm [resolvable:$true] %s115_s1 }
  0x14   :  { %87 = dma.hbm_to_vmem [thread:$0]  %s80_s14, 2048, %s82_s2, [#allocation9], %s11897_s16, %s11897_s16, %s11898_s17  }
  0x15   :  { %s117_s3 = sshll.u32 %s11904_s4, 4  ;;  %s11905_s22 = smov 256   ;;  %s118_s3 = int_to_ptr.vmem [resolvable:$true] %s117_s3 }
  0x16   :  { %s11906_s23 = smov 16  }
  0x17   :  { %123 = dma.hbm_to_vmem [thread:$0]  %s116_s1, 4096, %s118_s3, [#allocation12], %s11905_s22, %s11905_s22, %s11906_s23  }
  0x18   :  { %11886 = dma.done.wait [#allocation3], 512  }
  0x19   :  { %11887 = vsyncadd [#allocation3], 4294966784 }
  0x1a   :  { %11888 = dma.done.wait [#allocation6], 4096  }
  0x1b   :  { %11889 = vsyncadd [#allocation6], 4294963200 }
  0x1c   :  { %11890 = dma.done.wait [#allocation9], 4096  }
  0x1d   :  { %11891 = vsyncadd [#allocation9], 4294963200 }
  0x1e   :  { %11892 = dma.done.wait [#allocation12], 8192  }
  0x1f   :  { %11893 = vsyncadd [#allocation12], 4294959104  ;;  %v173_v0 = vld [vmem:[#allocation5 + $0x78] sm:$0xff]  ;;  %v172_v1 = vld [vmem:[#allocation5 + $0x70] sm:$0xff]  ;;  %s11907_s11 = smov 112   ;;  %s11908_s24 = smov 96  }
  0x20   :  { %v171_v2 = vld [vmem:[#allocation5 + $0x68] sm:$0xff]  ;;  %v12025_v3 = vand.u32 4294901760, %v173_v0  ;;  %v12027_v4 = vand.u32 4294901760, %v172_v1  ;;  %v170_v6 = vld [vmem:[#allocation5 + $0x60] sm:$0xff]  ;;  %v169_v11 = vld [vmem:[#allocation5 + $0x58] sm:$0xff]  ;;  %s11909_s25 = smov 80  }
  0x21   :  { %v12029_v5 = vand.u32 4294901760, %v171_v2  ;;  %v12039_v9 = vand.u32 4294901760, %v170_v6  ;;  %v12047_v14 = vand.u32 4294901760, %v169_v11  ;;  %v168_v19 = vld [vmem:[#allocation5 + $0x50] sm:$0xff]  ;;  %v167_v26 = vld [vmem:[#allocation5 + $0x48] sm:$0xff]  ;;  %v166_v32 = vld [vmem:[#allocation5 + $0x40] sm:$0xff] }
  0x22   :  { %175 = vmatpush.xpose.msra.mxu0 %v12025_v3  ;;  %v12033_v7 = vsub.f32 %v173_v0, %v12025_v3  ;;  %422 = vmatpush.xpose.msra.mxu3 %v12025_v3  ;;  %v12037_v8 = vsub.f32 %v172_v1, %v12027_v4  ;;  %v12062_v21 = vand.u32 4294901760, %v168_v19  ;;  %v12074_v27 = vand.u32 4294901760, %v167_v26  ;;  %v165_v38 = vld [vmem:[#allocation5 + $0x38] sm:$0xff]  ;;  %v164_v44 = vld [vmem:[#allocation5 + $0x30] sm:$0xff]  ;;  %v163_v50 = vld [vmem:[#allocation5 + $0x28] sm:$0xff]  ;;  %s11910_s26 = smov 64  }
  0x23   :  { %v12042_v10 = vsub.f32 %v171_v2, %v12029_v5  ;;  %v12059_v18 = vsub.f32 %v170_v6, %v12039_v9  ;;  %v12070_v25 = vsub.f32 %v169_v11, %v12047_v14  ;;  %v12093_v36 = vand.u32 4294901760, %v166_v32  ;;  %v162_v56 = vld [vmem:[#allocation5 + $0x20] sm:$0xff]  ;;  %v161_v62 = vld [vmem:[#allocation5 + $0x18] sm:$0xff]  ;;  %v160_v11 = vld [vmem:[#allocation5 + $0x10] sm:$0xff]  ;;  %s11911_s9 = smov 48   ;;  %s11912_s27 = smov 32  }
  0x24   :  { %354 = vmatpush.xpose.msra.mxu2 %v12033_v7  ;;  %v241_v12 = vand.u32 4294901760, %v12033_v7  ;;  %v247_v13 = vand.u32 4294901760, %v12037_v8  ;;  %v12082_v31 = vsub.f32 %v168_v19, %v12062_v21  ;;  %v12087_v33 = vsub.f32 %v167_v26, %v12074_v27  ;;  %v159_v26 = vld [vmem:[#allocation5 + $0x8] sm:$0xff]  ;;  %s11488_s21 = sshll.u32 %s17314_s13, 4  ;;  %s11489_s21 = int_to_ptr.hbm [resolvable:$true] %s11488_s21 }
  0x25   :  { %v253_v17 = vand.u32 4294901760, %v12042_v10  ;;  %v259_v24 = vand.u32 4294901760, %v12059_v18  ;;  %v17331_v30 = vand.u32 4294901760, %v12070_v25  ;;  %v12103_v42 = vand.u32 4294901760, %v165_v38 }
  0x26   :  { %177 = vmatpush.xpose.msra.mxu0 %v12027_v4  ;;  %v242_v15 = vsub.f32 %v12033_v7, %v241_v12  ;;  %424 = vmatpush.xpose.msra.mxu3 %v12027_v4  ;;  %v248_v16 = vsub.f32 %v12037_v8, %v247_v13  ;;  %v17328_v37 = vand.u32 4294901760, %v12082_v31  ;;  %v17327_v39 = vand.u32 4294901760, %v12087_v33 }
  0x27   :  { %v254_v23 = vsub.f32 %v12042_v10, %v253_v17  ;;  %v260_v29 = vsub.f32 %v12059_v18, %v259_v24  ;;  %v266_v35 = vsub.f32 %v12070_v25, %v17331_v30  ;;  %v12106_v43 = vsub.f32 %v166_v32, %v12093_v36 }
  0x28   :  { %v243_v20 = vand.u32 4294901760, %v242_v15  ;;  %357 = vmatpush.xpose.msra.mxu2 %v12037_v8  ;;  %v249_v22 = vand.u32 4294901760, %v248_v16  ;;  %v272_v41 = vsub.f32 %v12082_v31, %v17328_v37  ;;  %v278_v45 = vsub.f32 %v12087_v33, %v17327_v39  ;;  %v627_v16 = vld [vmem:[#allocation7 + $0x78] sm:$0xff]  ;;  %v620_v37 = vld [vmem:[#allocation7 + $0x40] sm:$0xff] }
  0x29   :  { %v255_v28 = vand.u32 4294901760, %v254_v23  ;;  %v261_v34 = vand.u32 4294901760, %v260_v29  ;;  %v267_v40 = vand.u32 4294901760, %v266_v35  ;;  %v12114_v47 = vand.u32 4294901760, %v164_v44  ;;  %v626_v29 = vld [vmem:[#allocation7 + $0x70] sm:$0xff] }
  0x2a   :  { %179 = vmatpush.xpose.msra.mxu0 %v12029_v5  ;;  %244 = vmatpush.xpose.msra.mxu1 %v243_v20  ;;  %v273_v46 = vand.u32 4294901760, %v272_v41  ;;  %v17324_v48 = vand.u32 4294901760, %v12106_v43  ;;  %v12118_v49 = vsub.f32 %v165_v38, %v12103_v42  ;;  %v279_v51 = vand.u32 4294901760, %v278_v45  ;;  %v158_v41 = vld [vmem:[#allocation5] sm:$0xff] }
  0x2b   :  { %426 = vmatpush.xpose.msra.mxu3 %v12029_v5  ;;  %v12126_v53 = vand.u32 4294901760, %v163_v50  ;;  %v12130_v55 = vsub.f32 %v164_v44, %v12114_v47  ;;  %v12134_v57 = vand.u32 4294901760, %v162_v56  ;;  %v12153_v2 = vand.u32 4294901760, %v161_v62 }
  0x2c   :  { %360 = vmatpush.xpose.msra.mxu2 %v12042_v10  ;;  %v284_v52 = vsub.f32 %v12106_v43, %v17324_v48  ;;  %v17322_v54 = vand.u32 4294901760, %v12118_v49  ;;  %v12176_v35 = vand.u32 4294901760, %v159_v26  ;;  %v12183_v44 = vand.u32 4294901760, %v626_v29  ;;  %v619_v10 = vld [vmem:[#allocation7 + $0x38] sm:$0xff] }
  0x2d   :  { %v17321_v60 = vand.u32 4294901760, %v12130_v55  ;;  %v12142_v61 = vsub.f32 %v163_v50, %v12126_v53  ;;  %v12147_v63 = vsub.f32 %v162_v56, %v12134_v57  ;;  %v12166_v23 = vsub.f32 %v161_v62, %v12153_v2 }
  0x2e   :  { %181 = vmatpush.xpose.msra.mxu0 %v12039_v9  ;;  %250 = vmatpush.xpose.msra.mxu1 %v249_v22  ;;  %v285_v58 = vand.u32 4294901760, %v284_v52  ;;  %v290_v59 = vsub.f32 %v12118_v49, %v17322_v54  ;;  %v12163_v22 = vand.u32 4294901760, %v160_v11  ;;  %v12193_v52 = vand.u32 4294901760, %v158_v41 }
  0x2f   :  { %428 = vmatpush.xpose.msra.mxu3 %v12039_v9  ;;  %v296_v1 = vsub.f32 %v12130_v55, %v17321_v60  ;;  %v17319_v6 = vand.u32 4294901760, %v12142_v61  ;;  %v17318_v15 = vand.u32 4294901760, %v12147_v63  ;;  %v17316_v38 = vand.u32 4294901760, %v12166_v23  ;;  %v622_v60 = vld [vmem:[#allocation7 + $0x50] sm:$0xff] }
  0x30   :  { %363 = vmatpush.xpose.msra.mxu2 %v12059_v18  ;;  %v291_v0 = vand.u32 4294901760, %v290_v59  ;;  %v12201_v59 = vsub.f32 %v626_v29, %v12183_v44  ;;  %v12326_v30 = vand.u32 4294901760, %v619_v10  ;;  %vm1720_vm0 = vcmask 130048  }
  0x31   :  { %v297_v19 = vand.u32 4294901760, %v296_v1  ;;  %v302_v20 = vsub.f32 %v12142_v61, %v17319_v6  ;;  %v308_v32 = vsub.f32 %v12147_v63, %v17318_v15  ;;  %v624_v1 = vld [vmem:[#allocation7 + $0x60] sm:$0xff] }
  0x32   :  { %183 = vmatpush.xpose.msra.mxu0 %v12047_v14  ;;  %256 = vmatpush.xpose.msra.mxu1 %v255_v28  ;;  %v12170_v28 = vand.u32 4294901760, %v627_v16 }
  0x33   :  { %430 = vmatpush.xpose.msra.mxu3 %v12047_v14  ;;  %v309_v50 = vand.u32 4294901760, %v308_v32 }
  0x34   :  { %366 = vmatpush.xpose.msra.mxu2 %v12070_v25  ;;  %v12187_v45 = vsub.f32 %v627_v16, %v12170_v28 }
  0x36   :  { %185 = vmatpush.xpose.msra.mxu0 %v12062_v21  ;;  %262 = vmatpush.xpose.msra.mxu1 %v261_v34  ;;  %v303_v34 = vand.u32 4294901760, %v302_v20  ;;  %v12213_v20 = vsub.f32 %v158_v41, %v12193_v52 }
  0x37   :  { %432 = vmatpush.xpose.msra.mxu3 %v12062_v21 }
  0x38   :  { %369 = vmatpush.xpose.msra.mxu2 %v12082_v31 }
  0x3a   :  { %187 = vmatpush.xpose.msra.mxu0 %v12074_v27  ;;  %268 = vmatpush.xpose.msra.mxu1 %v267_v40  ;;  %v12180_v40 = vsub.f32 %v160_v11, %v12163_v22 }
  0x3b   :  { %434 = vmatpush.xpose.msra.mxu3 %v12074_v27 }
  0x3c   :  { %372 = vmatpush.xpose.msra.mxu2 %v12087_v33  ;;  %v17315_v56 = vand.u32 4294901760, %v12180_v40 }
  0x3e   :  { %189 = vmatpush.xpose.msra.mxu0 %v12093_v36  ;;  %274 = vmatpush.xpose.msra.mxu1 %v273_v46  ;;  %v625_v46 = vld [vmem:[#allocation7 + $0x68] sm:$0xff]  ;;  %v320_v16 = vsub.f32 %v12180_v40, %v17315_v56 }
  0x3f   :  { %436 = vmatpush.xpose.msra.mxu3 %v12093_v36  ;;  %v12203_v62 = vand.u32 4294901760, %v625_v46 }
  0x40   :  { %375 = vmatpush.xpose.msra.mxu2 %v12106_v43  ;;  %v321_v41 = vand.u32 4294901760, %v320_v16 }
  0x41   :  { %v12218_v29 = vsub.f32 %v625_v46, %v12203_v62  ;;  %v17325_v46 = vand.u32 4294901760, %v12213_v20 }
  0x42   :  { %191 = vmatpush.xpose.msra.mxu0 %v12103_v42  ;;  %280 = vmatpush.xpose.msra.mxu1 %v279_v51  ;;  %v314_v51 = vsub.f32 %v12166_v23, %v17316_v38 }
  0x43   :  { %438 = vmatpush.xpose.msra.mxu3 %v12103_v42  ;;  %v17326_v15 = vand.u32 4294901760, %v12218_v29 }
  0x44   :  { %378 = vmatpush.xpose.msra.mxu2 %v12118_v49  ;;  %v315_v11 = vand.u32 4294901760, %v314_v51  ;;  %v154_v51 = vld [vmem:[#allocation2] sm:$0xff] }
  0x45   :  { %v12231_v38 = vand.u32 4294901760, %v154_v51 }
  0x46   :  { %193 = vmatpush.xpose.msra.mxu0 %v12114_v47  ;;  %286 = vmatpush.xpose.msra.mxu1 %v285_v58  ;;  %v12197_v58 = vsub.f32 %v159_v26, %v12176_v35  ;;  %v17323_v26 = vand.u32 4294901760, %v12201_v59 }
  0x47   :  { %440 = vmatpush.xpose.msra.mxu3 %v12114_v47 }
  0x48   :  { %381 = vmatpush.xpose.msra.mxu2 %v12130_v55 }
  0x4a   :  { %195 = vmatpush.xpose.msra.mxu0 %v12126_v53  ;;  %292 = vmatpush.xpose.msra.mxu1 %v291_v0  ;;  %v17317_v0 = vand.u32 4294901760, %v12187_v45 }
  0x4b   :  { %442 = vmatpush.xpose.msra.mxu3 %v12126_v53 }
  0x4c   :  { %384 = vmatpush.xpose.msra.mxu2 %v12142_v61  ;;  %v696_v32 = vsub.f32 %v12187_v45, %v17317_v0  ;;  %v702_v0 = vsub.f32 %v12201_v59, %v17323_v26  ;;  %v332_v26 = vsub.f32 %v12213_v20, %v17325_v46  ;;  %v621_v46 = vld [vmem:[#allocation7 + $0x48] sm:$0xff] }
  0x4e   :  { %197 = vmatpush.xpose.msra.mxu0 %v12134_v57  ;;  %298 = vmatpush.xpose.msra.mxu1 %v297_v19  ;;  %v17320_v19 = vand.u32 4294901760, %v12197_v58 }
  0x4f   :  { %444 = vmatpush.xpose.msra.mxu3 %v12134_v57 }
  0x50   :  { %387 = vmatpush.xpose.msra.mxu2 %v12147_v63  ;;  %v326_v56 = vsub.f32 %v12197_v58, %v17320_v19  ;;  %v12245_v19 = vsub.f32 %v154_v51, %v12231_v38 }
  0x52   :  { %199 = vmatpush.xpose.msra.mxu0 %v12153_v2  ;;  %304 = vmatpush.xpose.msra.mxu1 %v303_v34  ;;  %v12224_v34 = vand.u32 4294901760, %v624_v1  ;;  %17469 = vst [vmem:[#allocation20_spill] sm:$0xff] %v12245_v19  ;;  %v327_v54 = vand.u32 4294901760, %v326_v56  ;;  %v12252_v48 = vand.u32 4294901760, %v12245_v19 }
  0x53   :  { %446 = vmatpush.xpose.msra.mxu3 %v12153_v2 }
  0x54   :  { %390 = vmatpush.xpose.msra.mxu2 %v12166_v23  ;;  %v12240_v16 = vsub.f32 %v624_v1, %v12224_v34  ;;  %17470 = vst [vmem:[#allocation21_spill] sm:$0xff] %v12252_v48  ;;  %v703_v1 = vand.u32 4294901760, %v702_v0  ;;  %v209_v7 = vsub.f32 %v12245_v19, %v12252_v48  ;;  %v333_v0 = vand.u32 4294901760, %v332_v26 }
  0x56   :  { %201 = vmatpush.xpose.msra.mxu0 %v12163_v22  ;;  %310 = vmatpush.xpose.msra.mxu1 %v309_v50  ;;  %v623_v50 = vld [vmem:[#allocation7 + $0x58] sm:$0xff]  ;;  %v17329_v56 = vand.u32 4294901760, %v12240_v16 }
  0x57   :  { %448 = vmatpush.xpose.msra.mxu3 %v12163_v22  ;;  %v12242_v6 = vand.u32 4294901760, %v623_v50 }
  0x58   :  { %393 = vmatpush.xpose.msra.mxu2 %v12180_v40 }
  0x59   :  { %v12263_v51 = vsub.f32 %v623_v50, %v12242_v6 }
  0x5a   :  { %203 = vmatpush.xpose.msra.mxu0 %v12176_v35  ;;  %316 = vmatpush.xpose.msra.mxu1 %v315_v11  ;;  %v697_v11 = vand.u32 4294901760, %v696_v32  ;;  %v708_v32 = vsub.f32 %v12218_v29, %v17326_v15  ;;  %v12270_v15 = vand.u32 4294901760, %v209_v7 }
  0x5b   :  { %450 = vmatpush.xpose.msra.mxu3 %v12176_v35  ;;  %v17330_v26 = vand.u32 4294901760, %v12263_v51 }
  0x5c   :  { %396 = vmatpush.xpose.msra.mxu2 %v12197_v58  ;;  %v709_v50 = vand.u32 4294901760, %v708_v32 }
  0x5e   :  { %205 = vmatpush.xpose.msra.mxu0 %v12193_v52  ;;  %322 = vmatpush.xpose.msra.mxu1 %v321_v41  ;;  %v12265_v41 = vand.u32 4294901760, %v622_v60 }
  0x5f   :  { %452 = vmatpush.xpose.msra.mxu3 %v12193_v52 }
  0x60   :  { %399 = vmatpush.xpose.msra.mxu2 %v12213_v20  ;;  %v12285_v7 = vsub.f32 %v622_v60, %v12265_v41 }
  0x61   :  { %211 = vmatmul.f32.vlgmr.msra.gmra.mxu0 %v12270_v15 }
  0x62   :  { %481 = vmatpush.xpose.msrb.mxu0 %v241_v12  ;;  %v155_v12 = vld [vmem:[#allocation2 + $0x8] sm:$0xff]  ;;  %328 = vmatpush.xpose.msra.mxu1 %v327_v54  ;;  %v714_v54 = vsub.f32 %v12240_v16, %v17329_v56 }
  0x63   :  { %698 = vmatpush.xpose.msrb.mxu3 %v697_v11  ;;  %v12272_v39 = vand.u32 4294901760, %v155_v12  ;;  %v12277_v11 = vand.u32 4294901760, %v621_v46  ;;  %402 = vmatmul.f32.vlgmr.msra.gmra.mxu2 %v12245_v19 }
  0x64   :  { %629 = vmatpush.xpose.msrb.mxu2 %v12170_v28  ;;  %456 = vmatmul.f32.vlgmr.msra.gmra.mxu3 %v12252_v48  ;;  %v715_v32 = vand.u32 4294901760, %v714_v54 }
  0x65   :  { %v12289_v8 = vsub.f32 %v155_v12, %v12272_v39  ;;  %v12299_v60 = vsub.f32 %v621_v46, %v12277_v11  ;;  %v720_v12 = vsub.f32 %v12263_v51, %v17330_v26 }
  0x66   :  { %485 = vmatpush.xpose.msrb.mxu0 %v247_v13  ;;  %334 = vmatpush.xpose.msra.mxu1 %v333_v0  ;;  %v17332_v0 = vand.u32 4294901760, %v12285_v7 }
  0x67   :  { %704 = vmatpush.xpose.msrb.mxu3 %v703_v1  ;;  %17471 = vst [vmem:[#allocation22_spill] sm:$0xff] %v12289_v8  ;;  %v12293_v13 = vand.u32 4294901760, %v12289_v8  ;;  %v12301_v1 = vand.u32 4294901760, %v620_v37  ;;  %v721_v26 = vand.u32 4294901760, %v720_v12 }
  0x68   :  { %631 = vmatpush.xpose.msrb.mxu2 %v12183_v44  ;;  %17473 = vst [vmem:[#allocation24_spill] sm:$0xff] %v12299_v60 }
  0x69   :  { %17472 = vst [vmem:[#allocation23_spill] sm:$0xff] %v12293_v13  ;;  %v217_v56 = vsub.f32 %v12289_v8, %v12293_v13  ;;  %336 = vmatmul.f32.vlgmr.msra.gmra.mxu1 %v12231_v38  ;;  %v12321_v54 = vsub.f32 %v620_v37, %v12301_v1  ;;  %v17475_v37 = vand.u32 4294901760, %v12070_v25  ;;  %v617_v25 = vld [vmem:[#allocation7 + $0x28] sm:$0xff] }
  0x6a   :  { %489 = vmatpush.xpose.msrb.mxu0 %v253_v17  ;;  %560 = vmatpush.xpose.msrb.mxu1 %v12025_v3  ;;  %v156_v3 = vld [vmem:[#allocation2 + $0x10] sm:$0xff]  ;;  %v12368_v19 = vand.u32 4294901760, %v617_v25 }
  0x6b   :  { %710 = vmatpush.xpose.msrb.mxu3 %v709_v50  ;;  %v12311_v17 = vand.u32 4294901760, %v217_v56  ;;  %v12313_v46 = vand.u32 4294901760, %v156_v3  ;;  %v17337_v50 = vand.u32 4294901760, %v12299_v60  ;;  %v726_v56 = vsub.f32 %v12285_v7, %v17332_v0  ;;  %407 = vmatmul.f32.gmra.mxu2 %v12289_v8 }
  0x6c   :  { %633 = vmatpush.xpose.msrb.mxu2 %v12203_v62  ;;  %462 = vmatmul.f32.gmra.mxu3 %v12293_v13  ;;  %v17344_v12 = vand.u32 4294901760, %v12321_v54  ;;  %v12345_v0 = vsub.f32 %v619_v10, %v12326_v30 }
  0x6d   :  { %219 = vmatmul.f32.gmra.mxu0 %v12311_v17  ;;  %v12330_v18 = vsub.f32 %v156_v3, %v12313_v46  ;;  %v727_v3 = vand.u32 4294901760, %v726_v56 }
  0x6e   :  { %493 = vmatpush.xpose.msrb.mxu0 %v259_v24  ;;  %562 = vmatpush.xpose.msrb.mxu1 %v12027_v4  ;;  %v618_v4 = vld [vmem:[#allocation7 + $0x30] sm:$0xff]  ;;  %v738_v56 = vsub.f32 %v12321_v54, %v17344_v12  ;;  %v17347_v8 = vand.u32 4294901760, %v12345_v0  ;;  %v12389_v12 = vsub.f32 %v617_v25, %v12368_v19 }
  0x6f   :  { %716 = vmatpush.xpose.msrb.mxu3 %v715_v32  ;;  %v12334_v24 = vand.u32 4294901760, %v12330_v18  ;;  %v732_v32 = vsub.f32 %v12299_v60, %v17337_v50  ;;  %v12347_v13 = vand.u32 4294901760, %v618_v4  ;;  %v616_v60 = vld [vmem:[#allocation7 + $0x20] sm:$0xff] }
  0x70   :  { %635 = vmatpush.xpose.msrb.mxu2 %v12224_v34 }
  0x71   :  { %17474 = vst [vmem:[#allocation25_spill] sm:$0xff] %v12334_v24  ;;  %v225_v48 = vsub.f32 %v12330_v18, %v12334_v24  ;;  %340 = vmatmul.f32.gmra.mxu1 %v12272_v39  ;;  %v733_v10 = vand.u32 4294901760, %v732_v32  ;;  %v17478_v32 = vand.u32 4294901760, %v12087_v33  ;;  %v615_v33 = vld [vmem:[#allocation7 + $0x18] sm:$0xff] }
  0x72   :  { %497 = vmatpush.xpose.msrb.mxu0 %v17475_v37  ;;  %564 = vmatpush.xpose.msrb.mxu1 %v12029_v5  ;;  %v157_v5 = vld [vmem:[#allocation2 + $0x18] sm:$0xff] }
  0x73   :  { %722 = vmatpush.xpose.msrb.mxu3 %v721_v26  ;;  %v12353_v37 = vand.u32 4294901760, %v225_v48  ;;  %v12355_v50 = vand.u32 4294901760, %v157_v5  ;;  %v17476_v26 = vand.u32 4294901760, %v12082_v31  ;;  %v12366_v48 = vsub.f32 %v618_v4, %v12347_v13  ;;  %412 = vmatmul.f32.gmra.mxu2 %v12330_v18 }
  0x74   :  { %637 = vmatpush.xpose.msrb.mxu2 %v12242_v6  ;;  %468 = vmatmul.f32.gmra.mxu3 %v12334_v24  ;;  %v739_v4 = vand.u32 4294901760, %v738_v56 }
  0x75   :  { %227 = vmatmul.f32.gmra.mxu0 %v12353_v37  ;;  %v12372_v31 = vsub.f32 %v157_v5, %v12355_v50  ;;  %v744_v5 = vsub.f32 %v12345_v0, %v17347_v8  ;;  %v17351_v8 = vand.u32 4294901760, %v12389_v12 }
  0x76   :  { %501 = vmatpush.xpose.msrb.mxu0 %v17476_v26  ;;  %566 = vmatpush.xpose.msrb.mxu1 %v12039_v9  ;;  %v17348_v26 = vand.u32 4294901760, %v12366_v48 }
  0x77   :  { %728 = vmatpush.xpose.msrb.mxu3 %v727_v3  ;;  %v12376_v9 = vand.u32 4294901760, %v12372_v31  ;;  %v12382_v3 = vand.u32 4294901760, %v616_v60  ;;  %v745_v56 = vand.u32 4294901760, %v744_v5  ;;  %v756_v5 = vsub.f32 %v12389_v12, %v17351_v8  ;;  %v612_v8 = vld [vmem:[#allocation7] sm:$0xff] }
  0x78   :  { %639 = vmatpush.xpose.msrb.mxu2 %v12265_v41 }
  0x79   :  { %17477 = vst [vmem:[#allocation26_spill] sm:$0xff] %v12376_v9  ;;  %v233_v24 = vsub.f32 %v12372_v31, %v12376_v9  ;;  %344 = vmatmul.f32.gmra.mxu1 %v12313_v46  ;;  %v12402_v25 = vsub.f32 %v616_v60, %v12382_v3 }
  0x7a   :  { %505 = vmatpush.xpose.msrb.mxu0 %v17478_v32  ;;  %568 = vmatpush.xpose.msrb.mxu1 %v12047_v14  ;;  %v750_v32 = vsub.f32 %v12366_v48, %v17348_v26 }
  0x7b   :  { %734 = vmatpush.xpose.msrb.mxu3 %v733_v10  ;;  %v12395_v14 = vand.u32 4294901760, %v233_v24  ;;  %v17479_v10 = vand.u32 4294901760, %v12106_v43  ;;  %v12408_v24 = vand.u32 4294901760, %v615_v33  ;;  %v614_v43 = vld [vmem:[#allocation7 + $0x10] sm:$0xff]  ;;  %417 = vmatmul.f32.gmra.mxu2 %v12372_v31  ;;  %v761_v60 = vand.u32 4294901760, %v12402_v25 }
  0x7c   :  { %641 = vmatpush.xpose.msrb.mxu2 %v12277_v11  ;;  %474 = vmatmul.f32.gmra.mxu3 %v12376_v9  ;;  %v12423_v26 = vand.u32 4294901760, %v614_v43  ;;  %v613_v9 = vld [vmem:[#allocation7 + $0x8] sm:$0xff] }
  0x7d   :  { %235 = vmatmul.f32.gmra.mxu0 %v12395_v14 }
  0x7e   :  { %509 = vmatpush.xpose.msrb.mxu0 %v17479_v10  ;;  %570 = vmatpush.xpose.msrb.mxu1 %v12062_v21  ;;  %v17480_v21 = vand.u32 4294901760, %v12118_v49  ;;  %v12421_v10 = vsub.f32 %v615_v33, %v12408_v24  ;;  %v762_v49 = vsub.f32 %v12402_v25, %v761_v60 }
  0x7f   :  { %740 = vmatpush.xpose.msrb.mxu3 %v739_v4  ;;  %v751_v4 = vand.u32 4294901760, %v750_v32  ;;  %v12435_v32 = vsub.f32 %v614_v43, %v12423_v26 }
  0x80   :  { %643 = vmatpush.xpose.msrb.mxu2 %v12301_v1  ;;  %v767_v33 = vand.u32 4294901760, %v12421_v10 }
  0x81   :  { %348 = vmatmul.f32.gmra.mxu1 %v12355_v50 }
  0x82   :  { %513 = vmatpush.xpose.msrb.mxu0 %v17480_v21  ;;  %572 = vmatpush.xpose.msrb.mxu1 %v12074_v27  ;;  %v17481_v27 = vand.u32 4294901760, %v12130_v55  ;;  %v12437_v21 = vand.u32 4294901760, %v613_v9  ;;  %v17482_v55 = vand.u32 4294901760, %v12142_v61  ;;  %v17483_v61 = vand.u32 4294901760, %v12147_v63 }
  0x83   :  { %746 = vmatpush.xpose.msrb.mxu3 %v745_v56  ;;  %v757_v56 = vand.u32 4294901760, %v756_v5  ;;  %v773_v5 = vand.u32 4294901760, %v12435_v32 }
  0x84   :  { %645 = vmatpush.xpose.msrb.mxu2 %v12326_v30  ;;  %v12448_v43 = vsub.f32 %v613_v9, %v12437_v21 }
  0x86   :  { %517 = vmatpush.xpose.msrb.mxu0 %v17481_v27  ;;  %574 = vmatpush.xpose.msrb.mxu1 %v12093_v36  ;;  %v763_v36 = vand.u32 4294901760, %v762_v49  ;;  %v12450_v27 = vand.u32 4294901760, %v612_v8  ;;  %v774_v49 = vsub.f32 %v12435_v32, %v773_v5 }
  0x87   :  { %752 = vmatpush.xpose.msrb.mxu3 %v751_v4  ;;  %v768_v4 = vsub.f32 %v12421_v10, %v767_v33 }
  0x88   :  { %647 = vmatpush.xpose.msrb.mxu2 %v12347_v13  ;;  %v12461_v9 = vsub.f32 %v612_v8, %v12450_v27  ;;  %v17485_v8 = vand.u32 4294901760, %v12180_v40  ;;  %v17487_v40 = vand.u32 4294901760, %v12213_v20 }
  0x8a   :  { %521 = vmatpush.xpose.msrb.mxu0 %v17482_v55  ;;  %576 = vmatpush.xpose.msrb.mxu1 %v12103_v42  ;;  %v769_v42 = vand.u32 4294901760, %v768_v4  ;;  %v17484_v55 = vand.u32 4294901760, %v12166_v23  ;;  %v17486_v4 = vand.u32 4294901760, %v12197_v58  ;;  %v17497_v58 = vand.u32 4294901760, %v12345_v0 }
  0x8b   :  { %758 = vmatpush.xpose.msrb.mxu3 %v757_v56  ;;  %v779_v56 = vand.u32 4294901760, %v12448_v43 }
  0x8c   :  { %649 = vmatpush.xpose.msrb.mxu2 %v12368_v19 }
  0x8d   :  { %v780_v63 = vsub.f32 %v12448_v43, %v779_v56 }
  0x8e   :  { %525 = vmatpush.xpose.msrb.mxu0 %v17483_v61  ;;  %578 = vmatpush.xpose.msrb.mxu1 %v12114_v47  ;;  %v775_v47 = vand.u32 4294901760, %v774_v49  ;;  %v17501_v49 = vld [vmem:[#allocation22_spill] sm:$0xff] }
  0x8f   :  { %764 = vmatpush.xpose.msrb.mxu3 %v763_v36  ;;  %v785_v36 = vand.u32 4294901760, %v12461_v9  ;;  %v781_v23 = vand.u32 4294901760, %v780_v63 }
  0x90   :  { %651 = vmatpush.xpose.msrb.mxu2 %v12382_v3 }
  0x92   :  { %529 = vmatpush.xpose.msrb.mxu0 %v17484_v55  ;;  %580 = vmatpush.xpose.msrb.mxu1 %v12126_v53  ;;  %v786_v53 = vsub.f32 %v12461_v9, %v785_v36 }
  0x93   :  { %770 = vmatpush.xpose.msrb.mxu3 %v769_v42  ;;  %v1071_v42 = vld [vmem:[#allocation8 + $0x48] sm:$0xff] }
  0x94   :  { %653 = vmatpush.xpose.msrb.mxu2 %v12408_v24  ;;  %v787_v61 = vand.u32 4294901760, %v786_v53 }
  0x96   :  { %533 = vmatpush.xpose.msrb.mxu0 %v17485_v8  ;;  %582 = vmatpush.xpose.msrb.mxu1 %v12134_v57  ;;  %v17488_v57 = vand.u32 4294901760, %v12187_v45 }
  0x97   :  { %776 = vmatpush.xpose.msrb.mxu3 %v775_v47 }
  0x98   :  { %655 = vmatpush.xpose.msrb.mxu2 %v12423_v26 }
  0x9a   :  { %537 = vmatpush.xpose.msrb.mxu0 %v17486_v4  ;;  %584 = vmatpush.xpose.msrb.mxu1 %v12153_v2  ;;  %v17489_v2 = vand.u32 4294901760, %v12201_v59 }
  0x9b   :  { %782 = vmatpush.xpose.msrb.mxu3 %v781_v23 }
  0x9c   :  { %657 = vmatpush.xpose.msrb.mxu2 %v12437_v21 }
  0x9e   :  { %541 = vmatpush.xpose.msrb.mxu0 %v17487_v40  ;;  %586 = vmatpush.xpose.msrb.mxu1 %v12163_v22  ;;  %v17490_v22 = vand.u32 4294901760, %v12218_v29  ;;  %v1069_v40 = vld [vmem:[#allocation8 + $0x38] sm:$0xff] }
  0x9f   :  { %788 = vmatpush.xpose.msrb.mxu3 %v787_v61 }
  0xa0   :  { %659 = vmatpush.xpose.msrb.mxu2 %v12450_v27 }
  0xa1   :  { %543 = vmatmul.f32.vlgmr.msrb.gmra.mxu0 %v12231_v38 }
  0xa2   :  { %808 = vmatpush.xpose.msra.mxu0 %v12187_v45  ;;  %588 = vmatpush.xpose.msrb.mxu1 %v12176_v35  ;;  %v17492_v35 = vand.u32 4294901760, %v12263_v51  ;;  %v17494_v45 = vld [vmem:[#allocation24_spill] sm:$0xff] }
  0xa3   :  { %1014 = vmatpush.xpose.msra.mxu3 %v12170_v28  ;;  %665 = vmatmul.f32.vlgmr.msrb.gmra.mxu2 %v12270_v15 }
  0xa4   :  { %935 = vmatpush.xpose.msra.mxu2 %v17488_v57  ;;  %790 = vmatmul.f32.vlgmr.msrb.gmra.mxu3 %v12231_v38  ;;  %v17503_v57 = vld [vmem:[#allocation23_spill] sm:$0xff] }
  0xa6   :  { %811 = vmatpush.xpose.msra.mxu0 %v12201_v59  ;;  %590 = vmatpush.xpose.msrb.mxu1 %v12193_v52  ;;  %v17495_v52 = vand.u32 4294901760, %v17494_v45  ;;  %v17498_v59 = vand.u32 4294901760, %v12366_v48 }
  0xa7   :  { %1016 = vmatpush.xpose.msra.mxu3 %v12183_v44 }
  0xa8   :  { %939 = vmatpush.xpose.msra.mxu2 %v17489_v2  ;;  %v12667_v2 = vand.u32 4294901760, %v1069_v40 }
  0xa9   :  { %592 = vmatmul.f32.vlgmr.msrb.gmra.mxu1 %v12231_v38  ;;  %547 = vmatmul.f32.gmra.mxu0 %v12272_v39 }
  0xaa   :  { %814 = vmatpush.xpose.msra.mxu0 %v12218_v29  ;;  %876 = vmatpush.xpose.msra.mxu1 %v12170_v28  ;;  %v17491_v28 = vand.u32 4294901760, %v12240_v16 }
  0xab   :  { %1018 = vmatpush.xpose.msra.mxu3 %v12203_v62  ;;  %673 = vmatmul.f32.gmra.mxu2 %v12311_v17 }
  0xac   :  { %943 = vmatpush.xpose.msra.mxu2 %v17490_v22  ;;  %794 = vmatmul.f32.gmra.mxu3 %v12272_v39 }
  0xae   :  { %817 = vmatpush.xpose.msra.mxu0 %v12240_v16  ;;  %878 = vmatpush.xpose.msra.mxu1 %v12183_v44  ;;  %v17493_v44 = vand.u32 4294901760, %v12285_v7 }
  0xaf   :  { %1020 = vmatpush.xpose.msra.mxu3 %v12224_v34 }
  0xb0   :  { %947 = vmatpush.xpose.msra.mxu2 %v17491_v28 }
  0xb1   :  { %596 = vmatmul.f32.gmra.mxu1 %v12272_v39  ;;  %551 = vmatmul.f32.gmra.mxu0 %v12313_v46 }
  0xb2   :  { %820 = vmatpush.xpose.msra.mxu0 %v12263_v51  ;;  %880 = vmatpush.xpose.msra.mxu1 %v12203_v62  ;;  %v17499_v62 = vand.u32 4294901760, %v12389_v12 }
  0xb3   :  { %1022 = vmatpush.xpose.msra.mxu3 %v12242_v6  ;;  %681 = vmatmul.f32.gmra.mxu2 %v12353_v37 }
  0xb4   :  { %951 = vmatpush.xpose.msra.mxu2 %v17492_v35  ;;  %798 = vmatmul.f32.gmra.mxu3 %v12313_v46 }
  0xb6   :  { %823 = vmatpush.xpose.msra.mxu0 %v12285_v7  ;;  %882 = vmatpush.xpose.msra.mxu1 %v12224_v34 }
  0xb7   :  { %1024 = vmatpush.xpose.msra.mxu3 %v12265_v41 }
  0xb8   :  { %955 = vmatpush.xpose.msra.mxu2 %v17493_v44 }
  0xb9   :  { %600 = vmatmul.f32.gmra.mxu1 %v12313_v46  ;;  %555 = vmatmul.f32.gmra.mxu0 %v12355_v50 }
  0xba   :  { %826 = vmatpush.xpose.msra.mxu0 %v17494_v45  ;;  %884 = vmatpush.xpose.msra.mxu1 %v12242_v6  ;;  %v17496_v6 = vand.u32 4294901760, %v12321_v54  ;;  %v1068_v45 = vld [vmem:[#allocation8 + $0x30] sm:$0xff] }
  0xbb   :  { %1026 = vmatpush.xpose.msra.mxu3 %v12277_v11  ;;  %689 = vmatmul.f32.gmra.mxu2 %v12395_v14 }
  0xbc   :  { %959 = vmatpush.xpose.msra.mxu2 %v17495_v52  ;;  %802 = vmatmul.f32.gmra.mxu3 %v12355_v50  ;;  %v12681_v52 = vsub.f32 %v1069_v40, %v12667_v2 }
  0xbe   :  { %829 = vmatpush.xpose.msra.mxu0 %v12321_v54  ;;  %886 = vmatpush.xpose.msra.mxu1 %v12265_v41  ;;  %v1075_v41 = vld [vmem:[#allocation8 + $0x68] sm:$0xff]  ;;  %v1074_v54 = vld [vmem:[#allocation8 + $0x60] sm:$0xff] }
  0xbf   :  { %1028 = vmatpush.xpose.msra.mxu3 %v12301_v1 }
  0xc0   :  { %963 = vmatpush.xpose.msra.mxu2 %v17496_v6 }
  0xc1   :  { %604 = vmatmul.f32.gmra.mxu1 %v12355_v50 }
  0xc2   :  { %832 = vmatpush.xpose.msra.mxu0 %v12345_v0  ;;  %888 = vmatpush.xpose.msra.mxu1 %v12277_v11 }
  0xc3   :  { %1030 = vmatpush.xpose.msra.mxu3 %v12326_v30 }
  0xc4   :  { %967 = vmatpush.xpose.msra.mxu2 %v17497_v58 }
  0xc6   :  { %835 = vmatpush.xpose.msra.mxu0 %v12366_v48  ;;  %890 = vmatpush.xpose.msra.mxu1 %v12301_v1  ;;  %v17500_v1 = vld [vmem:[#allocation20_spill] sm:$0xff]  ;;  %v12609_v48 = vand.u32 4294901760, %v1074_v54 }
  0xc7   :  { %1032 = vmatpush.xpose.msra.mxu3 %v12347_v13 }
  0xc8   :  { %971 = vmatpush.xpose.msra.mxu2 %v17498_v59 }
  0xca   :  { %838 = vmatpush.xpose.msra.mxu0 %v12389_v12  ;;  %892 = vmatpush.xpose.msra.mxu1 %v12326_v30  ;;  %v1077_v30 = vld [vmem:[#allocation8 + $0x78] sm:$0xff] }
  0xcb   :  { %1034 = vmatpush.xpose.msra.mxu3 %v12368_v19  ;;  %v12571_v20 = vand.u32 4294901760, %v1077_v30  ;;  %v1073_v12 = vld [vmem:[#allocation8 + $0x58] sm:$0xff] }
  0xcc   :  { %975 = vmatpush.xpose.msra.mxu2 %v17499_v62  ;;  %v12688_v62 = vand.u32 4294901760, %v1068_v45 }
  0xcd   :  { %v12576_v29 = vsub.f32 %v1077_v30, %v12571_v20  ;;  %v17504_v30 = vld [vmem:[#allocation25_spill] sm:$0xff] }
  0xce   :  { %841 = vmatpush.xpose.msra.mxu0 %v12402_v25  ;;  %894 = vmatpush.xpose.msra.mxu1 %v12347_v13  ;;  %v12597_v13 = vand.u32 4294901760, %v1075_v41 }
  0xcf   :  { %1036 = vmatpush.xpose.msra.mxu3 %v12382_v3  ;;  %v17365_v34 = vand.u32 4294901760, %v12576_v29 }
  0xd0   :  { %979 = vmatpush.xpose.msra.mxu2 %v761_v60  ;;  %v12604_v0 = vsub.f32 %v1075_v41, %v12597_v13  ;;  %v1072_v60 = vld [vmem:[#allocation8 + $0x50] sm:$0xff] }
  0xd1   :  { %v1146_v11 = vsub.f32 %v12576_v29, %v17365_v34 }
  0xd2   :  { %844 = vmatpush.xpose.msra.mxu0 %v12421_v10  ;;  %896 = vmatpush.xpose.msra.mxu1 %v12368_v19  ;;  %v1076_v19 = vld [vmem:[#allocation8 + $0x70] sm:$0xff]  ;;  %v17363_v25 = vand.u32 4294901760, %v12604_v0  ;;  %v12620_v10 = vsub.f32 %v1074_v54, %v12609_v48  ;;  %v17354_v54 = vand.u32 4294901760, %v12681_v52 }
  0xd3   :  { %1038 = vmatpush.xpose.msra.mxu3 %v12408_v24  ;;  %v12582_v16 = vand.u32 4294901760, %v1076_v19 }
  0xd4   :  { %983 = vmatpush.xpose.msra.mxu2 %v767_v33  ;;  %v12625_v33 = vand.u32 4294901760, %v1072_v60 }
  0xd5   :  { %v12587_v51 = vsub.f32 %v1076_v19, %v12582_v16 }
  0xd6   :  { %847 = vmatpush.xpose.msra.mxu0 %v12435_v32  ;;  %898 = vmatpush.xpose.msra.mxu1 %v12382_v3  ;;  %v1147_v3 = vand.u32 4294901760, %v1146_v11  ;;  %v12648_v63 = vsub.f32 %v1072_v60, %v12625_v33  ;;  %v1194_v60 = vsub.f32 %v12681_v52, %v17354_v54 }
  0xd7   :  { %1040 = vmatpush.xpose.msra.mxu3 %v12423_v26  ;;  %v17364_v7 = vand.u32 4294901760, %v12587_v51 }
  0xd8   :  { %987 = vmatpush.xpose.msra.mxu2 %v773_v5  ;;  %v17361_v5 = vand.u32 4294901760, %v12620_v10  ;;  %v17358_v4 = vand.u32 4294901760, %v12648_v63 }
  0xda   :  { %850 = vmatpush.xpose.msra.mxu0 %v12448_v43  ;;  %900 = vmatpush.xpose.msra.mxu1 %v12408_v24  ;;  %v12617_v24 = vand.u32 4294901760, %v1073_v12  ;;  %v1164_v55 = vsub.f32 %v12620_v10, %v17361_v5  ;;  %v1176_v28 = vsub.f32 %v12648_v63, %v17358_v4  ;;  %v1062_v4 = vld [vmem:[#allocation8] sm:$0xff] }
  0xdb   :  { %1042 = vmatpush.xpose.msra.mxu3 %v12437_v21 }
  0xdc   :  { %991 = vmatpush.xpose.msra.mxu2 %v779_v56  ;;  %v12633_v43 = vsub.f32 %v1073_v12, %v12617_v24  ;;  %v12639_v56 = vand.u32 4294901760, %v1071_v42  ;;  %v1165_v23 = vand.u32 4294901760, %v1164_v55  ;;  %v1177_v6 = vand.u32 4294901760, %v1176_v28 }
  0xdd   :  { %v12704_v12 = vsub.f32 %v1068_v45, %v12688_v62 }
  0xde   :  { %853 = vmatpush.xpose.msra.mxu0 %v12461_v9  ;;  %902 = vmatpush.xpose.msra.mxu1 %v12423_v26  ;;  %v1152_v26 = vsub.f32 %v12587_v51, %v17364_v7  ;;  %v17360_v47 = vand.u32 4294901760, %v12633_v43  ;;  %v12660_v61 = vsub.f32 %v1071_v42, %v12639_v56  ;;  %v12694_v19 = vpop.f32.mrf.mxu0  ;;  %v17505_v42 = vld [vmem:[#allocation26_spill] sm:$0xff] }
  0xdf   :  { %1044 = vmatpush.xpose.msra.mxu3 %v12450_v27 }
  0xe0   :  { %995 = vmatpush.xpose.msra.mxu2 %v785_v36  ;;  %v1153_v32 = vand.u32 4294901760, %v1152_v26  ;;  %v1070_v36 = vld [vmem:[#allocation8 + $0x40] sm:$0xff]  ;;  %v1170_v53 = vsub.f32 %v12633_v43, %v17360_v47  ;;  %v17357_v35 = vand.u32 4294901760, %v12660_v61  ;;  %v12780_v47 = vand.u32 4294901760, %v1062_v4 }
  0xe1   :  { %856 = vmatmul.f32.vlgmr.msra.gmra.mxu0 %v17500_v1  ;;  %v12652_v8 = vand.u32 4294901760, %v1070_v36 }
  0xe2   :  { %1079 = vmatpush.xpose.msrb.mxu0 %v12571_v20  ;;  %904 = vmatpush.xpose.msra.mxu1 %v12437_v21  ;;  %v1158_v21 = vsub.f32 %v12604_v0, %v17363_v25  ;;  %v1171_v22 = vand.u32 4294901760, %v1170_v53  ;;  %v1182_v58 = vsub.f32 %v12660_v61, %v17357_v35  ;;  %v1195_v53 = vand.u32 4294901760, %v1194_v60  ;;  %v1064_v60 = vld [vmem:[#allocation8 + $0x10] sm:$0xff] }
  0xe3   :  { %1326 = vmatpush.xpose.msrb.mxu3 %v12571_v20  ;;  %997 = vmatmul.f32.vlgmr.msra.gmra.mxu2 %v12231_v38  ;;  %v12676_v44 = vsub.f32 %v1070_v36, %v12652_v8  ;;  %v1066_v36 = vld [vmem:[#allocation8 + $0x20] sm:$0xff] }
  0xe4   :  { %1258 = vmatpush.xpose.msrb.mxu2 %v12576_v29  ;;  %1046 = vmatmul.f32.vlgmr.msra.gmra.mxu3 %v12231_v38  ;;  %v1159_v9 = vand.u32 4294901760, %v1158_v21  ;;  %v1183_v41 = vand.u32 4294901760, %v1182_v58  ;;  %v12730_v28 = vand.u32 4294901760, %v1066_v36 }
  0xe5   :  { %v17355_v59 = vand.u32 4294901760, %v12676_v44 }
  0xe6   :  { %1081 = vmatpush.xpose.msrb.mxu0 %v12582_v16  ;;  %906 = vmatpush.xpose.msra.mxu1 %v12450_v27  ;;  %v17502_v27 = vld [vmem:[#allocation21_spill] sm:$0xff]  ;;  %v12735_v45 = vsub.f32 %v1066_v36, %v12730_v28  ;;  %v403_v7 = vpop.f32.mrf.mxu2 }
  0xe7   :  { %1328 = vmatpush.xpose.msrb.mxu3 %v12582_v16  ;;  %v1188_v11 = vsub.f32 %v12676_v44, %v17355_v59  ;;  %v1063_v59 = vld [vmem:[#allocation8 + $0x8] sm:$0xff]  ;;  %v457_v34 = vpop.f32.mrf.mxu3 }
  0xe8   :  { %1261 = vmatpush.xpose.msrb.mxu2 %v12587_v51  ;;  %v12768_v35 = vand.u32 4294901760, %v1063_v59 }
  0xe9   :  { %861 = vmatmul.f32.gmra.mxu0 %v17501_v49  ;;  %910 = vmatmul.f32.vlgmr.msra.gmra.mxu1 %v17502_v27  ;;  %v1189_v26 = vand.u32 4294901760, %v1188_v11  ;;  %v17356_v11 = vand.u32 4294901760, %v12735_v45 }
  0xea   :  { %1148 = vmatpush.xpose.msrb.mxu1 %v1147_v3  ;;  %1083 = vmatpush.xpose.msrb.mxu0 %v12597_v13  ;;  %v1067_v3 = vld [vmem:[#allocation8 + $0x28] sm:$0xff] }
  0xeb   :  { %1330 = vmatpush.xpose.msrb.mxu3 %v12597_v13  ;;  %1001 = vmatmul.f32.gmra.mxu2 %v12272_v39  ;;  %v12713_v21 = vand.u32 4294901760, %v1067_v3 }
  0xec   :  { %1050 = vmatmul.f32.gmra.mxu3 %v12272_v39  ;;  %1264 = vmatpush.xpose.msrb.mxu2 %v12604_v0 }
  0xed   :  { %v12721_v55 = vsub.f32 %v1067_v3, %v12713_v21 }
  0xee   :  { %1154 = vmatpush.xpose.msrb.mxu1 %v1153_v32  ;;  %1085 = vmatpush.xpose.msrb.mxu0 %v12609_v48  ;;  %v17353_v32 = vand.u32 4294901760, %v12704_v12 }
  0xef   :  { %1332 = vmatpush.xpose.msrb.mxu3 %v12609_v48 }
  0xf0   :  { %1267 = vmatpush.xpose.msrb.mxu2 %v12620_v10  ;;  %v1200_v40 = vsub.f32 %v12704_v12, %v17353_v32  ;;  %v12754_v32 = vand.u32 4294901760, %v1064_v60 }
  0xf1   :  { %866 = vmatmul.f32.gmra.mxu0 %v12330_v18  ;;  %916 = vmatmul.f32.gmra.mxu1 %v17503_v57 }
  0xf2   :  { %1160 = vmatpush.xpose.msrb.mxu1 %v1159_v9  ;;  %1087 = vmatpush.xpose.msrb.mxu0 %v12617_v24  ;;  %v12718_v9 = vpop.f32.mrf.mxu1  ;;  %v1201_v58 = vand.u32 4294901760, %v1200_v40  ;;  %v1212_v40 = vsub.f32 %v12735_v45, %v17356_v11  ;;  %v12761_v54 = vsub.f32 %v1064_v60, %v12754_v32  ;;  %v12773_v60 = vsub.f32 %v1063_v59, %v12768_v35 }
  0xf3   :  { %1334 = vmatpush.xpose.msrb.mxu3 %v12617_v24  ;;  %1005 = vmatmul.f32.gmra.mxu2 %v12313_v46  ;;  %v12787_v59 = vsub.f32 %v1062_v4, %v12780_v47  ;;  %v338_v4 = vadd.f32 %v12718_v9, %v12694_v19 }
  0xf4   :  { %1054 = vmatmul.f32.gmra.mxu3 %v12313_v46  ;;  %1270 = vmatpush.xpose.msrb.mxu2 %v12633_v43  ;;  %v17362_v11 = vand.u32 4294901760, %v12761_v54 }
  0xf5   :  { %v1235_v25 = vand.u32 4294901760, %v12787_v59 }
  0xf6   :  { %1166 = vmatpush.xpose.msrb.mxu1 %v1165_v23  ;;  %1089 = vmatpush.xpose.msrb.mxu0 %v12625_v33  ;;  %v12724_v23 = vpop.f32.mrf.mxu0 }
  0xf7   :  { %1336 = vmatpush.xpose.msrb.mxu3 %v12625_v33 }
  0xf8   :  { %1273 = vmatpush.xpose.msrb.mxu2 %v12648_v63 }
  0xf9   :  { %871 = vmatmul.f32.gmra.mxu0 %v12372_v31  ;;  %922 = vmatmul.f32.gmra.mxu1 %v17504_v30 }
  0xfa   :  { %1172 = vmatpush.xpose.msrb.mxu1 %v1171_v22  ;;  %1091 = vmatpush.xpose.msrb.mxu0 %v12639_v56  ;;  %v17352_v22 = vand.u32 4294901760, %v12721_v55  ;;  %v341_v36 = vpop.f32.mrf.mxu1 }
  0xfb   :  { %1338 = vmatpush.xpose.msrb.mxu3 %v12639_v56  ;;  %1009 = vmatmul.f32.gmra.mxu2 %v12355_v50 }
  0xfc   :  { %1058 = vmatmul.f32.gmra.mxu3 %v12355_v50  ;;  %1276 = vmatpush.xpose.msrb.mxu2 %v12660_v61 }
  0xfe   :  { %1178 = vmatpush.xpose.msrb.mxu1 %v1177_v6  ;;  %1093 = vmatpush.xpose.msrb.mxu0 %v12652_v8  ;;  %v1065_v6 = vld [vmem:[#allocation8 + $0x18] sm:$0xff] }
  0xff   :  { %1340 = vmatpush.xpose.msrb.mxu3 %v12652_v8  ;;  %v12742_v3 = vand.u32 4294901760, %v1065_v6 }
 0x100   :  { %1279 = vmatpush.xpose.msrb.mxu2 %v12676_v44 }
 0x101   :  { %928 = vmatmul.f32.gmra.mxu1 %v17505_v42 }
 0x102   :  { %1184 = vmatpush.xpose.msrb.mxu1 %v1183_v41  ;;  %1095 = vmatpush.xpose.msrb.mxu0 %v12667_v2  ;;  %v1206_v41 = vsub.f32 %v12721_v55, %v17352_v22  ;;  %v12784_v5 = vpop.f32.mrf.mxu1 }
 0x103   :  { %1342 = vmatpush.xpose.msrb.mxu3 %v12667_v2 }
 0x104   :  { %1282 = vmatpush.xpose.msrb.mxu2 %v12681_v52 }
 0x106   :  { %1190 = vmatpush.xpose.msrb.mxu1 %v1189_v26  ;;  %1097 = vmatpush.xpose.msrb.mxu0 %v12688_v62  ;;  %v12747_v26 = vsub.f32 %v1065_v6, %v12742_v3  ;;  %v12758_v6 = vpop.f32.mrf.mxu0 }
 0x107   :  { %1344 = vmatpush.xpose.msrb.mxu3 %v12688_v62 }
 0x108   :  { %1285 = vmatpush.xpose.msrb.mxu2 %v12704_v12  ;;  %v17359_v22 = vand.u32 4294901760, %v12747_v26 }
 0x10a   :  { %1196 = vmatpush.xpose.msrb.mxu1 %v1195_v53  ;;  %1099 = vmatpush.xpose.msrb.mxu0 %v12713_v21  ;;  %v1207_v53 = vand.u32 4294901760, %v1206_v41  ;;  %v1218_v41 = vsub.f32 %v12747_v26, %v17359_v22  ;;  %v17366_v22 = vand.u32 4294901760, %v12773_v60  ;;  %v12809_v19 = vpop.f32.mrf.mxu1 }
 0x10b   :  { %1346 = vmatpush.xpose.msrb.mxu3 %v12713_v21 }
 0x10c   :  { %1288 = vmatpush.xpose.msrb.mxu2 %v12721_v55 }
 0x10e   :  { %1202 = vmatpush.xpose.msrb.mxu1 %v1201_v58  ;;  %1101 = vmatpush.xpose.msrb.mxu0 %v12730_v28  ;;  %v1213_v58 = vand.u32 4294901760, %v1212_v40  ;;  %v1224_v40 = vsub.f32 %v12761_v54, %v17362_v11  ;;  %v1230_v11 = vsub.f32 %v12773_v60, %v17366_v22  ;;  %v17507_v22 = vand.u32 4294901760, %v12576_v29 }
 0x10f   :  { %1348 = vmatpush.xpose.msrb.mxu3 %v12730_v28  ;;  %v342_v29 = vadd.f32 %v341_v36, %v12724_v23  ;;  %v17513_v36 = vand.u32 4294901760, %v12660_v61  ;;  %v17520_v61 = vand.u32 4294901760, %v12735_v45 }
 0x110   :  { %1291 = vmatpush.xpose.msrb.mxu2 %v12735_v45 }
 0x112   :  { %1208 = vmatpush.xpose.msrb.mxu1 %v1207_v53  ;;  %1103 = vmatpush.xpose.msrb.mxu0 %v12742_v3  ;;  %v1219_v53 = vand.u32 4294901760, %v1218_v41  ;;  %v1225_v41 = vand.u32 4294901760, %v1224_v40  ;;  %v1236_v40 = vsub.f32 %v12787_v59, %v1235_v25 }
 0x113   :  { %1350 = vmatpush.xpose.msrb.mxu3 %v12742_v3 }
 0x114   :  { %1294 = vmatpush.xpose.msrb.mxu2 %v12747_v26  ;;  %v1237_v9 = vand.u32 4294901760, %v1236_v40 }
 0x116   :  { %1214 = vmatpush.xpose.msrb.mxu1 %v1213_v58  ;;  %1105 = vmatpush.xpose.msrb.mxu0 %v12754_v32  ;;  %v12790_v58 = vpop.f32.mrf.mxu0 }
 0x117   :  { %1352 = vmatpush.xpose.msrb.mxu3 %v12754_v32  ;;  %17506 = vst [vmem:[#allocation24_spill] sm:$0xff] %v12790_v58  ;;  %v404_v58 = vadd.f32 %v403_v7, %v338_v4  ;;  %v408_v7 = vpop.f32.mrf.mxu2  ;;  %v463_v4 = vpop.f32.mrf.mxu3 }
 0x118   :  { %1297 = vmatpush.xpose.msrb.mxu2 %v12761_v54  ;;  %v409_v40 = vadd.f32 %v408_v7, %v342_v29 }
 0x11a   :  { %1220 = vmatpush.xpose.msrb.mxu1 %v1219_v53  ;;  %1107 = vmatpush.xpose.msrb.mxu0 %v12768_v35  ;;  %v1231_v53 = vand.u32 4294901760, %v1230_v11 }
 0x11b   :  { %1354 = vmatpush.xpose.msrb.mxu3 %v12768_v35 }
 0x11c   :  { %1300 = vmatpush.xpose.msrb.mxu2 %v12773_v60 }
 0x11e   :  { %1226 = vmatpush.xpose.msrb.mxu1 %v1225_v41  ;;  %1109 = vmatpush.xpose.msrb.mxu0 %v12780_v47  ;;  %v544_v11 = vpop.f32.mrf.mxu0  ;;  %v17508_v41 = vand.u32 4294901760, %v12587_v51 }
 0x11f   :  { %1356 = vmatpush.xpose.msrb.mxu3 %v12780_v47  ;;  %v12830_v23 = vpop.f32.mrf.mxu2 }
 0x120   :  { %1303 = vmatpush.xpose.msrb.mxu2 %v12787_v59 }
 0x121   :  { %1115 = vmatmul.f32.vlgmr.msrb.gmra.mxu0 %v12270_v15 }
 0x122   :  { %1385 = vmatpush.xpose.msra.mxu0 %v17507_v22  ;;  %1232 = vmatpush.xpose.msrb.mxu1 %v1231_v53  ;;  %v458_v22 = vadd.f32 %v457_v34, %v404_v58  ;;  %v17509_v53 = vand.u32 4294901760, %v12604_v0  ;;  %v17510_v34 = vand.u32 4294901760, %v12620_v10  ;;  %v12836_v10 = vpop.f32.mrf.mxu3 }
 0x123   :  { %1360 = vmatmul.f32.vlgmr.msrb.gmra.mxu3 %v17502_v27  ;;  %1306 = vmatmul.f32.vlgmr.msrb.gmra.mxu2 %v17500_v1  ;;  %v464_v1 = vadd.f32 %v463_v4, %v409_v40 }
 0x124   :  { %v545_v15 = vadd.f32 %v544_v11, %v458_v22 }
 0x126   :  { %1389 = vmatpush.xpose.msra.mxu0 %v17508_v41  ;;  %1238 = vmatpush.xpose.msrb.mxu1 %v1237_v9  ;;  %v593_v51 = vpop.f32.mrf.mxu1  ;;  %v548_v0 = vpop.f32.mrf.mxu0 }
 0x129   :  { %1240 = vmatmul.f32.vlgmr.msrb.gmra.mxu1 %v12231_v38  ;;  %1123 = vmatmul.f32.gmra.mxu0 %v12311_v17  ;;  %v17511_v17 = vand.u32 4294901760, %v12633_v43 }
 0x12a   :  { %1464 = vmatpush.xpose.msra.mxu1 %v12571_v20  ;;  %1393 = vmatpush.xpose.msra.mxu0 %v17509_v53  ;;  %v594_v20 = vadd.f32 %v593_v51, %v545_v15 }
 0x12b   :  { %1366 = vmatmul.f32.gmra.mxu3 %v17503_v57  ;;  %1311 = vmatmul.f32.gmra.mxu2 %v17501_v49  ;;  %v17512_v49 = vand.u32 4294901760, %v12648_v63  ;;  %v17518_v63 = vand.u32 4294901760, %v12704_v12 }
 0x12c   :  { %v12827_v27 = vmul.f32 0.25, %v594_v20 }
 0x12e   :  { %1466 = vmatpush.xpose.msra.mxu1 %v12582_v16  ;;  %1397 = vmatpush.xpose.msra.mxu0 %v17510_v34  ;;  %v549_v16 = vadd.f32 %v548_v0, %v464_v1  ;;  %v1721_v9 = vsel %vm1720_vm0, %v12827_v27, 0 }
 0x12f   :  { %1516 = vrot.lane.b32.xlu1 %v12827_v27, %s11907_s11 }
 0x131   :  { %1244 = vmatmul.f32.gmra.mxu1 %v12272_v39  ;;  %1131 = vmatmul.f32.gmra.mxu0 %v12353_v37  ;;  %v12853_v37 = vpop.f32.mrf.mxu2 }
 0x132   :  { %1468 = vmatpush.xpose.msra.mxu1 %v12597_v13  ;;  %1401 = vmatpush.xpose.msra.mxu0 %v17511_v17  ;;  %v597_v13 = vpop.f32.mrf.mxu1  ;;  %17514 = vst [vmem:[#allocation20_spill] sm:$0xff] %v12853_v37 }
 0x133   :  { %1372 = vmatmul.f32.gmra.mxu3 %v17504_v30  ;;  %1316 = vmatmul.f32.gmra.mxu2 %v12330_v18  ;;  %v598_v43 = vadd.f32 %v597_v13, %v549_v16  ;;  %v17516_v18 = vand.u32 4294901760, %v12676_v44 }
 0x135   :  { %v12845_v57 = vmul.f32 0.25, %v598_v43 }
 0x136   :  { %1470 = vmatpush.xpose.msra.mxu1 %v12609_v48  ;;  %1405 = vmatpush.xpose.msra.mxu0 %v17512_v49  ;;  %v12856_v48 = vpop.f32.mrf.mxu3 }
 0x137   :  { %1518 = vrot.lane.b32.xlu1 %v12845_v57, %s11907_s11  ;;  %17515 = vst [vmem:[#allocation22_spill] sm:$0xff] %v12856_v48  ;;  %v1723_v34 = vsel %vm1720_vm0, %v12845_v57, 0 }
 0x138   :  { %v1755_v16 = vand.u32 4294901760, %v1723_v34 }
 0x139   :  { %1248 = vmatmul.f32.gmra.mxu1 %v12313_v46  ;;  %1139 = vmatmul.f32.gmra.mxu0 %v12395_v14  ;;  %v666_v14 = vpop.f32.mrf.mxu2 }
 0x13a   :  { %1472 = vmatpush.xpose.msra.mxu1 %v12617_v24  ;;  %1409 = vmatpush.xpose.msra.mxu0 %v17513_v36  ;;  %v17517_v24 = vand.u32 4294901760, %v12681_v52  ;;  %v17522_v52 = vand.u32 4294901760, %v12761_v54  ;;  %v1756_v36 = vsub.f32 %v1723_v34, %v1755_v16 }
 0x13b   :  { %1378 = vmatmul.f32.gmra.mxu3 %v17505_v42  ;;  %1321 = vmatmul.f32.gmra.mxu2 %v12372_v31  ;;  %v17519_v31 = vand.u32 4294901760, %v12721_v55 }
 0x13e   :  { %1474 = vmatpush.xpose.msra.mxu1 %v12625_v33  ;;  %1413 = vmatpush.xpose.msra.mxu0 %v17516_v18  ;;  %v791_v33 = vpop.f32.mrf.mxu3 }
 0x13f   :  { %1526 = vrot.lane.b32.xlu1 %v12845_v57, %s11908_s24 }
 0x141   :  { %1252 = vmatmul.f32.gmra.mxu1 %v12355_v50 }
 0x142   :  { %1476 = vmatpush.xpose.msra.mxu1 %v12639_v56  ;;  %1417 = vmatpush.xpose.msra.mxu0 %v17517_v24  ;;  %v674_v56 = vpop.f32.mrf.mxu2 }
 0x146   :  { %1478 = vmatpush.xpose.msra.mxu1 %v12652_v8  ;;  %1421 = vmatpush.xpose.msra.mxu0 %v17518_v63  ;;  %v795_v44 = vpop.f32.mrf.mxu3  ;;  %v17521_v8 = vand.u32 4294901760, %v12747_v26  ;;  %v1757_v63 = vand.u32 4294901760, %v1756_v36 }
 0x147   :  { %1532 = vrot.lane.b32.xlu1 %v12827_v27, %s11909_s25  ;;  %v796_v11 = vadd.f32 %v795_v44, %v674_v56 }
 0x14a   :  { %1480 = vmatpush.xpose.msra.mxu1 %v12667_v2  ;;  %1425 = vmatpush.xpose.msra.mxu0 %v17519_v31  ;;  %v12883_v2 = vpop.f32.mrf.mxu0  ;;  %v12888_v30 = vpop.f32.mrf.mxu2  ;;  %v1758_v31 = vsub.f32 %v1756_v36, %v1757_v63 }
 0x14b   :  { %17523 = vst [vmem:[#allocation21_spill] sm:$0xff] %v12888_v30 }
 0x14c   :  { %v1759_v56 = vand.u32 4294901760, %v1758_v31 }
 0x14e   :  { %1482 = vmatpush.xpose.msra.mxu1 %v12688_v62  ;;  %1429 = vmatpush.xpose.msra.mxu0 %v17520_v61  ;;  %v12890_v62 = vpop.f32.mrf.mxu1  ;;  %v12892_v12 = vpop.f32.mrf.mxu3 }
 0x14f   :  { %17524 = vst [vmem:[#allocation23_spill] sm:$0xff] %v12890_v62 }
 0x150   :  { %17525 = vst [vmem:[#allocation25_spill] sm:$0xff] %v12892_v12 }
 0x152   :  { %1484 = vmatpush.xpose.msra.mxu1 %v12713_v21  ;;  %1433 = vmatpush.xpose.msra.mxu0 %v17521_v8  ;;  %v17526_v21 = vand.u32 4294901760, %v12773_v60  ;;  %v12897_v42 = vpop.f32.mrf.mxu0  ;;  %v12904_v54 = vpop.f32.mrf.mxu2 }
 0x153   :  { %17527 = vst [vmem:[#allocation26_spill] sm:$0xff] %v12897_v42 }
 0x156   :  { %1486 = vmatpush.xpose.msra.mxu1 %v12730_v28  ;;  %1437 = vmatpush.xpose.msra.mxu0 %v17522_v52  ;;  %v12906_v55 = vpop.f32.mrf.mxu1  ;;  %v12908_v28 = vpop.f32.mrf.mxu3 }
 0x157   :  { %17528 = vst [vmem:[#allocation27_spill] sm:$0xff] %v12906_v55 }
 0x15a   :  { %1488 = vmatpush.xpose.msra.mxu1 %v12742_v3  ;;  %1441 = vmatpush.xpose.msra.mxu0 %v17526_v21  ;;  %v792_v3 = vadd.f32 %v791_v33, %v666_v14 }
 0x15e   :  { %1490 = vmatpush.xpose.msra.mxu1 %v12754_v32  ;;  %1445 = vmatpush.xpose.msra.mxu0 %v1235_v25  ;;  %v857_v45 = vpop.f32.mrf.mxu0 }
 0x15f   :  { %v858_v32 = vadd.f32 %v857_v45, %v792_v3 }
 0x161   :  { %1447 = vmatmul.f32.vlgmr.msra.gmra.mxu0 %v12231_v38 }
 0x162   :  { %1492 = vmatpush.xpose.msra.mxu1 %v12768_v35 }
 0x166   :  { %1494 = vmatpush.xpose.msra.mxu1 %v12780_v47  ;;  %v911_v25 = vpop.f32.mrf.mxu1  ;;  %v998_v60 = vpop.f32.mrf.mxu2  ;;  %v12921_v47 = vand.u32 4294901760, %v1721_v9 }
 0x167   :  { %v1047_v26 = vpop.f32.mrf.mxu3  ;;  %v912_v35 = vadd.f32 %v911_v25, %v858_v32  ;;  %v862_v58 = vpop.f32.mrf.mxu0 }
 0x168   :  { %v1748_v40 = vsub.f32 %v1721_v9, %v12921_v47 }
 0x169   :  { %1496 = vmatmul.f32.vlgmr.msra.gmra.mxu1 %v12231_v38  ;;  %1451 = vmatmul.f32.gmra.mxu0 %v12272_v39  ;;  %v999_v59 = vadd.f32 %v998_v60, %v912_v35  ;;  %v863_v38 = vadd.f32 %v862_v58, %v796_v11 }
 0x16a   :  { %v1749_v1 = vand.u32 4294901760, %v1748_v40 }
 0x16b   :  { %v12915_v41 = vadd.f32 %v1047_v26, %v999_v59 }
 0x16c   :  { %v1750_v13 = vsub.f32 %v1748_v40, %v1749_v1 }
 0x16d   :  { %1600 = vrot.lane.b32.xlu1 %v12915_v41, %s11910_s26  ;;  %v1725_v4 = vsel %vm1720_vm0, %v12915_v41, 0 }
 0x16e   :  { %v917_v29 = vpop.f32.mrf.mxu1  ;;  %v1002_v7 = vpop.f32.mrf.mxu2  ;;  %v1751_v24 = vand.u32 4294901760, %v1750_v13 }
 0x16f   :  { %v918_v22 = vadd.f32 %v917_v29, %v863_v38  ;;  %v1051_v53 = vpop.f32.mrf.mxu3  ;;  %v12973_v61 = vpop.f32.mrf.mxu0 }
 0x170   :  { %17529 = vst [vmem:[#allocation28_spill] sm:$0xff] %v12973_v61 }
 0x171   :  { %1500 = vmatmul.f32.gmra.mxu1 %v12272_v39  ;;  %1455 = vmatmul.f32.gmra.mxu0 %v12313_v46  ;;  %v1003_v15 = vadd.f32 %v1002_v7, %v918_v22  ;;  %v1745_v39 = vand.u32 4294901760, %v1725_v4 }
 0x173   :  { %v12926_v51 = vadd.f32 %v1051_v53, %v1003_v15  ;;  %v1785_v17 = vsub.f32 %v1725_v4, %v1745_v39 }
 0x175   :  { %1586 = vrot.lane.b32.xlu2 %v12926_v51, %s11908_s24  ;;  %1578 = vrot.lane.b32.xlu0 %v12926_v51, %s11907_s11  ;;  %v1727_v20 = vsel %vm1720_vm0, %v12926_v51, 0  ;;  %v1786_v43 = vand.u32 4294901760, %v1785_v17 }
 0x176   :  { %1610 = vrot.lane.b32.xlu1 %v12926_v51, %s11911_s9  ;;  %v1743_v0 = vand.u32 4294901760, %v1727_v20  ;;  %v12976_v44 = vpop.f32.mrf.mxu1  ;;  %v12992_v3 = vpop.f32.mrf.mxu2 }
 0x177   :  { %v1787_v33 = vsub.f32 %v1785_v17, %v1786_v43  ;;  %17530 = vst [vmem:[#allocation29_spill] sm:$0xff] %v12976_v44  ;;  %v12982_v8 = vpop.f32.mrf.mxu0  ;;  %v12994_v26 = vpop.f32.mrf.mxu3 }
 0x178   :  { %1744 = vmatpush.xpose.msra.mxu2 %v1743_v0  ;;  %17531 = vst [vmem:[#allocation30_spill] sm:$0xff] %v12992_v3 }
 0x179   :  { %1504 = vmatmul.f32.gmra.mxu1 %v12313_v46  ;;  %1459 = vmatmul.f32.gmra.mxu0 %v12355_v50  ;;  %v1779_v46 = vsub.f32 %v1727_v20, %v1743_v0  ;;  %17532 = vst [vmem:[#allocation31_spill] sm:$0xff] %v12994_v26 }
 0x17b   :  { %v1780_v49 = vand.u32 4294901760, %v1779_v46 }
 0x17c   :  { %1746 = vmatpush.xpose.msra.mxu2 %v1745_v39 }
 0x17d   :  { %v1781_v18 = vsub.f32 %v1779_v46, %v1780_v49  ;;  %1584 = vrot.lane.b32.xlu2 %v12915_v41, %s11908_s24  ;;  %1576 = vrot.lane.b32.xlu0 %v12915_v41, %s11907_s11 }
 0x17e   :  { %1550 = vrot.lane.b32.xlu1 %v12845_v57, %s11911_s9  ;;  %v12984_v52 = vpop.f32.mrf.mxu1  ;;  %v12998_v60 = vpop.f32.mrf.mxu2 }
 0x17f   :  { %v1782_v14 = vand.u32 4294901760, %v1781_v18  ;;  %1752 = vmatmul.f32.vlgmr.msra.gmra.mxu2 %v1751_v24 }
 0x180   :  { %1815 = vmatpush.xpose.msrb.mxu2 %v1779_v46 }
 0x181   :  { %1508 = vmatmul.f32.gmra.mxu1 %v12355_v50  ;;  %1783 = vmatpush.xpose.msra.mxu3 %v1782_v14  ;;  %v1788_v50 = vand.u32 4294901760, %v1787_v33 }
 0x184   :  { %1818 = vmatpush.xpose.msrb.mxu2 %v1785_v17 }
 0x185   :  { %1789 = vmatpush.xpose.msra.mxu3 %v1788_v50  ;;  %1594 = vrot.lane.b32.xlu2 %v12926_v51, %s11909_s25 }
 0x186   :  { %1524 = vrot.lane.b32.xlu0 %v12827_v27, %s11908_s24  ;;  %1556 = vrot.lane.b32.xlu1 %v12827_v27, %s11912_s27 }
 0x187   :  { %1760 = vmatmul.f32.gmra.mxu2 %v1759_v56 }
 0x188   :  { %1878 = vmatpush.xpose.msra.mxu2 %v1780_v49  ;;  %1791 = vmatmul.f32.vlgmr.msra.gmra.mxu3 %v12921_v47 }
 0x189   :  { %1845 = vmatpush.xpose.msrb.mxu3 %v1743_v0 }
 0x18c   :  { %1882 = vmatpush.xpose.msra.mxu2 %v1786_v43 }
 0x18d   :  { %1847 = vmatpush.xpose.msrb.mxu3 %v1745_v39  ;;  %1534 = vrot.lane.b32.xlu2 %v12845_v57, %s11909_s25 }
 0x18e   :  { %1592 = vrot.lane.b32.xlu0 %v12915_v41, %s11909_s25  ;;  %1624 = vrot.lane.b32.xlu1 %v12915_v41, %s11906_s23 }
 0x18f   :  { %1821 = vmatmul.f32.vlgmr.msrb.gmra.mxu2 %v1748_v40 }
 0x190   :  { %1795 = vmatmul.f32.gmra.mxu3 %v1755_v16 }
 0x191   :  { %1907 = vmatpush.xpose.msra.mxu3 %v1743_v0 }
 0x195   :  { %1909 = vmatpush.xpose.msra.mxu3 %v1745_v39  ;;  %1540 = vrot.lane.b32.xlu2 %v12827_v27, %s11910_s26 }
 0x196   :  { %1602 = vrot.lane.b32.xlu0 %v12926_v51, %s11910_s26 }
 0x197   :  { %1826 = vmatmul.f32.gmra.mxu2 %v1756_v36 }
 0x198   :  { %1851 = vmatmul.f32.vlgmr.msrb.gmra.mxu3 %v1749_v1 }
 0x19d   :  { %1608 = vrot.lane.b32.xlu2 %v12915_v41, %s11911_s9 }
 0x19e   :  { %1542 = vrot.lane.b32.xlu0 %v12845_v57, %s11910_s26  ;;  %v1116_v21 = vpop.f32.mrf.mxu0 }
 0x19f   :  { %1884 = vmatmul.f32.vlgmr.msra.gmra.mxu2 %v12921_v47 }
 0x1a0   :  { %1857 = vmatmul.f32.gmra.mxu3 %v1757_v63 }
 0x1a1   :  { %v1517_v34 = vpop.permute.xlu1 %1516 }
 0x1a2   :  { %v1919_v36 = vsel %vm1720_vm0, %v1517_v34, 0 }
 0x1a3   :  { %v13038_v31 = vand.u32 4294901760, %v1919_v36 }
 0x1a5   :  { %1558 = vrot.lane.b32.xlu2 %v12845_v57, %s11912_s27 }
 0x1a6   :  { %1548 = vrot.lane.b32.xlu0 %v12827_v27, %s11911_s9  ;;  %v1241_v45 = vpop.f32.mrf.mxu1  ;;  %v1124_v32 = vpop.f32.mrf.mxu0 }
 0x1a7   :  { %1888 = vmatmul.f32.gmra.mxu2 %v1755_v16  ;;  %v1242_v29 = vadd.f32 %v1241_v45, %v1116_v21 }
 0x1a8   :  { %1911 = vmatmul.f32.vlgmr.msra.gmra.mxu3 %v12921_v47 }
 0x1a9   :  { %v1519_v56 = vpop.permute.xlu1 %1518 }
 0x1ad   :  { %1618 = vrot.lane.b32.xlu2 %v12926_v51, %s11912_s27 }
 0x1ae   :  { %1616 = vrot.lane.b32.xlu0 %v12915_v41, %s11912_s27  ;;  %v1245_v25 = vpop.f32.mrf.mxu1  ;;  %v12996_v35 = vpop.f32.mrf.mxu0 }
 0x1af   :  { %17533 = vst [vmem:[#allocation32_spill] sm:$0xff] %v12996_v35  ;;  %v1307_v41 = vpop.f32.mrf.mxu2  ;;  %v1246_v40 = vadd.f32 %v1245_v25, %v1124_v32  ;;  %v13046_v32 = vsub.f32 %v1919_v36, %v13038_v31 }
 0x1b0   :  { %1915 = vmatmul.f32.gmra.mxu3 %v1755_v16  ;;  %v1308_v39 = vadd.f32 %v1307_v41, %v1242_v29  ;;  %v1921_v29 = vsel %vm1720_vm0, %v1519_v56, 0 }
 0x1b1   :  { %v1527_v34 = vpop.permute.xlu1 %1526  ;;  %v17542_v26 = vand.u32 4294901760, %v13046_v32 }
 0x1b5   :  { %1564 = vrot.lane.b32.xlu2 %v12827_v27, %s11906_s23  ;;  %v13002_v27 = vpop.f32.mrf.mxu3 }
 0x1b6   :  { %1626 = vrot.lane.b32.xlu0 %v12926_v51, %s11906_s23  ;;  %v13000_v59 = vpop.f32.mrf.mxu1 }
 0x1b7   :  { %17534 = vst [vmem:[#allocation33_spill] sm:$0xff] %v13000_v59  ;;  %v1312_v1 = vpop.f32.mrf.mxu2 }
 0x1b8   :  { %v1313_v17 = vadd.f32 %v1312_v1, %v1246_v40 }
 0x1bd   :  { %v1361_v22 = vpop.f32.mrf.mxu3 }
 0x1be   :  { %1566 = vrot.lane.b32.xlu0 %v12845_v57, %s11906_s23  ;;  %v13007_v57 = vpop.f32.mrf.mxu0  ;;  %v13014_v7 = vpop.f32.mrf.mxu1  ;;  %v1362_v16 = vadd.f32 %v1361_v22, %v1308_v39 }
 0x1bf   :  { %17535 = vst [vmem:[#allocation34_spill] sm:$0xff] %v13007_v57  ;;  %v13057_v39 = vpop.f32.mrf.mxu2 }
 0x1c0   :  { %17536 = vst [vmem:[#allocation35_spill] sm:$0xff] %v13014_v7 }
 0x1c1   :  { %17537 = vst [vmem:[#allocation36_spill] sm:$0xff] %v13057_v39 }
 0x1c5   :  { %v1367_v49 = vpop.f32.mrf.mxu3 }
 0x1c6   :  { %v1368_v24 = vadd.f32 %v1367_v49, %v1313_v17 }
 0x1cd   :  { %v13073_v56 = vpop.f32.mrf.mxu3 }
 0x1ce   :  { %17538 = vst [vmem:[#allocation37_spill] sm:$0xff] %v13073_v56 }
 0x1cf   :  { %v1587_v58 = vpop.permute.xlu2 %1586 }
 0x1d0   :  { %v2123_v9 = vsel %vm1720_vm0, %v1587_v58, 0 }
 0x1d1   :  { %v13005_v11 = vand.u32 4294901760, %v2123_v9 }
 0x1d3   :  { %v13010_v38 = vsub.f32 %v2123_v9, %v13005_v11  ;;  %2303 = vmatpush.xpose.msrb.mxu1 %v13005_v11 }
 0x1d5   :  { %v2176_v47 = vand.u32 4294901760, %v13010_v38 }
 0x1d7   :  { %2274 = vmatpush.xpose.msrb.mxu0 %v2176_v47  ;;  %v1585_v4 = vpop.permute.xlu2 %1584 }
 0x1d8   :  { %v2121_v53 = vsel %vm1720_vm0, %v1585_v4, 0  ;;  %v17368_v4 = vand.u32 4294901760, %v13046_v32 }
 0x1d9   :  { %v13019_v15 = vand.u32 4294901760, %v2121_v53 }
 0x1db   :  { %v13022_v20 = vsub.f32 %v2121_v53, %v13019_v15  ;;  %2305 = vmatpush.xpose.msrb.mxu1 %v13019_v15  ;;  %v13055_v53 = vand.u32 4294901760, %v1921_v29 }
 0x1dd   :  { %v17369_v0 = vand.u32 4294901760, %v13022_v20  ;;  %v17541_v7 = vand.u32 4294901760, %v13022_v20 }
 0x1de   :  { %v1448_v51 = vpop.f32.mrf.mxu0 }
 0x1df   :  { %2278 = vmatpush.xpose.msrb.mxu0 %v17369_v0  ;;  %v1595_v46 = vpop.permute.xlu2 %1594  ;;  %v1449_v14 = vadd.f32 %v1448_v51, %v1362_v16  ;;  %v1948_v16 = vsub.f32 %v13046_v32, %v17368_v4 }
 0x1e0   :  { %v2321_v13 = vsel %vm1720_vm0, %v1595_v46, 0 }
 0x1e1   :  { %v13030_v18 = vand.u32 4294901760, %v2321_v13 }
 0x1e3   :  { %v13033_v63 = vsub.f32 %v2321_v13, %v13030_v18  ;;  %2439 = vmatpush.xpose.msra.mxu1 %v13030_v18  ;;  %v13068_v13 = vsub.f32 %v1921_v29, %v13055_v53  ;;  %v1533_v29 = vpop.permute.xlu1 %1532 }
 0x1e5   :  { %2409 = vmatpush.xpose.msra.mxu0 %v13033_v63 }
 0x1e6   :  { %v1497_v43 = vpop.f32.mrf.mxu1  ;;  %v1452_v33 = vpop.f32.mrf.mxu0 }
 0x1e7   :  { %v13036_v50 = vadd.f32 %v1497_v43, %v1449_v14  ;;  %v1453_v21 = vadd.f32 %v1452_v33, %v1368_v24  ;;  %v1579_v45 = vpop.permute.xlu0 %1578  ;;  %v13059_v51 = vpop.permute.xlu2 %1534  ;;  %v1949_v24 = vand.u32 4294901760, %v1948_v16  ;;  %v17367_v33 = vand.u32 4294901760, %v13068_v13 }
 0x1e8   :  { %v1925_v25 = vsel %vm1720_vm0, %v1579_v45, 0  ;;  %v2317_v4 = vsel %vm1720_vm0, %v13059_v51, 0 }
 0x1e9   :  { %1636 = vrot.lane.b32.xlu1 %v13036_v50, %s11907_s11  ;;  %1648 = vrot.lane.b32.xlu0 %v13036_v50, %s11908_s24  ;;  %v1941_v9 = vand.u32 4294901760, %v1925_v25  ;;  %v13137_v59 = vand.u32 4294901760, %v2317_v4 }
 0x1eb   :  { %v1977_v22 = vsub.f32 %v1925_v25, %v1941_v9  ;;  %1942 = vmatpush.xpose.msrb.mxu2 %v1941_v9  ;;  %v13162_v57 = vsub.f32 %v2317_v4, %v13137_v59 }
 0x1ed   :  { %v1978_v40 = vand.u32 4294901760, %v1977_v22 }
 0x1ee   :  { %v1501_v58 = vpop.f32.mrf.mxu1 }
 0x1ef   :  { %v13049_v41 = vadd.f32 %v1501_v58, %v1453_v21  ;;  %v1979_v1 = vsub.f32 %v1977_v22, %v1978_v40  ;;  %v1577_v17 = vpop.permute.xlu0 %1576  ;;  %v13075_v21 = vpop.f32.mrf.mxu2 }
 0x1f0   :  { %v1923_v46 = vsel %vm1720_vm0, %v1577_v17, 0  ;;  %17539 = vst [vmem:[#allocation38_spill] sm:$0xff] %v13075_v21  ;;  %v1541_v25 = vpop.permute.xlu2 %1540 }
 0x1f1   :  { %1650 = vrot.lane.b32.xlu2 %v13049_v41, %s11908_s24  ;;  %1638 = vrot.lane.b32.xlu0 %v13049_v41, %s11907_s11  ;;  %v1943_v49 = vand.u32 4294901760, %v1923_v46  ;;  %v1980_v43 = vand.u32 4294901760, %v1979_v1 }
 0x1f3   :  { %v1983_v36 = vsub.f32 %v1923_v46, %v1943_v49  ;;  %1944 = vmatpush.xpose.msrb.mxu2 %v1943_v49  ;;  %1981 = vmatpush.xpose.msrb.mxu3 %v1980_v43  ;;  %v13089_v43 = vsel %vm1720_vm0, %v1527_v34, 0 }
 0x1f5   :  { %v1984_v14 = vand.u32 4294901760, %v1983_v36 }
 0x1f6   :  { %1950 = vmatmul.f32.vlgmr.msrb.gmra.mxu2 %v1949_v24  ;;  %v13093_v24 = vpop.f32.mrf.mxu3 }
 0x1f7   :  { %2013 = vmatpush.xpose.msra.mxu2 %v1977_v22  ;;  %v1985_v45 = vsub.f32 %v1983_v36, %v1984_v14  ;;  %v1956_v22 = vsub.f32 %v13068_v13, %v17367_v33  ;;  %17540 = vst [vmem:[#allocation39_spill] sm:$0xff] %v13093_v24  ;;  %v2513_v33 = vsel %vm1720_vm0, %v1541_v25, 0 }
 0x1f8   :  { %v1525_v58 = vpop.permute.xlu0 %1524  ;;  %v13130_v0 = vand.u32 4294901760, %v2513_v33 }
 0x1f9   :  { %1662 = vrot.lane.b32.xlu2 %v13049_v41, %s11909_s25  ;;  %v13078_v1 = vsel %vm1720_vm0, %v1525_v58, 0  ;;  %v1986_v16 = vand.u32 4294901760, %v1985_v45  ;;  %v1957_v46 = vand.u32 4294901760, %v1956_v22  ;;  %v1601_v45 = vpop.permute.xlu1 %1600  ;;  %v13099_v22 = vpop.permute.xlu2 %1608 }
 0x1fa   :  { %v13084_v17 = vand.u32 4294901760, %v13078_v1 }
 0x1fb   :  { %2016 = vmatpush.xpose.msra.mxu2 %v1983_v36  ;;  %1987 = vmatpush.xpose.msrb.mxu3 %v1986_v16  ;;  %v13097_v16 = vand.u32 4294901760, %v13089_v43 }
 0x1fc   :  { %2280 = vmatmul.f32.vlgmr.msrb.gmra.mxu0 %v13084_v17  ;;  %2307 = vmatmul.f32.vlgmr.msrb.gmra.mxu1 %v13084_v17 }
 0x1fe   :  { %1958 = vmatmul.f32.gmra.mxu2 %v1957_v46  ;;  %1989 = vmatmul.f32.vlgmr.msrb.gmra.mxu3 %v13038_v31 }
 0x1ff   :  { %2076 = vmatpush.xpose.msrb.mxu2 %v1978_v40  ;;  %2043 = vmatpush.xpose.msra.mxu3 %v1941_v9  ;;  %v2315_v40 = vsel %vm1720_vm0, %v1533_v29, 0 }
 0x200   :  { %v1593_v36 = vpop.permute.xlu0 %1592  ;;  %v13105_v46 = vand.u32 4294901760, %v2315_v40 }
 0x201   :  { %v2319_v58 = vsel %vm1720_vm0, %v1593_v36, 0  ;;  %v2517_v36 = vsel %vm1720_vm0, %v1601_v45, 0  ;;  %v1611_v44 = vpop.permute.xlu1 %1610 }
 0x202   :  { %v13103_v34 = vpop.f32.mrf.mxu2  ;;  %v2717_v30 = vsel %vm1720_vm0, %v1611_v44, 0  ;;  %v2715_v44 = vsel %vm1720_vm0, %v13099_v22, 0 }
 0x203   :  { %2080 = vmatpush.xpose.msrb.mxu2 %v1984_v14  ;;  %2045 = vmatpush.xpose.msra.mxu3 %v1943_v49  ;;  %v13101_v14 = vand.u32 4294901760, %v2319_v58  ;;  %v13188_v55 = vand.u32 4294901760, %v2717_v30  ;;  %v13207_v42 = vand.u32 4294901760, %v2715_v44 }
 0x204   :  { %2284 = vmatmul.f32.gmra.mxu0 %v13097_v16  ;;  %2311 = vmatmul.f32.gmra.mxu1 %v13097_v16 }
 0x205   :  { %v13108_v29 = vsub.f32 %v2319_v58, %v13101_v14  ;;  %2441 = vmatpush.xpose.msra.mxu1 %v13101_v14  ;;  %v13121_v58 = vand.u32 4294901760, %v2517_v36 }
 0x206   :  { %1993 = vmatmul.f32.gmra.mxu3 %v13055_v53  ;;  %2019 = vmatmul.f32.vlgmr.msra.gmra.mxu2 %v13046_v32 }
 0x207   :  { %2105 = vmatpush.xpose.msrb.mxu3 %v1941_v9  ;;  %2412 = vmatpush.xpose.msra.mxu0 %v13108_v29  ;;  %v13116_v9 = vsub.f32 %v2315_v40, %v13105_v46  ;;  %v2177_v40 = vsub.f32 %v13010_v38, %v2176_v47  ;;  %v13142_v35 = vsub.f32 %v2517_v36, %v13121_v58  ;;  %v2380_v62 = vand.u32 4294901760, %v13108_v29 }
 0x208   :  { %2140 = vmatpush.xpose.msra.mxu2 %v13005_v11  ;;  %v1603_v45 = vpop.permute.xlu0 %1602  ;;  %v13155_v47 = vsub.f32 %v2513_v33, %v13130_v0 }
 0x209   :  { %v17370_v39 = vand.u32 4294901760, %v13116_v9  ;;  %v2178_v21 = vand.u32 4294901760, %v2177_v40  ;;  %v2578_v3 = vand.u32 4294901760, %v13142_v35 }
 0x20a   :  { %v13139_v51 = vpop.f32.mrf.mxu2 }
 0x20b   :  { %2107 = vmatpush.xpose.msrb.mxu3 %v1943_v49  ;;  %v2519_v49 = vsel %vm1720_vm0, %v1603_v45, 0  ;;  %v13134_v56 = vpop.f32.mrf.mxu3  ;;  %v13144_v45 = vpop.permute.xlu2 %1558 }
 0x20c   :  { %v13132_v25 = vand.u32 4294901760, %v2519_v49  ;;  %2142 = vmatpush.xpose.msra.mxu2 %v13019_v15  ;;  %2415 = vmatmul.f32.vlgmr.msra.gmra.mxu0 %v13116_v9 }
 0x20d   :  { %2445 = vmatmul.f32.vlgmr.msra.gmra.mxu1 %v17370_v39 }
 0x20e   :  { %v13147_v24 = vsub.f32 %v2519_v49, %v13132_v25  ;;  %2536 = vmatpush.xpose.msrb.mxu0 %v13132_v25  ;;  %v2183_v49 = vsub.f32 %v13022_v20, %v17541_v7  ;;  %2024 = vmatmul.f32.gmra.mxu2 %v13068_v13  ;;  %v17372_v7 = vand.u32 4294901760, %v13155_v47 }
 0x20f   :  { %2049 = vmatmul.f32.vlgmr.msra.gmra.mxu3 %v17542_v26 }
 0x210   :  { %v2572_v36 = vand.u32 4294901760, %v13147_v24  ;;  %2179 = vmatpush.xpose.msra.mxu3 %v2178_v21  ;;  %v1543_v33 = vpop.permute.xlu0 %1542  ;;  %v2184_v61 = vand.u32 4294901760, %v2183_v49  ;;  %v17371_v21 = vand.u32 4294901760, %v13162_v57 }
 0x211   :  { %v2515_v40 = vsel %vm1720_vm0, %v1543_v33, 0  ;;  %v2579_v33 = vsub.f32 %v13142_v35, %v2578_v3 }
 0x212   :  { %v2573_v39 = vsub.f32 %v13147_v24, %v2572_v36  ;;  %2538 = vmatpush.xpose.msrb.mxu0 %v13121_v58  ;;  %v13172_v4 = vand.u32 4294901760, %v2515_v40  ;;  %v1822_v26 = vpop.f32.mrf.mxu2 }
 0x213   :  { %v13174_v32 = vpop.f32.mrf.mxu3 }
 0x214   :  { %v2574_v12 = vand.u32 4294901760, %v2573_v39  ;;  %2185 = vmatpush.xpose.msra.mxu3 %v2184_v61  ;;  %2420 = vmatmul.f32.gmra.mxu0 %v13162_v57  ;;  %v1619_v39 = vpop.permute.xlu2 %1618  ;;  %v13186_v49 = vsub.f32 %v2515_v40, %v13172_v4  ;;  %v17543_v61 = vand.u32 4294901760, %v13068_v13  ;;  %v13200_v40 = vsub.f32 %v13078_v1, %v13084_v17 }
 0x215   :  { %2451 = vmatmul.f32.gmra.mxu1 %v17371_v21 }
 0x216   :  { %2670 = vmatpush.xpose.msra.mxu0 %v2572_v36  ;;  %v2542_v36 = vsub.f32 %v13155_v47, %v17372_v7  ;;  %2575 = vmatpush.xpose.msrb.mxu1 %v2574_v12  ;;  %v2580_v7 = vand.u32 4294901760, %v2579_v33  ;;  %v2915_v12 = vsel %vm1720_vm0, %v1619_v39, 0  ;;  %v17373_v13 = vand.u32 4294901760, %v13186_v49 }
 0x217   :  { %2055 = vmatmul.f32.gmra.mxu3 %v17543_v61  ;;  %2082 = vmatmul.f32.vlgmr.msrb.gmra.mxu2 %v13038_v31  ;;  %v13205_v61 = vsub.f32 %v2717_v30, %v13188_v55  ;;  %v13210_v33 = vand.u32 4294901760, %v2915_v12  ;;  %v17374_v1 = vand.u32 4294901760, %v13200_v40  ;;  %v13231_v39 = vsub.f32 %v13089_v43, %v13097_v16 }
 0x218   :  { %2211 = vmatpush.xpose.msrb.mxu2 %v13010_v38  ;;  %v13196_v21 = vpop.permute.xlu0 %1548  ;;  %v2550_v30 = vsub.f32 %v13186_v49, %v17373_v13  ;;  %v1793_v43 = vadd.f32 %v13134_v56, %v13103_v34 }
 0x21a   :  { %2674 = vmatpush.xpose.msra.mxu0 %v2578_v3  ;;  %v2543_v3 = vand.u32 4294901760, %v2542_v36  ;;  %2581 = vmatpush.xpose.msrb.mxu1 %v2580_v7  ;;  %v1827_v38 = vpop.f32.mrf.mxu2  ;;  %v13220_v7 = vsub.f32 %v2715_v44, %v13207_v42  ;;  %v2146_v44 = vsub.f32 %v13200_v40, %v17374_v1  ;;  %v2551_v13 = vand.u32 4294901760, %v2550_v30 }
 0x21b   :  { %v1852_v22 = vpop.f32.mrf.mxu3  ;;  %v2153_v30 = vand.u32 4294901760, %v13231_v39 }
 0x21c   :  { %2214 = vmatpush.xpose.msrb.mxu2 %v13022_v20  ;;  %2544 = vmatmul.f32.vlgmr.msrb.gmra.mxu0 %v2543_v3  ;;  %v13225_v20 = vsub.f32 %v2915_v12, %v13210_v33 }
 0x21d   :  { %2583 = vmatmul.f32.vlgmr.msrb.gmra.mxu1 %v13130_v0 }
 0x21e   :  { %2699 = vmatpush.xpose.msra.mxu1 %v13132_v25  ;;  %2805 = vmatpush.xpose.msrb.mxu0 %v13205_v61  ;;  %v17544_v56 = vand.u32 4294901760, %v13225_v20 }
 0x21f   :  { %2086 = vmatmul.f32.gmra.mxu2 %v13055_v53  ;;  %2109 = vmatmul.f32.vlgmr.msrb.gmra.mxu3 %v13038_v31  ;;  %v2374_v31 = vand.u32 4294901760, %v13033_v63 }
 0x220   :  { %v1617_v36 = vpop.permute.xlu0 %1616  ;;  %2241 = vmatpush.xpose.msrb.mxu3 %v13005_v11  ;;  %v2147_v11 = vand.u32 4294901760, %v2146_v44  ;;  %v2969_v34 = vsub.f32 %v13225_v20, %v17544_v56  ;;  %v1551_v44 = vpop.permute.xlu1 %1550 }
 0x221   :  { %v2913_v3 = vsel %vm1720_vm0, %v1617_v36, 0  ;;  %v1823_v36 = vadd.f32 %v1822_v26, %v1793_v43  ;;  %v2375_v43 = vsub.f32 %v13033_v63, %v2374_v31 }
 0x222   :  { %2701 = vmatpush.xpose.msra.mxu1 %v13121_v58  ;;  %2808 = vmatpush.xpose.msrb.mxu0 %v13220_v7  ;;  %v13239_v12 = vand.u32 4294901760, %v2913_v3  ;;  %v1885_v1 = vpop.f32.mrf.mxu2 }
 0x223   :  { %v1858_v48 = vpop.f32.mrf.mxu3 }
 0x224   :  { %v13245_v37 = vsub.f32 %v2913_v3, %v13239_v12  ;;  %2552 = vmatmul.f32.gmra.mxu0 %v2551_v13  ;;  %2243 = vmatpush.xpose.msrb.mxu3 %v13019_v15  ;;  %v1853_v3 = vadd.f32 %v1852_v22, %v1823_v36  ;;  %v2154_v15 = vsub.f32 %v13231_v39, %v2153_v30 }
 0x225   :  { %2587 = vmatmul.f32.gmra.mxu1 %v13172_v4  ;;  %v1797_v22 = vadd.f32 %v13174_v32, %v13139_v51 }
 0x226   :  { %2835 = vmatpush.xpose.msrb.mxu1 %v13188_v55  ;;  %v2974_v13 = vand.u32 4294901760, %v13245_v37  ;;  %v1886_v26 = vadd.f32 %v1885_v1, %v1853_v3  ;;  %v2155_v63 = vand.u32 4294901760, %v2154_v15  ;;  %v2376_v3 = vand.u32 4294901760, %v2375_v43 }
 0x227   :  { %2148 = vmatmul.f32.vlgmr.msra.gmra.mxu2 %v2147_v11  ;;  %2113 = vmatmul.f32.gmra.mxu3 %v13055_v53  ;;  %v2970_v53 = vand.u32 4294901760, %v2969_v34  ;;  %v1828_v1 = vadd.f32 %v1827_v38, %v1797_v22  ;;  %v2381_v34 = vsub.f32 %v13108_v29, %v2380_v62 }
 0x228   :  { %2338 = vmatpush.xpose.msra.mxu2 %v13030_v18  ;;  %v2975_v56 = vsub.f32 %v13245_v37, %v2974_v13  ;;  %v1557_v43 = vpop.permute.xlu1 %1556 }
 0x22a   :  { %2837 = vmatpush.xpose.msrb.mxu1 %v13207_v42  ;;  %v1889_v32 = vpop.f32.mrf.mxu2 }
 0x22b   :  { %v1912_v11 = vpop.f32.mrf.mxu3 }
 0x22c   :  { %v13265_v36 = vadd.f32 %v1912_v11, %v1886_v26  ;;  %2340 = vmatpush.xpose.msra.mxu2 %v13101_v14  ;;  %2676 = vmatmul.f32.vlgmr.msra.gmra.mxu0 %v13130_v0  ;;  %v2711_v26 = vsel %vm1720_vm0, %v13196_v21, 0  ;;  %v1859_v11 = vadd.f32 %v1858_v48, %v1828_v1  ;;  %v2713_v21 = vsel %vm1720_vm0, %v1551_v44, 0 }
 0x22d   :  { %2703 = vmatmul.f32.vlgmr.msra.gmra.mxu1 %v13130_v0  ;;  %2932 = vmatpush.xpose.msra.mxu0 %v13210_v33  ;;  %v2976_v0 = vand.u32 4294901760, %v2975_v56  ;;  %v13281_v15 = vand.u32 4294901760, %v2711_v26  ;;  %v13298_v1 = vand.u32 4294901760, %v2713_v21 }
 0x22e   :  { %2971 = vmatpush.xpose.msra.mxu1 %v2970_v53  ;;  %v3305_v51 = vsel %vm1720_vm0, %v13265_v36, -inf  ;;  %v1890_v38 = vadd.f32 %v1889_v32, %v1859_v11  ;;  %v2382_v53 = vand.u32 4294901760, %v2381_v34  ;;  %v17547_v32 = vand.u32 4294901760, %v13116_v9  ;;  %v1627_v34 = vpop.permute.xlu0 %1626 }
 0x22f   :  { %2156 = vmatmul.f32.gmra.mxu2 %v2155_v63  ;;  %3306 = vmax.xlane.f32.xlu1 %v3305_v51  ;;  %v13291_v29 = vsub.f32 %v2711_v26, %v13281_v15  ;;  %v17545_v51 = vand.u32 4294901760, %v13225_v20 }
 0x230   :  { %2187 = vmatmul.f32.vlgmr.msra.gmra.mxu3 %v13084_v17  ;;  %v2909_v17 = vsel %vm1720_vm0, %v1557_v43, 0 }
 0x231   :  { %2377 = vmatpush.xpose.msra.mxu3 %v2376_v3  ;;  %2934 = vmatpush.xpose.msra.mxu0 %v13239_v12  ;;  %v13296_v56 = vand.u32 4294901760, %v2909_v17  ;;  %v2344_v3 = vsub.f32 %v13116_v9, %v17547_v32  ;;  %v1625_v9 = vpop.permute.xlu1 %1624 }
 0x232   :  { %2977 = vmatpush.xpose.msra.mxu1 %v2976_v0 }
 0x233   :  { %v1916_v22 = vpop.f32.mrf.mxu3  ;;  %v13307_v44 = vsub.f32 %v2909_v17, %v13296_v56  ;;  %v2345_v0 = vand.u32 4294901760, %v2344_v3 }
 0x234   :  { %v13283_v63 = vadd.f32 %v1916_v22, %v1890_v38  ;;  %2680 = vmatmul.f32.gmra.mxu0 %v13172_v4  ;;  %v3111_v22 = vsel %vm1720_vm0, %v1625_v9, 0 }
 0x235   :  { %2383 = vmatpush.xpose.msra.mxu3 %v2382_v53  ;;  %2707 = vmatmul.f32.gmra.mxu1 %v13172_v4  ;;  %v2739_v4 = vand.u32 4294901760, %v13291_v29  ;;  %v2937_v26 = vand.u32 4294901760, %v13307_v44  ;;  %v13350_v17 = vand.u32 4294901760, %v3111_v22 }
 0x236   :  { %v3308_v48 = vsel %vm1720_vm0, %v13283_v63, -inf }
 0x237   :  { %2217 = vmatmul.f32.vlgmr.msrb.gmra.mxu2 %v13200_v40  ;;  %3309 = vmax.xlane.f32.xlu2 %v3308_v48 }
 0x238   :  { %2191 = vmatmul.f32.gmra.mxu3 %v13097_v16  ;;  %2472 = vmatpush.xpose.msrb.mxu2 %v2374_v31  ;;  %v13311_v16 = vsub.f32 %v2713_v21, %v13298_v1  ;;  %v2911_v31 = vsel %vm1720_vm0, %v13144_v45, 0 }
 0x239   :  { %v13325_v11 = vand.u32 4294901760, %v2911_v31 }
 0x23a   :  { %v2747_v45 = vand.u32 4294901760, %v13311_v16 }
 0x23c   :  { %2476 = vmatpush.xpose.msrb.mxu2 %v2380_v62  ;;  %2811 = vmatmul.f32.vlgmr.msrb.gmra.mxu0 %v13291_v29  ;;  %v17546_v62 = vand.u32 4294901760, %v13200_v40  ;;  %v3113_v40 = vsel %vm1720_vm0, %v1627_v34, 0 }
 0x23d   :  { %2841 = vmatmul.f32.vlgmr.msrb.gmra.mxu1 %v2739_v4  ;;  %3066 = vmatpush.xpose.msrb.mxu0 %v17545_v51  ;;  %v13340_v38 = vand.u32 4294901760, %v3113_v40 }
 0x23e   :  { %3095 = vmatpush.xpose.msrb.mxu1 %v13210_v33 }
 0x23f   :  { %2222 = vmatmul.f32.gmra.mxu2 %v13231_v39  ;;  %v13353_v21 = vsub.f32 %v3113_v40, %v13340_v38  ;;  %v13357_v39 = vand.u32 4294901760, %v13049_v41 }
 0x240   :  { %2247 = vmatmul.f32.vlgmr.msrb.gmra.mxu3 %v17546_v62 }
 0x241   :  { %2501 = vmatpush.xpose.msrb.mxu3 %v13030_v18  ;;  %3070 = vmatpush.xpose.msrb.mxu0 %v2974_v13  ;;  %v2938_v18 = vsub.f32 %v13307_v44, %v2937_v26  ;;  %v13338_v13 = vsub.f32 %v2911_v31, %v13325_v11  ;;  %v13374_v51 = vsub.f32 %v13049_v41, %v13357_v39 }
 0x242   :  { %3097 = vmatpush.xpose.msrb.mxu1 %v13239_v12 }
 0x243   :  { %v2939_v43 = vand.u32 4294901760, %v2938_v18  ;;  %v2945_v48 = vand.u32 4294901760, %v13338_v13  ;;  %v3746_v32 = vand.u32 4294901760, %v13374_v51  ;;  %v1565_v18 = vpop.permute.xlu2 %1564 }
 0x244   :  { %2816 = vmatmul.f32.gmra.mxu0 %v13311_v16 }
 0x245   :  { %2503 = vmatpush.xpose.msrb.mxu3 %v13101_v14  ;;  %2847 = vmatmul.f32.gmra.mxu1 %v2747_v45  ;;  %v17548_v14 = vand.u32 4294901760, %v13162_v57  ;;  %v3747_v34 = vsub.f32 %v13374_v51, %v3746_v32 }
 0x247   :  { %2346 = vmatmul.f32.vlgmr.msra.gmra.mxu2 %v2345_v0  ;;  %v2352_v53 = vsub.f32 %v13162_v57, %v17548_v14  ;;  %v2946_v57 = vsub.f32 %v13338_v13, %v2945_v48  ;;  %v3748_v9 = vand.u32 4294901760, %v3747_v34 }
 0x248   :  { %2253 = vmatmul.f32.gmra.mxu3 %v2153_v30  ;;  %2607 = vmatpush.xpose.msra.mxu2 %v13147_v24  ;;  %v13366_v30 = vand.u32 4294901760, %v13036_v50 }
 0x249   :  { %v2353_v24 = vand.u32 4294901760, %v2352_v53  ;;  %v2947_v31 = vand.u32 4294901760, %v2946_v57  ;;  %v3107_v53 = vsel %vm1720_vm0, %v1565_v18, 0 }
 0x24a   :  { %v13381_v62 = vsub.f32 %v13036_v50, %v13366_v30 }
 0x24c   :  { %2610 = vmatpush.xpose.msra.mxu2 %v13142_v35  ;;  %2940 = vmatmul.f32.vlgmr.msra.gmra.mxu0 %v2939_v43  ;;  %v13369_v35 = vsub.f32 %v3111_v22, %v13350_v17  ;;  %v3752_v3 = vand.u32 4294901760, %v13381_v62  ;;  %v13404_v43 = vand.u32 4294901760, %v3107_v53 }
 0x24d   :  { %2979 = vmatmul.f32.vlgmr.msra.gmra.mxu1 %v13296_v56  ;;  %3201 = vmatpush.xpose.msra.mxu0 %v13353_v21 }
 0x24e   :  { %3231 = vmatpush.xpose.msra.mxu1 %v13340_v38  ;;  %v3753_v40 = vsub.f32 %v13381_v62, %v3752_v3  ;;  %v13409_v57 = vsub.f32 %v3107_v53, %v13404_v43 }
 0x24f   :  { %2354 = vmatmul.f32.gmra.mxu2 %v2353_v24  ;;  %v1567_v24 = vpop.permute.xlu0 %1566 }
 0x250   :  { %2385 = vmatmul.f32.vlgmr.msra.gmra.mxu3 %v13105_v46  ;;  %v3754_v22 = vand.u32 4294901760, %v3753_v40 }
 0x251   :  { %2637 = vmatpush.xpose.msra.mxu3 %v13132_v25  ;;  %3204 = vmatpush.xpose.msra.mxu0 %v13369_v35  ;;  %v2770_v25 = vand.u32 4294901760, %v13205_v61 }
 0x252   :  { %3233 = vmatpush.xpose.msra.mxu1 %v13350_v17 }
 0x253   :  { %v2771_v0 = vsub.f32 %v13205_v61, %v2770_v25 }
 0x254   :  { %2948 = vmatmul.f32.gmra.mxu0 %v2947_v31 }
 0x255   :  { %2639 = vmatpush.xpose.msra.mxu3 %v13121_v58  ;;  %2983 = vmatmul.f32.gmra.mxu1 %v13325_v11  ;;  %v2776_v58 = vand.u32 4294901760, %v13220_v7  ;;  %v2772_v14 = vand.u32 4294901760, %v2771_v0 }
 0x257   :  { %2478 = vmatmul.f32.vlgmr.msrb.gmra.mxu2 %v13105_v46  ;;  %v2777_v61 = vsub.f32 %v13220_v7, %v2776_v58  ;;  %v3109_v7 = vsel %vm1720_vm0, %v1567_v24, 0 }
 0x258   :  { %2389 = vmatmul.f32.gmra.mxu3 %v13137_v59  ;;  %2734 = vmatpush.xpose.msrb.mxu2 %v13188_v55  ;;  %v13415_v31 = vand.u32 4294901760, %v3109_v7 }
 0x25b   :  { %v13474_v24 = vpop.permute.xlu0 %1648 }
 0x25c   :  { %2736 = vmatpush.xpose.msrb.mxu2 %v13207_v42  ;;  %3072 = vmatmul.f32.vlgmr.msrb.gmra.mxu0 %v13296_v56 }
 0x25d   :  { %3099 = vmatmul.f32.vlgmr.msrb.gmra.mxu1 %v13296_v56  ;;  %3710 = vmatpush.msrb.mxu0 %v13357_v39  ;;  %v2778_v56 = vand.u32 4294901760, %v2777_v61 }
 0x25e   :  { %3749 = vmatpush.msrb.mxu1 %v3748_v9  ;;  %v13457_v9 = vpop.permute.xlu2 %1650 }
 0x25f   :  { %3712 = vmatpush.msrb.mxu0 %v13366_v30  ;;  %2482 = vmatmul.f32.gmra.mxu2 %v13137_v59 }
 0x260   :  { %3755 = vmatpush.msrb.mxu1 %v3754_v22  ;;  %2505 = vmatmul.f32.vlgmr.msrb.gmra.mxu3 %v13105_v46  ;;  %v3135_v46 = vand.u32 4294901760, %v13409_v57  ;;  %v1637_v22 = vpop.permute.xlu1 %1636 }
 0x261   :  { %2773 = vmatpush.xpose.msrb.mxu3 %v2772_v14 }
 0x264   :  { %3076 = vmatmul.f32.gmra.mxu0 %v13325_v11 }
 0x265   :  { %2779 = vmatpush.xpose.msrb.mxu3 %v2778_v56  ;;  %3103 = vmatmul.f32.gmra.mxu1 %v13325_v11  ;;  %v13422_v11 = vsub.f32 %v3109_v7, %v13415_v31 }
 0x266   :  { %v13471_v56 = vpop.permute.xlu2 %1662 }
 0x267   :  { %2613 = vmatmul.f32.vlgmr.msra.gmra.mxu2 %v13155_v47 }
 0x268   :  { %2509 = vmatmul.f32.gmra.mxu3 %v13137_v59  ;;  %2868 = vmatpush.xpose.msra.mxu2 %v2770_v25  ;;  %v17549_v59 = vand.u32 4294901760, %v13155_v47  ;;  %v2740_v25 = vsub.f32 %v13291_v29, %v2739_v4  ;;  %v17550_v47 = vand.u32 4294901760, %v13186_v49 }
 0x26a   :  { %v2741_v34 = vand.u32 4294901760, %v2740_v25 }
 0x26c   :  { %2872 = vmatpush.xpose.msra.mxu2 %v2776_v58  ;;  %3207 = vmatmul.f32.vlgmr.msra.gmra.mxu0 %v13409_v57 }
 0x26d   :  { %3237 = vmatmul.f32.vlgmr.msra.gmra.mxu1 %v3135_v46  ;;  %3844 = vmatpush.msra.mxu0 %v3746_v32  ;;  %v3143_v32 = vand.u32 4294901760, %v13422_v11 }
 0x26e   :  { %3873 = vmatpush.msra.mxu1 %v13357_v39 }
 0x26f   :  { %3848 = vmatpush.msra.mxu0 %v3752_v3  ;;  %2618 = vmatmul.f32.gmra.mxu2 %v13186_v49  ;;  %v3166_v49 = vand.u32 4294901760, %v13353_v21 }
 0x270   :  { %3875 = vmatpush.msra.mxu1 %v13366_v30  ;;  %2643 = vmatmul.f32.vlgmr.msra.gmra.mxu3 %v17549_v59 }
 0x271   :  { %2897 = vmatpush.xpose.msra.mxu3 %v13188_v55  ;;  %v2748_v55 = vsub.f32 %v13311_v16, %v2747_v45  ;;  %v3172_v45 = vand.u32 4294901760, %v13369_v35 }
 0x273   :  { %v2749_v29 = vand.u32 4294901760, %v2748_v55 }
 0x274   :  { %3212 = vmatmul.f32.gmra.mxu0 %v13422_v11 }
 0x275   :  { %2899 = vmatpush.xpose.msra.mxu3 %v13207_v42  ;;  %3243 = vmatmul.f32.gmra.mxu1 %v3143_v32 }
 0x277   :  { %2742 = vmatmul.f32.vlgmr.msrb.gmra.mxu2 %v2741_v34 }
 0x278   :  { %2649 = vmatmul.f32.gmra.mxu3 %v17550_v47  ;;  %3003 = vmatpush.xpose.msrb.mxu2 %v13225_v20 }
 0x279   :  { %v1951_v3 = vpop.f32.mrf.mxu2 }
 0x27c   :  { %3006 = vmatpush.xpose.msrb.mxu2 %v13245_v37  ;;  %v3167_v37 = vsub.f32 %v13353_v21, %v3166_v49  ;;  %v13461_v21 = vpop.f32.mrf.mxu0 }
 0x27f   :  { %2750 = vmatmul.f32.gmra.mxu2 %v2749_v29 }
 0x280   :  { %2781 = vmatmul.f32.vlgmr.msrb.gmra.mxu3 %v13281_v15 }
 0x281   :  { %3033 = vmatpush.xpose.msrb.mxu3 %v13210_v33  ;;  %v1959_v42 = vpop.f32.mrf.mxu2  ;;  %v1990_v4 = vpop.f32.mrf.mxu3  ;;  %v3168_v33 = vand.u32 4294901760, %v3167_v37 }
 0x282   :  { %v1639_v37 = vpop.permute.xlu0 %1638 }
 0x285   :  { %3035 = vmatpush.xpose.msrb.mxu3 %v13239_v12  ;;  %v3173_v12 = vsub.f32 %v13369_v35, %v3172_v45  ;;  %v1991_v35 = vadd.f32 %v1990_v4, %v1951_v3 }
 0x287   :  { %2874 = vmatmul.f32.vlgmr.msra.gmra.mxu2 %v13281_v15  ;;  %v3174_v58 = vand.u32 4294901760, %v3173_v12 }
 0x288   :  { %2785 = vmatmul.f32.gmra.mxu3 %v13298_v1  ;;  %3130 = vmatpush.xpose.msra.mxu2 %v13340_v38 }
 0x289   :  { %v2020_v20 = vpop.f32.mrf.mxu2  ;;  %v1994_v16 = vpop.f32.mrf.mxu3 }
 0x28a   :  { %v2021_v61 = vadd.f32 %v2020_v20, %v1991_v35  ;;  %v1995_v47 = vadd.f32 %v1994_v16, %v1959_v42 }
 0x28c   :  { %3132 = vmatpush.xpose.msra.mxu2 %v13350_v17 }
 0x28f   :  { %2878 = vmatmul.f32.gmra.mxu2 %v13298_v1 }
 0x290   :  { %2901 = vmatmul.f32.vlgmr.msra.gmra.mxu3 %v13281_v15  ;;  %v13463_v15 = vpop.f32.mrf.mxu1 }
 0x291   :  { %3169 = vmatpush.xpose.msra.mxu3 %v3168_v33  ;;  %v2025_v40 = vpop.f32.mrf.mxu2 }
 0x292   :  { %v2050_v0 = vpop.f32.mrf.mxu3 }
 0x293   :  { %v2051_v53 = vadd.f32 %v2050_v0, %v2021_v61 }
 0x295   :  { %3175 = vmatpush.xpose.msra.mxu3 %v3174_v58 }
 0x297   :  { %3009 = vmatmul.f32.vlgmr.msrb.gmra.mxu2 %v13307_v44  ;;  %v13478_v44 = vpop.f32.mrf.mxu0 }
 0x298   :  { %2905 = vmatmul.f32.gmra.mxu3 %v13298_v1  ;;  %3264 = vmatpush.xpose.msrb.mxu2 %v3166_v49  ;;  %v3136_v1 = vsub.f32 %v13409_v57, %v3135_v46  ;;  %v2026_v57 = vadd.f32 %v2025_v40, %v1995_v47  ;;  %v13484_v46 = vpop.f32.mrf.mxu1 }
 0x29a   :  { %v2083_v18 = vpop.f32.mrf.mxu2  ;;  %v2056_v14 = vpop.f32.mrf.mxu3  ;;  %v3137_v55 = vand.u32 4294901760, %v3136_v1 }
 0x29b   :  { %v2084_v7 = vadd.f32 %v2083_v18, %v2051_v53  ;;  %v2057_v29 = vadd.f32 %v2056_v14, %v2026_v57 }
 0x29c   :  { %3268 = vmatpush.xpose.msrb.mxu2 %v3172_v45 }
 0x29f   :  { %3014 = vmatmul.f32.gmra.mxu2 %v13338_v13  ;;  %v2281_v13 = vpop.f32.mrf.mxu0 }
 0x2a0   :  { %3039 = vmatmul.f32.vlgmr.msrb.gmra.mxu3 %v2937_v26  ;;  %v2308_v12 = vpop.f32.mrf.mxu1 }
 0x2a1   :  { %3293 = vmatpush.xpose.msrb.mxu3 %v13340_v38 }
 0x2a2   :  { %v2087_v59 = vpop.f32.mrf.mxu2  ;;  %v2110_v25 = vpop.f32.mrf.mxu3 }
 0x2a3   :  { %v3307_v34 = vpop.xlane.xlu1 %3306  ;;  %v13476_v3 = vadd.f32 %v2110_v25, %v2084_v7 }
 0x2a4   :  { %v3353_v26 = vsub.f32 %v13265_v36, %v3307_v34  ;;  %v3144_v36 = vsub.f32 %v13422_v11, %v3143_v32  ;;  %v13498_v11 = vand.u32 4294901760, %v1639_v37 }
 0x2a5   :  { %3295 = vmatpush.xpose.msrb.mxu3 %v13350_v17  ;;  %v3311_v38 = vsel %vm1720_vm0, %v13476_v3, -inf  ;;  %v2088_v17 = vadd.f32 %v2087_v59, %v2057_v29 }
 0x2a6   :  { %3312 = vmax.xlane.f32.xlu0 %v3311_v38  ;;  %v3369_v42 = vmul.f32 1.442695, %v3353_v26  ;;  %v13507_v40 = vsub.f32 %v1639_v37, %v13498_v11 }
 0x2a7   :  { %3138 = vmatmul.f32.vlgmr.msra.gmra.mxu2 %v3137_v55  ;;  %v2285_v35 = vpop.f32.mrf.mxu0 }
 0x2a8   :  { %3045 = vmatmul.f32.gmra.mxu3 %v2945_v48  ;;  %3781 = vmatpush.msra.mxu2 %v13374_v51  ;;  %11528 = vpow2.f32 %v3369_v42  ;;  %v3145_v48 = vand.u32 4294901760, %v3144_v36 }
 0x2aa   :  { %3784 = vmatpush.msra.mxu2 %v13381_v62  ;;  %v2149_v4 = vpop.f32.mrf.mxu2  ;;  %v2114_v49 = vpop.f32.mrf.mxu3  ;;  %v13501_v62 = vand.u32 4294901760, %v1637_v22 }
 0x2ab   :  { %v3310_v20 = vpop.xlane.xlu2 %3309  ;;  %v13493_v16 = vadd.f32 %v2114_v49, %v2088_v17 }
 0x2ac   :  { %v3354_v45 = vsub.f32 %v13283_v63, %v3310_v20  ;;  %v13511_v58 = vsub.f32 %v1637_v22, %v13501_v62 }
 0x2ad   :  { %v3314_v33 = vsel %vm1720_vm0, %v13493_v16, -inf }
 0x2ae   :  { %v3371_v51 = vmul.f32 1.442695, %v3354_v45  ;;  %3315 = vmax.xlane.f32.xlu2 %v3314_v33  ;;  %v13504_v32 = vpop.eup %11528  ;;  %v3948_v22 = vand.u32 4294901760, %v13511_v58 }
 0x2af   :  { %3146 = vmatmul.f32.gmra.mxu2 %v3145_v48  ;;  %v3401_v14 = vsel %vm1720_vm0, %v13504_v32, 0.0  ;;  %v2416_v47 = vpop.f32.mrf.mxu0 }
 0x2b0   :  { %11530 = vpow2.f32 %v3371_v51  ;;  %3177 = vmatmul.f32.vlgmr.msra.gmra.mxu3 %v13404_v43  ;;  %v3949_v59 = vsub.f32 %v13511_v58, %v3948_v22 }
 0x2b1   :  { %3811 = vmatpush.msra.mxu3 %v13357_v39  ;;  %v3942_v39 = vand.u32 4294901760, %v13507_v40 }
 0x2b2   :  { %v2157_v63 = vpop.f32.mrf.mxu2  ;;  %v3950_v55 = vand.u32 4294901760, %v3949_v59 }
 0x2b3   :  { %3813 = vmatpush.msra.mxu3 %v13366_v30  ;;  %v2188_v0 = vpop.f32.mrf.mxu3  ;;  %v2312_v30 = vpop.f32.mrf.mxu1  ;;  %v3943_v7 = vsub.f32 %v13507_v40, %v3942_v39 }
 0x2b4   :  { %v2189_v34 = vadd.f32 %v2188_v0, %v2149_v4 }
 0x2b5   :  { %v3944_v25 = vand.u32 4294901760, %v3943_v7 }
 0x2b6   :  { %v13513_v18 = vpop.eup %11530  ;;  %3402 = vadd.xlane.f32.xlu2 %v3401_v14 }
 0x2b7   :  { %3270 = vmatmul.f32.vlgmr.msrb.gmra.mxu2 %v13404_v43  ;;  %v3404_v61 = vsel %vm1720_vm0, %v13513_v18, 0.0  ;;  %v2421_v4 = vpop.f32.mrf.mxu0 }
 0x2b8   :  { %3181 = vmatmul.f32.gmra.mxu3 %v13415_v31  ;;  %3906 = vmatpush.msrb.mxu2 %v13498_v11 }
 0x2b9   :  { %3405 = vadd.xlane.f32.xlu1 %v3404_v61 }
 0x2ba   :  { %3908 = vmatpush.msrb.mxu2 %v13501_v62  ;;  %v2218_v53 = vpop.f32.mrf.mxu2 }
 0x2bb   :  { %v2192_v1 = vpop.f32.mrf.mxu3  ;;  %v2219_v26 = vadd.f32 %v2218_v53, %v2189_v34  ;;  %v2446_v38 = vpop.f32.mrf.mxu1 }
 0x2bc   :  { %v2193_v17 = vadd.f32 %v2192_v1, %v2157_v63 }
 0x2bf   :  { %3274 = vmatmul.f32.gmra.mxu2 %v13415_v31 }
 0x2c0   :  { %3297 = vmatmul.f32.vlgmr.msrb.gmra.mxu3 %v13404_v43 }
 0x2c1   :  { %3945 = vmatpush.msrb.mxu3 %v3944_v25 }
 0x2c2   :  { %v2223_v57 = vpop.f32.mrf.mxu2 }
 0x2c3   :  { %3951 = vmatpush.msrb.mxu3 %v3950_v55  ;;  %v2248_v29 = vpop.f32.mrf.mxu3  ;;  %v2224_v20 = vadd.f32 %v2223_v57, %v2193_v17  ;;  %v2452_v51 = vpop.f32.mrf.mxu1 }
 0x2c4   :  { %v2249_v42 = vadd.f32 %v2248_v29, %v2219_v26 }
 0x2c6   :  { %v2282_v36 = vadd.f32 %v2281_v13, %v2249_v42 }
 0x2c8   :  { %3301 = vmatmul.f32.gmra.mxu3 %v13415_v31  ;;  %v13534_v49 = vadd.f32 %v2308_v12, %v2282_v36  ;;  %v2545_v12 = vpop.f32.mrf.mxu0 }
 0x2ca   :  { %v2347_v37 = vpop.f32.mrf.mxu2  ;;  %v3317_v43 = vsel %vm1720_vm0, %v13534_v49, -inf }
 0x2cb   :  { %v2254_v45 = vpop.f32.mrf.mxu3  ;;  %3318 = vmax.xlane.f32.xlu1 %v3317_v43  ;;  %v2584_v63 = vpop.f32.mrf.mxu1 }
 0x2cc   :  { %v2255_v48 = vadd.f32 %v2254_v45, %v2224_v20 }
 0x2ce   :  { %v2286_v33 = vadd.f32 %v2285_v35, %v2255_v48  ;;  %v2585_v48 = vadd.f32 %v2584_v63, %v2545_v12 }
 0x2d0   :  { %v13538_v0 = vadd.f32 %v2312_v30, %v2286_v33  ;;  %v2553_v59 = vpop.f32.mrf.mxu0 }
 0x2d2   :  { %v2355_v14 = vpop.f32.mrf.mxu2  ;;  %v3320_v13 = vsel %vm1720_vm0, %v13538_v0, -inf }
 0x2d3   :  { %v2386_v31 = vpop.f32.mrf.mxu3  ;;  %3321 = vmax.xlane.f32.xlu0 %v3320_v13  ;;  %v2588_v55 = vpop.f32.mrf.mxu1 }
 0x2d4   :  { %v2387_v61 = vadd.f32 %v2386_v31, %v2347_v37 }
 0x2d6   :  { %v2417_v7 = vadd.f32 %v2416_v47, %v2387_v61 }
 0x2d8   :  { %v2447_v34 = vadd.f32 %v2446_v38, %v2417_v7  ;;  %v2677_v17 = vpop.f32.mrf.mxu0 }
 0x2da   :  { %v2479_v53 = vpop.f32.mrf.mxu2 }
 0x2db   :  { %v2390_v1 = vpop.f32.mrf.mxu3  ;;  %v2480_v26 = vadd.f32 %v2479_v53, %v2447_v34  ;;  %v2704_v43 = vpop.f32.mrf.mxu1 }
 0x2dc   :  { %v2391_v25 = vadd.f32 %v2390_v1, %v2355_v14 }
 0x2de   :  { %v2422_v57 = vadd.f32 %v2421_v4, %v2391_v25 }
 0x2e0   :  { %v2453_v36 = vadd.f32 %v2452_v51, %v2422_v57  ;;  %v2681_v14 = vpop.f32.mrf.mxu0  ;;  %v2589_v51 = vadd.f32 %v2588_v55, %v2553_v59 }
 0x2e2   :  { %v2483_v35 = vpop.f32.mrf.mxu2 }
 0x2e3   :  { %v2506_v30 = vpop.f32.mrf.mxu3  ;;  %v2484_v20 = vadd.f32 %v2483_v35, %v2453_v36  ;;  %v2708_v61 = vpop.f32.mrf.mxu1 }
 0x2e4   :  { %v13542_v29 = vadd.f32 %v2506_v30, %v2480_v26 }
 0x2e6   :  { %v3323_v42 = vsel %vm1720_vm0, %v13542_v29, -inf }
 0x2e7   :  { %3324 = vmax.xlane.f32.xlu2 %v3323_v42 }
 0x2e8   :  { %v2812_v30 = vpop.f32.mrf.mxu0 }
 0x2ea   :  { %v2614_v37 = vpop.f32.mrf.mxu2 }
 0x2eb   :  { %v2510_v47 = vpop.f32.mrf.mxu3  ;;  %v2615_v4 = vadd.f32 %v2614_v37, %v2585_v48  ;;  %v2842_v63 = vpop.f32.mrf.mxu1 }
 0x2ec   :  { %v13546_v45 = vadd.f32 %v2510_v47, %v2484_v20 }
 0x2ee   :  { %v3326_v38 = vsel %vm1720_vm0, %v13546_v45, -inf }
 0x2ef   :  { %3327 = vmax.xlane.f32.xlu1 %v3326_v38 }
 0x2f0   :  { %v2817_v55 = vpop.f32.mrf.mxu0 }
 0x2f2   :  { %v2619_v33 = vpop.f32.mrf.mxu2 }
 0x2f3   :  { %v2644_v13 = vpop.f32.mrf.mxu3  ;;  %v2620_v7 = vadd.f32 %v2619_v33, %v2589_v51 }
 0x2f4   :  { %v2645_v31 = vadd.f32 %v2644_v13, %v2615_v4 }
 0x2f6   :  { %v2678_v53 = vadd.f32 %v2677_v17, %v2645_v31  ;;  %v2848_v17 = vpop.f32.mrf.mxu1 }
 0x2f8   :  { %v13550_v1 = vadd.f32 %v2704_v43, %v2678_v53  ;;  %v2941_v47 = vpop.f32.mrf.mxu0 }
 0x2fa   :  { %v2743_v25 = vpop.f32.mrf.mxu2  ;;  %v3329_v34 = vsel %vm1720_vm0, %v13550_v1, -inf }
 0x2fb   :  { %v2650_v26 = vpop.f32.mrf.mxu3  ;;  %3330 = vmax.xlane.f32.xlu2 %v3329_v34 }
 0x2fc   :  { %v2651_v35 = vadd.f32 %v2650_v26, %v2620_v7 }
 0x2fe   :  { %v2682_v12 = vadd.f32 %v2681_v14, %v2651_v35  ;;  %v2980_v38 = vpop.f32.mrf.mxu1 }
 0x300   :  { %v13554_v57 = vadd.f32 %v2708_v61, %v2682_v12  ;;  %v2949_v61 = vpop.f32.mrf.mxu0 }
 0x302   :  { %v2751_v42 = vpop.f32.mrf.mxu2  ;;  %v3332_v36 = vsel %vm1720_vm0, %v13554_v57, -inf }
 0x303   :  { %v2782_v59 = vpop.f32.mrf.mxu3  ;;  %3333 = vmax.xlane.f32.xlu0 %v3332_v36 }
 0x304   :  { %v2783_v36 = vadd.f32 %v2782_v59, %v2743_v25 }
 0x306   :  { %v2984_v34 = vpop.f32.mrf.mxu1 }
 0x307   :  { %v2985_v25 = vadd.f32 %v2984_v34, %v2949_v61 }
 0x308   :  { %1660 = vrot.lane.b32.xlu1 %v13036_v50, %s11909_s25 }
 0x30a   :  { %v2875_v20 = vpop.f32.mrf.mxu2 }
 0x30b   :  { %v2786_v37 = vpop.f32.mrf.mxu3 }
 0x30c   :  { %v2787_v43 = vadd.f32 %v2786_v37, %v2751_v42  ;;  %v2981_v42 = vadd.f32 %v2980_v38, %v2941_v47 }
 0x30e   :  { %v2818_v4 = vadd.f32 %v2817_v55, %v2787_v43 }
 0x310   :  { %v2849_v14 = vadd.f32 %v2848_v17, %v2818_v4 }
 0x312   :  { %v2879_v33 = vpop.f32.mrf.mxu2 }
 0x313   :  { %v2902_v48 = vpop.f32.mrf.mxu3  ;;  %v2880_v13 = vadd.f32 %v2879_v33, %v2849_v14  ;;  %v3073_v33 = vpop.f32.mrf.mxu0  ;;  %v2813_v14 = vadd.f32 %v2812_v30, %v2783_v36 }
 0x315   :  { %v2843_v59 = vadd.f32 %v2842_v63, %v2813_v14 }
 0x319   :  { %v3313_v31 = vpop.xlane.xlu0 %3312 }
 0x31a   :  { %v3355_v53 = vsub.f32 %v13476_v3, %v3313_v31  ;;  %v3010_v35 = vpop.f32.mrf.mxu2 }
 0x31b   :  { %v2906_v51 = vpop.f32.mrf.mxu3  ;;  %v3011_v55 = vadd.f32 %v3010_v35, %v2981_v42  ;;  %v2876_v35 = vadd.f32 %v2875_v20, %v2843_v59 }
 0x31c   :  { %v13561_v7 = vadd.f32 %v2906_v51, %v2880_v13  ;;  %v3373_v26 = vmul.f32 1.442695, %v3355_v53  ;;  %v3100_v51 = vpop.f32.mrf.mxu1 }
 0x31d   :  { %v13574_v36 = vadd.f32 %v2902_v48, %v2876_v35 }
 0x31e   :  { %v3338_v12 = vsel %vm1720_vm0, %v13561_v7, -inf  ;;  %11532 = vpow2.f32 %v3373_v26 }
 0x31f   :  { %3339 = vmax.xlane.f32.xlu2 %v3338_v12  ;;  %v3335_v34 = vsel %vm1720_vm0, %v13574_v36, -inf }
 0x321   :  { %v3316_v17 = vpop.xlane.xlu2 %3315 }
 0x322   :  { %v3356_v37 = vsub.f32 %v13493_v16, %v3316_v17  ;;  %v3015_v26 = vpop.f32.mrf.mxu2 }
 0x323   :  { %v3040_v43 = vpop.f32.mrf.mxu3  ;;  %v3016_v12 = vadd.f32 %v3015_v26, %v2985_v25 }
 0x324   :  { %v3041_v4 = vadd.f32 %v3040_v43, %v3011_v55  ;;  %v13566_v3 = vpop.eup %11532  ;;  %v3375_v13 = vmul.f32 1.442695, %v3356_v37  ;;  %v3077_v37 = vpop.f32.mrf.mxu0 }
 0x325   :  { %v3407_v53 = vsel %vm1720_vm0, %v13566_v3, 0.0 }
 0x326   :  { %v3074_v31 = vadd.f32 %v3073_v33, %v3041_v4  ;;  %3408 = vadd.xlane.f32.xlu0 %v3407_v53  ;;  %11534 = vpow2.f32 %v3375_v13  ;;  %v3104_v33 = vpop.f32.mrf.mxu1 }
 0x328   :  { %v13570_v47 = vadd.f32 %v3100_v51, %v3074_v31 }
 0x329   :  { %v3403_v16 = vpop.xlane.xlu2 %3402 }
 0x32a   :  { %v3341_v38 = vsel %vm1720_vm0, %v13570_v47, -inf  ;;  %11536 = vrcp.f32 %v3403_v16  ;;  %v3460_v13 = vand.u32 2147483648, %v3403_v16  ;;  %v3458_v51 = vand.u32 2147483647, %v3403_v16 }
 0x32b   :  { %v3046_v30 = vpop.f32.mrf.mxu3  ;;  %3342 = vmax.xlane.f32.xlu2 %v3341_v38  ;;  %vm3454_vm2 = vweird.f32 %v3403_v16 }
 0x32c   :  { %v3406_v42 = vpop.xlane.xlu1 %3405  ;;  %v3047_v55 = vadd.f32 %v3046_v30, %v3016_v12  ;;  %v13576_v17 = vpop.eup %11534  ;;  %v3461_v12 = vor.u32 1.1754944e-38, %v3460_v13  ;;  %vm3459_vm5 = vcmp.eq.f32.partialorder %v3458_v51, 8.507059e+37  ;;  %v13596_v51 = vand.u32 4294901760, %v13474_v24 }
 0x32d   :  { %11538 = vrcp.f32 %v3406_v42  ;;  %v3410_v20 = vsel %vm1720_vm0, %v13576_v17, 0.0  ;;  %v3475_v25 = vand.u32 2147483648, %v3406_v42  ;;  %v3473_v35 = vand.u32 2147483647, %v3406_v42 }
 0x32e   :  { %v3078_v63 = vadd.f32 %v3077_v37, %v3047_v55  ;;  %vm3469_vm6 = vweird.f32 %v3406_v42 }
 0x32f   :  { %vm3474_vm8 = vcmp.eq.f32.partialorder %v3473_v35, 8.507059e+37 }
 0x330   :  { %v11537_v61 = vpop.eup %11536  ;;  %v13582_v31 = vadd.f32 %v3104_v33, %v3078_v63 }
 0x331   :  { %v3450_v43 = vmul.f32 %v11537_v61, %v3403_v16  ;;  %vm3455_vm1 = vweird.f32 %v11537_v61 }
 0x332   :  { %3336 = vmax.xlane.f32.xlu1 %v3335_v34  ;;  %vm3456_vm4 = vmor %vm3454_vm2, %vm3455_vm1  ;;  %v3344_v30 = vsel %vm1720_vm0, %v13582_v31, -inf  ;;  %v3476_v34 = vor.u32 1.1754944e-38, %v3475_v25 }
 0x333   :  { %v11539_v4 = vpop.eup %11538  ;;  %3411 = vadd.xlane.f32.xlu2 %v3410_v20  ;;  %v3451_v48 = vsub.f32 1.0, %v3450_v43 }
 0x334   :  { %v3465_v14 = vmul.f32 %v11539_v4, %v3406_v42  ;;  %vm3470_vm3 = vweird.f32 %v11539_v4 }
 0x335   :  { %v3452_v53 = vmul.f32 %v11537_v61, %v3451_v48  ;;  %vm3471_vm7 = vmor %vm3469_vm6, %vm3470_vm3 }
 0x336   :  { %v3466_v26 = vsub.f32 1.0, %v3465_v14  ;;  %v13592_v14 = vand.u32 4294901760, %v13457_v9 }
 0x337   :  { %v3453_v59 = vadd.f32 %v11537_v61, %v3452_v53 }
 0x338   :  { %v3467_v38 = vmul.f32 %v11539_v4, %v3466_v26  ;;  %v3139_v26 = vpop.f32.mrf.mxu2 }
 0x339   :  { %v3457_v55 = vsel %vm3456_vm4, %v11537_v61, %v3453_v59  ;;  %v13608_v59 = vsub.f32 %v13474_v24, %v13596_v51 }
 0x33a   :  { %v3468_v37 = vadd.f32 %v11539_v4, %v3467_v38  ;;  %3345 = vmax.xlane.f32.xlu1 %v3344_v30  ;;  %v3462_v63 = vsel %vm3459_vm5, %v3461_v12, %v3457_v55  ;;  %1672 = vrot.lane.b32.xlu0 %v13036_v50, %s11910_s26  ;;  %v3178_v38 = vpop.f32.mrf.mxu3 }
 0x33b   :  { %v3463_v16 = vmul.f32 %v13504_v32, %v3462_v63  ;;  %v3179_v63 = vadd.f32 %v3178_v38, %v3139_v26 }
 0x33c   :  { %v3472_v43 = vsel %vm3471_vm7, %v11539_v4, %v3468_v37 }
 0x33d   :  { %v3477_v20 = vsel %vm3474_vm8, %v3476_v34, %v3472_v43  ;;  %v3690_v33 = vsel %vm1720_vm0, %v3463_v16, 0  ;;  %v3238_v16 = vpop.f32.mrf.mxu1 }
 0x33e   :  { %v3478_v48 = vmul.f32 %v13513_v18, %v3477_v20  ;;  %v3713_v61 = vand.u32 4294901760, %v3690_v33  ;;  %v13601_v18 = vsub.f32 %v13457_v9, %v13592_v14  ;;  %v3319_v20 = vpop.xlane.xlu1 %3318 }
 0x33f   :  { %v3357_v26 = vsub.f32 %v13534_v49, %v3319_v20 }
 0x340   :  { %v3693_v42 = vsel %vm1720_vm0, %v3478_v48, 0  ;;  %3757 = vmatmul.f32.vlgmr.msrb.gmra.mxu1 %v3713_v61  ;;  %v3714_v13 = vsub.f32 %v3690_v33, %v3713_v61  ;;  %v4138_v12 = vand.u32 4294901760, %v13601_v18 }
 0x341   :  { %v3721_v53 = vand.u32 4294901760, %v3693_v42  ;;  %4007 = vmatpush.msrb.mxu1 %v13498_v11 }
 0x342   :  { %3787 = vmatmul.f32.vlgmr.msra.gmra.mxu2 %v3714_v13  ;;  %v3715_v32 = vand.u32 4294901760, %v3714_v13  ;;  %v3182_v55 = vpop.f32.mrf.mxu3 }
 0x343   :  { %v3722_v4 = vsub.f32 %v3693_v42, %v3721_v53  ;;  %4009 = vmatpush.msrb.mxu1 %v13501_v62  ;;  %4040 = vmatpush.msra.mxu2 %v3942_v39  ;;  %v4144_v39 = vand.u32 4294901760, %v13608_v59 }
 0x344   :  { %3817 = vmatmul.f32.vlgmr.msra.gmra.mxu3 %v3715_v32  ;;  %v3716_v25 = vsub.f32 %v3714_v13, %v3715_v32 }
 0x345   :  { %4044 = vmatpush.msra.mxu2 %v3948_v22  ;;  %4069 = vmatpush.msra.mxu3 %v13498_v11  ;;  %v3723_v35 = vand.u32 4294901760, %v3722_v4  ;;  %v4139_v11 = vsub.f32 %v13601_v18, %v4138_v12  ;;  %v3147_v22 = vpop.f32.mrf.mxu2 }
 0x346   :  { %v3717_v9 = vand.u32 4294901760, %v3716_v25  ;;  %v3183_v48 = vadd.f32 %v3182_v55, %v3147_v22 }
 0x347   :  { %4071 = vmatpush.msra.mxu3 %v13501_v62  ;;  %v3724_v24 = vsub.f32 %v3722_v4, %v3723_v35  ;;  %v4145_v62 = vsub.f32 %v13608_v59, %v4144_v39  ;;  %v4140_v30 = vand.u32 4294901760, %v4139_v11 }
 0x348   :  { %3718 = vmatmul.f32.vlgmr.msrb.gmra.mxu0 %v3717_v9  ;;  %3761 = vmatmul.f32.gmra.mxu1 %v3721_v53  ;;  %v3244_v9 = vpop.f32.mrf.mxu1 }
 0x349   :  { %3977 = vmatpush.msrb.mxu0 %v13507_v40  ;;  %v3725_v40 = vand.u32 4294901760, %v3724_v24  ;;  %v4146_v37 = vand.u32 4294901760, %v4145_v62 }
 0x34a   :  { %3792 = vmatmul.f32.gmra.mxu2 %v3722_v4  ;;  %v3298_v33 = vpop.f32.mrf.mxu3 }
 0x34b   :  { %1674 = vrot.lane.b32.xlu2 %v13049_v41, %s11910_s26  ;;  %3980 = vmatpush.msrb.mxu0 %v13511_v58  ;;  %v3208_v58 = vpop.f32.mrf.mxu0 }
 0x34c   :  { %3823 = vmatmul.f32.gmra.mxu3 %v3723_v35  ;;  %v3209_v34 = vadd.f32 %v3208_v58, %v3179_v63 }
 0x34d   :  { %v3271_v43 = vpop.f32.mrf.mxu2 }
 0x34e   :  { %v3239_v42 = vadd.f32 %v3238_v16, %v3209_v34 }
 0x350   :  { %3726 = vmatmul.f32.gmra.mxu0 %v3725_v40  ;;  %3877 = vmatmul.f32.vlgmr.msra.gmra.mxu1 %v3713_v61  ;;  %v3272_v13 = vadd.f32 %v3271_v43, %v3239_v42  ;;  %v3377_v40 = vmul.f32 1.442695, %v3357_v26 }
 0x351   :  { %4141 = vmatpush.msra.mxu1 %v4140_v30 }
 0x352   :  { %v13628_v25 = vadd.f32 %v3298_v33, %v3272_v13  ;;  %v3302_v62 = vpop.f32.mrf.mxu3 }
 0x353   :  { %4147 = vmatpush.msra.mxu1 %v4146_v37  ;;  %v3213_v32 = vpop.f32.mrf.mxu0  ;;  %v3322_v37 = vpop.xlane.xlu0 %3321 }
 0x354   :  { %v3214_v4 = vadd.f32 %v3213_v32, %v3183_v48  ;;  %v3347_v11 = vsel %vm1720_vm0, %v13628_v25, -inf  ;;  %v3358_v49 = vsub.f32 %v13538_v0, %v3322_v37 }
 0x356   :  { %v3245_v24 = vadd.f32 %v3244_v9, %v3214_v4  ;;  %v3379_v58 = vmul.f32 1.442695, %v3358_v49 }
 0x358   :  { %3850 = vmatmul.f32.vlgmr.msra.gmra.mxu0 %v3713_v61  ;;  %3881 = vmatmul.f32.gmra.mxu1 %v3721_v53  ;;  %v3275_v61 = vpop.f32.mrf.mxu2 }
 0x359   :  { %4102 = vmatpush.msra.mxu0 %v13592_v14  ;;  %v3276_v30 = vadd.f32 %v3275_v61, %v3245_v24 }
 0x35a   :  { %v3325_v55 = vpop.xlane.xlu2 %3324 }
 0x35b   :  { %4104 = vmatpush.msra.mxu0 %v13596_v51  ;;  %v3359_v0 = vsub.f32 %v13542_v29, %v3325_v55 }
 0x35d   :  { %v3381_v42 = vmul.f32 1.442695, %v3359_v0 }
 0x360   :  { %3854 = vmatmul.f32.gmra.mxu0 %v3721_v53  ;;  %v13634_v53 = vadd.f32 %v3302_v62, %v3276_v30 }
 0x362   :  { %v3328_v38 = vpop.xlane.xlu1 %3327 }
 0x363   :  { %v3360_v35 = vsub.f32 %v13546_v45, %v3328_v38  ;;  %v3350_v45 = vsel %vm1720_vm0, %v13634_v53, -inf }
 0x364   :  { %3348 = vmax.xlane.f32.xlu0 %v3347_v11 }
 0x365   :  { %v3383_v22 = vmul.f32 1.442695, %v3360_v35 }
 0x367   :  { %11540 = vpow2.f32 %v3383_v22 }
 0x368   :  { %11542 = vpow2.f32 %v3377_v40 }
 0x369   :  { %11544 = vpow2.f32 %v3379_v58 }
 0x36c   :  { %3351 = vmax.xlane.f32.xlu0 %v3350_v45 }
 0x36d   :  { %v13639_v63 = vpop.eup %11540 }
 0x36e   :  { %v3331_v34 = vpop.xlane.xlu2 %3330  ;;  %v3422_v16 = vsel %vm1720_vm0, %v13639_v63, 0.0  ;;  %v13644_v20 = vpop.eup %11542 }
 0x36f   :  { %v3361_v43 = vsub.f32 %v13550_v1, %v3331_v34  ;;  %3423 = vadd.xlane.f32.xlu1 %v3422_v16  ;;  %v3413_v48 = vsel %vm1720_vm0, %v13644_v20, 0.0  ;;  %v13649_v32 = vpop.eup %11544 }
 0x370   :  { %v3416_v29 = vsel %vm1720_vm0, %v13649_v32, 0.0 }
 0x371   :  { %v3385_v33 = vmul.f32 1.442695, %v3361_v43 }
 0x373   :  { %11546 = vpow2.f32 %v3385_v33 }
 0x374   :  { %3414 = vadd.xlane.f32.xlu2 %v3413_v48  ;;  %11548 = vpow2.f32 %v3381_v42 }
 0x376   :  { %v3334_v13 = vpop.xlane.xlu0 %3333 }
 0x377   :  { %v3362_v1 = vsub.f32 %v13554_v57, %v3334_v13 }
 0x379   :  { %v13651_v4 = vpop.eup %11546  ;;  %v3387_v38 = vmul.f32 1.442695, %v3362_v1 }
 0x37a   :  { %v3425_v26 = vsel %vm1720_vm0, %v13651_v4, 0.0  ;;  %v13658_v9 = vpop.eup %11548  ;;  %v13671_v30 = vpop.permute.xlu1 %1660 }
 0x37b   :  { %3426 = vadd.xlane.f32.xlu0 %v3425_v26  ;;  %11550 = vpow2.f32 %v3387_v38  ;;  %v3419_v61 = vsel %vm1720_vm0, %v13658_v9, 0.0 }
 0x37c   :  { %3417 = vadd.xlane.f32.xlu2 %v3416_v29 }
 0x381   :  { %v13662_v35 = vpop.eup %11550 }
 0x382   :  { %v3428_v57 = vsel %vm1720_vm0, %v13662_v35, 0.0 }
 0x384   :  { %3420 = vadd.xlane.f32.xlu2 %v3419_v61 }
 0x38c   :  { %3429 = vadd.xlane.f32.xlu2 %v3428_v57 }
 0x38f   :  { %1684 = vrot.lane.b32.xlu0 %v13036_v50, %s11911_s9 }
 0x392   :  { %v3340_v24 = vpop.xlane.xlu2 %3339 }
 0x393   :  { %v3364_v11 = vsub.f32 %v13561_v7, %v3340_v24 }
 0x395   :  { %v3391_v62 = vmul.f32 1.442695, %v3364_v11 }
 0x397   :  { %11552 = vpow2.f32 %v3391_v62 }
 0x399   :  { %v3409_v22 = vpop.xlane.xlu0 %3408 }
 0x39a   :  { %11554 = vrcp.f32 %v3409_v22  ;;  %v3490_v34 = vand.u32 2147483648, %v3409_v22  ;;  %v3488_v43 = vand.u32 2147483647, %v3409_v22  ;;  %vm3484_vm10 = vweird.f32 %v3409_v22 }
 0x39c   :  { %v3491_v13 = vor.u32 1.1754944e-38, %v3490_v34  ;;  %vm3489_vm12 = vcmp.eq.f32.partialorder %v3488_v43, 8.507059e+37 }
 0x39d   :  { %v13669_v40 = vpop.eup %11552 }
 0x39e   :  { %v13673_v55 = vpop.xlane.xlu2 %3342  ;;  %v3434_v37 = vsel %vm1720_vm0, %v13669_v40, 0.0 }
 0x39f   :  { %3435 = vadd.xlane.f32.xlu1 %v3434_v37 }
 0x3a0   :  { %v11555_v49 = vpop.eup %11554 }
 0x3a1   :  { %v3480_v45 = vmul.f32 %v11555_v49, %v3409_v22  ;;  %vm3485_vm9 = vweird.f32 %v11555_v49 }
 0x3a2   :  { %vm3486_vm11 = vmor %vm3484_vm10, %vm3485_vm9 }
 0x3a3   :  { %v3481_v58 = vsub.f32 1.0, %v3480_v45 }
 0x3a5   :  { %v3337_v16 = vpop.xlane.xlu1 %3336  ;;  %v3482_v7 = vmul.f32 %v11555_v49, %v3481_v58 }
 0x3a6   :  { %v3363_v33 = vsub.f32 %v13574_v36, %v3337_v16  ;;  %v3412_v0 = vpop.xlane.xlu2 %3411 }
 0x3a7   :  { %11556 = vrcp.f32 %v3412_v0  ;;  %v3483_v48 = vadd.f32 %v11555_v49, %v3482_v7  ;;  %v3503_v45 = vand.u32 2147483647, %v3412_v0  ;;  %vm3499_vm14 = vweird.f32 %v3412_v0 }
 0x3a8   :  { %v3389_v42 = vmul.f32 1.442695, %v3363_v33  ;;  %v13697_v33 = vand.u32 4294901760, %v13671_v30 }
 0x3a9   :  { %v3487_v1 = vsel %vm3486_vm11, %v11555_v49, %v3483_v48  ;;  %v3505_v49 = vand.u32 2147483648, %v3412_v0  ;;  %vm3504_vm1 = vcmp.eq.f32.partialorder %v3503_v45, 8.507059e+37 }
 0x3aa   :  { %11558 = vpow2.f32 %v3389_v42  ;;  %v3492_v26 = vsel %vm3489_vm12, %v3491_v13, %v3487_v1 }
 0x3ab   :  { %v3493_v29 = vmul.f32 %v13566_v3, %v3492_v26  ;;  %v3506_v43 = vor.u32 1.1754944e-38, %v3505_v49 }
 0x3ad   :  { %v11557_v38 = vpop.eup %11556  ;;  %v3346_v61 = vpop.xlane.xlu1 %3345  ;;  %v3886_v36 = vsel %vm1720_vm0, %v3493_v29, 0 }
 0x3ae   :  { %v3495_v57 = vmul.f32 %v11557_v38, %v3412_v0  ;;  %v3366_v24 = vsub.f32 %v13582_v31, %v3346_v61  ;;  %v13683_v37 = vand.u32 4294901760, %v3886_v36  ;;  %vm3500_vm13 = vweird.f32 %v11557_v38 }
 0x3af   :  { %v13691_v31 = vand.u32 4294901760, %v13471_v56  ;;  %vm3501_vm15 = vmor %vm3499_vm14, %vm3500_vm13 }
 0x3b0   :  { %v13681_v11 = vpop.eup %11558  ;;  %v3496_v62 = vsub.f32 1.0, %v3495_v57  ;;  %v3395_v22 = vmul.f32 1.442695, %v3366_v24  ;;  %3953 = vmatmul.f32.vlgmr.msrb.gmra.mxu3 %v13683_v37  ;;  %v3910_v3 = vsub.f32 %v3886_v36, %v13683_v37 }
 0x3b1   :  { %v3431_v58 = vsel %vm1720_vm0, %v13681_v11, 0.0  ;;  %4203 = vmatpush.msrb.mxu3 %v13592_v14  ;;  %v13706_v1 = vsub.f32 %v13471_v56, %v13691_v31 }
 0x3b2   :  { %v3497_v34 = vmul.f32 %v11557_v38, %v3496_v62  ;;  %11560 = vpow2.f32 %v3395_v22  ;;  %3432 = vadd.xlane.f32.xlu2 %v3431_v58  ;;  %3983 = vmatmul.f32.vlgmr.msrb.gmra.mxu0 %v3910_v3  ;;  %v3911_v7 = vand.u32 4294901760, %v3910_v3  ;;  %v346_v62 = vadd.f32 %v12784_v5, %v12758_v6 }
 0x3b3   :  { %4205 = vmatpush.msrb.mxu3 %v13596_v51  ;;  %4236 = vmatpush.msrb.mxu0 %v4138_v12  ;;  %v804_v22 = vadd.f32 %v12908_v28, %v12904_v54  ;;  %v13745_v54 = vpop.permute.xlu0 %1672 }
 0x3b4   :  { %v3498_v16 = vadd.f32 %v11557_v38, %v3497_v34  ;;  %4013 = vmatmul.f32.vlgmr.msrb.gmra.mxu1 %v3911_v7  ;;  %v3912_v42 = vsub.f32 %v3910_v3, %v3911_v7  ;;  %v414_v49 = vadd.f32 %v12830_v23, %v346_v62  ;;  %v17553_v7 = vld [vmem:[#allocation20_spill] sm:$0xff] }
 0x3b5   :  { %4240 = vmatpush.msrb.mxu0 %v4144_v39  ;;  %4265 = vmatpush.msrb.mxu1 %v13592_v14  ;;  %v13716_v14 = vsub.f32 %v13671_v30, %v13697_v33  ;;  %v873_v45 = vadd.f32 %v12982_v8, %v804_v22  ;;  %v17551_v8 = vld [vmem:[#allocation24_spill] sm:$0xff] }
 0x3b6   :  { %v3502_v48 = vsel %vm3501_vm15, %v11557_v38, %v3498_v16  ;;  %v3913_v12 = vand.u32 4294901760, %v3912_v42  ;;  %v4334_v38 = vand.u32 4294901760, %v13706_v1  ;;  %v470_v5 = vadd.f32 %v12836_v10, %v414_v49  ;;  %v17558_v49 = vld [vmem:[#allocation25_spill] sm:$0xff] }
 0x3b7   :  { %v3507_v13 = vsel %vm3504_vm1, %v3506_v43, %v3502_v48  ;;  %4267 = vmatpush.msrb.mxu1 %v13596_v51  ;;  %v4340_v51 = vand.u32 4294901760, %v13716_v14  ;;  %v930_v58 = vadd.f32 %v12984_v52, %v873_v45  ;;  %v350_v52 = vadd.f32 %v12809_v19, %v17551_v8  ;;  %v17554_v43 = vld [vmem:[#allocation22_spill] sm:$0xff]  ;;  %v17557_v45 = vld [vmem:[#allocation21_spill] sm:$0xff] }
 0x3b8   :  { %v13702_v0 = vpop.eup %11560  ;;  %1686 = vrot.lane.b32.xlu1 %v13049_v41, %s11911_s9  ;;  %v3508_v26 = vmul.f32 %v13576_v17, %v3507_v13  ;;  %3914 = vmatmul.f32.vlgmr.msrb.gmra.mxu2 %v3913_v12  ;;  %v4335_v30 = vsub.f32 %v13706_v1, %v4334_v38  ;;  %v553_v23 = vadd.f32 %v12883_v2, %v470_v5 }
 0x3b9   :  { %v3440_v29 = vsel %vm1720_vm0, %v13702_v0, 0.0  ;;  %4173 = vmatpush.msrb.mxu2 %v13601_v18  ;;  %v4341_v18 = vsub.f32 %v13716_v14, %v4340_v51  ;;  %v1011_v6 = vadd.f32 %v12998_v60, %v930_v58  ;;  %v419_v2 = vadd.f32 %v17553_v7, %v350_v52 }
 0x3ba   :  { %3441 = vadd.xlane.f32.xlu0 %v3440_v29  ;;  %v3889_v56 = vsel %vm1720_vm0, %v3508_v26, 0  ;;  %v4336_v36 = vand.u32 4294901760, %v4335_v30  ;;  %v3365_v19 = vsub.f32 %v13570_v47, %v13673_v55  ;;  %v17555_v29 = vld [vmem:[#allocation26_spill] sm:$0xff]  ;;  %v800_v58 = vadd.f32 %v17558_v49, %v17557_v45 }
 0x3bb   :  { %v3917_v39 = vand.u32 4294901760, %v3889_v56  ;;  %4176 = vmatpush.msrb.mxu2 %v13608_v59  ;;  %v4342_v59 = vand.u32 4294901760, %v4341_v18  ;;  %v13750_v28 = vadd.f32 %v13002_v27, %v1011_v6  ;;  %v13763_v27 = vpop.permute.xlu2 %1674  ;;  %v476_v48 = vadd.f32 %v17554_v43, %v419_v2  ;;  %v17559_v6 = vld [vmem:[#allocation28_spill] sm:$0xff] }
 0x3bd   :  { %3957 = vmatmul.f32.gmra.mxu3 %v3917_v39  ;;  %v3918_v17 = vsub.f32 %v3889_v56, %v3917_v39  ;;  %v557_v56 = vadd.f32 %v17555_v29, %v476_v48 }
 0x3bf   :  { %3988 = vmatmul.f32.gmra.mxu0 %v3918_v17  ;;  %v3919_v61 = vand.u32 4294901760, %v3918_v17 }
 0x3c1   :  { %4019 = vmatmul.f32.gmra.mxu1 %v3919_v61  ;;  %v3920_v57 = vsub.f32 %v3918_v17, %v3919_v61  ;;  %v3393_v17 = vmul.f32 1.442695, %v3365_v19 }
 0x3c3   :  { %v3921_v24 = vand.u32 4294901760, %v3920_v57 }
 0x3c5   :  { %3922 = vmatmul.f32.gmra.mxu2 %v3921_v24  ;;  %4073 = vmatmul.f32.vlgmr.msra.gmra.mxu3 %v13683_v37 }
 0x3c6   :  { %4337 = vmatpush.msra.mxu3 %v4336_v36 }
 0x3c8   :  { %4343 = vmatpush.msra.mxu3 %v4342_v59 }
 0x3ca   :  { %1698 = vrot.lane.b32.xlu2 %v13049_v41, %s11912_s27 }
 0x3cd   :  { %4046 = vmatmul.f32.vlgmr.msra.gmra.mxu2 %v13683_v37  ;;  %4077 = vmatmul.f32.gmra.mxu3 %v3917_v39  ;;  %v17552_v37 = vld [vmem:[#allocation23_spill] sm:$0xff] }
 0x3ce   :  { %4298 = vmatpush.msra.mxu2 %v13691_v31  ;;  %1696 = vrot.lane.b32.xlu0 %v13036_v50, %s11912_s27  ;;  %v602_v10 = vadd.f32 %v17552_v37, %v553_v23  ;;  %v868_v23 = vadd.f32 %v17559_v6, %v800_v58 }
 0x3d0   :  { %4300 = vmatpush.msra.mxu2 %v13697_v33  ;;  %v13758_v16 = vmul.f32 0.25, %v602_v10 }
 0x3d5   :  { %4050 = vmatmul.f32.gmra.mxu2 %v3917_v39 }
 0x3d6   :  { %1582 = vrot.lane.b32.xlu0 %v13750_v28, %s11907_s11 }
 0x3d7   :  { %v3349_v34 = vpop.xlane.xlu0 %3348 }
 0x3d8   :  { %v3367_v60 = vsub.f32 %v13628_v25, %v3349_v34 }
 0x3da   :  { %v3397_v3 = vmul.f32 1.442695, %v3367_v60  ;;  %v17560_v60 = vld [vmem:[#allocation29_spill] sm:$0xff] }
 0x3dc   :  { %11562 = vpow2.f32 %v3397_v3  ;;  %v924_v3 = vadd.f32 %v17560_v60, %v868_v23 }
 0x3de   :  { %1520 = vrot.lane.b32.xlu0 %v13758_v16, %s11907_s11 }
 0x3df   :  { %v3352_v42 = vpop.xlane.xlu0 %3351 }
 0x3e0   :  { %v3368_v13 = vsub.f32 %v13634_v53, %v3352_v42  ;;  %v17556_v53 = vld [vmem:[#allocation27_spill] sm:$0xff] }
 0x3e1   :  { %v606_v55 = vadd.f32 %v17556_v53, %v557_v56 }
 0x3e2   :  { %v13769_v25 = vpop.xlane.xlu1 %3423  ;;  %v13771_v12 = vpop.eup %11562  ;;  %v3399_v26 = vmul.f32 1.442695, %v3368_v13 }
 0x3e3   :  { %11564 = vrcp.f32 %v13769_v25  ;;  %v3443_v39 = vsel %vm1720_vm0, %v13771_v12, 0.0  ;;  %v13784_v57 = vmul.f32 0.25, %v606_v55  ;;  %vm3559_vm8 = vweird.f32 %v13769_v25 }
 0x3e4   :  { %11566 = vpow2.f32 %v3399_v26  ;;  %3444 = vadd.xlane.f32.xlu1 %v3443_v39  ;;  %v17561_v26 = vld [vmem:[#allocation30_spill] sm:$0xff] }
 0x3e5   :  { %v1007_v29 = vadd.f32 %v17561_v26, %v924_v3 }
 0x3e6   :  { %1590 = vrot.lane.b32.xlu0 %v13750_v28, %s11908_s24 }
 0x3e7   :  { %v3415_v47 = vpop.xlane.xlu2 %3414 }
 0x3e8   :  { %11568 = vrcp.f32 %v3415_v47  ;;  %v3520_v52 = vand.u32 2147483648, %v3415_v47  ;;  %v3518_v34 = vand.u32 2147483647, %v3415_v47  ;;  %vm3514_vm3 = vweird.f32 %v3415_v47 }
 0x3e9   :  { %11570 = vpow2.f32 %v3393_v17  ;;  %v13780_v61 = vpop.eup %11564 }
 0x3ea   :  { %v13782_v30 = vpop.eup %11566  ;;  %v3555_v36 = vmul.f32 %v13780_v61, %v13769_v25  ;;  %v3521_v48 = vor.u32 1.1754944e-38, %v3520_v52  ;;  %vm3519_vm5 = vcmp.eq.f32.partialorder %v3518_v34, 8.507059e+37  ;;  %vm3560_vm6 = vweird.f32 %v13780_v61 }
 0x3eb   :  { %v3446_v18 = vsel %vm1720_vm0, %v13782_v30, 0.0  ;;  %vm13820_vm9 = vmor %vm3559_vm8, %vm3560_vm6  ;;  %v13839_v34 = vand.u32 4294901760, %v13745_v54 }
 0x3ec   :  { %3447 = vadd.xlane.f32.xlu1 %v3446_v18  ;;  %v3556_v8 = vsub.f32 1.0, %v3555_v36 }
 0x3ee   :  { %v11569_v24 = vpop.eup %11568  ;;  %1530 = vrot.lane.b32.xlu0 %v13784_v57, %s11908_s24  ;;  %v3557_v43 = vmul.f32 %v13780_v61, %v3556_v8  ;;  %v13810_v55 = vpop.xlane.xlu0 %3426  ;;  %v13826_v8 = vand.u32 4294901760, %v13763_v27 }
 0x3ef   :  { %v13792_v59 = vpop.eup %11570  ;;  %v3510_v62 = vmul.f32 %v11569_v24, %v3415_v47  ;;  %v3418_v22 = vpop.xlane.xlu2 %3417  ;;  %vm3515_vm2 = vweird.f32 %v11569_v24 }
 0x3f0   :  { %11572 = vrcp.f32 %v3418_v22  ;;  %v3437_v37 = vsel %vm1720_vm0, %v13792_v59, 0.0  ;;  %vm3516_vm4 = vmor %vm3514_vm3, %vm3515_vm2  ;;  %v3558_v47 = vadd.f32 %v13780_v61, %v3557_v43  ;;  %v3535_v53 = vand.u32 2147483648, %v3418_v22 }
 0x3f1   :  { %v3511_v5 = vsub.f32 1.0, %v3510_v62  ;;  %v17562_v62 = vld [vmem:[#allocation31_spill] sm:$0xff]  ;;  %vm3529_vm10 = vweird.f32 %v3418_v22 }
 0x3f2   :  { %v13814_v45 = vadd.f32 %v17562_v62, %v1007_v29  ;;  %v3536_v52 = vor.u32 1.1754944e-38, %v3535_v53 }
 0x3f3   :  { %v3512_v10 = vmul.f32 %v11569_v24, %v3511_v5  ;;  %3438 = vadd.xlane.f32.xlu2 %v3437_v37  ;;  %v3563_v5 = vand.u32 2147483647, %v13769_v25 }
 0x3f5   :  { %v3513_v7 = vadd.f32 %v11569_v24, %v3512_v10  ;;  %vm3564_vm13 = vcmp.eq.f32.partialorder %v3563_v5, 8.507059e+37 }
 0x3f6   :  { %v11573_v2 = vpop.eup %11572  ;;  %1536 = vrot.lane.b32.xlu0 %v13758_v16, %s11909_s25 }
 0x3f7   :  { %v3517_v42 = vsel %vm3516_vm4, %v11569_v24, %v3513_v7  ;;  %v3525_v19 = vmul.f32 %v11573_v2, %v3418_v22  ;;  %v13803_v13 = vpop.xlane.xlu2 %3420  ;;  %vm3530_vm7 = vweird.f32 %v11573_v2  ;;  %v3533_v24 = vand.u32 2147483647, %v3418_v22 }
 0x3f8   :  { %v3522_v56 = vsel %vm3519_vm5, %v3521_v48, %v3517_v42  ;;  %11574 = vrcp.f32 %v13803_v13  ;;  %vm3531_vm11 = vmor %vm3529_vm10, %vm3530_vm7  ;;  %v3550_v48 = vand.u32 2147483648, %v13803_v13  ;;  %v3548_v26 = vand.u32 2147483647, %v13803_v13 }
 0x3f9   :  { %v3523_v39 = vmul.f32 %v13644_v20, %v3522_v56  ;;  %v3526_v17 = vsub.f32 1.0, %v3525_v19  ;;  %v3565_v20 = vand.u32 2147483648, %v13769_v25  ;;  %11576 = vrcp.f32 %v13810_v55 }
 0x3fa   :  { %v3562_v25 = vsel %vm13820_vm9, %v13780_v61, %v3558_v47  ;;  %vm3534_vm12 = vcmp.eq.f32.partialorder %v3533_v24, 8.507059e+37  ;;  %vm3544_vm15 = vweird.f32 %v13803_v13  ;;  %vm3549_vm2 = vcmp.eq.f32.partialorder %v3548_v26, 8.507059e+37 }
 0x3fb   :  { %v3527_v18 = vmul.f32 %v11573_v2, %v3526_v17  ;;  %v4082_v36 = vsel %vm1720_vm0, %v3523_v39, 0  ;;  %v3566_v60 = vor.u32 1.1754944e-38, %v3565_v20  ;;  %vm3574_vm4 = vweird.f32 %v13810_v55 }
 0x3fc   :  { %v13818_v49 = vand.u32 4294901760, %v4082_v36 }
 0x3fd   :  { %v3528_v6 = vadd.f32 %v11573_v2, %v3527_v18  ;;  %v3567_v43 = vsel %vm3564_vm13, %v3566_v60, %v3562_v25 }
 0x3fe   :  { %v11575_v23 = vpop.eup %11574  ;;  %4149 = vmatmul.f32.vlgmr.msra.gmra.mxu1 %v13818_v49  ;;  %1604 = vrot.lane.b32.xlu0 %v13814_v45, %s11910_s26  ;;  %v4106_v37 = vsub.f32 %v4082_v36, %v13818_v49 }
 0x3ff   :  { %v3532_v22 = vsel %vm3531_vm11, %v11573_v2, %v3528_v6  ;;  %v3540_v10 = vmul.f32 %v11575_v23, %v13803_v13  ;;  %4399 = vmatpush.msra.mxu1 %v13691_v31  ;;  %v13846_v2 = vsub.f32 %v13763_v27, %v13826_v8  ;;  %vm3545_vm14 = vweird.f32 %v11575_v23  ;;  %v13851_v29 = vpop.xlane.xlu2 %3429  ;;  %v13855_v56 = vpop.eup %11576 }
 0x400   :  { %v3537_v3 = vsel %vm3534_vm12, %v3536_v52, %v3532_v22  ;;  %4179 = vmatmul.f32.vlgmr.msrb.gmra.mxu2 %v4106_v37  ;;  %v4107_v61 = vand.u32 4294901760, %v4106_v37  ;;  %v13859_v27 = vsub.f32 %v13745_v54, %v13839_v34  ;;  %vm3546_vm1 = vmor %vm3544_vm15, %vm3545_vm14  ;;  %11578 = vrcp.f32 %v13851_v29 }
 0x401   :  { %v3541_v7 = vsub.f32 1.0, %v3540_v10  ;;  %4401 = vmatpush.msra.mxu1 %v13697_v33  ;;  %4432 = vmatpush.msrb.mxu2 %v4334_v38  ;;  %v3538_v42 = vmul.f32 %v13649_v32, %v3537_v3  ;;  %v4530_v53 = vand.u32 4294901760, %v13846_v2  ;;  %v3570_v54 = vmul.f32 %v13855_v56, %v13810_v55 }
 0x402   :  { %4209 = vmatmul.f32.vlgmr.msrb.gmra.mxu3 %v4107_v61  ;;  %v4108_v38 = vsub.f32 %v4106_v37, %v4107_v61  ;;  %v4536_v24 = vand.u32 4294901760, %v13859_v27  ;;  %vm3575_vm3 = vweird.f32 %v13855_v56  ;;  %vm3589_vm8 = vweird.f32 %v13851_v29 }
 0x403   :  { %v3542_v19 = vmul.f32 %v11575_v23, %v3541_v7  ;;  %4436 = vmatpush.msrb.mxu2 %v4340_v51  ;;  %4461 = vmatpush.msrb.mxu3 %v13691_v31  ;;  %v4085_v32 = vsel %vm1720_vm0, %v3538_v42, 0  ;;  %v3551_v51 = vor.u32 1.1754944e-38, %v3550_v48  ;;  %v3568_v31 = vmul.f32 %v13639_v63, %v3567_v43  ;;  %vm13926_vm5 = vmor %vm3574_vm4, %vm3575_vm3 }
 0x404   :  { %v4109_v17 = vand.u32 4294901760, %v4108_v38  ;;  %v13864_v47 = vand.u32 4294901760, %v4085_v32  ;;  %v3571_v62 = vsub.f32 1.0, %v3570_v54  ;;  %v3580_v43 = vand.u32 2147483648, %v13810_v55 }
 0x405   :  { %v3543_v39 = vadd.f32 %v11575_v23, %v3542_v19  ;;  %4463 = vmatpush.msrb.mxu3 %v13697_v33  ;;  %1710 = vrot.lane.b32.xlu1 %v13049_v41, %s11906_s23  ;;  %v4531_v33 = vsub.f32 %v13846_v2, %v4530_v53  ;;  %v4281_v58 = vsel %vm1720_vm0, %v3568_v31, 0  ;;  %v3578_v19 = vand.u32 2147483647, %v13810_v55 }
 0x406   :  { %4110 = vmatmul.f32.vlgmr.msra.gmra.mxu0 %v4109_v17  ;;  %4153 = vmatmul.f32.gmra.mxu1 %v13864_v47  ;;  %v4114_v18 = vsub.f32 %v4085_v32, %v13864_v47  ;;  %v13890_v5 = vpop.eup %11578  ;;  %v13902_v52 = vand.u32 4294901760, %v4281_v58  ;;  %v3572_v37 = vmul.f32 %v13855_v56, %v3571_v62  ;;  %v17567_v32 = vld [vmem:[#allocation34_spill] sm:$0xff]  ;;  %v3581_v31 = vor.u32 1.1754944e-38, %v3580_v43 }
 0x407   :  { %v3547_v13 = vsel %vm3546_vm1, %v11575_v23, %v3543_v39  ;;  %4369 = vmatpush.msra.mxu0 %v13706_v1  ;;  %1614 = vrot.lane.b32.xlu0 %v13750_v28, %s11911_s9  ;;  %v3585_v25 = vmul.f32 %v13890_v5, %v13851_v29  ;;  %v17568_v39 = vld [vmem:[#allocation35_spill] sm:$0xff]  ;;  %vm3579_vm6 = vcmp.eq.f32.partialorder %v3578_v19, 8.507059e+37  ;;  %vm3590_vm7 = vweird.f32 %v13890_v5  ;;  %v17575_v19 = vld [vmem:[#allocation33_spill] sm:$0xff] }
 0x408   :  { %v3552_v36 = vsel %vm3549_vm2, %v3551_v51, %v3547_v13  ;;  %4184 = vmatmul.f32.gmra.mxu2 %v4114_v18  ;;  %v4115_v63 = vand.u32 4294901760, %v4114_v18  ;;  %v13913_v3 = vsub.f32 %v4281_v58, %v13902_v52  ;;  %v3573_v7 = vadd.f32 %v13855_v56, %v3572_v37  ;;  %v17569_v13 = vld [vmem:[#allocation38_spill] sm:$0xff]  ;;  %vm3591_vm9 = vmor %vm3589_vm8, %vm3590_vm7 }
 0x409   :  { %v3553_v41 = vmul.f32 %v13658_v9, %v3552_v36  ;;  %4372 = vmatpush.msra.mxu0 %v13716_v14  ;;  %v4537_v9 = vsub.f32 %v13859_v27, %v4536_v24  ;;  %v4532_v14 = vand.u32 4294901760, %v4531_v33  ;;  %v3586_v61 = vsub.f32 1.0, %v3585_v25 }
 0x40a   :  { %4215 = vmatmul.f32.gmra.mxu3 %v4115_v63  ;;  %v4116_v20 = vsub.f32 %v4114_v18, %v4115_v63  ;;  %v4311_v38 = vand.u32 4294901760, %v13913_v3  ;;  %v1254_v17 = vadd.f32 %v17568_v39, %v17567_v32  ;;  %v3577_v51 = vsel %vm13926_vm5, %v13855_v56, %v3573_v7 }
 0x40b   :  { %1708 = vrot.lane.b32.xlu2 %v13036_v50, %s11906_s23  ;;  %v4278_v1 = vsel %vm1720_vm0, %v3553_v41, 0  ;;  %v4538_v22 = vand.u32 4294901760, %v4537_v9  ;;  %v3587_v55 = vmul.f32 %v13890_v5, %v3586_v61  ;;  %v3582_v54 = vsel %vm3579_vm6, %v3581_v31, %v3577_v51 }
 0x40c   :  { %v13895_v6 = vand.u32 4294901760, %v4278_v1  ;;  %v4117_v23 = vand.u32 4294901760, %v4116_v20  ;;  %v4312_v56 = vsub.f32 %v13913_v3, %v4311_v38  ;;  %v1323_v18 = vadd.f32 %v17569_v13, %v1254_v17  ;;  %v17570_v20 = vld [vmem:[#allocation39_spill] sm:$0xff] }
 0x40d   :  { %1528 = vrot.lane.b32.xlu1 %v13758_v16, %s11908_s24  ;;  %v3595_v36 = vand.u32 2147483648, %v13851_v29  ;;  %v3583_v63 = vmul.f32 %v13651_v4, %v3582_v54  ;;  %v3593_v33 = vand.u32 2147483647, %v13851_v29 }
 0x40e   :  { %v13900_v50 = vsub.f32 %v4278_v1, %v13895_v6  ;;  %4118 = vmatmul.f32.gmra.mxu0 %v4117_v23  ;;  %4269 = vmatmul.f32.vlgmr.msrb.gmra.mxu1 %v13818_v49  ;;  %v4313_v62 = vand.u32 4294901760, %v4312_v56  ;;  %v1380_v1 = vadd.f32 %v17570_v20, %v1323_v18 }
 0x40f   :  { %4533 = vmatpush.msrb.mxu1 %v4532_v14  ;;  %1554 = vrot.lane.b32.xlu0 %v13784_v57, %s11911_s9  ;;  %v3596_v9 = vor.u32 1.1754944e-38, %v3595_v36  ;;  %vm3594_vm10 = vcmp.eq.f32.partialorder %v3593_v33, 8.507059e+37  ;;  %v4474_v29 = vsel %vm1720_vm0, %v3583_v63, 0 }
 0x410   :  { %v4303_v10 = vand.u32 4294901760, %v13900_v50  ;;  %v13978_v37 = vand.u32 4294901760, %v4474_v29 }
 0x411   :  { %4539 = vmatpush.msrb.mxu1 %v4538_v22 }
 0x412   :  { %v4304_v60 = vsub.f32 %v13900_v50, %v4303_v10  ;;  %4345 = vmatmul.f32.vlgmr.msra.gmra.mxu3 %v13895_v6  ;;  %v13921_v48 = vpop.xlane.xlu1 %3435 }
 0x413   :  { %1580 = vrot.lane.b32.xlu2 %v13814_v45, %s11907_s11  ;;  %4595 = vmatpush.msra.mxu3 %v13826_v8  ;;  %11580 = vrcp.f32 %v13921_v48  ;;  %vm3619_vm12 = vweird.f32 %v13921_v48  ;;  %v3623_v26 = vand.u32 2147483647, %v13921_v48 }
 0x414   :  { %v4305_v42 = vand.u32 4294901760, %v4304_v60 }
 0x415   :  { %4597 = vmatpush.msra.mxu3 %v13839_v34  ;;  %1596 = vrot.lane.b32.xlu1 %v13814_v45, %s11909_s25  ;;  %vm3624_vm15 = vcmp.eq.f32.partialorder %v3623_v26, 8.507059e+37 }
 0x416   :  { %4242 = vmatmul.f32.vlgmr.msrb.gmra.mxu0 %v13818_v49  ;;  %4273 = vmatmul.f32.gmra.mxu1 %v13864_v47  ;;  %v3588_v49 = vadd.f32 %v13890_v5, %v3587_v55 }
 0x417   :  { %4306 = vmatmul.f32.vlgmr.msra.gmra.mxu2 %v4305_v42  ;;  %4494 = vmatpush.msrb.mxu0 %v13826_v8  ;;  %v3625_v42 = vand.u32 2147483648, %v13921_v48 }
 0x418   :  { %4565 = vmatpush.msra.mxu2 %v13846_v2  ;;  %1560 = vrot.lane.b32.xlu0 %v13758_v16, %s11912_s27  ;;  %v3592_v58 = vsel %vm3591_vm9, %v13890_v5, %v3588_v49  ;;  %v1461_v5 = vadd.f32 %v13478_v44, %v1380_v1 }
 0x419   :  { %4496 = vmatpush.msrb.mxu0 %v13839_v34  ;;  %v13957_v41 = vpop.eup %11580  ;;  %v3597_v23 = vsel %vm3594_vm10, %v3596_v9, %v3592_v58  ;;  %v3626_v56 = vor.u32 1.1754944e-38, %v3625_v42  ;;  %v17574_v42 = vld [vmem:[#allocation32_spill] sm:$0xff] }
 0x41a   :  { %4568 = vmatpush.msra.mxu2 %v13859_v27  ;;  %4349 = vmatmul.f32.gmra.mxu3 %v13902_v52  ;;  %v3615_v4 = vmul.f32 %v13957_v41, %v13921_v48  ;;  %v3598_v25 = vmul.f32 %v13662_v35, %v3597_v23  ;;  %v13989_v44 = vadd.f32 %v13484_v46, %v1461_v5  ;;  %vm3620_vm11 = vweird.f32 %v13957_v41 }
 0x41b   :  { %1522 = vrot.lane.b32.xlu2 %v13784_v57, %s11907_s11  ;;  %v13997_v35 = vsub.f32 %v4474_v29, %v13978_v37  ;;  %vm14025_vm13 = vmor %vm3619_vm12, %vm3620_vm11  ;;  %v1250_v26 = vadd.f32 %v17575_v19, %v17574_v42 }
 0x41c   :  { %v3616_v14 = vsub.f32 1.0, %v3615_v4 }
 0x41d   :  { %1606 = vrot.lane.b32.xlu1 %v13750_v28, %s11910_s26 }
 0x41e   :  { %4246 = vmatmul.f32.gmra.mxu0 %v13864_v47  ;;  %4405 = vmatmul.f32.vlgmr.msra.gmra.mxu1 %v4303_v10  ;;  %v1685_v47 = vpop.permute.xlu0 %1684  ;;  %v4477_v10 = vsel %vm1720_vm0, %v3598_v25, 0 }
 0x41f   :  { %4314 = vmatmul.f32.gmra.mxu2 %v4313_v62  ;;  %4657 = vmatpush.msra.mxu1 %v13826_v8  ;;  %v13983_v22 = vand.u32 4294901760, %v1685_v47  ;;  %v14015_v7 = vand.u32 4294901760, %v4477_v10 }
 0x420   :  { %1628 = vrot.lane.b32.xlu0 %v13814_v45, %s11906_s23 }
 0x421   :  { %4659 = vmatpush.msra.mxu1 %v13839_v34  ;;  %v3617_v34 = vmul.f32 %v13957_v41, %v3616_v14  ;;  %v14003_v46 = vsub.f32 %v1685_v47, %v13983_v22  ;;  %v4506_v55 = vsub.f32 %v4477_v10, %v14015_v7 }
 0x422   :  { %4465 = vmatmul.f32.vlgmr.msrb.gmra.mxu3 %v13895_v6 }
 0x423   :  { %1588 = vrot.lane.b32.xlu2 %v13814_v45, %s11908_s24  ;;  %v4732_v43 = vand.u32 4294901760, %v14003_v46  ;;  %v4507_v62 = vand.u32 4294901760, %v4506_v55 }
 0x425   :  { %v13980_v8 = vpop.xlane.xlu2 %3432  ;;  %1546 = vrot.lane.b32.xlu1 %v13784_v57, %s11910_s26  ;;  %v4508_v23 = vsub.f32 %v4506_v55, %v4507_v62 }
 0x426   :  { %11582 = vrcp.f32 %v13980_v8  ;;  %4375 = vmatmul.f32.vlgmr.msra.gmra.mxu0 %v13900_v50  ;;  %4411 = vmatmul.f32.gmra.mxu1 %v4311_v38  ;;  %v3610_v51 = vand.u32 2147483648, %v13980_v8  ;;  %vm3604_vm1 = vweird.f32 %v13980_v8 }
 0x427   :  { %4438 = vmatmul.f32.vlgmr.msrb.gmra.mxu2 %v13895_v6  ;;  %4628 = vmatpush.msra.mxu0 %v4530_v53  ;;  %v3618_v53 = vadd.f32 %v13957_v41, %v3617_v34  ;;  %v4499_v6 = vand.u32 4294901760, %v13997_v35 }
 0x428   :  { %1642 = vrot.lane.b32.xlu0 %v13989_v44, %s11907_s11 }
 0x429   :  { %4632 = vmatpush.msra.mxu0 %v4536_v24  ;;  %v3622_v17 = vsel %vm14025_vm13, %v13957_v41, %v3618_v53  ;;  %v4500_v48 = vsub.f32 %v13997_v35, %v4499_v6  ;;  %v3611_v41 = vor.u32 1.1754944e-38, %v3610_v51 }
 0x42a   :  { %v1687_v50 = vpop.permute.xlu1 %1686  ;;  %4469 = vmatmul.f32.gmra.mxu3 %v13902_v52  ;;  %v3627_v36 = vsel %vm3624_vm15, %v3626_v56, %v3622_v17 }
 0x42b   :  { %v14007_v60 = vand.u32 4294901760, %v1687_v50  ;;  %1598 = vrot.lane.b32.xlu2 %v13750_v28, %s11909_s25  ;;  %v4501_v33 = vand.u32 4294901760, %v4500_v48  ;;  %v3628_v4 = vmul.f32 %v13669_v40, %v3627_v36  ;;  %v14111_v48 = vpop.f32.mrf.mxu2 }
 0x42c   :  { %v11583_v2 = vpop.eup %11582  ;;  %17580 = vst [vmem:[#allocation26_spill] sm:$0xff] %v14111_v48 }
 0x42d   :  { %v3600_v27 = vmul.f32 %v11583_v2, %v13980_v8  ;;  %v4725_v24 = vsub.f32 %v1687_v50, %v14007_v60  ;;  %4690 = vmatpush.msrb.mxu2 %v14007_v60  ;;  %v1699_v61 = vpop.permute.xlu2 %1698  ;;  %1552 = vrot.lane.b32.xlu1 %v13758_v16, %s11911_s9  ;;  %vm3605_vm14 = vweird.f32 %v11583_v2  ;;  %v14058_v29 = vpop.xlane.xlu0 %3441  ;;  %v4673_v40 = vsel %vm1720_vm0, %v3628_v4, 0 }
 0x42e   :  { %v14030_v39 = vand.u32 4294901760, %v1699_v61  ;;  %4380 = vmatmul.f32.gmra.mxu0 %v13913_v3  ;;  %4541 = vmatmul.f32.vlgmr.msrb.gmra.mxu1 %v13978_v37  ;;  %v3608_v3 = vand.u32 2147483647, %v13980_v8  ;;  %vm3606_vm2 = vmor %vm3604_vm1, %vm3605_vm14  ;;  %v4509_v8 = vand.u32 4294901760, %v4508_v23  ;;  %11584 = vrcp.f32 %v14058_v29 }
 0x42f   :  { %v3601_v38 = vsub.f32 1.0, %v3600_v27  ;;  %v4726_v32 = vand.u32 4294901760, %v4725_v24  ;;  %4442 = vmatmul.f32.gmra.mxu2 %v13902_v52  ;;  %4791 = vmatpush.msrb.mxu1 %v14007_v60  ;;  %v4733_v52 = vsub.f32 %v14003_v46, %v4732_v43  ;;  %vm3649_vm5 = vweird.f32 %v14058_v29 }
 0x430   :  { %4692 = vmatpush.msrb.mxu2 %v13983_v22  ;;  %v14045_v13 = vsub.f32 %v1699_v61, %v14030_v39  ;;  %vm3609_vm3 = vcmp.eq.f32.partialorder %v3608_v3, 8.507059e+37 }
 0x431   :  { %v3602_v31 = vmul.f32 %v11583_v2, %v3601_v38  ;;  %v4727_v54 = vsub.f32 %v4725_v24, %v4726_v32  ;;  %4793 = vmatpush.msrb.mxu1 %v13983_v22  ;;  %v4734_v9 = vand.u32 4294901760, %v4733_v52  ;;  %v14100_v38 = vpop.f32.mrf.mxu0 }
 0x432   :  { %4601 = vmatmul.f32.vlgmr.msra.gmra.mxu3 %v4499_v6  ;;  %v4922_v1 = vand.u32 4294901760, %v14045_v13  ;;  %17576 = vst [vmem:[#allocation23_spill] sm:$0xff] %v14100_v38 }
 0x433   :  { %v3603_v18 = vadd.f32 %v11583_v2, %v3602_v31  ;;  %v4728_v49 = vand.u32 4294901760, %v4727_v54  ;;  %1538 = vrot.lane.b32.xlu2 %v13784_v57, %s11909_s25  ;;  %v17581_v31 = vld [vmem:[#allocation37_spill] sm:$0xff] }
 0x435   :  { %v3607_v63 = vsel %vm3606_vm2, %v11583_v2, %v3603_v18  ;;  %4729 = vmatpush.msrb.mxu3 %v4728_v49  ;;  %1620 = vrot.lane.b32.xlu1 %v13814_v45, %s11912_s27 }
 0x436   :  { %v3612_v20 = vsel %vm3609_vm3, %v3611_v41, %v3607_v63  ;;  %4502 = vmatmul.f32.vlgmr.msrb.gmra.mxu0 %v4501_v33  ;;  %4545 = vmatmul.f32.gmra.mxu1 %v14015_v7 }
 0x437   :  { %v3613_v58 = vmul.f32 %v13681_v11, %v3612_v20  ;;  %4571 = vmatmul.f32.vlgmr.msra.gmra.mxu2 %v13997_v35  ;;  %4761 = vmatpush.msrb.mxu0 %v4725_v24  ;;  %v4923_v11 = vsub.f32 %v14045_v13, %v4922_v1  ;;  %v14073_v35 = vand.u32 4294901760, %v4673_v40 }
 0x438   :  { %4824 = vmatpush.msra.mxu2 %v4726_v32  ;;  %4735 = vmatpush.msrb.mxu3 %v4734_v9  ;;  %v17577_v32 = vld [vmem:[#allocation36_spill] sm:$0xff] }
 0x439   :  { %v4670_v5 = vsel %vm1720_vm0, %v3613_v58, 0  ;;  %4764 = vmatpush.msrb.mxu0 %v14003_v46  ;;  %v4924_v25 = vand.u32 4294901760, %v4923_v11  ;;  %v4702_v50 = vsub.f32 %v4673_v40, %v14073_v35  ;;  %v1318_v17 = vadd.f32 %v17577_v32, %v1250_v26 }
 0x43a   :  { %4853 = vmatpush.msra.mxu3 %v14007_v60  ;;  %v4693_v47 = vand.u32 4294901760, %v4670_v5  ;;  %4828 = vmatpush.msra.mxu2 %v4732_v43  ;;  %v14089_v43 = vpop.f32.mrf.mxu1 }
 0x43b   :  { %4607 = vmatmul.f32.gmra.mxu3 %v4507_v62  ;;  %1544 = vrot.lane.b32.xlu2 %v13758_v16, %s11910_s26  ;;  %v4703_v6 = vand.u32 4294901760, %v4702_v50  ;;  %17573 = vst [vmem:[#allocation24_spill] sm:$0xff] %v14089_v43  ;;  %v1374_v3 = vadd.f32 %v17581_v31, %v1318_v17 }
 0x43c   :  { %4855 = vmatpush.msra.mxu3 %v13983_v22  ;;  %v4694_v14 = vsub.f32 %v4670_v5, %v4693_v47  ;;  %v3655_v5 = vand.u32 2147483648, %v14058_v29 }
 0x43d   :  { %1630 = vrot.lane.b32.xlu1 %v13750_v28, %s11906_s23  ;;  %v4704_v61 = vsub.f32 %v4702_v50, %v4703_v6  ;;  %v1457_v56 = vadd.f32 %v13461_v21, %v1374_v3  ;;  %v14132_v21 = vpop.f32.mrf.mxu2 }
 0x43e   :  { %v4695_v34 = vand.u32 4294901760, %v4694_v14  ;;  %4510 = vmatmul.f32.gmra.mxu0 %v4509_v8  ;;  %4661 = vmatmul.f32.vlgmr.msra.gmra.mxu1 %v13978_v37  ;;  %17585 = vst [vmem:[#allocation28_spill] sm:$0xff] %v14132_v21 }
 0x43f   :  { %4576 = vmatmul.f32.gmra.mxu2 %v4506_v55  ;;  %4925 = vmatpush.msra.mxu1 %v4924_v25  ;;  %v11585_v55 = vpop.eup %11584  ;;  %v14126_v41 = vadd.f32 %v13463_v15, %v1457_v56 }
 0x440   :  { %v1697_v10 = vpop.permute.xlu0 %1696  ;;  %v4696_v22 = vsub.f32 %v4694_v14, %v4695_v34  ;;  %v3645_v54 = vmul.f32 %v11585_v55, %v14058_v29  ;;  %vm3650_vm4 = vweird.f32 %v11585_v55 }
 0x441   :  { %v4887_v46 = vand.u32 4294901760, %v1697_v10  ;;  %vm3651_vm6 = vmor %vm3649_vm5, %vm3650_vm4 }
 0x442   :  { %v4697_v53 = vand.u32 4294901760, %v4696_v22  ;;  %v3646_v36 = vsub.f32 1.0, %v3645_v54 }
 0x443   :  { %v4927_v60 = vsub.f32 %v1697_v10, %v4887_v46  ;;  %4737 = vmatmul.f32.vlgmr.msrb.gmra.mxu3 %v4693_v47  ;;  %1612 = vrot.lane.b32.xlu2 %v13814_v45, %s11911_s9 }
 0x444   :  { %4987 = vmatpush.msrb.mxu3 %v14030_v39  ;;  %v3647_v20 = vmul.f32 %v11585_v55, %v3646_v36 }
 0x445   :  { %v4928_v2 = vand.u32 4294901760, %v4927_v60  ;;  %1570 = vrot.lane.b32.xlu1 %v13784_v57, %s11906_s23  ;;  %v14147_v40 = vpop.f32.mrf.mxu2 }
 0x446   :  { %4989 = vmatpush.msrb.mxu3 %v4887_v46  ;;  %4634 = vmatmul.f32.vlgmr.msra.gmra.mxu0 %v13978_v37  ;;  %v4705_v37 = vand.u32 4294901760, %v4704_v61  ;;  %v3648_v23 = vadd.f32 %v11585_v55, %v3647_v20 }
 0x447   :  { %4665 = vmatmul.f32.gmra.mxu1 %v14015_v7  ;;  %v4929_v27 = vsub.f32 %v4927_v60, %v4928_v2  ;;  %4698 = vmatmul.f32.vlgmr.msrb.gmra.mxu2 %v4697_v53 }
 0x448   :  { %4886 = vmatpush.msra.mxu0 %v14030_v39  ;;  %4957 = vmatpush.msrb.mxu2 %v14045_v13  ;;  %v14119_v13 = vpop.f32.mrf.mxu0 }
 0x449   :  { %v4930_v24 = vand.u32 4294901760, %v4929_v27  ;;  %17582 = vst [vmem:[#allocation27_spill] sm:$0xff] %v14119_v13 }
 0x44a   :  { %4888 = vmatpush.msra.mxu0 %v4887_v46  ;;  %4960 = vmatpush.msrb.mxu2 %v4927_v60 }
 0x44b   :  { %4741 = vmatmul.f32.gmra.mxu3 %v14073_v35  ;;  %4931 = vmatpush.msra.mxu1 %v4930_v24 }
 0x44c   :  { %1622 = vrot.lane.b32.xlu2 %v13750_v28, %s11912_s27 }
 0x44d   :  { %1654 = vrot.lane.b32.xlu1 %v13989_v44, %s11908_s24  ;;  %v14162_v32 = vpop.f32.mrf.mxu2 }
 0x44e   :  { %4638 = vmatmul.f32.gmra.mxu0 %v14015_v7  ;;  %v14105_v7 = vpop.f32.mrf.mxu1  ;;  %17592 = vst [vmem:[#allocation35_spill] sm:$0xff] %v14162_v32 }
 0x44f   :  { %4797 = vmatmul.f32.vlgmr.msrb.gmra.mxu1 %v4695_v34  ;;  %4706 = vmatmul.f32.gmra.mxu2 %v4705_v37  ;;  %17578 = vst [vmem:[#allocation20_spill] sm:$0xff] %v14105_v7 }
 0x450   :  { %5049 = vmatpush.msrb.mxu1 %v14030_v39  ;;  %v14107_v39 = vpop.f32.mrf.mxu3  ;;  %v14140_v4 = vpop.f32.mrf.mxu0 }
 0x451   :  { %17579 = vst [vmem:[#allocation22_spill] sm:$0xff] %v14107_v39 }
 0x452   :  { %5051 = vmatpush.msrb.mxu1 %v4887_v46  ;;  %17586 = vst [vmem:[#allocation29_spill] sm:$0xff] %v14140_v4  ;;  %v3656_v46 = vor.u32 1.1754944e-38, %v3655_v5 }
 0x453   :  { %4857 = vmatmul.f32.vlgmr.msra.gmra.mxu3 %v4693_v47 }
 0x454   :  { %1562 = vrot.lane.b32.xlu2 %v13784_v57, %s11912_s27 }
 0x455   :  { %1666 = vrot.lane.b32.xlu1 %v13989_v44, %s11909_s25 }
 0x456   :  { %4767 = vmatmul.f32.vlgmr.msrb.gmra.mxu0 %v4694_v14  ;;  %v14128_v63 = vpop.f32.mrf.mxu1 }
 0x457   :  { %4803 = vmatmul.f32.gmra.mxu1 %v4703_v6  ;;  %4830 = vmatmul.f32.vlgmr.msra.gmra.mxu2 %v4693_v47  ;;  %v3445_v51 = vpop.xlane.xlu1 %3444  ;;  %17583 = vst [vmem:[#allocation21_spill] sm:$0xff] %v14128_v63  ;;  %v3653_v47 = vand.u32 2147483647, %v14058_v29 }
 0x458   :  { %5020 = vmatpush.msrb.mxu0 %v4922_v1  ;;  %11586 = vrcp.f32 %v3445_v51  ;;  %v14130_v33 = vpop.f32.mrf.mxu3  ;;  %v3670_v10 = vand.u32 2147483648, %v3445_v51  ;;  %vm3664_vm8 = vweird.f32 %v3445_v51  ;;  %v3668_v22 = vand.u32 2147483647, %v3445_v51  ;;  %v14160_v26 = vpop.f32.mrf.mxu0 }
 0x459   :  { %17584 = vst [vmem:[#allocation25_spill] sm:$0xff] %v14130_v33  ;;  %vm3654_vm9 = vcmp.eq.f32.partialorder %v3653_v47, 8.507059e+37 }
 0x45a   :  { %5024 = vmatpush.msrb.mxu0 %v4928_v2  ;;  %v3671_v27 = vor.u32 1.1754944e-38, %v3670_v10  ;;  %vm3669_vm11 = vcmp.eq.f32.partialorder %v3668_v22, 8.507059e+37  ;;  %17591 = vst [vmem:[#allocation34_spill] sm:$0xff] %v14160_v26 }
 0x45b   :  { %4861 = vmatmul.f32.gmra.mxu3 %v14073_v35 }
 0x45c   :  { %1568 = vrot.lane.b32.xlu2 %v13758_v16, %s11906_s23 }
 0x45e   :  { %v11587_v52 = vpop.eup %11586  ;;  %4772 = vmatmul.f32.gmra.mxu0 %v4702_v50  ;;  %v14149_v14 = vpop.f32.mrf.mxu1 }
 0x45f   :  { %v3660_v18 = vmul.f32 %v11587_v52, %v3445_v51  ;;  %4834 = vmatmul.f32.gmra.mxu2 %v14073_v35  ;;  %v14122_v49 = vpop.xlane.xlu1 %3447  ;;  %17587 = vst [vmem:[#allocation30_spill] sm:$0xff] %v14149_v14  ;;  %vm3665_vm7 = vweird.f32 %v11587_v52  ;;  %v3652_v35 = vsel %vm3651_vm6, %v11585_v55, %v3648_v23 }
 0x460   :  { %11588 = vrcp.f32 %v14122_v49  ;;  %v14143_v11 = vpop.f32.mrf.mxu3  ;;  %vm14151_vm10 = vmor %vm3664_vm8, %vm3665_vm7  ;;  %v3657_v29 = vsel %vm3654_vm9, %v3656_v46, %v3652_v35  ;;  %vm3679_vm15 = vweird.f32 %v14122_v49  ;;  %v3685_v56 = vand.u32 2147483648, %v14122_v49 }
 0x461   :  { %v3661_v62 = vsub.f32 1.0, %v3660_v18  ;;  %v3658_v51 = vmul.f32 %v13702_v0, %v3657_v29  ;;  %v3683_v36 = vand.u32 2147483647, %v14122_v49 }
 0x462   :  { %v3686_v5 = vor.u32 1.1754944e-38, %v3685_v56 }
 0x463   :  { %v3662_v9 = vmul.f32 %v11587_v52, %v3661_v62  ;;  %v4869_v23 = vsel %vm1720_vm0, %v3658_v51, 0  ;;  %vm3684_vm4 = vcmp.eq.f32.partialorder %v3683_v36, 8.507059e+37 }
 0x464   :  { %1640 = vrot.lane.b32.xlu2 %v14126_v41, %s11907_s11  ;;  %v14187_v35 = vand.u32 4294901760, %v4869_v23 }
 0x465   :  { %v3663_v8 = vadd.f32 %v11587_v52, %v3662_v9 }
 0x466   :  { %v3439_v1 = vpop.xlane.xlu2 %3438  ;;  %v14136_v58 = vpop.eup %11588 }
 0x467   :  { %11590 = vrcp.f32 %v3439_v1  ;;  %v3675_v15 = vmul.f32 %v14136_v58, %v14122_v49  ;;  %v3667_v2 = vsel %vm14151_vm10, %v11587_v52, %v3663_v8  ;;  %v3640_v24 = vand.u32 2147483648, %v3439_v1  ;;  %v14165_v55 = vpop.f32.mrf.mxu1 }
 0x468   :  { %v14158_v37 = vpop.f32.mrf.mxu3  ;;  %v3638_v19 = vand.u32 2147483647, %v3439_v1  ;;  %v3672_v17 = vsel %vm3669_vm11, %v3671_v27, %v3667_v2  ;;  %vm3634_vm13 = vweird.f32 %v3439_v1  ;;  %vm3680_vm14 = vweird.f32 %v14136_v58 }
 0x469   :  { %v3676_v25 = vsub.f32 1.0, %v3675_v15  ;;  %17590 = vst [vmem:[#allocation31_spill] sm:$0xff] %v14158_v37  ;;  %v3641_v52 = vor.u32 1.1754944e-38, %v3640_v24  ;;  %v3673_v18 = vmul.f32 %v13771_v12, %v3672_v17  ;;  %vm3681_vm3 = vmor %vm3679_vm15, %vm3680_vm14  ;;  %v5263_v12 = vsel %vm1720_vm0, %v13750_v28, 0 }
 0x46a   :  { %vm3639_vm2 = vcmp.eq.f32.partialorder %v3638_v19, 8.507059e+37  ;;  %v14193_v28 = vand.u32 4294901760, %v5263_v12 }
 0x46b   :  { %v3677_v53 = vmul.f32 %v14136_v58, %v3676_v25  ;;  %v5062_v49 = vsel %vm1720_vm0, %v3673_v18, 0  ;;  %v14183_v25 = vpop.f32.mrf.mxu0 }
 0x46c   :  { %v14197_v60 = vand.u32 4294901760, %v5062_v49  ;;  %v14208_v19 = vsub.f32 %v5263_v12, %v14193_v28 }
 0x46d   :  { %v11591_v34 = vpop.eup %11590  ;;  %v3678_v31 = vadd.f32 %v14136_v58, %v3677_v53  ;;  %v5261_v53 = vsel %vm1720_vm0, %v13814_v45, 0 }
 0x46e   :  { %v3630_v50 = vmul.f32 %v11591_v34, %v3439_v1  ;;  %v1709_v61 = vpop.permute.xlu2 %1708  ;;  %vm3635_vm12 = vweird.f32 %v11591_v34  ;;  %v14210_v17 = vand.u32 4294901760, %v5261_v53  ;;  %v14213_v51 = vsub.f32 %v5062_v49, %v14197_v60 }
 0x46f   :  { %v14169_v54 = vand.u32 4294901760, %v1709_v61  ;;  %vm3636_vm1 = vmor %vm3634_vm13, %vm3635_vm12  ;;  %v3682_v20 = vsel %vm3681_vm3, %v14136_v58, %v3678_v31  ;;  %v14189_v10 = vpop.f32.mrf.mxu1 }
 0x470   :  { %v3631_v6 = vsub.f32 1.0, %v3630_v50  ;;  %v3687_v58 = vsel %vm3684_vm4, %v3686_v5, %v3682_v20  ;;  %17593 = vst [vmem:[#allocation38_spill] sm:$0xff] %v14189_v10  ;;  %v14191_v46 = vpop.f32.mrf.mxu3  ;;  %v14195_v50 = vpop.f32.mrf.mxu2  ;;  %v5087_v20 = vand.u32 4294901760, %v14213_v51 }
 0x471   :  { %v5123_v9 = vsub.f32 %v1709_v61, %v14169_v54  ;;  %v4898_v61 = vsub.f32 %v4869_v23, %v14187_v35 }
 0x472   :  { %v3632_v42 = vmul.f32 %v11591_v34, %v3631_v6  ;;  %v3688_v6 = vmul.f32 %v13782_v30, %v3687_v58 }
 0x473   :  { %v5124_v22 = vand.u32 4294901760, %v5123_v9  ;;  %v4899_v56 = vand.u32 4294901760, %v4898_v61 }
 0x474   :  { %v3633_v3 = vadd.f32 %v11591_v34, %v3632_v42  ;;  %v5065_v31 = vsel %vm1720_vm0, %v3688_v6, 0 }
 0x475   :  { %v5125_v42 = vsub.f32 %v5123_v9, %v5124_v22  ;;  %v4900_v5 = vsub.f32 %v4898_v61, %v4899_v56 }
 0x476   :  { %v3637_v0 = vsel %vm3636_vm1, %v11591_v34, %v3633_v3 }
 0x477   :  { %v3642_v62 = vsel %vm3639_vm2, %v3641_v52, %v3637_v0  ;;  %v1711_v15 = vpop.permute.xlu1 %1710  ;;  %v14216_v52 = vpop.f32.mrf.mxu0  ;;  %v5126_v36 = vand.u32 4294901760, %v5125_v42  ;;  %v5316_v0 = vand.u32 4294901760, %v14208_v19 }
 0x478   :  { %v3643_v1 = vmul.f32 %v13792_v59, %v3642_v62  ;;  %v5081_v47 = vand.u32 4294901760, %v1711_v15  ;;  %17594 = vst [vmem:[#allocation39_spill] sm:$0xff] %v14216_v52  ;;  %v14222_v62 = vsub.f32 %v5261_v53, %v14210_v17  ;;  %v14230_v23 = vpop.f32.mrf.mxu2 }
 0x479   :  { %17597 = vst [vmem:[#allocation36_spill] sm:$0xff] %v14230_v23  ;;  %v5317_v12 = vsub.f32 %v14208_v19, %v5316_v0 }
 0x47a   :  { %v4866_v8 = vsel %vm1720_vm0, %v3643_v1, 0  ;;  %v5117_v34 = vsub.f32 %v1711_v15, %v5081_v47  ;;  %5082 = vmatpush.msra.mxu2 %v5081_v47  ;;  %v14226_v1 = vand.u32 4294901760, %v5065_v31  ;;  %v14228_v15 = vpop.f32.mrf.mxu3  ;;  %v17375_v49 = vand.u32 4294901760, %v14222_v62 }
 0x47b   :  { %v14185_v59 = vand.u32 4294901760, %v4866_v8  ;;  %v14218_v18 = vpop.f32.mrf.mxu1  ;;  %17596 = vst [vmem:[#allocation33_spill] sm:$0xff] %v14228_v15 }
 0x47c   :  { %v5118_v29 = vand.u32 4294901760, %v5117_v34  ;;  %5084 = vmatpush.msra.mxu2 %v14169_v54  ;;  %17595 = vst [vmem:[#allocation32_spill] sm:$0xff] %v14218_v18  ;;  %v14239_v58 = vsub.f32 %v5065_v31, %v14226_v1 }
 0x47d   :  { %4933 = vmatmul.f32.vlgmr.msra.gmra.mxu1 %v14185_v59  ;;  %v4890_v2 = vsub.f32 %v4866_v8, %v14185_v59  ;;  %v5088_v8 = vsub.f32 %v14213_v51, %v5087_v20 }
 0x47e   :  { %5183 = vmatpush.msra.mxu1 %v5081_v47  ;;  %v5119_v27 = vsub.f32 %v5117_v34, %v5118_v29 }
 0x47f   :  { %4963 = vmatmul.f32.vlgmr.msrb.gmra.mxu2 %v4890_v2  ;;  %v4891_v24 = vand.u32 4294901760, %v4890_v2 }
 0x480   :  { %5185 = vmatpush.msra.mxu1 %v14169_v54  ;;  %5216 = vmatpush.msrb.mxu2 %v5118_v29  ;;  %v5120_v45 = vand.u32 4294901760, %v5119_v27  ;;  %v5318_v29 = vand.u32 4294901760, %v5317_v12 }
 0x481   :  { %4993 = vmatmul.f32.vlgmr.msrb.gmra.mxu3 %v4891_v24  ;;  %v4892_v30 = vsub.f32 %v4890_v2, %v4891_v24  ;;  %v5089_v2 = vand.u32 4294901760, %v5088_v8  ;;  %v1581_v24 = vpop.permute.xlu2 %1580 }
 0x482   :  { %5220 = vmatpush.msrb.mxu2 %v5124_v22  ;;  %5121 = vmatpush.msra.mxu3 %v5120_v45  ;;  %v4901_v22 = vand.u32 4294901760, %v4900_v5  ;;  %v5459_v31 = vsel %vm1720_vm0, %v1581_v24, 0 }
 0x483   :  { %v4893_v3 = vand.u32 4294901760, %v4892_v30  ;;  %v14249_v6 = vpop.f32.mrf.mxu1 }
 0x484   :  { %5127 = vmatpush.msra.mxu3 %v5126_v36 }
 0x485   :  { %4894 = vmatmul.f32.vlgmr.msra.gmra.mxu0 %v4893_v3  ;;  %4937 = vmatmul.f32.gmra.mxu1 %v14187_v35  ;;  %v14251_v27 = vpop.f32.mrf.mxu3 }
 0x486   :  { %5153 = vmatpush.msra.mxu0 %v5117_v34  ;;  %5245 = vmatpush.msrb.mxu3 %v5081_v47  ;;  %v1583_v34 = vpop.permute.xlu0 %1582  ;;  %v14241_v47 = vpop.f32.mrf.mxu0  ;;  %17599 = vst [vmem:[#allocation40_spill] sm:$0xff] %v14251_v27 }
 0x487   :  { %4968 = vmatmul.f32.gmra.mxu2 %v4898_v61  ;;  %17598 = vst [vmem:[#allocation37_spill] sm:$0xff] %v14241_v47  ;;  %v5461_v53 = vsel %vm1720_vm0, %v1583_v34, 0  ;;  %v14253_v61 = vpop.f32.mrf.mxu2 }
 0x488   :  { %5156 = vmatpush.msra.mxu0 %v5123_v9  ;;  %5247 = vmatpush.msrb.mxu3 %v14169_v54  ;;  %v5323_v9 = vsub.f32 %v14222_v62, %v17375_v49  ;;  %v5095_v54 = vand.u32 4294901760, %v14239_v58  ;;  %17600 = vst [vmem:[#allocation41_spill] sm:$0xff] %v14253_v61  ;;  %v14256_v45 = vand.u32 4294901760, %v5461_v53 }
 0x489   :  { %4999 = vmatmul.f32.gmra.mxu3 %v4899_v56  ;;  %v14266_v56 = vand.u32 4294901760, %v5459_v31 }
 0x48a   :  { %v5324_v42 = vand.u32 4294901760, %v5323_v9  ;;  %v5096_v30 = vsub.f32 %v14239_v58, %v5095_v54  ;;  %v14264_v3 = vsub.f32 %v5461_v53, %v14256_v45  ;;  %v1523_v53 = vpop.permute.xlu2 %1522 }
 0x48b   :  { %v14274_v12 = vpop.f32.mrf.mxu1 }
 0x48c   :  { %v5097_v36 = vand.u32 4294901760, %v5096_v30  ;;  %17601 = vst [vmem:[#allocation42_spill] sm:$0xff] %v14274_v12  ;;  %v5514_v34 = vand.u32 4294901760, %v14264_v3 }
 0x48d   :  { %4902 = vmatmul.f32.gmra.mxu0 %v4901_v22  ;;  %5053 = vmatmul.f32.vlgmr.msrb.gmra.mxu1 %v14185_v59  ;;  %v14276_v8 = vpop.f32.mrf.mxu3  ;;  %v14280_v22 = vsub.f32 %v5459_v31, %v14266_v56 }
 0x48e   :  { %5319 = vmatpush.xpose.msrb.mxu1 %v5318_v29  ;;  %v14270_v5 = vpop.f32.mrf.mxu0  ;;  %17602 = vst [vmem:[#allocation43_spill] sm:$0xff] %v14276_v8  ;;  %v1521_v29 = vpop.permute.xlu0 %1520  ;;  %v5515_v9 = vsub.f32 %v14264_v3, %v5514_v34 }
 0x48f   :  { %5090 = vmatmul.f32.vlgmr.msra.gmra.mxu2 %v5089_v2  ;;  %v5520_v2 = vand.u32 4294901760, %v14280_v22 }
 0x490   :  { %5351 = vmatpush.xpose.msra.mxu2 %v14208_v19  ;;  %v5516_v30 = vand.u32 4294901760, %v5515_v9  ;;  %v17607_v19 = vand.u32 4294901760, %v14222_v62 }
 0x491   :  { %5129 = vmatmul.f32.vlgmr.msra.gmra.mxu3 %v14197_v60 }
 0x492   :  { %5325 = vmatpush.xpose.msrb.mxu1 %v5324_v42  ;;  %5381 = vmatpush.xpose.msra.mxu3 %v14193_v28  ;;  %v5257_v42 = vsel %vm1720_vm0, %v13758_v16, 0  ;;  %v1589_v14 = vpop.permute.xlu2 %1588 }
 0x493   :  { %v14299_v49 = vpop.f32.mrf.mxu1 }
 0x494   :  { %5354 = vmatpush.xpose.msra.mxu2 %v14222_v62  ;;  %17605 = vst [vmem:[#allocation46_spill] sm:$0xff] %v14299_v49 }
 0x495   :  { %5026 = vmatmul.f32.vlgmr.msrb.gmra.mxu0 %v14185_v59  ;;  %5057 = vmatmul.f32.gmra.mxu1 %v14187_v35  ;;  %v14282_v59 = vpop.f32.mrf.mxu2 }
 0x496   :  { %5280 = vmatpush.xpose.msrb.mxu0 %v14193_v28  ;;  %5383 = vmatpush.xpose.msra.mxu3 %v14210_v17  ;;  %17603 = vst [vmem:[#allocation44_spill] sm:$0xff] %v14282_v59  ;;  %v14291_v24 = vpop.f32.mrf.mxu0 }
 0x497   :  { %5098 = vmatmul.f32.gmra.mxu2 %v5097_v36  ;;  %17604 = vst [vmem:[#allocation45_spill] sm:$0xff] %v14291_v24  ;;  %v5521_v36 = vsub.f32 %v14280_v22, %v5520_v2 }
 0x499   :  { %5133 = vmatmul.f32.gmra.mxu3 %v14226_v1  ;;  %v5522_v16 = vand.u32 4294901760, %v5521_v36 }
 0x49a   :  { %5282 = vmatpush.xpose.msrb.mxu0 %v14210_v17  ;;  %v1599_v39 = vpop.permute.xlu2 %1598 }
 0x49b   :  { %v5857_v13 = vsel %vm1720_vm0, %v1599_v39, 0 }
 0x49d   :  { %5030 = vmatmul.f32.gmra.mxu0 %v14187_v35  ;;  %5189 = vmatmul.f32.vlgmr.msra.gmra.mxu1 %v5087_v20  ;;  %v14296_v31 = vpop.f32.mrf.mxu2  ;;  %v14301_v35 = vpop.f32.mrf.mxu3 }
 0x49e   :  { %5443 = vmatpush.xpose.msra.mxu1 %v14193_v28  ;;  %v14305_v28 = vand.u32 4294901760, %v5257_v42  ;;  %v1591_v20 = vpop.permute.xlu0 %1590 }
 0x49f   :  { %5222 = vmatmul.f32.vlgmr.msrb.gmra.mxu2 %v14197_v60  ;;  %v5659_v9 = vsel %vm1720_vm0, %v1591_v20, 0  ;;  %v5657_v20 = vsel %vm1720_vm0, %v1589_v14, 0  ;;  %v5457_v14 = vsel %vm1720_vm0, %v1523_v53, 0  ;;  %v14359_v53 = vpop.permute.xlu1 %1528 }
 0x4a0   :  { %5478 = vmatpush.xpose.msrb.mxu2 %v14256_v45  ;;  %v14342_v26 = vand.u32 4294901760, %v5657_v20 }
 0x4a1   :  { %5249 = vmatmul.f32.vlgmr.msrb.gmra.mxu3 %v14197_v60  ;;  %v5284_v60 = vsub.f32 %v5257_v42, %v14305_v28  ;;  %v14326_v42 = vand.u32 4294901760, %v5659_v9 }
 0x4a2   :  { %5445 = vmatpush.xpose.msra.mxu1 %v14210_v17  ;;  %5517 = vmatpush.xpose.msrb.mxu3 %v5516_v30  ;;  %v5259_v17 = vsel %vm1720_vm0, %v13784_v57, 0  ;;  %v5455_v30 = vsel %vm1720_vm0, %v1521_v29, 0  ;;  %v14328_v57 = vpop.f32.mrf.mxu1 }
 0x4a3   :  { %v14324_v36 = vand.u32 4294901760, %v5259_v17  ;;  %v14332_v29 = vand.u32 4294901760, %v5455_v30 }
 0x4a4   :  { %5480 = vmatpush.xpose.msrb.mxu2 %v14266_v56 }
 0x4a5   :  { %5159 = vmatmul.f32.vlgmr.msra.gmra.mxu0 %v14213_v51  ;;  %5195 = vmatmul.f32.gmra.mxu1 %v5095_v54  ;;  %v14317_v51 = vpop.f32.mrf.mxu0  ;;  %v5285_v54 = vand.u32 4294901760, %v5284_v60  ;;  %v14345_v63 = vsub.f32 %v5455_v30, %v14332_v29  ;;  %v14357_v30 = vand.u32 4294901760, %v5457_v14 }
 0x4a6   :  { %5414 = vmatpush.xpose.msra.mxu0 %v5316_v0  ;;  %5523 = vmatpush.xpose.msrb.mxu3 %v5522_v16  ;;  %17606 = vst [vmem:[#allocation47_spill] sm:$0xff] %v14317_v51  ;;  %v14322_v0 = vpop.f32.mrf.mxu2  ;;  %v14330_v16 = vpop.f32.mrf.mxu3 }
 0x4a7   :  { %5226 = vmatmul.f32.gmra.mxu2 %v14226_v1  ;;  %17608 = vst [vmem:[#allocation48_spill] sm:$0xff] %v14322_v0  ;;  %v5286_v62 = vsub.f32 %v5284_v60, %v5285_v54  ;;  %v14376_v21 = vsub.f32 %v5457_v14, %v14357_v30  ;;  %v1531_v48 = vpop.permute.xlu0 %1530 }
 0x4a8   :  { %17609 = vst [vmem:[#allocation49_spill] sm:$0xff] %v14330_v16 }
 0x4a9   :  { %5253 = vmatmul.f32.gmra.mxu3 %v14226_v1  ;;  %v5292_v1 = vsub.f32 %v5259_v17, %v14324_v36 }
 0x4aa   :  { %5418 = vmatpush.xpose.msra.mxu0 %v17607_v19  ;;  %v14340_v19 = vsub.f32 %v5659_v9, %v14326_v42  ;;  %v14352_v9 = vsub.f32 %v5657_v20, %v14342_v26 }
 0x4ac   :  { %v17376_v17 = vand.u32 4294901760, %v14340_v19  ;;  %v17377_v4 = vand.u32 4294901760, %v14352_v9 }
 0x4ad   :  { %5164 = vmatmul.f32.gmra.mxu0 %v14239_v58  ;;  %5327 = vmatmul.f32.vlgmr.msrb.gmra.mxu1 %v14305_v28  ;;  %v5287_v58 = vand.u32 4294901760, %v5286_v62  ;;  %v14354_v33 = vpop.f32.mrf.mxu0 }
 0x4ae   :  { %5579 = vmatpush.xpose.msrb.mxu1 %v14256_v45  ;;  %v14366_v62 = vpop.f32.mrf.mxu3  ;;  %v5713_v20 = vsub.f32 %v14340_v19, %v17376_v17  ;;  %v5491_v17 = vand.u32 4294901760, %v14376_v21 }
 0x4af   :  { %5357 = vmatmul.f32.vlgmr.msra.gmra.mxu2 %v5284_v60  ;;  %v5293_v60 = vand.u32 4294901760, %v5292_v1 }
 0x4b0   :  { %5612 = vmatpush.xpose.msra.mxu2 %v5514_v34  ;;  %v5483_v34 = vand.u32 4294901760, %v14345_v63  ;;  %v5714_v7 = vand.u32 4294901760, %v5713_v20 }
 0x4b1   :  { %5387 = vmatmul.f32.vlgmr.msra.gmra.mxu3 %v5285_v54  ;;  %v14361_v54 = vpop.f32.mrf.mxu2 }
 0x4b2   :  { %5581 = vmatpush.xpose.msrb.mxu1 %v14266_v56  ;;  %5641 = vmatpush.xpose.msra.mxu3 %v14256_v45  ;;  %v14364_v45 = vpop.f32.mrf.mxu1 }
 0x4b3   :  { %17610 = vst [vmem:[#allocation50_spill] sm:$0xff] %v14364_v45 }
 0x4b4   :  { %5616 = vmatpush.xpose.msra.mxu2 %v5520_v2  ;;  %v5294_v2 = vsub.f32 %v5292_v1, %v5293_v60 }
 0x4b5   :  { %5288 = vmatmul.f32.vlgmr.msrb.gmra.mxu0 %v5287_v58  ;;  %5331 = vmatmul.f32.gmra.mxu1 %v14324_v36  ;;  %v5484_v58 = vsub.f32 %v14345_v63, %v5483_v34  ;;  %v14385_v14 = vpop.f32.mrf.mxu0 }
 0x4b6   :  { %5549 = vmatpush.xpose.msrb.mxu0 %v14264_v3  ;;  %5643 = vmatpush.xpose.msra.mxu3 %v14266_v56  ;;  %v5295_v3 = vand.u32 4294901760, %v5294_v2  ;;  %v5719_v56 = vsub.f32 %v14352_v9, %v17377_v4  ;;  %17611 = vst [vmem:[#allocation51_spill] sm:$0xff] %v14385_v14  ;;  %v14391_v20 = vpop.f32.mrf.mxu3  ;;  %v14394_v4 = vand.u32 4294901760, %v5857_v13 }
 0x4b7   :  { %5362 = vmatmul.f32.gmra.mxu2 %v5292_v1  ;;  %v5485_v1 = vand.u32 4294901760, %v5484_v58  ;;  %17614 = vst [vmem:[#allocation54_spill] sm:$0xff] %v14391_v20  ;;  %v5653_v20 = vsel %vm1720_vm0, %v14359_v53, 0 }
 0x4b8   :  { %v5720_v58 = vand.u32 4294901760, %v5719_v56 }
 0x4b9   :  { %5393 = vmatmul.f32.gmra.mxu3 %v5293_v60  ;;  %v1597_v60 = vpop.permute.xlu1 %1596 }
 0x4ba   :  { %5552 = vmatpush.xpose.msrb.mxu0 %v14280_v22  ;;  %v14387_v22 = vpop.f32.mrf.mxu2  ;;  %v14389_v2 = vpop.f32.mrf.mxu1  ;;  %v5855_v39 = vsel %vm1720_vm0, %v1597_v60, 0 }
 0x4bb   :  { %17612 = vst [vmem:[#allocation52_spill] sm:$0xff] %v14387_v22 }
 0x4bc   :  { %17613 = vst [vmem:[#allocation53_spill] sm:$0xff] %v14389_v2 }
 0x4bd   :  { %5296 = vmatmul.f32.gmra.mxu0 %v5295_v3  ;;  %5447 = vmatmul.f32.vlgmr.msra.gmra.mxu1 %v14305_v28  ;;  %v5492_v3 = vsub.f32 %v14376_v21, %v5491_v17  ;;  %v14410_v60 = vpop.f32.mrf.mxu0 }
 0x4be   :  { %5715 = vmatpush.xpose.msra.mxu1 %v5714_v7  ;;  %v14401_v7 = vand.u32 4294901760, %v5855_v39  ;;  %17615 = vst [vmem:[#allocation55_spill] sm:$0xff] %v14410_v60 }
 0x4bf   :  { %5486 = vmatmul.f32.vlgmr.msrb.gmra.mxu2 %v5485_v1  ;;  %v14404_v1 = vsub.f32 %v5857_v13, %v14394_v4  ;;  %v5493_v56 = vand.u32 4294901760, %v5492_v3 }
 0x4c0   :  { %5747 = vmatpush.xpose.msrb.mxu2 %v14340_v19 }
 0x4c1   :  { %5525 = vmatmul.f32.vlgmr.msrb.gmra.mxu3 %v14332_v29  ;;  %v5910_v43 = vand.u32 4294901760, %v14404_v1 }
 0x4c2   :  { %5721 = vmatpush.xpose.msra.mxu1 %v5720_v58  ;;  %5777 = vmatpush.xpose.msrb.mxu3 %v14326_v42  ;;  %v14413_v58 = vsub.f32 %v5855_v39, %v14401_v7  ;;  %v14416_v13 = vpop.f32.mrf.mxu2  ;;  %v14418_v38 = vpop.f32.mrf.mxu1 }
 0x4c3   :  { %17616 = vst [vmem:[#allocation56_spill] sm:$0xff] %v14416_v13  ;;  %v1537_v39 = vpop.permute.xlu0 %1536 }
 0x4c4   :  { %5750 = vmatpush.xpose.msrb.mxu2 %v14352_v9  ;;  %17617 = vst [vmem:[#allocation57_spill] sm:$0xff] %v14418_v38  ;;  %v5916_v3 = vand.u32 4294901760, %v14413_v58 }
 0x4c5   :  { %5420 = vmatmul.f32.vlgmr.msra.gmra.mxu0 %v14305_v28  ;;  %5451 = vmatmul.f32.gmra.mxu1 %v14324_v36  ;;  %v14420_v28 = vpop.f32.mrf.mxu3  ;;  %v14433_v14 = vpop.f32.mrf.mxu0 }
 0x4c6   :  { %5676 = vmatpush.xpose.msra.mxu0 %v14326_v42  ;;  %5779 = vmatpush.xpose.msrb.mxu3 %v14342_v26  ;;  %17618 = vst [vmem:[#allocation58_spill] sm:$0xff] %v14420_v28  ;;  %v5917_v45 = vsub.f32 %v14413_v58, %v5916_v3 }
 0x4c7   :  { %5494 = vmatmul.f32.gmra.mxu2 %v5493_v56  ;;  %v5911_v56 = vsub.f32 %v14404_v1, %v5910_v43  ;;  %17619 = vst [vmem:[#allocation59_spill] sm:$0xff] %v14433_v14 }
 0x4c8   :  { %v5918_v53 = vand.u32 4294901760, %v5917_v45  ;;  %v1539_v45 = vpop.permute.xlu2 %1538 }
 0x4c9   :  { %5529 = vmatmul.f32.gmra.mxu3 %v14357_v30  ;;  %v5912_v22 = vand.u32 4294901760, %v5911_v56  ;;  %v1607_v56 = vpop.permute.xlu1 %1606  ;;  %v5853_v12 = vsel %vm1720_vm0, %v1539_v45, 0 }
 0x4ca   :  { %5678 = vmatpush.xpose.msra.mxu0 %v14342_v26  ;;  %v6055_v0 = vsel %vm1720_vm0, %v1607_v56, 0 }
 0x4cd   :  { %5424 = vmatmul.f32.gmra.mxu0 %v14324_v36  ;;  %5585 = vmatmul.f32.vlgmr.msrb.gmra.mxu1 %v5483_v34  ;;  %v14437_v36 = vand.u32 4294901760, %v5653_v20  ;;  %v14441_v34 = vpop.f32.mrf.mxu1  ;;  %v14443_v16 = vpop.f32.mrf.mxu3 }
 0x4ce   :  { %5839 = vmatpush.xpose.msrb.mxu1 %v14326_v42  ;;  %v14439_v42 = vpop.f32.mrf.mxu2  ;;  %17621 = vst [vmem:[#allocation61_spill] sm:$0xff] %v14441_v34  ;;  %v5851_v34 = vsel %vm1720_vm0, %v1537_v39, 0 }
 0x4cf   :  { %5618 = vmatmul.f32.vlgmr.msra.gmra.mxu2 %v14332_v29  ;;  %17620 = vst [vmem:[#allocation60_spill] sm:$0xff] %v14439_v42 }
 0x4d0   :  { %5874 = vmatpush.xpose.msra.mxu2 %v14394_v4  ;;  %17622 = vst [vmem:[#allocation62_spill] sm:$0xff] %v14443_v16  ;;  %v1605_v16 = vpop.permute.xlu0 %1604 }
 0x4d1   :  { %5645 = vmatmul.f32.vlgmr.msra.gmra.mxu3 %v14332_v29  ;;  %v17623_v29 = vand.u32 4294901760, %v14340_v19 }
 0x4d2   :  { %5841 = vmatpush.xpose.msrb.mxu1 %v14342_v26  ;;  %5913 = vmatpush.xpose.msra.mxu3 %v5912_v22  ;;  %v5680_v26 = vsub.f32 %v5653_v20, %v14437_v36  ;;  %v5655_v22 = vsel %vm1720_vm0, %v1531_v48, 0  ;;  %v14459_v20 = vand.u32 4294901760, %v6055_v0  ;;  %v6053_v48 = vsel %vm1720_vm0, %v1605_v16, 0 }
 0x4d4   :  { %5876 = vmatpush.xpose.msra.mxu2 %v14401_v7  ;;  %v5681_v19 = vand.u32 4294901760, %v5680_v26  ;;  %v14479_v16 = vsub.f32 %v6055_v0, %v14459_v20  ;;  %v14492_v0 = vand.u32 4294901760, %v5853_v12 }
 0x4d5   :  { %5555 = vmatmul.f32.vlgmr.msrb.gmra.mxu0 %v14345_v63  ;;  %5591 = vmatmul.f32.gmra.mxu1 %v5491_v17  ;;  %v17624_v63 = vand.u32 4294901760, %v14352_v9  ;;  %v14457_v17 = vand.u32 4294901760, %v5655_v22  ;;  %v14470_v9 = vpop.f32.mrf.mxu1 }
 0x4d6   :  { %5810 = vmatpush.xpose.msrb.mxu0 %v17623_v29  ;;  %5919 = vmatpush.xpose.msra.mxu3 %v5918_v53  ;;  %v14461_v53 = vpop.f32.mrf.mxu0  ;;  %v14463_v29 = vand.u32 4294901760, %v5851_v34  ;;  %v14466_v56 = vpop.f32.mrf.mxu2  ;;  %17626 = vst [vmem:[#allocation64_spill] sm:$0xff] %v14470_v9  ;;  %v17378_v28 = vand.u32 4294901760, %v14479_v16 }
 0x4d7   :  { %5622 = vmatmul.f32.gmra.mxu2 %v14357_v30  ;;  %17625 = vst [vmem:[#allocation63_spill] sm:$0xff] %v14461_v53  ;;  %v5688_v39 = vsub.f32 %v5655_v22, %v14457_v17  ;;  %v14476_v53 = vand.u32 4294901760, %v6053_v48 }
 0x4d9   :  { %5649 = vmatmul.f32.gmra.mxu3 %v14357_v30  ;;  %v14472_v30 = vpop.f32.mrf.mxu3  ;;  %v5689_v22 = vand.u32 4294901760, %v5688_v39 }
 0x4da   :  { %5814 = vmatpush.xpose.msrb.mxu0 %v17624_v63  ;;  %v5682_v63 = vsub.f32 %v5680_v26, %v5681_v19 }
 0x4db   :  { %v5690_v45 = vsub.f32 %v5688_v39, %v5689_v22 }
 0x4dc   :  { %v5683_v9 = vand.u32 4294901760, %v5682_v63 }
 0x4dd   :  { %5560 = vmatmul.f32.gmra.mxu0 %v14376_v21  ;;  %5723 = vmatmul.f32.vlgmr.msra.gmra.mxu1 %v14437_v36  ;;  %v14482_v21 = vsub.f32 %v5851_v34, %v14463_v29  ;;  %v14494_v34 = vpop.permute.xlu2 %1544  ;;  %v14507_v63 = vpop.f32.mrf.mxu1 }
 0x4de   :  { %5975 = vmatpush.xpose.msra.mxu1 %v14394_v4  ;;  %17629 = vst [vmem:[#allocation67_spill] sm:$0xff] %v14507_v63 }
 0x4df   :  { %5753 = vmatmul.f32.vlgmr.msrb.gmra.mxu2 %v5680_v26  ;;  %v14488_v26 = vsub.f32 %v6053_v48, %v14476_v53  ;;  %v6109_v48 = vsub.f32 %v14479_v16, %v17378_v28 }
 0x4e0   :  { %6008 = vmatpush.xpose.msrb.mxu2 %v5910_v43  ;;  %v17379_v43 = vand.u32 4294901760, %v14482_v21 }
 0x4e1   :  { %5783 = vmatmul.f32.vlgmr.msrb.gmra.mxu3 %v5681_v19  ;;  %v14497_v19 = vpop.f32.mrf.mxu0  ;;  %v17631_v15 = vand.u32 4294901760, %v14488_v26 }
 0x4e2   :  { %5977 = vmatpush.xpose.msra.mxu1 %v14401_v7  ;;  %6037 = vmatpush.xpose.msrb.mxu3 %v14394_v4  ;;  %17627 = vst [vmem:[#allocation65_spill] sm:$0xff] %v14497_v19  ;;  %v14500_v4 = vpop.f32.mrf.mxu2  ;;  %v14515_v19 = vsub.f32 %v5853_v12, %v14492_v0 }
 0x4e3   :  { %17628 = vst [vmem:[#allocation66_spill] sm:$0xff] %v14500_v4  ;;  %v6115_v28 = vsub.f32 %v14488_v26, %v17631_v15 }
 0x4e4   :  { %6012 = vmatpush.xpose.msrb.mxu2 %v5916_v3  ;;  %v6110_v3 = vand.u32 4294901760, %v6109_v48  ;;  %v5887_v24 = vand.u32 4294901760, %v14515_v19 }
 0x4e5   :  { %5684 = vmatmul.f32.vlgmr.msra.gmra.mxu0 %v5683_v9  ;;  %5727 = vmatmul.f32.gmra.mxu1 %v14457_v17  ;;  %v14509_v9 = vpop.f32.mrf.mxu3  ;;  %v1613_v12 = vpop.permute.xlu2 %1612 }
 0x4e6   :  { %5945 = vmatpush.xpose.msra.mxu0 %v14404_v1  ;;  %6039 = vmatpush.xpose.msrb.mxu3 %v14401_v7  ;;  %17630 = vst [vmem:[#allocation68_spill] sm:$0xff] %v14509_v9  ;;  %v5880_v1 = vsub.f32 %v14482_v21, %v17379_v43  ;;  %v1615_v7 = vpop.permute.xlu0 %1614  ;;  %v5888_v15 = vsub.f32 %v14515_v19, %v5887_v24 }
 0x4e7   :  { %5758 = vmatmul.f32.gmra.mxu2 %v5688_v39  ;;  %v5691_v39 = vand.u32 4294901760, %v5690_v45  ;;  %v6253_v43 = vsel %vm1720_vm0, %v1615_v7, 0 }
 0x4e8   :  { %v5881_v42 = vand.u32 4294901760, %v5880_v1  ;;  %v14527_v45 = vand.u32 4294901760, %v6253_v43  ;;  %v6251_v1 = vsel %vm1720_vm0, %v1613_v12, 0  ;;  %v5889_v7 = vand.u32 4294901760, %v5888_v15 }
 0x4e9   :  { %5789 = vmatmul.f32.gmra.mxu3 %v5689_v22  ;;  %v14524_v22 = vpop.f32.mrf.mxu0 }
 0x4ea   :  { %5948 = vmatpush.xpose.msra.mxu0 %v14413_v58  ;;  %17632 = vst [vmem:[#allocation69_spill] sm:$0xff] %v14524_v22  ;;  %v6116_v58 = vand.u32 4294901760, %v6115_v28  ;;  %v14529_v48 = vpop.f32.mrf.mxu2  ;;  %v14541_v28 = vsub.f32 %v6253_v43, %v14527_v45 }
 0x4eb   :  { %17633 = vst [vmem:[#allocation70_spill] sm:$0xff] %v14529_v48 }
 0x4ec   :  { %v17380_v12 = vand.u32 4294901760, %v14541_v28 }
 0x4ed   :  { %5692 = vmatmul.f32.gmra.mxu0 %v5691_v39  ;;  %5843 = vmatmul.f32.vlgmr.msrb.gmra.mxu1 %v14437_v36  ;;  %v14533_v39 = vpop.f32.mrf.mxu1  ;;  %v14535_v38 = vpop.f32.mrf.mxu3 }
 0x4ee   :  { %6111 = vmatpush.xpose.msrb.mxu1 %v6110_v3  ;;  %17634 = vst [vmem:[#allocation71_spill] sm:$0xff] %v14533_v39  ;;  %v14543_v3 = vand.u32 4294901760, %v6251_v1 }
 0x4ef   :  { %5882 = vmatmul.f32.vlgmr.msra.gmra.mxu2 %v5881_v42  ;;  %17635 = vst [vmem:[#allocation72_spill] sm:$0xff] %v14535_v38  ;;  %v1547_v42 = vpop.permute.xlu1 %1546 }
 0x4f0   :  { %6143 = vmatpush.xpose.msra.mxu2 %v14479_v16 }
 0x4f1   :  { %5921 = vmatmul.f32.vlgmr.msra.gmra.mxu3 %v14463_v29  ;;  %v14553_v43 = vpop.f32.mrf.mxu0 }
 0x4f2   :  { %6117 = vmatpush.xpose.msrb.mxu1 %v6116_v58  ;;  %6173 = vmatpush.xpose.msra.mxu3 %v14459_v20  ;;  %v14551_v58 = vsub.f32 %v6251_v1, %v14543_v3  ;;  %17636 = vst [vmem:[#allocation73_spill] sm:$0xff] %v14553_v43  ;;  %v14557_v39 = vpop.f32.mrf.mxu2  ;;  %v17639_v1 = vand.u32 4294901760, %v14482_v21 }
 0x4f3   :  { %17637 = vst [vmem:[#allocation74_spill] sm:$0xff] %v14557_v39  ;;  %v6049_v39 = vsel %vm1720_vm0, %v14494_v34, 0 }
 0x4f4   :  { %6146 = vmatpush.xpose.msra.mxu2 %v14488_v26  ;;  %v17381_v14 = vand.u32 4294901760, %v14551_v58 }
 0x4f5   :  { %5816 = vmatmul.f32.vlgmr.msrb.gmra.mxu0 %v14437_v36  ;;  %5847 = vmatmul.f32.gmra.mxu1 %v14457_v17  ;;  %v14559_v15 = vpop.f32.mrf.mxu3 }
 0x4f6   :  { %6072 = vmatpush.xpose.msrb.mxu0 %v14459_v20  ;;  %6175 = vmatpush.xpose.msra.mxu3 %v14476_v53  ;;  %17638 = vst [vmem:[#allocation75_spill] sm:$0xff] %v14559_v15 }
 0x4f7   :  { %5890 = vmatmul.f32.gmra.mxu2 %v5889_v7  ;;  %v6307_v7 = vsub.f32 %v14541_v28, %v17380_v12  ;;  %v1553_v13 = vpop.permute.xlu1 %1552  ;;  %v6313_v12 = vsub.f32 %v14551_v58, %v17381_v14  ;;  %v1623_v14 = vpop.permute.xlu2 %1622 }
 0x4f9   :  { %5925 = vmatmul.f32.gmra.mxu3 %v14492_v0  ;;  %v6308_v15 = vand.u32 4294901760, %v6307_v7  ;;  %v6314_v7 = vand.u32 4294901760, %v6313_v12 }
 0x4fa   :  { %6074 = vmatpush.xpose.msrb.mxu0 %v14476_v53  ;;  %v4934_v36 = vpop.f32.mrf.mxu1 }
 0x4fd   :  { %5820 = vmatmul.f32.gmra.mxu0 %v14457_v17  ;;  %5981 = vmatmul.f32.vlgmr.msra.gmra.mxu1 %v17639_v1 }
 0x4fe   :  { %6235 = vmatpush.xpose.msra.mxu1 %v14459_v20  ;;  %v14578_v20 = vand.u32 4294901760, %v6049_v39 }
 0x4ff   :  { %6014 = vmatmul.f32.vlgmr.msrb.gmra.mxu2 %v14463_v29 }
 0x500   :  { %6270 = vmatpush.xpose.msrb.mxu2 %v14527_v45 }
 0x501   :  { %6041 = vmatmul.f32.vlgmr.msrb.gmra.mxu3 %v14463_v29  ;;  %v17640_v29 = vand.u32 4294901760, %v14479_v16 }
 0x502   :  { %6237 = vmatpush.xpose.msra.mxu1 %v14476_v53  ;;  %v4895_v17 = vpop.f32.mrf.mxu0  ;;  %v4938_v1 = vpop.f32.mrf.mxu1  ;;  %6309 = vmatpush.xpose.msrb.mxu3 %v6308_v15  ;;  %v6076_v53 = vsub.f32 %v6049_v39, %v14578_v20 }
 0x503   :  { %v4935_v23 = vadd.f32 %v4934_v36, %v4895_v17  ;;  %v4964_v49 = vpop.f32.mrf.mxu2  ;;  %v6051_v36 = vsel %vm1720_vm0, %v1547_v42, 0  ;;  %v1621_v15 = vpop.permute.xlu1 %1620  ;;  %v6451_v17 = vsel %vm1720_vm0, %v1623_v14, 0 }
 0x504   :  { %6272 = vmatpush.xpose.msrb.mxu2 %v14543_v3  ;;  %v4994_v34 = vpop.f32.mrf.mxu3  ;;  %v14592_v39 = vand.u32 4294901760, %v6051_v36  ;;  %v6449_v14 = vsel %vm1720_vm0, %v1621_v15, 0  ;;  %v17642_v15 = vand.u32 4294901760, %v14541_v28 }
 0x505   :  { %v4965_v27 = vadd.f32 %v4964_v49, %v4935_v23  ;;  %5951 = vmatmul.f32.vlgmr.msra.gmra.mxu0 %v14482_v21  ;;  %5987 = vmatmul.f32.gmra.mxu1 %v5887_v24  ;;  %v6247_v23 = vsel %vm1720_vm0, %v1553_v13, 0  ;;  %v17641_v49 = vand.u32 4294901760, %v14488_v26  ;;  %v1555_v21 = vpop.permute.xlu0 %1554 }
 0x506   :  { %6206 = vmatpush.xpose.msra.mxu0 %v17640_v29  ;;  %6315 = vmatpush.xpose.msrb.mxu3 %v6314_v7  ;;  %v14594_v7 = vand.u32 4294901760, %v6451_v17  ;;  %v14596_v42 = vand.u32 4294901760, %v6247_v23  ;;  %v6084_v26 = vsub.f32 %v6051_v36, %v14592_v39 }
 0x507   :  { %v4995_v2 = vadd.f32 %v4994_v34, %v4965_v27  ;;  %6018 = vmatmul.f32.gmra.mxu2 %v14492_v0  ;;  %v6077_v27 = vand.u32 4294901760, %v6076_v53 }
 0x509   :  { %6045 = vmatmul.f32.gmra.mxu3 %v14492_v0  ;;  %v6078_v0 = vsub.f32 %v6076_v53, %v6077_v27 }
 0x50a   :  { %6210 = vmatpush.xpose.msra.mxu0 %v17641_v49  ;;  %v4903_v24 = vpop.f32.mrf.mxu0  ;;  %v5054_v16 = vpop.f32.mrf.mxu1 }
 0x50b   :  { %v4939_v12 = vadd.f32 %v4938_v1, %v4903_v24  ;;  %v4969_v34 = vpop.f32.mrf.mxu2  ;;  %v14603_v1 = vand.u32 4294901760, %v6449_v14  ;;  %v14606_v24 = vsub.f32 %v6451_v17, %v14594_v7  ;;  %v6085_v17 = vand.u32 4294901760, %v6084_v26 }
 0x50c   :  { %v5000_v29 = vpop.f32.mrf.mxu3 }
 0x50d   :  { %v4970_v13 = vadd.f32 %v4969_v34, %v4939_v12  ;;  %5956 = vmatmul.f32.gmra.mxu0 %v14515_v19  ;;  %6119 = vmatmul.f32.vlgmr.msrb.gmra.mxu1 %v14578_v20  ;;  %v14611_v12 = vsub.f32 %v6247_v23, %v14596_v42  ;;  %v6249_v19 = vsel %vm1720_vm0, %v1555_v21, 0  ;;  %v14617_v60 = vsub.f32 %v6449_v14, %v14603_v1 }
 0x50e   :  { %6371 = vmatpush.xpose.msrb.mxu1 %v14527_v45  ;;  %v17643_v23 = vand.u32 4294901760, %v14551_v58  ;;  %v14622_v21 = vand.u32 4294901760, %v6249_v19  ;;  %v6086_v14 = vsub.f32 %v6084_v26, %v6085_v17 }
 0x50f   :  { %v5001_v49 = vadd.f32 %v5000_v29, %v4970_v13  ;;  %6149 = vmatmul.f32.vlgmr.msra.gmra.mxu2 %v6076_v53  ;;  %v6079_v13 = vand.u32 4294901760, %v6078_v0  ;;  %v17383_v10 = vand.u32 4294901760, %v14611_v12  ;;  %v17645_v43 = vand.u32 4294901760, %v14617_v60 }
 0x510   :  { %6404 = vmatpush.xpose.msra.mxu2 %v17642_v15  ;;  %v17382_v15 = vand.u32 4294901760, %v14606_v24 }
 0x511   :  { %6179 = vmatmul.f32.vlgmr.msra.gmra.mxu3 %v6077_v27  ;;  %v14624_v27 = vpop.permute.xlu0 %1560 }
 0x512   :  { %6373 = vmatpush.xpose.msrb.mxu1 %v14543_v3  ;;  %v5027_v36 = vpop.f32.mrf.mxu0  ;;  %v5058_v34 = vpop.f32.mrf.mxu1  ;;  %6433 = vmatpush.xpose.msra.mxu3 %v14527_v45 }
 0x513   :  { %v5028_v53 = vadd.f32 %v5027_v36, %v4995_v2  ;;  %v5091_v29 = vpop.f32.mrf.mxu2 }
 0x514   :  { %6408 = vmatpush.xpose.msra.mxu2 %v17643_v23  ;;  %v5130_v45 = vpop.f32.mrf.mxu3  ;;  %v6505_v23 = vsub.f32 %v14606_v24, %v17382_v15  ;;  %v6511_v15 = vsub.f32 %v14617_v60, %v17645_v43 }
 0x515   :  { %v14627_v0 = vadd.f32 %v5054_v16, %v5028_v53  ;;  %6080 = vmatmul.f32.vlgmr.msrb.gmra.mxu0 %v6079_v13  ;;  %6123 = vmatmul.f32.gmra.mxu1 %v14592_v39  ;;  %v5131_v2 = vadd.f32 %v5130_v45, %v5091_v29  ;;  %v14637_v16 = vsub.f32 %v6249_v19, %v14622_v21  ;;  %v1631_v53 = vpop.permute.xlu1 %1630  ;;  %v6087_v45 = vand.u32 4294901760, %v6086_v14 }
 0x516   :  { %6341 = vmatpush.xpose.msrb.mxu0 %v14541_v28  ;;  %6435 = vmatpush.xpose.msra.mxu3 %v14543_v3  ;;  %v6276_v13 = vsub.f32 %v14611_v12, %v17383_v10  ;;  %v6506_v36 = vand.u32 4294901760, %v6505_v23  ;;  %v6512_v14 = vand.u32 4294901760, %v6511_v15 }
 0x517   :  { %17644 = vst [vmem:[#allocation76_spill] sm:$0xff] %v14627_v0  ;;  %6154 = vmatmul.f32.gmra.mxu2 %v6084_v26  ;;  %v6283_v19 = vand.u32 4294901760, %v14637_v16 }
 0x518   :  { %v6277_v38 = vand.u32 4294901760, %v6276_v13 }
 0x519   :  { %6185 = vmatmul.f32.gmra.mxu3 %v6085_v17  ;;  %v6284_v43 = vsub.f32 %v14637_v16, %v6283_v19 }
 0x51a   :  { %6344 = vmatpush.xpose.msrb.mxu0 %v14551_v58  ;;  %v5031_v28 = vpop.f32.mrf.mxu0  ;;  %v5190_v3 = vpop.f32.mrf.mxu1  ;;  %v6649_v58 = vsel %vm1720_vm0, %v1631_v53, 0 }
 0x51b   :  { %v5032_v26 = vadd.f32 %v5031_v28, %v5001_v49  ;;  %v5099_v29 = vpop.f32.mrf.mxu2  ;;  %v1629_v49 = vpop.permute.xlu0 %1628  ;;  %v14652_v23 = vand.u32 4294901760, %v6649_v58 }
 0x51c   :  { %v5134_v10 = vpop.f32.mrf.mxu3 }
 0x51d   :  { %v14647_v9 = vadd.f32 %v5058_v34, %v5032_v26  ;;  %6088 = vmatmul.f32.gmra.mxu0 %v6087_v45  ;;  %6239 = vmatmul.f32.vlgmr.msra.gmra.mxu1 %v14578_v20  ;;  %v5135_v17 = vadd.f32 %v5134_v10, %v5099_v29  ;;  %v6647_v34 = vsel %vm1720_vm0, %v1629_v49, 0  ;;  %v6285_v29 = vand.u32 4294901760, %v6284_v43 }
 0x51e   :  { %6507 = vmatpush.xpose.msra.mxu1 %v6506_v36  ;;  %v14661_v15 = vand.u32 4294901760, %v6647_v34  ;;  %v14664_v36 = vsub.f32 %v6649_v58, %v14652_v23 }
 0x51f   :  { %17646 = vst [vmem:[#allocation77_spill] sm:$0xff] %v14647_v9  ;;  %6278 = vmatmul.f32.vlgmr.msrb.gmra.mxu2 %v6277_v38 }
 0x520   :  { %6539 = vmatpush.xpose.msrb.mxu2 %v14606_v24  ;;  %v6702_v49 = vand.u32 4294901760, %v14664_v36 }
 0x521   :  { %6317 = vmatmul.f32.vlgmr.msrb.gmra.mxu3 %v14596_v42 }
 0x522   :  { %6513 = vmatpush.xpose.msra.mxu1 %v6512_v14  ;;  %v5160_v13 = vpop.f32.mrf.mxu0  ;;  %v5196_v28 = vpop.f32.mrf.mxu1  ;;  %6569 = vmatpush.xpose.msrb.mxu3 %v14594_v7 }
 0x523   :  { %v5161_v10 = vadd.f32 %v5160_v13, %v5131_v2  ;;  %v5223_v38 = vpop.f32.mrf.mxu2  ;;  %v14671_v2 = vsub.f32 %v6647_v34, %v14661_v15 }
 0x524   :  { %6542 = vmatpush.xpose.msrb.mxu2 %v14617_v60  ;;  %v5250_v26 = vpop.f32.mrf.mxu3 }
 0x525   :  { %v5191_v53 = vadd.f32 %v5190_v3, %v5161_v10  ;;  %6212 = vmatmul.f32.vlgmr.msra.gmra.mxu0 %v14578_v20  ;;  %6243 = vmatmul.f32.gmra.mxu1 %v14592_v39  ;;  %v17384_v13 = vand.u32 4294901760, %v14671_v2  ;;  %v6703_v10 = vsub.f32 %v14664_v36, %v6702_v49 }
 0x526   :  { %6468 = vmatpush.xpose.msra.mxu0 %v14594_v7  ;;  %6571 = vmatpush.xpose.msrb.mxu3 %v14603_v1 }
 0x527   :  { %v5224_v45 = vadd.f32 %v5223_v38, %v5191_v53  ;;  %6286 = vmatmul.f32.gmra.mxu2 %v6285_v29  ;;  %v1563_v38 = vpop.permute.xlu2 %1562 }
 0x529   :  { %v14674_v58 = vadd.f32 %v5250_v26, %v5224_v45  ;;  %6321 = vmatmul.f32.gmra.mxu3 %v14622_v21  ;;  %v17648_v26 = vand.u32 4294901760, %v14611_v12  ;;  %v6704_v45 = vand.u32 4294901760, %v6703_v10 }
 0x52a   :  { %6470 = vmatpush.xpose.msra.mxu0 %v14603_v1  ;;  %v5165_v20 = vpop.f32.mrf.mxu0  ;;  %v5328_v3 = vpop.f32.mrf.mxu1 }
 0x52b   :  { %17647 = vst [vmem:[#allocation78_spill] sm:$0xff] %v14674_v58  ;;  %v5166_v14 = vadd.f32 %v5165_v20, %v5135_v17  ;;  %v5227_v43 = vpop.f32.mrf.mxu2  ;;  %v6445_v17 = vsel %vm1720_vm0, %v14624_v27, 0 }
 0x52c   :  { %v5254_v34 = vpop.f32.mrf.mxu3 }
 0x52d   :  { %v5197_v53 = vadd.f32 %v5196_v28, %v5166_v14  ;;  %6216 = vmatmul.f32.gmra.mxu0 %v14592_v39  ;;  %6377 = vmatmul.f32.vlgmr.msrb.gmra.mxu1 %v17648_v26  ;;  %v6709_v39 = vsub.f32 %v14671_v2, %v17384_v13  ;;  %v14695_v14 = vand.u32 4294901760, %v6445_v17 }
 0x52e   :  { %6631 = vmatpush.xpose.msrb.mxu1 %v14594_v7 }
 0x52f   :  { %v5228_v29 = vadd.f32 %v5227_v43, %v5197_v53  ;;  %6410 = vmatmul.f32.vlgmr.msra.gmra.mxu2 %v14596_v42  ;;  %v6710_v10 = vand.u32 4294901760, %v6709_v39  ;;  %v17650_v53 = vand.u32 4294901760, %v14606_v24 }
 0x530   :  { %6666 = vmatpush.xpose.msra.mxu2 %v14652_v23 }
 0x531   :  { %v14688_v20 = vadd.f32 %v5254_v34, %v5228_v29  ;;  %6437 = vmatmul.f32.vlgmr.msra.gmra.mxu3 %v14596_v42  ;;  %v6472_v42 = vsub.f32 %v6445_v17, %v14695_v14  ;;  %v6447_v34 = vsel %vm1720_vm0, %v1563_v38, 0 }
 0x532   :  { %6633 = vmatpush.xpose.msrb.mxu1 %v14603_v1  ;;  %v5289_v7 = vpop.f32.mrf.mxu0  ;;  %v5332_v28 = vpop.f32.mrf.mxu1  ;;  %6705 = vmatpush.xpose.msra.mxu3 %v6704_v45  ;;  %v14710_v39 = vand.u32 4294901760, %v6447_v34 }
 0x533   :  { %17649 = vst [vmem:[#allocation79_spill] sm:$0xff] %v14688_v20  ;;  %v5358_v43 = vpop.f32.mrf.mxu2  ;;  %v1569_v1 = vpop.permute.xlu2 %1568  ;;  %v5329_v26 = vadd.f32 %v5328_v3, %v5289_v7  ;;  %v6473_v24 = vand.u32 4294901760, %v6472_v42 }
 0x534   :  { %6668 = vmatpush.xpose.msra.mxu2 %v14661_v15  ;;  %v5388_v27 = vpop.f32.mrf.mxu3  ;;  %v6643_v29 = vsel %vm1720_vm0, %v1569_v1, 0  ;;  %v6480_v7 = vsub.f32 %v6447_v34, %v14710_v39  ;;  %v1571_v1 = vpop.permute.xlu1 %1570 }
 0x535   :  { %6347 = vmatmul.f32.vlgmr.msrb.gmra.mxu0 %v14611_v12  ;;  %6383 = vmatmul.f32.gmra.mxu1 %v6283_v19  ;;  %v17651_v12 = vand.u32 4294901760, %v14617_v60  ;;  %v5359_v38 = vadd.f32 %v5358_v43, %v5329_v26  ;;  %v14721_v60 = vand.u32 4294901760, %v14126_v41  ;;  %v6645_v13 = vsel %vm1720_vm0, %v1571_v1, 0 }
 0x536   :  { %6602 = vmatpush.xpose.msrb.mxu0 %v17650_v53  ;;  %6711 = vmatpush.xpose.msra.mxu3 %v6710_v10  ;;  %v14713_v10 = vand.u32 4294901760, %v13989_v44  ;;  %v14715_v53 = vand.u32 4294901760, %v6643_v29 }
 0x537   :  { %6414 = vmatmul.f32.gmra.mxu2 %v14622_v21 }
 0x538   :  { %v14729_v43 = vsub.f32 %v6643_v29, %v14715_v53  ;;  %v6481_v29 = vand.u32 4294901760, %v6480_v7 }
 0x539   :  { %6441 = vmatmul.f32.gmra.mxu3 %v14622_v21  ;;  %v6474_v21 = vsub.f32 %v6472_v42, %v6473_v24 }
 0x53a   :  { %6606 = vmatpush.xpose.msrb.mxu0 %v17651_v12  ;;  %v5297_v19 = vpop.f32.mrf.mxu0  ;;  %v5448_v45 = vpop.f32.mrf.mxu1  ;;  %v14726_v12 = vsub.f32 %v13989_v44, %v14713_v10 }
 0x53b   :  { %v5363_v17 = vpop.f32.mrf.mxu2  ;;  %v5333_v26 = vadd.f32 %v5332_v28, %v5297_v19  ;;  %v14741_v19 = vand.u32 4294901760, %v6645_v13 }
 0x53c   :  { %v5394_v3 = vpop.f32.mrf.mxu3  ;;  %v17385_v28 = vand.u32 4294901760, %v14726_v12 }
 0x53d   :  { %6352 = vmatmul.f32.gmra.mxu0 %v14637_v16  ;;  %6515 = vmatmul.f32.vlgmr.msra.gmra.mxu1 %v14695_v14  ;;  %v5389_v16 = vadd.f32 %v5388_v27, %v5359_v38  ;;  %v17652_v27 = vand.u32 4294901760, %v14671_v2  ;;  %v5364_v38 = vadd.f32 %v5363_v17, %v5333_v26  ;;  %v14756_v26 = vsub.f32 %v6645_v13, %v14741_v19 }
 0x53e   :  { %6767 = vmatpush.xpose.msra.mxu1 %v14652_v23  ;;  %v7283_v17 = vsub.f32 %v14726_v12, %v17385_v28 }
 0x53f   :  { %6545 = vmatmul.f32.vlgmr.msrb.gmra.mxu2 %v6472_v42  ;;  %v14735_v42 = vsub.f32 %v14126_v41, %v14721_v60  ;;  %v6679_v28 = vand.u32 4294901760, %v14756_v26 }
 0x540   :  { %6800 = vmatpush.xpose.msrb.mxu2 %v6702_v49  ;;  %v6475_v49 = vand.u32 4294901760, %v6474_v21  ;;  %v7284_v13 = vand.u32 4294901760, %v7283_v17 }
 0x541   :  { %6575 = vmatmul.f32.vlgmr.msrb.gmra.mxu3 %v6473_v24  ;;  %v6671_v24 = vand.u32 4294901760, %v14729_v43 }
 0x542   :  { %6769 = vmatpush.xpose.msra.mxu1 %v14661_v15  ;;  %v5421_v9 = vpop.f32.mrf.mxu0  ;;  %v5452_v58 = vpop.f32.mrf.mxu1  ;;  %6829 = vmatpush.xpose.msrb.mxu3 %v14652_v23 }
 0x543   :  { %v5422_v34 = vadd.f32 %v5421_v9, %v5389_v16  ;;  %v5487_v20 = vpop.f32.mrf.mxu2  ;;  %v7288_v9 = vand.u32 4294901760, %v14735_v42  ;;  %v6482_v16 = vsub.f32 %v6480_v7, %v6481_v29 }
 0x544   :  { %6804 = vmatpush.xpose.msrb.mxu2 %v17652_v27  ;;  %v5526_v1 = vpop.f32.mrf.mxu3 }
 0x545   :  { %6476 = vmatmul.f32.vlgmr.msra.gmra.mxu0 %v6475_v49  ;;  %6519 = vmatmul.f32.gmra.mxu1 %v14710_v39  ;;  %v14745_v21 = vadd.f32 %v5448_v45, %v5422_v34  ;;  %v5395_v45 = vadd.f32 %v5394_v3, %v5364_v38  ;;  %v1643_v3 = vpop.permute.xlu0 %1642  ;;  %v5527_v17 = vadd.f32 %v5526_v1, %v5487_v20 }
 0x546   :  { %6737 = vmatpush.xpose.msra.mxu0 %v14664_v36  ;;  %6831 = vmatpush.xpose.msrb.mxu3 %v14661_v15  ;;  %v6672_v36 = vsub.f32 %v14729_v43, %v6671_v24 }
 0x547   :  { %6550 = vmatmul.f32.gmra.mxu2 %v6480_v7  ;;  %v6841_v23 = vsel %vm1720_vm0, %v14745_v21, -inf  ;;  %v7289_v7 = vsub.f32 %v14735_v42, %v7288_v9 }
 0x548   :  { %6842 = vmax.xlane.f32.xlu0 %v6841_v23  ;;  %v6483_v23 = vand.u32 4294901760, %v6482_v16  ;;  %v6673_v4 = vand.u32 4294901760, %v6672_v36  ;;  %v14776_v16 = vand.u32 4294901760, %v1643_v3 }
 0x549   :  { %6581 = vmatmul.f32.gmra.mxu3 %v6481_v29  ;;  %v7290_v29 = vand.u32 4294901760, %v7289_v7 }
 0x54a   :  { %6740 = vmatpush.xpose.msra.mxu0 %v14671_v2  ;;  %v5425_v15 = vpop.f32.mrf.mxu0  ;;  %v5586_v49 = vpop.f32.mrf.mxu1  ;;  %v14789_v20 = vsub.f32 %v1643_v3, %v14776_v16 }
 0x54b   :  { %v5426_v34 = vadd.f32 %v5425_v15, %v5395_v45  ;;  %v14765_v27 = vpop.f32.mrf.mxu2  ;;  %v1641_v45 = vpop.permute.xlu2 %1640 }
 0x54c   :  { %v14768_v51 = vpop.f32.mrf.mxu3  ;;  %v14785_v15 = vand.u32 4294901760, %v1641_v45  ;;  %v17387_v3 = vand.u32 4294901760, %v14789_v20 }
 0x54d   :  { %6484 = vmatmul.f32.gmra.mxu0 %v6483_v23  ;;  %6635 = vmatmul.f32.vlgmr.msrb.gmra.mxu1 %v14695_v14  ;;  %v14771_v2 = vadd.f32 %v5452_v58, %v5426_v34  ;;  %v6680_v58 = vsub.f32 %v14756_v26, %v6679_v28 }
 0x54e   :  { %7285 = vmatpush.msrb.mxu1 %v7284_v13 }
 0x54f   :  { %6674 = vmatmul.f32.vlgmr.msra.gmra.mxu2 %v6673_v4  ;;  %v6844_v38 = vsel %vm1720_vm0, %v14771_v2, -inf  ;;  %v6681_v13 = vand.u32 4294901760, %v6680_v58 }
 0x550   :  { %7291 = vmatpush.msrb.mxu1 %v7290_v29  ;;  %7317 = vmatpush.msra.mxu2 %v14726_v12  ;;  %v14796_v29 = vsub.f32 %v1641_v45, %v14785_v15  ;;  %v7479_v45 = vsub.f32 %v14789_v20, %v17387_v3 }
 0x551   :  { %6845 = vmax.xlane.f32.xlu2 %v6844_v38  ;;  %6713 = vmatmul.f32.vlgmr.msra.gmra.mxu3 %v14715_v53 }
 0x552   :  { %7320 = vmatpush.msra.mxu2 %v14735_v42  ;;  %v5556_v4 = vpop.f32.mrf.mxu0  ;;  %v14783_v36 = vpop.f32.mrf.mxu1  ;;  %7347 = vmatpush.msra.mxu3 %v14713_v10  ;;  %v17386_v58 = vand.u32 4294901760, %v14796_v29 }
 0x553   :  { %v5557_v7 = vadd.f32 %v5556_v4, %v5527_v17  ;;  %v5619_v34 = vpop.f32.mrf.mxu2 }
 0x554   :  { %7349 = vmatpush.msra.mxu3 %v14721_v60  ;;  %v5646_v23 = vpop.f32.mrf.mxu3 }
 0x555   :  { %v5587_v1 = vadd.f32 %v5586_v49, %v5557_v7  ;;  %6608 = vmatmul.f32.vlgmr.msrb.gmra.mxu0 %v14695_v14  ;;  %6639 = vmatmul.f32.gmra.mxu1 %v14710_v39 }
 0x556   :  { %7246 = vmatpush.msrb.mxu0 %v14713_v10 }
 0x557   :  { %v5620_v38 = vadd.f32 %v5619_v34, %v5587_v1  ;;  %6682 = vmatmul.f32.gmra.mxu2 %v6681_v13  ;;  %v7485_v1 = vsub.f32 %v14796_v29, %v17386_v58 }
 0x558   :  { %7248 = vmatpush.msrb.mxu0 %v14721_v60 }
 0x559   :  { %v14800_v49 = vadd.f32 %v5646_v23, %v5620_v38  ;;  %6717 = vmatmul.f32.gmra.mxu3 %v14741_v19  ;;  %v7480_v23 = vand.u32 4294901760, %v7479_v45 }
 0x55a   :  { %v5561_v17 = vpop.f32.mrf.mxu0  ;;  %v5724_v14 = vpop.f32.mrf.mxu1 }
 0x55b   :  { %v5623_v4 = vpop.f32.mrf.mxu2  ;;  %v6847_v7 = vsel %vm1720_vm0, %v14800_v49, -inf }
 0x55c   :  { %6848 = vmax.xlane.f32.xlu1 %v6847_v7  ;;  %1652 = vrot.lane.b32.xlu0 %v14126_v41, %s11908_s24  ;;  %v5650_v34 = vpop.f32.mrf.mxu3  ;;  %v17653_v7 = vand.u32 4294901760, %v14726_v12  ;;  %v5531_v12 = vadd.f32 %v14768_v51, %v14765_v27 }
 0x55d   :  { %6612 = vmatmul.f32.gmra.mxu0 %v14710_v39  ;;  %6773 = vmatmul.f32.vlgmr.msra.gmra.mxu1 %v6671_v24 }
 0x55e   :  { %7409 = vmatpush.msra.mxu1 %v14713_v10  ;;  %v7486_v10 = vand.u32 4294901760, %v7485_v1  ;;  %v5562_v42 = vadd.f32 %v5561_v17, %v5531_v12 }
 0x55f   :  { %6806 = vmatmul.f32.vlgmr.msrb.gmra.mxu2 %v14715_v53 }
 0x560   :  { %7442 = vmatpush.msrb.mxu2 %v14776_v16  ;;  %7411 = vmatpush.msra.mxu1 %v14721_v60 }
 0x561   :  { %6833 = vmatmul.f32.vlgmr.msrb.gmra.mxu3 %v14715_v53 }
 0x562   :  { %7444 = vmatpush.msrb.mxu2 %v14785_v15  ;;  %v5685_v39 = vpop.f32.mrf.mxu0  ;;  %v5728_v13 = vpop.f32.mrf.mxu1  ;;  %7481 = vmatpush.msrb.mxu3 %v7480_v23 }
 0x563   :  { %v5754_v24 = vpop.f32.mrf.mxu2  ;;  %v5725_v53 = vadd.f32 %v5724_v14, %v5685_v39  ;;  %v5593_v39 = vadd.f32 %v14783_v36, %v5562_v42 }
 0x564   :  { %7487 = vmatpush.msrb.mxu3 %v7486_v10  ;;  %v5784_v38 = vpop.f32.mrf.mxu3 }
 0x565   :  { %6743 = vmatmul.f32.vlgmr.msra.gmra.mxu0 %v14729_v43  ;;  %6779 = vmatmul.f32.gmra.mxu1 %v6679_v28  ;;  %v5755_v23 = vadd.f32 %v5754_v24, %v5725_v53 }
 0x566   :  { %7380 = vmatpush.msra.mxu0 %v17653_v7 }
 0x567   :  { %6810 = vmatmul.f32.gmra.mxu2 %v14741_v19  ;;  %v5785_v43 = vadd.f32 %v5784_v38, %v5755_v23  ;;  %v5624_v23 = vadd.f32 %v5623_v4, %v5593_v39 }
 0x568   :  { %7384 = vmatpush.msra.mxu0 %v7288_v9 }
 0x569   :  { %6837 = vmatmul.f32.gmra.mxu3 %v14741_v19  ;;  %v14840_v51 = vadd.f32 %v5650_v34, %v5624_v23 }
 0x56a   :  { %v5693_v60 = vpop.f32.mrf.mxu0  ;;  %v5844_v45 = vpop.f32.mrf.mxu1 }
 0x56b   :  { %v5759_v1 = vpop.f32.mrf.mxu2  ;;  %v5729_v38 = vadd.f32 %v5728_v13, %v5693_v60  ;;  %v6850_v36 = vsel %vm1720_vm0, %v14840_v51, -inf }
 0x56c   :  { %v5790_v10 = vpop.f32.mrf.mxu3 }
 0x56d   :  { %6748 = vmatmul.f32.gmra.mxu0 %v14756_v26  ;;  %v5760_v52 = vadd.f32 %v5759_v1, %v5729_v38 }
 0x572   :  { %v5817_v28 = vpop.f32.mrf.mxu0  ;;  %v5848_v58 = vpop.f32.mrf.mxu1 }
 0x573   :  { %v5818_v7 = vadd.f32 %v5817_v28, %v5785_v43  ;;  %v5883_v3 = vpop.f32.mrf.mxu2 }
 0x574   :  { %v5922_v9 = vpop.f32.mrf.mxu3 }
 0x575   :  { %v14835_v14 = vadd.f32 %v5844_v45, %v5818_v7  ;;  %v5923_v27 = vadd.f32 %v5922_v9, %v5883_v3  ;;  %v5791_v45 = vadd.f32 %v5790_v10, %v5760_v52 }
 0x577   :  { %v6853_v19 = vsel %vm1720_vm0, %v14835_v14, -inf }
 0x578   :  { %6854 = vmax.xlane.f32.xlu2 %v6853_v19 }
 0x57a   :  { %v5821_v24 = vpop.f32.mrf.mxu0  ;;  %v5982_v26 = vpop.f32.mrf.mxu1 }
 0x57b   :  { %v5891_v53 = vpop.f32.mrf.mxu2  ;;  %v5822_v7 = vadd.f32 %v5821_v24, %v5791_v45 }
 0x57c   :  { %v5926_v61 = vpop.f32.mrf.mxu3 }
 0x57d   :  { %v5927_v60 = vadd.f32 %v5926_v61, %v5891_v53  ;;  %v14846_v1 = vadd.f32 %v5848_v58, %v5822_v7 }
 0x57f   :  { %v6856_v24 = vsel %vm1720_vm0, %v14846_v1, -inf }
 0x582   :  { %v5952_v17 = vpop.f32.mrf.mxu0  ;;  %v5988_v43 = vpop.f32.mrf.mxu1 }
 0x583   :  { %v5953_v28 = vadd.f32 %v5952_v17, %v5923_v27  ;;  %v6015_v12 = vpop.f32.mrf.mxu2 }
 0x584   :  { %v6042_v19 = vpop.f32.mrf.mxu3 }
 0x585   :  { %v5983_v0 = vadd.f32 %v5982_v26, %v5953_v28 }
 0x586   :  { %6851 = vmax.xlane.f32.xlu0 %v6850_v36 }
 0x587   :  { %v6016_v13 = vadd.f32 %v6015_v12, %v5983_v0 }
 0x589   :  { %v14844_v4 = vadd.f32 %v6042_v19, %v6016_v13 }
 0x58a   :  { %v5957_v34 = vpop.f32.mrf.mxu0  ;;  %v6120_v3 = vpop.f32.mrf.mxu1 }
 0x58b   :  { %v5958_v42 = vadd.f32 %v5957_v34, %v5927_v60  ;;  %v6019_v9 = vpop.f32.mrf.mxu2  ;;  %v6859_v52 = vsel %vm1720_vm0, %v14844_v4, -inf }
 0x58c   :  { %6860 = vmax.xlane.f32.xlu1 %v6859_v52  ;;  %v6046_v39 = vpop.f32.mrf.mxu3 }
 0x58d   :  { %v5989_v10 = vadd.f32 %v5988_v43, %v5958_v42 }
 0x58e   :  { %6857 = vmax.xlane.f32.xlu0 %v6856_v24 }
 0x58f   :  { %v6020_v0 = vadd.f32 %v6019_v9, %v5989_v10 }
 0x591   :  { %v14852_v61 = vadd.f32 %v6046_v39, %v6020_v0 }
 0x592   :  { %v6081_v26 = vpop.f32.mrf.mxu0  ;;  %v6124_v58 = vpop.f32.mrf.mxu1 }
 0x593   :  { %v6150_v38 = vpop.f32.mrf.mxu2  ;;  %v6862_v53 = vsel %vm1720_vm0, %v14852_v61, -inf  ;;  %v6121_v27 = vadd.f32 %v6120_v3, %v6081_v26 }
 0x594   :  { %6863 = vmax.xlane.f32.xlu2 %v6862_v53  ;;  %v6180_v23 = vpop.f32.mrf.mxu3 }
 0x595   :  { %v6151_v28 = vadd.f32 %v6150_v38, %v6121_v27 }
 0x597   :  { %v6181_v7 = vadd.f32 %v6180_v23, %v6151_v28 }
 0x59a   :  { %v6089_v17 = vpop.f32.mrf.mxu0  ;;  %v6240_v45 = vpop.f32.mrf.mxu1 }
 0x59b   :  { %v6155_v43 = vpop.f32.mrf.mxu2  ;;  %v6125_v19 = vadd.f32 %v6124_v58, %v6089_v17 }
 0x59c   :  { %v6186_v12 = vpop.f32.mrf.mxu3 }
 0x59d   :  { %v6156_v42 = vadd.f32 %v6155_v43, %v6125_v19 }
 0x59f   :  { %v6187_v3 = vadd.f32 %v6186_v12, %v6156_v42 }
 0x5a2   :  { %v6213_v36 = vpop.f32.mrf.mxu0  ;;  %v6244_v13 = vpop.f32.mrf.mxu1 }
 0x5a3   :  { %v6214_v60 = vadd.f32 %v6213_v36, %v6181_v7  ;;  %v6279_v34 = vpop.f32.mrf.mxu2 }
 0x5a4   :  { %v6318_v9 = vpop.f32.mrf.mxu3 }
 0x5a5   :  { %v14856_v52 = vadd.f32 %v6240_v45, %v6214_v60  ;;  %v6319_v23 = vadd.f32 %v6318_v9, %v6279_v34 }
 0x5a7   :  { %v6865_v10 = vsel %vm1720_vm0, %v14856_v52, -inf }
 0x5a8   :  { %6866 = vmax.xlane.f32.xlu1 %v6865_v10  ;;  %v14869_v10 = vpop.permute.xlu1 %1654 }
 0x5aa   :  { %v6217_v39 = vpop.f32.mrf.mxu0  ;;  %v6378_v26 = vpop.f32.mrf.mxu1 }
 0x5ab   :  { %v6218_v24 = vadd.f32 %v6217_v39, %v6187_v3  ;;  %v6287_v0 = vpop.f32.mrf.mxu2 }
 0x5ac   :  { %v6322_v58 = vpop.f32.mrf.mxu3 }
 0x5ad   :  { %v14860_v38 = vadd.f32 %v6244_v13, %v6218_v24  ;;  %v6323_v34 = vadd.f32 %v6322_v58, %v6287_v0 }
 0x5af   :  { %v6868_v53 = vsel %vm1720_vm0, %v14860_v38, -inf }
 0x5b0   :  { %6869 = vmax.xlane.f32.xlu0 %v6868_v53 }
 0x5b2   :  { %v6348_v27 = vpop.f32.mrf.mxu0  ;;  %v6384_v43 = vpop.f32.mrf.mxu1 }
 0x5b3   :  { %v6349_v17 = vadd.f32 %v6348_v27, %v6319_v23  ;;  %v6411_v28 = vpop.f32.mrf.mxu2 }
 0x5b4   :  { %v6438_v19 = vpop.f32.mrf.mxu3 }
 0x5b5   :  { %v6379_v45 = vadd.f32 %v6378_v26, %v6349_v17 }
 0x5b7   :  { %v6412_v7 = vadd.f32 %v6411_v28, %v6379_v45  ;;  %v14874_v28 = vpop.permute.xlu1 %1666 }
 0x5b9   :  { %v14864_v12 = vadd.f32 %v6438_v19, %v6412_v7 }
 0x5ba   :  { %v6353_v36 = vpop.f32.mrf.mxu0  ;;  %v6516_v39 = vpop.f32.mrf.mxu1 }
 0x5bb   :  { %v6843_v60 = vpop.xlane.xlu0 %6842  ;;  %v6871_v13 = vsel %vm1720_vm0, %v14864_v12, -inf  ;;  %v6354_v3 = vadd.f32 %v6353_v36, %v6323_v34  ;;  %v6415_v24 = vpop.f32.mrf.mxu2 }
 0x5bc   :  { %v6889_v42 = vsub.f32 %v14745_v21, %v6843_v60  ;;  %6872 = vmax.xlane.f32.xlu2 %v6871_v13  ;;  %v6442_v45 = vpop.f32.mrf.mxu3 }
 0x5bd   :  { %v6385_v53 = vadd.f32 %v6384_v43, %v6354_v3 }
 0x5be   :  { %v6905_v9 = vmul.f32 1.442695, %v6889_v42 }
 0x5bf   :  { %v6416_v21 = vadd.f32 %v6415_v24, %v6385_v53 }
 0x5c0   :  { %11592 = vpow2.f32 %v6905_v9 }
 0x5c1   :  { %v14878_v60 = vadd.f32 %v6442_v45, %v6416_v21 }
 0x5c2   :  { %v6477_v26 = vpop.f32.mrf.mxu0  ;;  %v6520_v19 = vpop.f32.mrf.mxu1 }
 0x5c3   :  { %v6517_v58 = vadd.f32 %v6516_v39, %v6477_v26  ;;  %v6546_v43 = vpop.f32.mrf.mxu2  ;;  %v6874_v34 = vsel %vm1720_vm0, %v14878_v60, -inf }
 0x5c4   :  { %v6846_v23 = vpop.xlane.xlu2 %6845  ;;  %v6576_v9 = vpop.f32.mrf.mxu3 }
 0x5c5   :  { %v6890_v27 = vsub.f32 %v14771_v2, %v6846_v23  ;;  %v6547_v13 = vadd.f32 %v6546_v43, %v6517_v58 }
 0x5c6   :  { %v14872_v17 = vpop.eup %11592 }
 0x5c7   :  { %v6907_v7 = vmul.f32 1.442695, %v6890_v27  ;;  %v6937_v0 = vsel %vm1720_vm0, %v14872_v17, 0.0  ;;  %v6577_v24 = vadd.f32 %v6576_v9, %v6547_v13 }
 0x5c8   :  { %6938 = vadd.xlane.f32.xlu1 %v6937_v0 }
 0x5c9   :  { %11594 = vpow2.f32 %v6907_v7 }
 0x5ca   :  { %v6485_v36 = vpop.f32.mrf.mxu0  ;;  %v6636_v27 = vpop.f32.mrf.mxu1 }
 0x5cb   :  { %v6551_v0 = vpop.f32.mrf.mxu2 }
 0x5cc   :  { %v6582_v43 = vpop.f32.mrf.mxu3 }
 0x5ce   :  { %v14899_v58 = vpop.permute.xlu0 %1652 }
 0x5cf   :  { %v14880_v2 = vpop.eup %11594  ;;  %v6849_v42 = vpop.xlane.xlu1 %6848 }
 0x5d0   :  { %v6891_v3 = vsub.f32 %v14800_v49, %v6849_v42  ;;  %6875 = vmax.xlane.f32.xlu1 %v6874_v34  ;;  %v6940_v39 = vsel %vm1720_vm0, %v14880_v2, 0.0 }
 0x5d1   :  { %6941 = vadd.xlane.f32.xlu2 %v6940_v39 }
 0x5d2   :  { %v6909_v26 = vmul.f32 1.442695, %v6891_v3  ;;  %v6609_v53 = vpop.f32.mrf.mxu0 }
 0x5d3   :  { %v6610_v23 = vadd.f32 %v6609_v53, %v6577_v24  ;;  %v6675_v42 = vpop.f32.mrf.mxu2  ;;  %v6521_v24 = vadd.f32 %v6520_v19, %v6485_v36  ;;  %v6640_v53 = vpop.f32.mrf.mxu1 }
 0x5d4   :  { %11596 = vpow2.f32 %v6909_v26  ;;  %v6714_v39 = vpop.f32.mrf.mxu3 }
 0x5d5   :  { %v14887_v45 = vadd.f32 %v6636_v27, %v6610_v23  ;;  %v6552_v23 = vadd.f32 %v6551_v0, %v6521_v24  ;;  %v6715_v18 = vadd.f32 %v6714_v39, %v6675_v42 }
 0x5d7   :  { %v6877_v21 = vsel %vm1720_vm0, %v14887_v45, -inf  ;;  %v6583_v48 = vadd.f32 %v6582_v43, %v6552_v23 }
 0x5d8   :  { %6878 = vmax.xlane.f32.xlu1 %v6877_v21 }
 0x5da   :  { %v14891_v7 = vpop.eup %11596  ;;  %v6613_v34 = vpop.f32.mrf.mxu0 }
 0x5db   :  { %v6943_v49 = vsel %vm1720_vm0, %v14891_v7, 0.0  ;;  %v6683_v21 = vpop.f32.mrf.mxu2  ;;  %v6774_v19 = vpop.f32.mrf.mxu1 }
 0x5dc   :  { %6944 = vadd.xlane.f32.xlu0 %v6943_v49  ;;  %v6718_v63 = vpop.f32.mrf.mxu3 }
 0x5dd   :  { %v6719_v32 = vadd.f32 %v6718_v63, %v6683_v21 }
 0x5e2   :  { %v6744_v49 = vpop.f32.mrf.mxu0 }
 0x5e3   :  { %v6807_v24 = vpop.f32.mrf.mxu2 }
 0x5e4   :  { %v6834_v43 = vpop.f32.mrf.mxu3 }
 0x5e9   :  { %1664 = vrot.lane.b32.xlu2 %v14126_v41, %s11909_s25 }
 0x5ea   :  { %v6749_v37 = vpop.f32.mrf.mxu0 }
 0x5eb   :  { %v6855_v26 = vpop.xlane.xlu2 %6854  ;;  %v6750_v22 = vadd.f32 %v6749_v37, %v6719_v32 }
 0x5f0   :  { %1676 = vrot.lane.b32.xlu0 %v14126_v41, %s11910_s26 }
 0x5f9   :  { %v6852_v13 = vpop.xlane.xlu0 %6851 }
 0x5fa   :  { %v6892_v9 = vsub.f32 %v14840_v51, %v6852_v13  ;;  %v6614_v13 = vadd.f32 %v6613_v34, %v6583_v48  ;;  %v6811_v34 = vpop.f32.mrf.mxu2 }
 0x5fc   :  { %v6911_v3 = vmul.f32 1.442695, %v6892_v9  ;;  %v6745_v9 = vadd.f32 %v6744_v49, %v6715_v18  ;;  %v14907_v0 = vadd.f32 %v6640_v53, %v6614_v13  ;;  %v6838_v53 = vpop.f32.mrf.mxu3  ;;  %v6893_v13 = vsub.f32 %v14835_v14, %v6855_v26 }
 0x5fe   :  { %11598 = vpow2.f32 %v6911_v3  ;;  %v6775_v3 = vadd.f32 %v6774_v19, %v6745_v9 }
 0x5ff   :  { %v6861_v42 = vpop.xlane.xlu1 %6860 }
 0x600   :  { %v6808_v59 = vadd.f32 %v6807_v24, %v6775_v3 }
 0x601   :  { %v6858_v19 = vpop.xlane.xlu0 %6857 }
 0x602   :  { %v14911_v48 = vadd.f32 %v6834_v43, %v6808_v59  ;;  %v6894_v3 = vsub.f32 %v14846_v1, %v6858_v19 }
 0x604   :  { %v14902_v27 = vpop.eup %11598  ;;  %v6883_v37 = vsel %vm1720_vm0, %v14911_v48, -inf }
 0x605   :  { %v6946_v8 = vsel %vm1720_vm0, %v14902_v27, 0.0 }
 0x606   :  { %6947 = vadd.xlane.f32.xlu1 %v6946_v8  ;;  %v6880_v8 = vsel %vm1720_vm0, %v14907_v0, -inf }
 0x607   :  { %v6864_v47 = vpop.xlane.xlu2 %6863 }
 0x608   :  { %v6896_v51 = vsub.f32 %v14852_v61, %v6864_v47  ;;  %v6780_v47 = vpop.f32.mrf.mxu1 }
 0x609   :  { %v6781_v18 = vadd.f32 %v6780_v47, %v6750_v22 }
 0x60a   :  { %v6919_v36 = vmul.f32 1.442695, %v6896_v51 }
 0x60b   :  { %v6812_v39 = vadd.f32 %v6811_v34, %v6781_v18 }
 0x60c   :  { %11600 = vpow2.f32 %v6919_v36 }
 0x60d   :  { %v14920_v21 = vadd.f32 %v6838_v53, %v6812_v39  ;;  %v6895_v39 = vsub.f32 %v14844_v4, %v6861_v42 }
 0x60f   :  { %v6886_v22 = vsel %vm1720_vm0, %v14920_v21, -inf }
 0x612   :  { %6881 = vmax.xlane.f32.xlu2 %v6880_v8  ;;  %v14913_v61 = vpop.eup %11600  ;;  %v6915_v8 = vmul.f32 1.442695, %v6894_v3 }
 0x613   :  { %v6958_v63 = vsel %vm1720_vm0, %v14913_v61, 0.0 }
 0x61a   :  { %6959 = vadd.xlane.f32.xlu2 %v6958_v63  ;;  %6884 = vmax.xlane.f32.xlu0 %v6883_v37 }
 0x61b   :  { %v6867_v32 = vpop.xlane.xlu1 %6866 }
 0x61c   :  { %v6897_v23 = vsub.f32 %v14856_v52, %v6867_v32  ;;  %v6913_v52 = vmul.f32 1.442695, %v6893_v13 }
 0x61e   :  { %v6921_v59 = vmul.f32 1.442695, %v6897_v23 }
 0x61f   :  { %1678 = vrot.lane.b32.xlu1 %v13989_v44, %s11910_s26 }
 0x620   :  { %11602 = vpow2.f32 %v6921_v59 }
 0x622   :  { %6887 = vmax.xlane.f32.xlu0 %v6886_v22 }
 0x623   :  { %v6870_v32 = vpop.xlane.xlu0 %6869 }
 0x626   :  { %v14926_v49 = vpop.eup %11602 }
 0x627   :  { %v6961_v51 = vsel %vm1720_vm0, %v14926_v49, 0.0 }
 0x62a   :  { %6962 = vadd.xlane.f32.xlu0 %v6961_v51 }
 0x62f   :  { %v14931_v36 = vpop.xlane.xlu2 %6872 }
 0x63b   :  { %v6939_v9 = vpop.xlane.xlu1 %6938 }
 0x63c   :  { %11604 = vrcp.f32 %v6939_v9  ;;  %v6996_v63 = vand.u32 2147483648, %v6939_v9  ;;  %v6994_v1 = vand.u32 2147483647, %v6939_v9  ;;  %vm6990_vm6 = vweird.f32 %v6939_v9 }
 0x63d   :  { %11606 = vpow2.f32 %v6913_v52 }
 0x63e   :  { %1688 = vrot.lane.b32.xlu0 %v14126_v41, %s11911_s9  ;;  %v6997_v22 = vor.u32 1.1754944e-38, %v6996_v63  ;;  %vm6995_vm8 = vcmp.eq.f32.partialorder %v6994_v1, 8.507059e+37 }
 0x642   :  { %v11605_v24 = vpop.eup %11604 }
 0x643   :  { %v6986_v43 = vmul.f32 %v11605_v24, %v6939_v9  ;;  %v6876_v47 = vpop.xlane.xlu1 %6875  ;;  %v14937_v14 = vpop.eup %11606  ;;  %vm6991_vm5 = vweird.f32 %v11605_v24 }
 0x644   :  { %v6900_v18 = vsub.f32 %v14878_v60, %v6876_v47  ;;  %v6942_v34 = vpop.xlane.xlu2 %6941  ;;  %v6949_v23 = vsel %vm1720_vm0, %v14937_v14, 0.0  ;;  %v6917_v60 = vmul.f32 1.442695, %v6895_v39  ;;  %vm6992_vm7 = vmor %vm6990_vm6, %vm6991_vm5 }
 0x645   :  { %v6987_v26 = vsub.f32 1.0, %v6986_v43  ;;  %11608 = vrcp.f32 %v6942_v34  ;;  %v6898_v43 = vsub.f32 %v14860_v38, %v6870_v32  ;;  %v7011_v9 = vand.u32 2147483648, %v6942_v34 }
 0x646   :  { %v6927_v37 = vmul.f32 1.442695, %v6900_v18  ;;  %11610 = vpow2.f32 %v6915_v8  ;;  %v7009_v39 = vand.u32 2147483647, %v6942_v34  ;;  %v14959_v38 = vand.u32 4294901760, %v14869_v10 }
 0x647   :  { %v6988_v53 = vmul.f32 %v11605_v24, %v6987_v26  ;;  %vm7005_vm10 = vweird.f32 %v6942_v34  ;;  %v6923_v32 = vmul.f32 1.442695, %v6898_v43 }
 0x648   :  { %11612 = vpow2.f32 %v6927_v37  ;;  %vm7010_vm12 = vcmp.eq.f32.partialorder %v7009_v39, 8.507059e+37 }
 0x649   :  { %v6989_v59 = vadd.f32 %v11605_v24, %v6988_v53  ;;  %6950 = vadd.xlane.f32.xlu1 %v6949_v23  ;;  %11614 = vpow2.f32 %v6917_v60  ;;  %v7012_v53 = vor.u32 1.1754944e-38, %v7011_v9  ;;  %v17655_v9 = vand.u32 4294901760, %v14796_v29 }
 0x64b   :  { %v11609_v51 = vpop.eup %11608  ;;  %v6993_v13 = vsel %vm6992_vm7, %v11605_v24, %v6989_v59  ;;  %v14966_v59 = vand.u32 4294901760, %v14899_v58 }
 0x64c   :  { %v6998_v4 = vsel %vm6995_vm8, %v6997_v22, %v6993_v13  ;;  %v7001_v42 = vmul.f32 %v11609_v51, %v6942_v34  ;;  %v14942_v52 = vpop.eup %11610  ;;  %vm7006_vm9 = vweird.f32 %v11609_v51  ;;  %v14971_v34 = vsub.f32 %v14869_v10, %v14959_v38 }
 0x64d   :  { %v6999_v19 = vmul.f32 %v14872_v17, %v6998_v4  ;;  %v6952_v17 = vsel %vm1720_vm0, %v14942_v52, 0.0  ;;  %vm7007_vm11 = vmor %vm7005_vm10, %vm7006_vm9  ;;  %v17654_v4 = vand.u32 4294901760, %v14789_v20  ;;  %v14981_v43 = vsub.f32 %v14899_v58, %v14966_v59 }
 0x64e   :  { %v14945_v3 = vpop.eup %11612  ;;  %v7002_v8 = vsub.f32 1.0, %v7001_v42 }
 0x64f   :  { %v14948_v47 = vpop.xlane.xlu0 %6944  ;;  %v6970_v18 = vsel %vm1720_vm0, %v14945_v3, 0.0  ;;  %v7226_v24 = vsel %vm1720_vm0, %v6999_v19, 0  ;;  %v14963_v23 = vpop.eup %11614 }
 0x650   :  { %v7003_v26 = vmul.f32 %v11609_v51, %v7002_v8  ;;  %6971 = vadd.xlane.f32.xlu2 %v6970_v18  ;;  %11616 = vrcp.f32 %v14948_v47  ;;  %v14956_v63 = vand.u32 4294901760, %v7226_v24  ;;  %v7026_v39 = vand.u32 2147483648, %v14948_v47 }
 0x651   :  { %6953 = vadd.xlane.f32.xlu1 %v6952_v17  ;;  %11618 = vpow2.f32 %v6923_v32  ;;  %v7024_v32 = vand.u32 2147483647, %v14948_v47  ;;  %vm7020_vm14 = vweird.f32 %v14948_v47 }
 0x652   :  { %v7004_v37 = vadd.f32 %v11609_v51, %v7003_v26  ;;  %7293 = vmatmul.f32.vlgmr.msrb.gmra.mxu1 %v14956_v63  ;;  %v7250_v1 = vsub.f32 %v7226_v24, %v14956_v63  ;;  %v7674_v24 = vand.u32 4294901760, %v14971_v34 }
 0x653   :  { %7543 = vmatpush.msrb.mxu1 %v14776_v16  ;;  %vm7025_vm1 = vcmp.eq.f32.partialorder %v7024_v32, 8.507059e+37 }
 0x654   :  { %v7008_v60 = vsel %vm7007_vm11, %v11609_v51, %v7004_v37  ;;  %7323 = vmatmul.f32.vlgmr.msra.gmra.mxu2 %v7250_v1  ;;  %v7251_v13 = vand.u32 4294901760, %v7250_v1  ;;  %v6899_v51 = vsub.f32 %v14864_v12, %v14931_v36 }
 0x655   :  { %v7013_v22 = vsel %vm7010_vm12, %v7012_v53, %v7008_v60  ;;  %7545 = vmatpush.msrb.mxu1 %v14785_v15  ;;  %7576 = vmatpush.msra.mxu2 %v17654_v4 }
 0x656   :  { %v7014_v42 = vmul.f32 %v14880_v2, %v7013_v22  ;;  %v11617_v19 = vpop.eup %11616  ;;  %7353 = vmatmul.f32.vlgmr.msra.gmra.mxu3 %v7251_v13  ;;  %v7252_v8 = vsub.f32 %v7250_v1, %v7251_v13  ;;  %v6955_v2 = vsel %vm1720_vm0, %v14963_v23, 0.0  ;;  %v6925_v58 = vmul.f32 1.442695, %v6899_v51 }
 0x657   :  { %v7016_v10 = vmul.f32 %v11617_v19, %v14948_v47  ;;  %7580 = vmatpush.msra.mxu2 %v17655_v9  ;;  %7605 = vmatpush.msra.mxu3 %v14776_v16  ;;  %v7680_v16 = vand.u32 4294901760, %v14981_v43  ;;  %vm7021_vm13 = vweird.f32 %v11617_v19  ;;  %v14996_v53 = vpop.eup %11618  ;;  %v7027_v22 = vor.u32 1.1754944e-38, %v7026_v39  ;;  %v15025_v39 = vpop.xlane.xlu1 %6878 }
 0x658   :  { %v7229_v18 = vsel %vm1720_vm0, %v7014_v42, 0  ;;  %v7253_v12 = vand.u32 4294901760, %v7252_v8  ;;  %11620 = vpow2.f32 %v6925_v58  ;;  %vm7022_vm15 = vmor %vm7020_vm14, %vm7021_vm13 }
 0x659   :  { %6956 = vadd.xlane.f32.xlu1 %v6955_v2  ;;  %v7257_v36 = vand.u32 4294901760, %v7229_v18  ;;  %v7017_v26 = vsub.f32 1.0, %v7016_v10  ;;  %7607 = vmatpush.msra.mxu3 %v14785_v15  ;;  %v7675_v15 = vsub.f32 %v14971_v34, %v7674_v24  ;;  %v7681_v42 = vsub.f32 %v14981_v43, %v7680_v16 }
 0x65a   :  { %7254 = vmatmul.f32.vlgmr.msrb.gmra.mxu0 %v7253_v12 }
 0x65b   :  { %7297 = vmatmul.f32.gmra.mxu1 %v7257_v36  ;;  %v7258_v17 = vsub.f32 %v7229_v18, %v7257_v36  ;;  %v7018_v37 = vmul.f32 %v11617_v19, %v7017_v26  ;;  %7513 = vmatpush.msrb.mxu0 %v14789_v20  ;;  %v6964_v20 = vsel %vm1720_vm0, %v14996_v53, 0.0  ;;  %v7676_v10 = vand.u32 4294901760, %v7675_v15 }
 0x65d   :  { %7328 = vmatmul.f32.gmra.mxu2 %v7258_v17  ;;  %v7259_v1 = vand.u32 4294901760, %v7258_v17  ;;  %v7019_v60 = vadd.f32 %v11617_v19, %v7018_v37  ;;  %7516 = vmatpush.msrb.mxu0 %v14796_v29  ;;  %v7682_v29 = vand.u32 4294901760, %v7681_v42 }
 0x65f   :  { %7359 = vmatmul.f32.gmra.mxu3 %v7259_v1  ;;  %v7260_v13 = vsub.f32 %v7258_v17, %v7259_v1  ;;  %v7023_v4 = vsel %vm7022_vm15, %v11617_v19, %v7019_v60  ;;  %v15009_v19 = vpop.eup %11620  ;;  %v1665_v17 = vpop.permute.xlu2 %1664 }
 0x660   :  { %v7028_v51 = vsel %vm7025_vm1, %v7027_v22, %v7023_v4  ;;  %v15040_v4 = vand.u32 4294901760, %v1665_v17 }
 0x661   :  { %6965 = vadd.xlane.f32.xlu1 %v6964_v20  ;;  %v7261_v8 = vand.u32 4294901760, %v7260_v13  ;;  %v7029_v47 = vmul.f32 %v14891_v7, %v7028_v51  ;;  %v6967_v7 = vsel %vm1720_vm0, %v15009_v19, 0.0 }
 0x662   :  { %v15034_v1 = vpop.permute.xlu0 %1676 }
 0x663   :  { %7262 = vmatmul.f32.gmra.mxu0 %v7261_v8  ;;  %7413 = vmatmul.f32.vlgmr.msra.gmra.mxu1 %v14956_v63  ;;  %v7422_v9 = vsel %vm1720_vm0, %v7029_v47, 0 }
 0x664   :  { %7677 = vmatpush.msra.mxu1 %v7676_v10  ;;  %v15011_v2 = vand.u32 4294901760, %v7422_v9  ;;  %v15049_v10 = vsub.f32 %v1665_v17, %v15040_v4 }
 0x666   :  { %7683 = vmatpush.msra.mxu1 %v7682_v29  ;;  %v7446_v18 = vsub.f32 %v7422_v9, %v15011_v2 }
 0x667   :  { %7489 = vmatmul.f32.vlgmr.msrb.gmra.mxu3 %v15011_v2 }
 0x668   :  { %7739 = vmatpush.msrb.mxu3 %v14959_v38  ;;  %1690 = vrot.lane.b32.xlu2 %v13989_v44, %s11911_s9  ;;  %v7447_v12 = vand.u32 4294901760, %v7446_v18 }
 0x669   :  { %6968 = vadd.xlane.f32.xlu1 %v6967_v7 }
 0x66a   :  { %7741 = vmatpush.msrb.mxu3 %v14966_v59  ;;  %v7448_v26 = vsub.f32 %v7446_v18, %v7447_v12 }
 0x66b   :  { %7386 = vmatmul.f32.vlgmr.msra.gmra.mxu0 %v14956_v63  ;;  %7417 = vmatmul.f32.gmra.mxu1 %v7257_v36 }
 0x66c   :  { %7638 = vmatpush.msra.mxu0 %v14959_v38  ;;  %v7449_v58 = vand.u32 4294901760, %v7448_v26 }
 0x66e   :  { %7640 = vmatpush.msra.mxu0 %v14966_v59  ;;  %7450 = vmatmul.f32.vlgmr.msrb.gmra.mxu2 %v7449_v58 }
 0x66f   :  { %7709 = vmatpush.msrb.mxu2 %v14971_v34  ;;  %v15038_v34 = vand.u32 4294901760, %v14874_v28 }
 0x671   :  { %7712 = vmatpush.msrb.mxu2 %v14981_v43  ;;  %v15045_v51 = vsub.f32 %v14874_v28, %v15038_v34 }
 0x673   :  { %7390 = vmatmul.f32.gmra.mxu0 %v7257_v36  ;;  %7549 = vmatmul.f32.vlgmr.msrb.gmra.mxu1 %v7447_v12  ;;  %v7876_v12 = vand.u32 4294901760, %v15049_v10 }
 0x674   :  { %7801 = vmatpush.msrb.mxu1 %v14959_v38 }
 0x676   :  { %7803 = vmatpush.msrb.mxu1 %v14966_v59 }
 0x679   :  { %v6948_v63 = vpop.xlane.xlu1 %6947 }
 0x67a   :  { %11622 = vrcp.f32 %v6948_v63  ;;  %v7041_v36 = vand.u32 2147483648, %v6948_v63  ;;  %v7039_v59 = vand.u32 2147483647, %v6948_v63  ;;  %vm7035_vm3 = vweird.f32 %v6948_v63 }
 0x67b   :  { %7519 = vmatmul.f32.vlgmr.msrb.gmra.mxu0 %v7446_v18  ;;  %v7870_v18 = vand.u32 4294901760, %v15045_v51 }
 0x67c   :  { %7772 = vmatpush.msrb.mxu0 %v7674_v24  ;;  %v7042_v24 = vor.u32 1.1754944e-38, %v7041_v36  ;;  %vm7040_vm5 = vcmp.eq.f32.partialorder %v7039_v59, 8.507059e+37  ;;  %v6901_v59 = vsub.f32 %v14887_v45, %v15025_v39 }
 0x67e   :  { %7776 = vmatpush.msrb.mxu0 %v7680_v16 }
 0x680   :  { %v11623_v37 = vpop.eup %11622 }
 0x681   :  { %v7031_v32 = vmul.f32 %v11623_v37, %v6948_v63  ;;  %vm7036_vm2 = vweird.f32 %v11623_v37 }
 0x682   :  { %1702 = vrot.lane.b32.xlu1 %v13989_v44, %s11912_s27  ;;  %vm7037_vm4 = vmor %vm7035_vm3, %vm7036_vm2 }
 0x683   :  { %v7032_v43 = vsub.f32 1.0, %v7031_v32 }
 0x685   :  { %v7033_v38 = vmul.f32 %v11623_v37, %v7032_v43  ;;  %v6882_v15 = vpop.xlane.xlu2 %6881 }
 0x686   :  { %v6902_v60 = vsub.f32 %v14907_v0, %v6882_v15 }
 0x687   :  { %v7034_v22 = vadd.f32 %v11623_v37, %v7033_v38 }
 0x688   :  { %v6931_v16 = vmul.f32 1.442695, %v6902_v60  ;;  %v3955_v60 = vadd.f32 %v14143_v11, %v14147_v40 }
 0x689   :  { %v7038_v13 = vsel %vm7037_vm4, %v11623_v37, %v7034_v22  ;;  %v7877_v37 = vsub.f32 %v15049_v10, %v7876_v12  ;;  %v6929_v22 = vmul.f32 1.442695, %v6901_v59  ;;  %v17668_v59 = vld [vmem:[#allocation47_spill] sm:$0xff] }
 0x68a   :  { %v7043_v20 = vsel %vm7040_vm5, %v7042_v24, %v7038_v13  ;;  %11624 = vpow2.f32 %v6931_v16  ;;  %v3985_v39 = vadd.f32 %v14183_v25, %v3955_v60 }
 0x68b   :  { %v7044_v42 = vmul.f32 %v14902_v27, %v7043_v20  ;;  %v7878_v15 = vand.u32 4294901760, %v7877_v37 }
 0x68c   :  { %v4015_v16 = vadd.f32 %v14165_v55, %v3985_v39  ;;  %v17672_v39 = vld [vmem:[#allocation73_spill] sm:$0xff] }
 0x68d   :  { %v6885_v0 = vpop.xlane.xlu0 %6884  ;;  %v7425_v8 = vsel %vm1720_vm0, %v7044_v42, 0 }
 0x68e   :  { %v6903_v47 = vsub.f32 %v14911_v48, %v6885_v0  ;;  %v7453_v29 = vand.u32 4294901760, %v7425_v8  ;;  %v7871_v48 = vsub.f32 %v15045_v51, %v7870_v18  ;;  %v4048_v40 = vadd.f32 %v14195_v50, %v4015_v16 }
 0x690   :  { %v15052_v9 = vpop.eup %11624  ;;  %v6933_v7 = vmul.f32 1.442695, %v6903_v47  ;;  %7493 = vmatmul.f32.gmra.mxu3 %v7453_v29  ;;  %v7454_v28 = vsub.f32 %v7425_v8, %v7453_v29  ;;  %v7872_v43 = vand.u32 4294901760, %v7871_v48  ;;  %v4075_v20 = vadd.f32 %v14191_v46, %v4048_v40  ;;  %v15106_v8 = vpop.xlane.xlu2 %6959  ;;  %v17664_v48 = vld [vmem:[#allocation43_spill] sm:$0xff] }
 0x691   :  { %v6976_v27 = vsel %vm1720_vm0, %v15052_v9, 0.0  ;;  %v15098_v0 = vpop.permute.xlu1 %1678  ;;  %vm7095_vm12 = vweird.f32 %v15106_v8 }
 0x692   :  { %6977 = vadd.xlane.f32.xlu0 %v6976_v27  ;;  %11626 = vpow2.f32 %v6933_v7  ;;  %7524 = vmatmul.f32.gmra.mxu0 %v7454_v28  ;;  %v7455_v26 = vand.u32 4294901760, %v7454_v28  ;;  %v17660_v7 = vld [vmem:[#allocation67_spill] sm:$0xff] }
 0x694   :  { %7555 = vmatmul.f32.gmra.mxu1 %v7455_v26  ;;  %v7456_v63 = vsub.f32 %v7454_v28, %v7455_v26  ;;  %v17663_v28 = vld [vmem:[#allocation70_spill] sm:$0xff] }
 0x695   :  { %v6888_v58 = vpop.xlane.xlu0 %6887 }
 0x696   :  { %v6904_v17 = vsub.f32 %v14920_v21, %v6888_v58  ;;  %v7457_v32 = vand.u32 4294901760, %v7456_v63  ;;  %v17665_v63 = vld [vmem:[#allocation76_spill] sm:$0xff] }
 0x698   :  { %v6935_v36 = vmul.f32 1.442695, %v6904_v17  ;;  %v15065_v38 = vpop.eup %11626  ;;  %7458 = vmatmul.f32.gmra.mxu2 %v7457_v32  ;;  %7609 = vmatmul.f32.vlgmr.msra.gmra.mxu3 %v15011_v2  ;;  %v17666_v17 = vld [vmem:[#allocation39_spill] sm:$0xff] }
 0x699   :  { %7873 = vmatpush.msra.mxu3 %v7872_v43  ;;  %v6979_v21 = vsel %vm1720_vm0, %v15065_v38, 0.0  ;;  %v17667_v43 = vld [vmem:[#allocation41_spill] sm:$0xff] }
 0x69a   :  { %11628 = vpow2.f32 %v6935_v36  ;;  %6980 = vadd.xlane.f32.xlu2 %v6979_v21  ;;  %v17669_v21 = vld [vmem:[#allocation66_spill] sm:$0xff] }
 0x69b   :  { %7879 = vmatpush.msra.mxu3 %v7878_v15  ;;  %11630 = vpow2.f32 %v6929_v22  ;;  %v17670_v15 = vld [vmem:[#allocation68_spill] sm:$0xff] }
 0x69c   :  { %11632 = vrcp.f32 %v15106_v8  ;;  %v4743_v60 = vadd.f32 %v17670_v15, %v17669_v21  ;;  %v17671_v22 = vld [vmem:[#allocation72_spill] sm:$0xff]  ;;  %v17686_v21 = vld [vmem:[#allocation33_spill] sm:$0xff] }
 0x69e   :  { %v4774_v16 = vadd.f32 %v17672_v39, %v4743_v60  ;;  %v17687_v60 = vld [vmem:[#allocation58_spill] sm:$0xff] }
 0x6a0   :  { %v15074_v24 = vpop.eup %11628  ;;  %7582 = vmatmul.f32.vlgmr.msra.gmra.mxu2 %v15011_v2  ;;  %7613 = vmatmul.f32.gmra.mxu3 %v7453_v29  ;;  %v4347_v2 = vadd.f32 %v14301_v35, %v14296_v31  ;;  %v4739_v31 = vadd.f32 %v14472_v30, %v14466_v56  ;;  %v17656_v35 = vld [vmem:[#allocation69_spill] sm:$0xff] }
 0x6a1   :  { %v6982_v45 = vsel %vm1720_vm0, %v15074_v24, 0.0  ;;  %7834 = vmatpush.msra.mxu2 %v15038_v34  ;;  %v15085_v11 = vpop.eup %11630  ;;  %v17661_v56 = vld [vmem:[#allocation37_spill] sm:$0xff] }
 0x6a2   :  { %6983 = vadd.xlane.f32.xlu2 %v6982_v45  ;;  %v4377_v25 = vadd.f32 %v14354_v33, %v4347_v2  ;;  %v6973_v13 = vsel %vm1720_vm0, %v15085_v11, 0.0  ;;  %v4155_v33 = vadd.f32 %v14249_v6, %v14270_v5  ;;  %v4769_v46 = vadd.f32 %v17656_v35, %v4739_v31  ;;  %v17662_v6 = vld [vmem:[#allocation32_spill] sm:$0xff]  ;;  %v15122_v32 = vpop.eup %11632  ;;  %v17673_v2 = vld [vmem:[#allocation38_spill] sm:$0xff] }
 0x6a3   :  { %7836 = vmatpush.msra.mxu2 %v15040_v4  ;;  %v4151_v5 = vadd.f32 %v17662_v6, %v17661_v56  ;;  %v17682_v6 = vld [vmem:[#allocation45_spill] sm:$0xff]  ;;  %vm7096_vm10 = vweird.f32 %v15122_v32 }
 0x6a4   :  { %v4407_v55 = vadd.f32 %v14328_v57, %v4377_v25  ;;  %v17657_v57 = vld [vmem:[#allocation44_spill] sm:$0xff]  ;;  %v4799_v27 = vadd.f32 %v17660_v7, %v4769_v46  ;;  %v17680_v7 = vld [vmem:[#allocation59_spill] sm:$0xff]  ;;  %vm15185_vm13 = vmor %vm7095_vm12, %vm7096_vm10 }
 0x6a5   :  { %v4186_v47 = vadd.f32 %v17657_v57, %v4155_v33  ;;  %v4181_v36 = vadd.f32 %v17667_v43, %v4151_v5  ;;  %v17677_v33 = vld [vmem:[#allocation46_spill] sm:$0xff] }
 0x6a6   :  { %1700 = vrot.lane.b32.xlu0 %v14126_v41, %s11912_s27  ;;  %v4440_v42 = vadd.f32 %v14361_v54, %v4407_v55  ;;  %v17658_v54 = vld [vmem:[#allocation35_spill] sm:$0xff]  ;;  %v4832_v26 = vadd.f32 %v17663_v28, %v4799_v27  ;;  %v17681_v27 = vld [vmem:[#allocation57_spill] sm:$0xff]  ;;  %v17685_v43 = vld [vmem:[#allocation74_spill] sm:$0xff] }
 0x6a7   :  { %v4217_v58 = vadd.f32 %v17664_v48, %v4186_v47  ;;  %v17678_v47 = vld [vmem:[#allocation36_spill] sm:$0xff]  ;;  %v4547_v56 = vadd.f32 %v17681_v27, %v17680_v7  ;;  %v17683_v28 = vld [vmem:[#allocation71_spill] sm:$0xff] }
 0x6a8   :  { %7586 = vmatmul.f32.gmra.mxu2 %v7453_v29  ;;  %v4467_v50 = vadd.f32 %v14366_v62, %v4440_v42  ;;  %v17659_v62 = vld [vmem:[#allocation31_spill] sm:$0xff]  ;;  %v4859_v45 = vadd.f32 %v17671_v22, %v4832_v26  ;;  %v7091_v42 = vmul.f32 %v15122_v32, %v15106_v8  ;;  %v4805_v26 = vadd.f32 %v17683_v28, %v4774_v16  ;;  %v17688_v22 = vld [vmem:[#allocation42_spill] sm:$0xff] }
 0x6a9   :  { %v3959_v29 = vadd.f32 %v17659_v62, %v17658_v54  ;;  %v17679_v62 = vld [vmem:[#allocation56_spill] sm:$0xff] }
 0x6ab   :  { %v3990_v37 = vadd.f32 %v17666_v17, %v3959_v29  ;;  %v7092_v17 = vsub.f32 1.0, %v7091_v42 }
 0x6ac   :  { %6974 = vadd.xlane.f32.xlu1 %v6973_v13  ;;  %v17674_v13 = vld [vmem:[#allocation55_spill] sm:$0xff] }
 0x6ad   :  { %v4021_v25 = vadd.f32 %v17673_v2, %v3990_v37  ;;  %v17689_v2 = vld [vmem:[#allocation63_spill] sm:$0xff] }
 0x6ae   :  { %8797 = vrot.lane.b32.xlu0 %v4075_v20, %s11906_s23  ;;  %v17675_v20 = vld [vmem:[#allocation53_spill] sm:$0xff] }
 0x6af   :  { %v4543_v55 = vadd.f32 %v17675_v20, %v17674_v13  ;;  %v4052_v54 = vadd.f32 %v17678_v47, %v4021_v25  ;;  %v17690_v13 = vld [vmem:[#allocation62_spill] sm:$0xff] }
 0x6b1   :  { %v4573_v29 = vadd.f32 %v17679_v62, %v4543_v55  ;;  %v4079_v15 = vadd.f32 %v17686_v21, %v4052_v54  ;;  %v7093_v55 = vmul.f32 %v15122_v32, %v7092_v17  ;;  %v7101_v62 = vand.u32 2147483648, %v15106_v8 }
 0x6b2   :  { %v15194_v21 = vand.u32 4294901760, %v15098_v0 }
 0x6b6   :  { %8829 = vrot.lane.b32.xlu0 %v4467_v50, %s11911_s9  ;;  %v17676_v50 = vld [vmem:[#allocation40_spill] sm:$0xff] }
 0x6b7   :  { %v4211_v31 = vadd.f32 %v17676_v50, %v4181_v36  ;;  %v4836_v36 = vadd.f32 %v17685_v43, %v4805_v26  ;;  %v17691_v50 = vld [vmem:[#allocation75_spill] sm:$0xff] }
 0x6b9   :  { %v4244_v5 = vadd.f32 %v17682_v6, %v4211_v31  ;;  %v4863_v31 = vadd.f32 %v17691_v50, %v4836_v36  ;;  %v7102_v36 = vor.u32 1.1754944e-38, %v7101_v62 }
 0x6ba   :  { %1714 = vrot.lane.b32.xlu2 %v13989_v44, %s11906_s23  ;;  %v4248_v44 = vadd.f32 %v17668_v59, %v4217_v58  ;;  %v17684_v58 = vld [vmem:[#allocation60_spill] sm:$0xff] }
 0x6bc   :  { %v6951_v30 = vpop.xlane.xlu1 %6950  ;;  %v4275_v35 = vadd.f32 %v17677_v33, %v4248_v44 }
 0x6bd   :  { %11634 = vrcp.f32 %v6951_v30  ;;  %v7056_v37 = vand.u32 2147483648, %v6951_v30  ;;  %v7054_v44 = vand.u32 2147483647, %v6951_v30  ;;  %vm7050_vm7 = vweird.f32 %v6951_v30 }
 0x6be   :  { %8877 = vrot.lane.b32.xlu0 %v17665_v63, %s11908_s24  ;;  %v4578_v63 = vadd.f32 %v17684_v58, %v4547_v56  ;;  %v7094_v56 = vadd.f32 %v15122_v32, %v7093_v55  ;;  %v15217_v55 = vsub.f32 %v15098_v0, %v15194_v21 }
 0x6bf   :  { %v7057_v42 = vor.u32 1.1754944e-38, %v7056_v37  ;;  %vm7055_vm9 = vcmp.eq.f32.partialorder %v7054_v44, 8.507059e+37  ;;  %v15183_v37 = vand.u32 4294901760, %v15034_v1 }
 0x6c0   :  { %v4609_v20 = vadd.f32 %v17690_v13, %v4578_v63  ;;  %v15178_v63 = vpop.xlane.xlu0 %6962 }
 0x6c2   :  { %8861 = vrot.lane.b32.xlu2 %v4859_v45, %s11909_s25  ;;  %v4271_v45 = vadd.f32 %v17688_v22, %v4244_v5  ;;  %v17697_v22 = vld [vmem:[#allocation48_spill] sm:$0xff] }
 0x6c3   :  { %v11635_v40 = vpop.eup %11634 }
 0x6c4   :  { %v7046_v46 = vmul.f32 %v11635_v40, %v6951_v30  ;;  %v15138_v57 = vpop.xlane.xlu1 %6953  ;;  %vm7051_vm6 = vweird.f32 %v11635_v40  ;;  %v17692_v30 = vld [vmem:[#allocation65_spill] sm:$0xff] }
 0x6c5   :  { %11636 = vrcp.f32 %v15138_v57  ;;  %1712 = vrot.lane.b32.xlu1 %v14126_v41, %s11906_s23  ;;  %v4603_v41 = vadd.f32 %v17687_v60, %v4573_v29  ;;  %vm7052_vm8 = vmor %vm7050_vm7, %vm7051_vm6  ;;  %v4640_v47 = vadd.f32 %v17692_v30, %v4609_v20  ;;  %v7071_v6 = vand.u32 2147483648, %v15138_v57 }
 0x6c6   :  { %v7047_v48 = vsub.f32 1.0, %v7046_v46  ;;  %8815 = vrot.lane.b32.xlu0 %v4275_v35, %s11912_s27  ;;  %v7069_v28 = vand.u32 2147483647, %v15138_v57  ;;  %vm7065_vm14 = vweird.f32 %v15138_v57  ;;  %v15213_v20 = vsub.f32 %v15034_v1, %v15183_v37 }
 0x6c7   :  { %v4636_v25 = vadd.f32 %v17689_v2, %v4603_v41 }
 0x6c8   :  { %v7048_v59 = vmul.f32 %v11635_v40, %v7047_v48  ;;  %v17694_v48 = vld [vmem:[#allocation64_spill] sm:$0xff]  ;;  %vm7070_vm1 = vcmp.eq.f32.partialorder %v7069_v28, 8.507059e+37 }
 0x6c9   :  { %v4667_v58 = vadd.f32 %v17694_v48, %v4640_v47 }
 0x6ca   :  { %v7049_v39 = vadd.f32 %v11635_v40, %v7048_v59  ;;  %8799 = vrot.lane.b32.xlu2 %v4079_v15, %s11906_s23  ;;  %v7072_v15 = vor.u32 1.1754944e-38, %v7071_v6  ;;  %v17702_v6 = vld [vmem:[#allocation50_spill] sm:$0xff] }
 0x6cb   :  { %v11637_v16 = vpop.eup %11636 }
 0x6cc   :  { %v7053_v33 = vsel %vm7052_vm8, %v11635_v40, %v7049_v39  ;;  %v7061_v35 = vmul.f32 %v11637_v16, %v15138_v57  ;;  %v15161_v46 = vpop.xlane.xlu1 %6956  ;;  %v17693_v40 = vld [vmem:[#allocation61_spill] sm:$0xff]  ;;  %vm7066_vm11 = vweird.f32 %v11637_v16  ;;  %vm7110_vm8 = vweird.f32 %v15178_v63 }
 0x6cd   :  { %v7058_v54 = vsel %vm7055_vm9, %v7057_v42, %v7053_v33  ;;  %11638 = vrcp.f32 %v15161_v46  ;;  %8813 = vrot.lane.b32.xlu1 %v4271_v45, %s11912_s27  ;;  %v4663_v27 = vadd.f32 %v17693_v40, %v4636_v25  ;;  %vm7067_vm15 = vmor %vm7065_vm14, %vm7066_vm11  ;;  %v17698_v45 = vld [vmem:[#allocation49_spill] sm:$0xff]  ;;  %v7086_v42 = vand.u32 2147483648, %v15161_v46 }
 0x6ce   :  { %v7059_v29 = vmul.f32 %v14937_v14, %v7058_v54  ;;  %v7062_v7 = vsub.f32 1.0, %v7061_v35  ;;  %8863 = vrot.lane.b32.xlu0 %v4863_v31, %s11909_s25  ;;  %v7099_v14 = vand.u32 2147483647, %v15106_v8  ;;  %v7098_v8 = vsel %vm15185_vm13, %v15122_v32, %v7094_v56  ;;  %v17699_v35 = vld [vmem:[#allocation51_spill] sm:$0xff] }
 0x6cf   :  { %11640 = vrcp.f32 %v15178_v63  ;;  %v4351_v39 = vadd.f32 %v17698_v45, %v17697_v22  ;;  %v7084_v33 = vand.u32 2147483647, %v15161_v46  ;;  %vm7080_vm4 = vweird.f32 %v15161_v46 }
 0x6d0   :  { %v7063_v5 = vmul.f32 %v11637_v16, %v7062_v7  ;;  %v7618_v26 = vsel %vm1720_vm0, %v7059_v29, 0  ;;  %vm7100_vm2 = vcmp.eq.f32.partialorder %v7099_v14, 8.507059e+37  ;;  %v8066_v29 = vand.u32 4294901760, %v15217_v55  ;;  %v17703_v14 = vld [vmem:[#allocation52_spill] sm:$0xff] }
 0x6d1   :  { %v15180_v17 = vand.u32 4294901760, %v7618_v26  ;;  %v7103_v2 = vsel %vm7100_vm2, %v7102_v36, %v7098_v8  ;;  %v4382_v1 = vadd.f32 %v17699_v35, %v4351_v39  ;;  %v7087_v7 = vor.u32 1.1754944e-38, %v7086_v42 }
 0x6d2   :  { %v7064_v59 = vadd.f32 %v11637_v16, %v7063_v5  ;;  %8847 = vrot.lane.b32.xlu2 %v4667_v58, %s11910_s26  ;;  %v7104_v30 = vmul.f32 %v14913_v61, %v7103_v2  ;;  %v8072_v61 = vand.u32 4294901760, %v15213_v20  ;;  %vm7085_vm6 = vcmp.eq.f32.partialorder %v7084_v33, 8.507059e+37 }
 0x6d3   :  { %v11639_v44 = vpop.eup %11638  ;;  %7685 = vmatmul.f32.vlgmr.msra.gmra.mxu1 %v15180_v17  ;;  %v7642_v60 = vsub.f32 %v7618_v26, %v15180_v17  ;;  %v4413_v5 = vadd.f32 %v17702_v6, %v4382_v1  ;;  %v8067_v48 = vsub.f32 %v15217_v55, %v8066_v29 }
 0x6d4   :  { %v7068_v57 = vsel %vm7067_vm15, %v11637_v16, %v7064_v59  ;;  %v7076_v41 = vmul.f32 %v11639_v44, %v15161_v46  ;;  %7935 = vmatpush.msra.mxu1 %v15038_v34  ;;  %v15206_v13 = vpop.xlane.xlu1 %6965  ;;  %vm7081_vm3 = vweird.f32 %v11639_v44  ;;  %v7817_v26 = vsel %vm1720_vm0, %v7104_v30, 0 }
 0x6d5   :  { %v7073_v32 = vsel %vm7070_vm1, %v7072_v15, %v7068_v57  ;;  %8845 = vrot.lane.b32.xlu1 %v4663_v27, %s11910_s26  ;;  %7715 = vmatmul.f32.vlgmr.msrb.gmra.mxu2 %v7642_v60  ;;  %v7643_v16 = vand.u32 4294901760, %v7642_v60  ;;  %v15228_v47 = vpop.eup %11640  ;;  %vm7082_vm5 = vmor %vm7080_vm4, %vm7081_vm3  ;;  %11642 = vrcp.f32 %v15206_v13  ;;  %v4444_v43 = vadd.f32 %v17703_v14, %v4413_v5  ;;  %v17707_v5 = vld [vmem:[#allocation77_spill] sm:$0xff] }
 0x6d6   :  { %v7077_v25 = vsub.f32 1.0, %v7076_v41  ;;  %7937 = vmatpush.msra.mxu1 %v15040_v4  ;;  %7968 = vmatpush.msrb.mxu2 %v7870_v18  ;;  %v7074_v50 = vmul.f32 %v14942_v52, %v7073_v32  ;;  %v7106_v27 = vmul.f32 %v15228_v47, %v15178_v63  ;;  %v8073_v36 = vsub.f32 %v15213_v20, %v8072_v61  ;;  %v17704_v32 = vld [vmem:[#allocation54_spill] sm:$0xff] }
 0x6d7   :  { %7745 = vmatmul.f32.vlgmr.msrb.gmra.mxu3 %v7643_v16  ;;  %v7644_v18 = vsub.f32 %v7642_v60, %v7643_v16  ;;  %v15265_v15 = vand.u32 4294901760, %v7817_v26  ;;  %v4471_v22 = vadd.f32 %v17704_v32, %v4444_v43  ;;  %vm7111_vm7 = vweird.f32 %v15228_v47 }
 0x6d8   :  { %v7078_v31 = vmul.f32 %v11639_v44, %v7077_v25  ;;  %7972 = vmatpush.msrb.mxu2 %v7876_v12  ;;  %7997 = vmatpush.msrb.mxu3 %v15038_v34  ;;  %v7621_v0 = vsel %vm1720_vm0, %v7074_v50, 0  ;;  %v15234_v12 = vpop.xlane.xlu2 %6971  ;;  %v17700_v34 = vld [vmem:[#allocation79_spill] sm:$0xff]  ;;  %v7107_v59 = vsub.f32 1.0, %v7106_v27  ;;  %v8074_v2 = vand.u32 4294901760, %v8073_v36  ;;  %v1689_v50 = vpop.permute.xlu0 %1688  ;;  %vm15299_vm9 = vmor %vm7110_vm8, %vm7111_vm7 }
 0x6d9   :  { %v7645_v54 = vand.u32 4294901760, %v7644_v18  ;;  %v15231_v62 = vand.u32 4294901760, %v7621_v0  ;;  %v15278_v16 = vsub.f32 %v7817_v26, %v15265_v15  ;;  %v7116_v30 = vand.u32 2147483648, %v15178_v63 }
 0x6da   :  { %v7079_v52 = vadd.f32 %v11639_v44, %v7078_v31  ;;  %7999 = vmatpush.msrb.mxu3 %v15040_v4  ;;  %8895 = vrot.lane.b32.xlu2 %v17700_v34, %s11907_s11  ;;  %v17701_v4 = vld [vmem:[#allocation78_spill] sm:$0xff]  ;;  %v7108_v45 = vmul.f32 %v15228_v47, %v7107_v59  ;;  %vm7125_vm12 = vweird.f32 %v15206_v13 }
 0x6db   :  { %7646 = vmatmul.f32.vlgmr.msra.gmra.mxu0 %v7645_v54  ;;  %7689 = vmatmul.f32.gmra.mxu1 %v15231_v62  ;;  %v7650_v46 = vsub.f32 %v7621_v0, %v15231_v62  ;;  %v15267_v60 = vpop.eup %11642  ;;  %v7847_v0 = vand.u32 4294901760, %v15278_v16 }
 0x6dc   :  { %v7083_v40 = vsel %vm7082_vm5, %v11639_v44, %v7079_v52  ;;  %7905 = vmatpush.msra.mxu0 %v15045_v51  ;;  %v15257_v51 = vpop.xlane.xlu1 %6968  ;;  %v7121_v42 = vmul.f32 %v15267_v60, %v15206_v13  ;;  %v7109_v35 = vadd.f32 %v15228_v47, %v7108_v45  ;;  %v15293_v52 = vand.u32 4294901760, %v1689_v50 }
 0x6dd   :  { %v7088_v56 = vsel %vm7085_vm6, %v7087_v7, %v7083_v40  ;;  %8893 = vrot.lane.b32.xlu1 %v17701_v4, %s11907_s11  ;;  %7720 = vmatmul.f32.gmra.mxu2 %v7650_v46  ;;  %v7651_v58 = vand.u32 4294901760, %v7650_v46  ;;  %11644 = vrcp.f32 %v15257_v51  ;;  %v7114_v7 = vand.u32 2147483647, %v15178_v63 }
 0x6de   :  { %v7089_v28 = vmul.f32 %v14963_v23, %v7088_v56  ;;  %7908 = vmatpush.msra.mxu0 %v15049_v10  ;;  %v8068_v10 = vand.u32 4294901760, %v8067_v48  ;;  %11646 = vrcp.f32 %v15234_v12  ;;  %v7122_v54 = vsub.f32 1.0, %v7121_v42 }
 0x6df   :  { %7751 = vmatmul.f32.gmra.mxu3 %v7651_v58  ;;  %v7652_v44 = vsub.f32 %v7650_v46, %v7651_v58  ;;  %v7113_v27 = vsel %vm15299_vm9, %v15228_v47, %v7109_v35  ;;  %v7848_v63 = vsub.f32 %v15278_v16, %v7847_v0  ;;  %v7117_v56 = vor.u32 1.1754944e-38, %v7116_v30 }
 0x6e0   :  { %v7814_v23 = vsel %vm1720_vm0, %v7089_v28, 0  ;;  %v1691_v39 = vpop.permute.xlu2 %1690  ;;  %v15319_v4 = vsub.f32 %v1689_v50, %v15293_v52  ;;  %v7123_v6 = vmul.f32 %v15267_v60, %v7122_v54  ;;  %vm7115_vm10 = vcmp.eq.f32.partialorder %v7114_v7, 8.507059e+37 }
 0x6e1   :  { %v15263_v8 = vand.u32 4294901760, %v7814_v23  ;;  %v7653_v57 = vand.u32 4294901760, %v7652_v44  ;;  %v15284_v33 = vand.u32 4294901760, %v1691_v39  ;;  %v7118_v47 = vsel %vm7115_vm10, %v7117_v56, %v7113_v27 }
 0x6e2   :  { %v7849_v48 = vand.u32 4294901760, %v7848_v63  ;;  %v8268_v58 = vand.u32 4294901760, %v15319_v4  ;;  %v7124_v14 = vadd.f32 %v15267_v60, %v7123_v6  ;;  %vm7126_vm11 = vweird.f32 %v15267_v60 }
 0x6e3   :  { %v15271_v41 = vsub.f32 %v7814_v23, %v15263_v8  ;;  %7805 = vmatmul.f32.vlgmr.msrb.gmra.mxu1 %v15180_v17  ;;  %7654 = vmatmul.f32.gmra.mxu0 %v7653_v57  ;;  %v15286_v18 = vpop.eup %11644  ;;  %v15304_v40 = vsub.f32 %v1691_v39, %v15284_v33  ;;  %v7119_v43 = vmul.f32 %v14926_v49, %v7118_v47  ;;  %v7131_v23 = vand.u32 2147483648, %v15206_v13  ;;  %vm7127_vm13 = vmor %vm7125_vm12, %vm7126_vm11 }
 0x6e4   :  { %8069 = vmatpush.msrb.mxu1 %v8068_v10  ;;  %v7136_v46 = vmul.f32 %v15286_v18, %v15257_v51  ;;  %v7129_v44 = vand.u32 2147483647, %v15206_v13  ;;  %v15343_v10 = vpop.f32.mrf.mxu0  ;;  %v7128_v49 = vsel %vm7127_vm13, %v15267_v60, %v7124_v14  ;;  %v8269_v32 = vsub.f32 %v15319_v4, %v8268_v58  ;;  %v15358_v60 = vpop.f32.mrf.mxu1 }
 0x6e5   :  { %v7839_v25 = vand.u32 4294901760, %v15271_v41  ;;  %8831 = vrot.lane.b32.xlu1 %v4471_v22, %s11911_s9  ;;  %v8262_v28 = vand.u32 4294901760, %v15304_v40  ;;  %v7132_v45 = vor.u32 1.1754944e-38, %v7131_v23  ;;  %v8010_v13 = vsel %vm1720_vm0, %v7119_v43, 0 }
 0x6e6   :  { %8075 = vmatpush.msrb.mxu1 %v8074_v2  ;;  %v7137_v26 = vsub.f32 1.0, %v7136_v46  ;;  %vm7130_vm14 = vcmp.eq.f32.partialorder %v7129_v44, 8.507059e+37  ;;  %vm7141_vm15 = vweird.f32 %v15286_v18  ;;  %vm7140_vm1 = vweird.f32 %v15257_v51 }
 0x6e7   :  { %v7840_v31 = vsub.f32 %v15271_v41, %v7839_v25  ;;  %7881 = vmatmul.f32.vlgmr.msra.gmra.mxu3 %v15263_v8  ;;  %v8263_v59 = vsub.f32 %v15304_v40, %v8262_v28  ;;  %vm15362_vm2 = vmor %vm7140_vm1, %vm7141_vm15  ;;  %v15367_v50 = vand.u32 4294901760, %v8010_v13  ;;  %v7161_v7 = vand.u32 2147483648, %v15234_v12 }
 0x6e8   :  { %8131 = vmatpush.msra.mxu3 %v15194_v21  ;;  %v7138_v57 = vmul.f32 %v15286_v18, %v7137_v26  ;;  %vm7155_vm5 = vweird.f32 %v15234_v12 }
 0x6e9   :  { %v7841_v1 = vand.u32 4294901760, %v7840_v31  ;;  %v8264_v39 = vand.u32 4294901760, %v8263_v59  ;;  %v7162_v56 = vor.u32 1.1754944e-38, %v7161_v7 }
 0x6ea   :  { %8133 = vmatpush.msra.mxu3 %v15183_v37  ;;  %v7139_v2 = vadd.f32 %v15286_v18, %v7138_v57 }
 0x6eb   :  { %7842 = vmatmul.f32.vlgmr.msra.gmra.mxu2 %v7841_v1  ;;  %7809 = vmatmul.f32.gmra.mxu1 %v15231_v62 }
 0x6ec   :  { %7778 = vmatmul.f32.vlgmr.msrb.gmra.mxu0 %v15180_v17  ;;  %8101 = vmatpush.msra.mxu2 %v15217_v55  ;;  %v15326_v17 = vpop.eup %11646  ;;  %v7143_v35 = vsel %vm15362_vm2, %v15286_v18, %v7139_v2  ;;  %v15380_v30 = vpop.f32.mrf.mxu0  ;;  %v7159_v55 = vand.u32 2147483647, %v15234_v12 }
 0x6ed   :  { %8030 = vmatpush.msrb.mxu0 %v15194_v21  ;;  %8879 = vrot.lane.b32.xlu1 %v17707_v5, %s11908_s24  ;;  %v7151_v36 = vmul.f32 %v15326_v17, %v15234_v12  ;;  %17710 = vst [vmem:[#allocation69_spill] sm:$0xff] %v15380_v30  ;;  %vm7156_vm4 = vweird.f32 %v15326_v17  ;;  %v15404_v63 = vpop.f32.mrf.mxu1 }
 0x6ee   :  { %8104 = vmatpush.msra.mxu2 %v15213_v20  ;;  %vm7157_vm6 = vmor %vm7155_vm5, %vm7156_vm4  ;;  %17711 = vst [vmem:[#allocation44_spill] sm:$0xff] %v15404_v63  ;;  %vm7160_vm7 = vcmp.eq.f32.partialorder %v7159_v55, 8.507059e+37 }
 0x6ef   :  { %8032 = vmatpush.msrb.mxu0 %v15183_v37  ;;  %7885 = vmatmul.f32.gmra.mxu3 %v15265_v15  ;;  %v7152_v22 = vsub.f32 1.0, %v7151_v36 }
 0x6f1   :  { %v7153_v31 = vmul.f32 %v15326_v17, %v7152_v22 }
 0x6f3   :  { %7850 = vmatmul.f32.gmra.mxu2 %v7849_v48  ;;  %7941 = vmatmul.f32.vlgmr.msra.gmra.mxu1 %v7839_v25  ;;  %v7144_v25 = vand.u32 2147483647, %v15257_v51 }
 0x6f4   :  { %7782 = vmatmul.f32.gmra.mxu0 %v15231_v62  ;;  %8193 = vmatpush.msra.mxu1 %v15194_v21  ;;  %v7133_v62 = vsel %vm7130_vm14, %v7132_v45, %v7128_v49  ;;  %v7146_v21 = vand.u32 2147483648, %v15257_v51  ;;  %v15417_v47 = vpop.f32.mrf.mxu0 }
 0x6f5   :  { %v7134_v51 = vmul.f32 %v14996_v53, %v7133_v62  ;;  %vm7145_vm3 = vcmp.eq.f32.partialorder %v7144_v25, 8.507059e+37  ;;  %v7154_v53 = vadd.f32 %v15326_v17, %v7153_v31 }
 0x6f6   :  { %8195 = vmatpush.msra.mxu1 %v15183_v37  ;;  %v8270_v37 = vand.u32 4294901760, %v8269_v32  ;;  %v7147_v1 = vor.u32 1.1754944e-38, %v7146_v21 }
 0x6f7   :  { %8001 = vmatmul.f32.vlgmr.msrb.gmra.mxu3 %v15263_v8  ;;  %v8013_v54 = vsel %vm1720_vm0, %v7134_v51, 0  ;;  %v7158_v27 = vsel %vm7157_vm6, %v15326_v17, %v7154_v53 }
 0x6f8   :  { %8265 = vmatpush.msrb.mxu3 %v8264_v39  ;;  %v7148_v18 = vsel %vm7145_vm3, %v7147_v1, %v7143_v35  ;;  %v7163_v12 = vsel %vm7160_vm7, %v7162_v56, %v7158_v27 }
 0x6f9   :  { %v7149_v34 = vmul.f32 %v15009_v19, %v7148_v18  ;;  %v7164_v48 = vmul.f32 %v14945_v3, %v7163_v12  ;;  %v15436_v3 = vpop.f32.mrf.mxu1 }
 0x6fa   :  { %8271 = vmatpush.msrb.mxu3 %v8270_v37  ;;  %17714 = vst [vmem:[#allocation67_spill] sm:$0xff] %v15436_v3 }
 0x6fb   :  { %7974 = vmatmul.f32.vlgmr.msrb.gmra.mxu2 %v15263_v8  ;;  %7947 = vmatmul.f32.gmra.mxu1 %v7847_v0  ;;  %v15378_v8 = vpop.f32.mrf.mxu3  ;;  %v8034_v0 = vsub.f32 %v8010_v13, %v15367_v50  ;;  %v8206_v19 = vsel %vm1720_vm0, %v7149_v34, 0  ;;  %v8209_v44 = vsel %vm1720_vm0, %v7164_v48, 0 }
 0x6fc   :  { %7911 = vmatmul.f32.vlgmr.msra.gmra.mxu0 %v15271_v41  ;;  %8226 = vmatpush.msrb.mxu2 %v15284_v33  ;;  %v1703_v41 = vpop.permute.xlu1 %1702  ;;  %v15449_v49 = vand.u32 4294901760, %v8209_v44  ;;  %v15451_v32 = vpop.f32.mrf.mxu0 }
 0x6fd   :  { %8164 = vmatpush.msra.mxu0 %v8066_v29  ;;  %v15395_v29 = vpop.f32.mrf.mxu2  ;;  %v15398_v46 = vand.u32 4294901760, %v1703_v41  ;;  %v8035_v20 = vand.u32 4294901760, %v8034_v0  ;;  %17715 = vst [vmem:[#allocation37_spill] sm:$0xff] %v15451_v32 }
 0x6fe   :  { %8228 = vmatpush.msrb.mxu2 %v15293_v52 }
 0x6ff   :  { %8168 = vmatpush.msra.mxu0 %v8072_v61  ;;  %8005 = vmatmul.f32.gmra.mxu3 %v15265_v15  ;;  %v15401_v61 = vand.u32 4294901760, %v8013_v54  ;;  %v8036_v6 = vsub.f32 %v8034_v0, %v8035_v20 }
 0x701   :  { %v8042_v5 = vsub.f32 %v8013_v54, %v15401_v61  ;;  %v8037_v43 = vand.u32 4294901760, %v8036_v6  ;;  %v15467_v21 = vpop.f32.mrf.mxu1 }
 0x702   :  { %17716 = vst [vmem:[#allocation32_spill] sm:$0xff] %v15467_v21 }
 0x703   :  { %7978 = vmatmul.f32.gmra.mxu2 %v15265_v15  ;;  %8077 = vmatmul.f32.vlgmr.msrb.gmra.mxu1 %v15367_v50  ;;  %v15411_v15 = vsub.f32 %v1703_v41, %v15398_v46  ;;  %v15415_v17 = vpop.f32.mrf.mxu3  ;;  %v8043_v36 = vand.u32 4294901760, %v8042_v5 }
 0x704   :  { %7916 = vmatmul.f32.gmra.mxu0 %v15278_v16  ;;  %8327 = vmatpush.msrb.mxu1 %v15284_v33  ;;  %17712 = vst [vmem:[#allocation35_spill] sm:$0xff] %v15415_v17  ;;  %v15419_v16 = vand.u32 4294901760, %v8206_v19 }
 0x705   :  { %v15421_v26 = vpop.xlane.xlu0 %6977  ;;  %v8458_v14 = vand.u32 4294901760, %v15411_v15  ;;  %v15426_v23 = vpop.f32.mrf.mxu2  ;;  %v8044_v57 = vsub.f32 %v8042_v5, %v8043_v36 }
 0x706   :  { %8329 = vmatpush.msrb.mxu1 %v15293_v52  ;;  %17713 = vst [vmem:[#allocation31_spill] sm:$0xff] %v15426_v23  ;;  %11648 = vrcp.f32 %v15421_v26  ;;  %vm7185_vm9 = vweird.f32 %v15421_v26  ;;  %v17731_v23 = vld [vmem:[#allocation21_spill] sm:$0xff] }
 0x707   :  { %8137 = vmatmul.f32.vlgmr.msra.gmra.mxu3 %v8035_v20  ;;  %v8045_v13 = vand.u32 4294901760, %v8044_v57  ;;  %v7191_v57 = vand.u32 2147483648, %v15421_v26 }
 0x708   :  { %8389 = vmatpush.msra.mxu3 %v15284_v33  ;;  %v15434_v33 = vsub.f32 %v8206_v19, %v15419_v16 }
 0x70a   :  { %8391 = vmatpush.msra.mxu3 %v15293_v52  ;;  %v8459_v52 = vsub.f32 %v15411_v15, %v8458_v14 }
 0x70b   :  { %8107 = vmatmul.f32.vlgmr.msra.gmra.mxu2 %v8034_v0  ;;  %8081 = vmatmul.f32.gmra.mxu1 %v15401_v61  ;;  %v7520_v0 = vpop.f32.mrf.mxu0 }
 0x70c   :  { %8038 = vmatmul.f32.vlgmr.msrb.gmra.mxu0 %v8037_v43  ;;  %8360 = vmatpush.msra.mxu2 %v8262_v28  ;;  %v8231_v28 = vand.u32 4294901760, %v15434_v33  ;;  %v15453_v22 = vpop.eup %11648  ;;  %v8460_v45 = vand.u32 4294901760, %v8459_v52  ;;  %v7550_v43 = vpop.f32.mrf.mxu1 }
 0x70d   :  { %8297 = vmatpush.msrb.mxu0 %v15304_v40  ;;  %v15439_v59 = vpop.xlane.xlu2 %6980  ;;  %v7490_v40 = vpop.f32.mrf.mxu3  ;;  %v7181_v2 = vmul.f32 %v15453_v22, %v15421_v26  ;;  %vm7186_vm8 = vweird.f32 %v15453_v22 }
 0x70e   :  { %8364 = vmatpush.msra.mxu2 %v8268_v58  ;;  %11650 = vrcp.f32 %v15439_v59  ;;  %v7451_v39 = vpop.f32.mrf.mxu2  ;;  %v15461_v58 = vsub.f32 %v8209_v44, %v15449_v49  ;;  %v7189_v44 = vand.u32 2147483647, %v15421_v26  ;;  %vm15517_vm10 = vmor %vm7185_vm9, %vm7186_vm8  ;;  %vm7200_vm13 = vweird.f32 %v15439_v59 }
 0x70f   :  { %8300 = vmatpush.msrb.mxu0 %v15319_v4  ;;  %8143 = vmatmul.f32.gmra.mxu3 %v8043_v36  ;;  %v8232_v4 = vsub.f32 %v15434_v33, %v8231_v28  ;;  %v7182_v51 = vsub.f32 1.0, %v7181_v2  ;;  %v7491_v54 = vadd.f32 %v7490_v40, %v7451_v39  ;;  %vm8909_vm9 = vcmask 261120  }
 0x710   :  { %v8239_v35 = vand.u32 4294901760, %v15461_v58  ;;  %vm7190_vm11 = vcmp.eq.f32.partialorder %v7189_v44, 8.507059e+37 }
 0x711   :  { %v8233_v31 = vand.u32 4294901760, %v8232_v4  ;;  %v7183_v34 = vmul.f32 %v15453_v22, %v7182_v51  ;;  %v7521_v27 = vadd.f32 %v7520_v0, %v7491_v54 }
 0x712   :  { %v8240_v55 = vsub.f32 %v15461_v58, %v8239_v35 }
 0x713   :  { %8112 = vmatmul.f32.gmra.mxu2 %v8042_v5  ;;  %8197 = vmatmul.f32.vlgmr.msra.gmra.mxu1 %v15367_v50  ;;  %v7184_v36 = vadd.f32 %v15453_v22, %v7183_v34 }
 0x714   :  { %8046 = vmatmul.f32.gmra.mxu0 %v8045_v13  ;;  %8461 = vmatpush.msra.mxu1 %v8460_v45  ;;  %v15469_v37 = vpop.eup %11650  ;;  %v8241_v48 = vand.u32 4294901760, %v8240_v55  ;;  %v7551_v13 = vadd.f32 %v7550_v43, %v7521_v27 }
 0x715   :  { %v15465_v62 = vpop.xlane.xlu2 %6983  ;;  %v7494_v1 = vpop.f32.mrf.mxu3  ;;  %v7196_v53 = vmul.f32 %v15469_v37, %v15439_v59  ;;  %v7188_v0 = vsel %vm15517_vm10, %v15453_v22, %v7184_v36  ;;  %vm7201_vm12 = vweird.f32 %v15469_v37  ;;  %v7206_v22 = vand.u32 2147483648, %v15439_v59 }
 0x716   :  { %11652 = vrcp.f32 %v15465_v62  ;;  %vm15541_vm14 = vmor %vm7200_vm13, %vm7201_vm12  ;;  %vm7215_vm6 = vweird.f32 %v15465_v62  ;;  %vm8914_vm10 = vcmask 392192   ;;  %vm8924_vm12 = vcmask 654336  }
 0x717   :  { %8273 = vmatmul.f32.vlgmr.msrb.gmra.mxu3 %v15419_v16  ;;  %v7197_v12 = vsub.f32 1.0, %v7196_v53  ;;  %v7525_v53 = vpop.f32.mrf.mxu0  ;;  %vm8929_vm13 = vcmask 785408  }
 0x718   :  { %v1701_v25 = vpop.permute.xlu0 %1700  ;;  %8523 = vmatpush.msrb.mxu3 %v15398_v46 }
 0x719   :  { %v15471_v42 = vand.u32 4294901760, %v1701_v25  ;;  %v7198_v39 = vmul.f32 %v15469_v37, %v7197_v12  ;;  %v7556_v12 = vpop.f32.mrf.mxu1 }
 0x71b   :  { %v15478_v18 = vsub.f32 %v1701_v25, %v15471_v42  ;;  %8234 = vmatmul.f32.vlgmr.msrb.gmra.mxu2 %v8233_v31  ;;  %8525 = vmatpush.msrb.mxu3 %v15471_v42  ;;  %v7459_v41 = vpop.f32.mrf.mxu2  ;;  %v7221_v31 = vand.u32 2147483648, %v15465_v62 }
 0x71c   :  { %8201 = vmatmul.f32.gmra.mxu1 %v15401_v61  ;;  %8170 = vmatmul.f32.vlgmr.msra.gmra.mxu0 %v15367_v50  ;;  %v15502_v6 = vpop.eup %11652  ;;  %v7495_v40 = vadd.f32 %v7494_v1, %v7459_v41  ;;  %v7192_v41 = vor.u32 1.1754944e-38, %v7191_v57 }
 0x71d   :  { %v8464_v7 = vand.u32 4294901760, %v15478_v18  ;;  %8493 = vmatpush.msrb.mxu2 %v15411_v15  ;;  %8422 = vmatpush.msra.mxu0 %v15398_v46  ;;  %v1715_v20 = vpop.permute.xlu2 %1714  ;;  %v7211_v4 = vmul.f32 %v15502_v6, %v15465_v62  ;;  %v7610_v2 = vpop.f32.mrf.mxu3  ;;  %vm7216_vm5 = vweird.f32 %v15502_v6  ;;  %v8954_v15 = vld [vmem:[#allocation10 + $0x78] sm:$0xff] }
 0x71e   :  { %v15493_v56 = vand.u32 4294901760, %v1715_v20  ;;  %v7526_v54 = vadd.f32 %v7525_v53, %v7495_v40  ;;  %v7193_v27 = vsel %vm7190_vm11, %v7192_v41, %v7188_v0  ;;  %vm7217_vm7 = vmor %vm7215_vm6, %vm7216_vm5  ;;  %v15579_v0 = vand.u32 4294901760, %v8954_v15  ;;  %v8953_v53 = vld [vmem:[#allocation10 + $0x70] sm:$0xff] }
 0x71f   :  { %8496 = vmatpush.msrb.mxu2 %v15478_v18  ;;  %v15495_v19 = vpop.xlane.xlu1 %6974  ;;  %v8465_v50 = vsub.f32 %v15478_v18, %v8464_v7  ;;  %8424 = vmatpush.msra.mxu0 %v15471_v42  ;;  %v7194_v40 = vmul.f32 %v15052_v9, %v7193_v27  ;;  %v7222_v41 = vor.u32 1.1754944e-38, %v7221_v31  ;;  %vm8919_vm11 = vcmask 523264  }
 0x720   :  { %11654 = vrcp.f32 %v15495_v19  ;;  %v15505_v5 = vsub.f32 %v1715_v20, %v15493_v56  ;;  %8277 = vmatmul.f32.gmra.mxu3 %v15449_v49  ;;  %v7199_v20 = vadd.f32 %v15469_v37, %v7198_v39  ;;  %v7174_v36 = vand.u32 2147483647, %v15495_v19 }
 0x721   :  { %v8466_v52 = vand.u32 4294901760, %v8465_v50  ;;  %v7557_v44 = vadd.f32 %v7556_v12, %v7526_v54  ;;  %vm7170_vm1 = vweird.f32 %v15495_v19 }
 0x722   :  { %v8654_v45 = vand.u32 4294901760, %v15505_v5  ;;  %vm7175_vm4 = vcmp.eq.f32.partialorder %v7174_v36, 8.507059e+37 }
 0x723   :  { %8242 = vmatmul.f32.gmra.mxu2 %v8241_v48  ;;  %8467 = vmatpush.msra.mxu1 %v8466_v52  ;;  %v7583_v25 = vpop.f32.mrf.mxu2  ;;  %v7176_v48 = vand.u32 2147483648, %v15495_v19 }
 0x724   :  { %v8655_v51 = vsub.f32 %v15505_v5, %v8654_v45  ;;  %v7584_v1 = vadd.f32 %v7583_v25, %v7551_v13  ;;  %8174 = vmatmul.f32.gmra.mxu0 %v15401_v61  ;;  %8333 = vmatmul.f32.vlgmr.msrb.gmra.mxu1 %v8231_v28  ;;  %v7212_v61 = vsub.f32 1.0, %v7211_v4  ;;  %v7207_v13 = vor.u32 1.1754944e-38, %v7206_v22 }
 0x725   :  { %8585 = vmatpush.msrb.mxu1 %v15398_v46  ;;  %v7204_v46 = vand.u32 2147483647, %v15439_v59  ;;  %v7203_v59 = vsel %vm15541_vm14, %v15469_v37, %v7199_v20  ;;  %v7614_v37 = vpop.f32.mrf.mxu3  ;;  %vm8934_vm14 = vcmask 916480  }
 0x726   :  { %v11655_v26 = vpop.eup %11654  ;;  %v8656_v55 = vand.u32 4294901760, %v8655_v51  ;;  %v7611_v28 = vadd.f32 %v7610_v2, %v7584_v1  ;;  %v7213_v52 = vmul.f32 %v15502_v6, %v7212_v61  ;;  %v7219_v1 = vand.u32 2147483647, %v15465_v62 }
 0x727   :  { %v7166_v34 = vmul.f32 %v11655_v26, %v15495_v19  ;;  %8587 = vmatpush.msrb.mxu1 %v15471_v42  ;;  %vm7171_vm15 = vweird.f32 %v11655_v26  ;;  %vm7205_vm2 = vcmp.eq.f32.partialorder %v7204_v46, 8.507059e+37  ;;  %v15590_v61 = vsub.f32 %v8954_v15, %v15579_v0  ;;  %v8949_v15 = vld [vmem:[#allocation10 + $0x50] sm:$0xff] }
 0x728   :  { %8393 = vmatmul.f32.vlgmr.msra.gmra.mxu3 %v15419_v16  ;;  %8801 = vrot.lane.b32.xlu0 %v7611_v28, %s11906_s23  ;;  %vm7172_vm3 = vmor %vm7170_vm1, %vm7171_vm15  ;;  %v7208_v2 = vsel %vm7205_vm2, %v7207_v13, %v7203_v59  ;;  %v7214_v19 = vadd.f32 %v15502_v6, %v7213_v52  ;;  %vm7220_vm8 = vcmp.eq.f32.partialorder %v7219_v1, 8.507059e+37  ;;  %v8952_v28 = vld [vmem:[#allocation10 + $0x68] sm:$0xff]  ;;  %v8951_v59 = vld [vmem:[#allocation10 + $0x60] sm:$0xff] }
 0x729   :  { %v7167_v50 = vsub.f32 1.0, %v7166_v34  ;;  %8657 = vmatpush.msra.mxu3 %v8656_v55  ;;  %v15587_v55 = vand.u32 4294901760, %v8953_v53  ;;  %v15601_v36 = vand.u32 4294901760, %v8952_v28 }
 0x72b   :  { %v7168_v42 = vmul.f32 %v11655_v26, %v7167_v50  ;;  %8366 = vmatmul.f32.vlgmr.msra.gmra.mxu2 %v15419_v16  ;;  %v7587_v57 = vpop.f32.mrf.mxu2  ;;  %v7177_v16 = vor.u32 1.1754944e-38, %v7176_v48  ;;  %v15596_v12 = vsub.f32 %v8953_v53, %v15587_v55  ;;  %v8948_v53 = vld [vmem:[#allocation10 + $0x48] sm:$0xff] }
 0x72c   :  { %8618 = vmatpush.msra.mxu2 %v15493_v56  ;;  %v7588_v4 = vadd.f32 %v7587_v57, %v7557_v44  ;;  %8303 = vmatmul.f32.vlgmr.msrb.gmra.mxu0 %v15434_v33 }
 0x72d   :  { %v7169_v39 = vadd.f32 %v11655_v26, %v7168_v42  ;;  %8339 = vmatmul.f32.gmra.mxu1 %v8239_v35  ;;  %8556 = vmatpush.msrb.mxu0 %v8458_v14  ;;  %v8405_v35 = vsel %vm1720_vm0, %v7194_v40, 0  ;;  %v7209_v14 = vmul.f32 %v15065_v38, %v7208_v2  ;;  %v17396_v42 = vand.u32 4294901760, %v15590_v61 }
 0x72e   :  { %v7615_v25 = vadd.f32 %v7614_v37, %v7588_v4  ;;  %v17395_v57 = vand.u32 4294901760, %v15596_v12  ;;  %v15616_v4 = vand.u32 4294901760, %v8951_v59 }
 0x72f   :  { %v7173_v9 = vsel %vm7172_vm3, %v11655_v26, %v7169_v39  ;;  %8560 = vmatpush.msrb.mxu0 %v8464_v7  ;;  %v15574_v7 = vand.u32 4294901760, %v8405_v35  ;;  %v9023_v13 = vsub.f32 %v15590_v61, %v17396_v42  ;;  %v15614_v39 = vsub.f32 %v8952_v28, %v15601_v36  ;;  %v8947_v28 = vld [vmem:[#allocation10 + $0x40] sm:$0xff] }
 0x730   :  { %v7178_v33 = vsel %vm7175_vm4, %v7177_v16, %v7173_v9  ;;  %8397 = vmatmul.f32.gmra.mxu3 %v15449_v49  ;;  %8803 = vrot.lane.b32.xlu1 %v7615_v25, %s11906_s23  ;;  %v9029_v9 = vsub.f32 %v15596_v12, %v17395_v57 }
 0x731   :  { %v7179_v51 = vmul.f32 %v15085_v11, %v7178_v33  ;;  %v7218_v11 = vsel %vm7217_vm7, %v15502_v6, %v7214_v19  ;;  %v8434_v6 = vsub.f32 %v8405_v35, %v15574_v7  ;;  %v9024_v25 = vand.u32 4294901760, %v9023_v13 }
 0x732   :  { %v7223_v62 = vsel %vm7220_vm8, %v7222_v41, %v7218_v11  ;;  %v17394_v19 = vand.u32 4294901760, %v15614_v39  ;;  %v15627_v33 = vsub.f32 %v8951_v59, %v15616_v4  ;;  %v15645_v11 = vand.u32 4294901760, %v8949_v15  ;;  %v8946_v59 = vld [vmem:[#allocation10 + $0x38] sm:$0xff] }
 0x733   :  { %8370 = vmatmul.f32.gmra.mxu2 %v15449_v49  ;;  %v8402_v18 = vsel %vm1720_vm0, %v7179_v51, 0  ;;  %v8598_v49 = vsel %vm1720_vm0, %v7209_v14, 0  ;;  %v7224_v50 = vmul.f32 %v15074_v24, %v7223_v62  ;;  %v8435_v46 = vand.u32 4294901760, %v8434_v6 }
 0x734   :  { %v15577_v26 = vand.u32 4294901760, %v8402_v18  ;;  %8308 = vmatmul.f32.gmra.mxu0 %v15461_v58  ;;  %v15592_v58 = vand.u32 4294901760, %v8598_v49  ;;  %v9035_v14 = vsub.f32 %v15614_v39, %v17394_v19  ;;  %v17392_v1 = vand.u32 4294901760, %v15627_v33 }
 0x735   :  { %v8601_v52 = vsel %vm1720_vm0, %v7224_v50, 0 }
 0x736   :  { %v8426_v38 = vsub.f32 %v8402_v18, %v15577_v26  ;;  %8469 = vmatmul.f32.vlgmr.msra.gmra.mxu1 %v15577_v26  ;;  %v15604_v44 = vsub.f32 %v8598_v49, %v15592_v58  ;;  %v15619_v37 = vand.u32 4294901760, %v8601_v52  ;;  %v15650_v49 = vand.u32 4294901760, %v8948_v53 }
 0x737   :  { %8719 = vmatpush.msra.mxu1 %v15493_v56  ;;  %v1713_v54 = vpop.permute.xlu1 %1712  ;;  %v9036_v62 = vand.u32 4294901760, %v9035_v14 }
 0x738   :  { %v8619_v34 = vand.u32 4294901760, %v1713_v54  ;;  %v8427_v20 = vand.u32 4294901760, %v8426_v38  ;;  %v8623_v16 = vand.u32 4294901760, %v15604_v44  ;;  %v15635_v51 = vsub.f32 %v8601_v52, %v15619_v37 }
 0x73a   :  { %v8659_v27 = vsub.f32 %v1713_v54, %v8619_v34  ;;  %8529 = vmatmul.f32.vlgmr.msrb.gmra.mxu3 %v8427_v20  ;;  %8620 = vmatpush.msra.mxu2 %v8619_v34  ;;  %v8428_v22 = vsub.f32 %v8426_v38, %v8427_v20  ;;  %v8624_v31 = vsub.f32 %v15604_v44, %v8623_v16 }
 0x73b   :  { %8721 = vmatpush.msra.mxu1 %v8619_v34  ;;  %8499 = vmatmul.f32.vlgmr.msrb.gmra.mxu2 %v8426_v38  ;;  %v8631_v38 = vand.u32 4294901760, %v15635_v51  ;;  %v9041_v54 = vsub.f32 %v15627_v33, %v17392_v1  ;;  %v17724_v1 = vld [vmem:[#allocation27_spill] sm:$0xff] }
 0x73c   :  { %8752 = vmatpush.msrb.mxu2 %v8654_v45  ;;  %v8429_v48 = vand.u32 4294901760, %v8428_v22  ;;  %v8660_v43 = vand.u32 4294901760, %v8659_v27  ;;  %v8436_v45 = vsub.f32 %v8434_v6, %v8435_v46  ;;  %v8625_v41 = vand.u32 4294901760, %v8624_v31 }
 0x73d   :  { %v8632_v20 = vsub.f32 %v15635_v51, %v8631_v38  ;;  %v9042_v50 = vand.u32 4294901760, %v9041_v54 }
 0x73e   :  { %8430 = vmatmul.f32.vlgmr.msra.gmra.mxu0 %v8429_v48  ;;  %8473 = vmatmul.f32.gmra.mxu1 %v15574_v7  ;;  %v8661_v24 = vsub.f32 %v8659_v27, %v8660_v43  ;;  %v8437_v2 = vand.u32 4294901760, %v8436_v45  ;;  %v15684_v45 = vpop.permute.xlu0 %8797 }
 0x73f   :  { %8689 = vmatpush.msra.mxu0 %v15505_v5  ;;  %8756 = vmatpush.msrb.mxu2 %v8660_v43  ;;  %v8950_v5 = vld [vmem:[#allocation10 + $0x58] sm:$0xff]  ;;  %v8633_v43 = vand.u32 4294901760, %v8632_v20 }
 0x740   :  { %v8662_v40 = vand.u32 4294901760, %v8661_v24  ;;  %v15629_v35 = vand.u32 4294901760, %v8950_v5  ;;  %v15680_v24 = vpop.permute.xlu1 %8813 }
 0x741   :  { %8692 = vmatpush.msra.mxu0 %v8659_v27  ;;  %v15667_v27 = vsub.f32 %v8948_v53, %v15650_v49  ;;  %v8944_v53 = vld [vmem:[#allocation10 + $0x28] sm:$0xff] }
 0x742   :  { %8535 = vmatmul.f32.gmra.mxu3 %v8435_v46  ;;  %v15643_v18 = vsub.f32 %v8950_v5, %v15629_v35 }
 0x743   :  { %8663 = vmatpush.msra.mxu3 %v8662_v40  ;;  %8504 = vmatmul.f32.gmra.mxu2 %v8434_v6  ;;  %v17389_v52 = vand.u32 4294901760, %v15667_v27 }
 0x744   :  { %v17391_v6 = vand.u32 4294901760, %v15643_v18 }
 0x745   :  { %8781 = vmatpush.msrb.mxu3 %v15493_v56  ;;  %v9030_v56 = vand.u32 4294901760, %v9029_v9  ;;  %v8945_v9 = vld [vmem:[#allocation10 + $0x30] sm:$0xff] }
 0x746   :  { %8438 = vmatmul.f32.gmra.mxu0 %v8437_v2  ;;  %8589 = vmatmul.f32.vlgmr.msrb.gmra.mxu1 %v15577_v26  ;;  %v9047_v46 = vsub.f32 %v15643_v18, %v17391_v6  ;;  %v15693_v2 = vand.u32 4294901760, %v8946_v59  ;;  %v15708_v14 = vand.u32 4294901760, %v8945_v9  ;;  %v15752_v6 = vpop.permute.xlu2 %8861 }
 0x747   :  { %8783 = vmatpush.msrb.mxu3 %v8619_v34  ;;  %9025 = vmatpush.xpose.msrb.mxu1 %v9024_v25  ;;  %v15658_v34 = vsub.f32 %v8949_v15, %v15645_v11  ;;  %v9059_v25 = vsub.f32 %v15667_v27, %v17389_v52 }
 0x748   :  { %v9048_v40 = vand.u32 4294901760, %v9047_v46  ;;  %v15726_v46 = vand.u32 4294901760, %v8944_v53 }
 0x749   :  { %v17390_v48 = vand.u32 4294901760, %v15658_v34 }
 0x74a   :  { %8665 = vmatmul.f32.vlgmr.msra.gmra.mxu3 %v15592_v58 }
 0x74b   :  { %9203 = vmatpush.xpose.msra.mxu3 %v15579_v0  ;;  %8626 = vmatmul.f32.vlgmr.msra.gmra.mxu2 %v8625_v41  ;;  %v9053_v13 = vsub.f32 %v15658_v34, %v17390_v48 }
 0x74c   :  { %9031 = vmatpush.xpose.msrb.mxu1 %v9030_v56  ;;  %9135 = vmatpush.xpose.msra.mxu2 %v15590_v61  ;;  %v15706_v56 = vsub.f32 %v8946_v59, %v15693_v2  ;;  %v17721_v59 = vld [vmem:[#allocation23_spill] sm:$0xff] }
 0x74d   :  { %v9054_v31 = vand.u32 4294901760, %v9053_v13  ;;  %v15730_v13 = vpop.permute.xlu1 %8845 }
 0x74e   :  { %8562 = vmatmul.f32.vlgmr.msrb.gmra.mxu0 %v15577_v26  ;;  %8593 = vmatmul.f32.gmra.mxu1 %v15574_v7  ;;  %v15676_v26 = vand.u32 4294901760, %v8947_v28  ;;  %v8800_v30 = vpop.permute.xlu2 %8799 }
 0x74f   :  { %8956 = vmatpush.xpose.msrb.mxu0 %v15579_v0  ;;  %9205 = vmatpush.xpose.msra.mxu3 %v15587_v55 }
 0x750   :  { %9037 = vmatpush.xpose.msrb.mxu1 %v9036_v62  ;;  %v15670_v22 = vpop.f32.mrf.mxu1  ;;  %9138 = vmatpush.xpose.msra.mxu2 %v15596_v12  ;;  %v15691_v5 = vsub.f32 %v8947_v28, %v15676_v26  ;;  %v9060_v62 = vand.u32 4294901760, %v9059_v25  ;;  %v17393_v28 = vand.u32 4294901760, %v15706_v56  ;;  %v15733_v25 = vpop.permute.xlu0 %8829 }
 0x752   :  { %8669 = vmatmul.f32.gmra.mxu3 %v15619_v37  ;;  %v17388_v15 = vand.u32 4294901760, %v15691_v5 }
 0x753   :  { %8958 = vmatpush.xpose.msrb.mxu0 %v15587_v55  ;;  %8634 = vmatmul.f32.gmra.mxu2 %v8633_v43  ;;  %v8943_v43 = vld [vmem:[#allocation10 + $0x20] sm:$0xff] }
 0x754   :  { %9043 = vmatpush.xpose.msrb.mxu1 %v9042_v50  ;;  %9207 = vmatpush.xpose.msra.mxu3 %v15601_v36  ;;  %v9065_v20 = vsub.f32 %v15691_v5, %v17388_v15  ;;  %v15724_v50 = vsub.f32 %v8945_v9, %v15708_v14  ;;  %v15739_v9 = vand.u32 4294901760, %v8943_v43  ;;  %v15747_v15 = vsub.f32 %v8944_v53, %v15726_v46 }
 0x755   :  { %9141 = vmatpush.xpose.msra.mxu2 %v15614_v39  ;;  %v15776_v17 = vpop.permute.xlu1 %8893 }
 0x756   :  { %8566 = vmatmul.f32.gmra.mxu0 %v15574_v7  ;;  %8725 = vmatmul.f32.vlgmr.msra.gmra.mxu1 %v8623_v16  ;;  %v15760_v53 = vsub.f32 %v8943_v43, %v15739_v9  ;;  %v8941_v43 = vld [vmem:[#allocation10 + $0x10] sm:$0xff] }
 0x757   :  { %8960 = vmatpush.xpose.msrb.mxu0 %v15601_v36 }
 0x758   :  { %9049 = vmatpush.xpose.msrb.mxu1 %v9048_v40  ;;  %9209 = vmatpush.xpose.msra.mxu3 %v15616_v4  ;;  %v7647_v7 = vpop.f32.mrf.mxu0  ;;  %v15711_v16 = vpop.f32.mrf.mxu1  ;;  %v17722_v40 = vld [vmem:[#allocation24_spill] sm:$0xff] }
 0x759   :  { %9144 = vmatpush.xpose.msra.mxu2 %v15627_v33  ;;  %v7716_v54 = vpop.f32.mrf.mxu2 }
 0x75a   :  { %8785 = vmatmul.f32.vlgmr.msrb.gmra.mxu3 %v15592_v58  ;;  %v15714_v41 = vpop.f32.mrf.mxu3 }
 0x75b   :  { %8962 = vmatpush.xpose.msrb.mxu0 %v15616_v4  ;;  %8758 = vmatmul.f32.vlgmr.msrb.gmra.mxu2 %v15592_v58  ;;  %v3759_v58 = vadd.f32 %v17722_v40, %v17721_v59  ;;  %v9071_v59 = vsub.f32 %v15706_v56, %v17393_v28  ;;  %v17397_v40 = vand.u32 4294901760, %v15724_v50  ;;  %v17725_v28 = vld [vmem:[#allocation20_spill] sm:$0xff] }
 0x75c   :  { %9055 = vmatpush.xpose.msrb.mxu1 %v9054_v31  ;;  %9211 = vmatpush.xpose.msra.mxu3 %v15629_v35  ;;  %v9066_v31 = vand.u32 4294901760, %v9065_v20  ;;  %v3763_v19 = vadd.f32 %v17725_v28, %v17724_v1  ;;  %v17726_v28 = vld [vmem:[#allocation22_spill] sm:$0xff] }
 0x75d   :  { %9147 = vmatpush.xpose.msra.mxu2 %v15643_v18 }
 0x75e   :  { %8695 = vmatmul.f32.vlgmr.msra.gmra.mxu0 %v15604_v44  ;;  %8731 = vmatmul.f32.gmra.mxu1 %v8631_v38  ;;  %v17723_v44 = vld [vmem:[#allocation26_spill] sm:$0xff]  ;;  %v7687_v38 = vadd.f32 %v15670_v22, %v7647_v7  ;;  %v9072_v7 = vand.u32 4294901760, %v9071_v59  ;;  %v17728_v59 = vld [vmem:[#allocation29_spill] sm:$0xff] }
 0x75f   :  { %8964 = vmatpush.xpose.msrb.mxu0 %v15629_v35  ;;  %v3789_v52 = vadd.f32 %v17723_v44, %v3759_v58  ;;  %v9077_v58 = vsub.f32 %v15724_v50, %v17397_v40  ;;  %v15780_v44 = vpop.permute.xlu0 %8877  ;;  %v17730_v40 = vld [vmem:[#allocation25_spill] sm:$0xff] }
 0x760   :  { %9061 = vmatpush.xpose.msrb.mxu1 %v9060_v62  ;;  %9213 = vmatpush.xpose.msra.mxu3 %v15645_v11  ;;  %v7806_v48 = vpop.f32.mrf.mxu1  ;;  %v8942_v62 = vld [vmem:[#allocation10 + $0x18] sm:$0xff]  ;;  %v7655_v20 = vpop.f32.mrf.mxu0 }
 0x761   :  { %9150 = vmatpush.xpose.msra.mxu2 %v15658_v34  ;;  %v15769_v1 = vand.u32 4294901760, %v8942_v62  ;;  %v3819_v57 = vadd.f32 %v17726_v28, %v3789_v52  ;;  %v7721_v42 = vpop.f32.mrf.mxu2  ;;  %v9078_v52 = vand.u32 4294901760, %v9077_v58  ;;  %v7691_v28 = vadd.f32 %v15711_v16, %v7655_v20 }
 0x762   :  { %8789 = vmatmul.f32.gmra.mxu3 %v15619_v37  ;;  %v15762_v22 = vpop.f32.mrf.mxu3 }
 0x763   :  { %8966 = vmatpush.xpose.msrb.mxu0 %v15645_v11  ;;  %8762 = vmatmul.f32.gmra.mxu2 %v15619_v37  ;;  %v7717_v37 = vadd.f32 %v7716_v54, %v7687_v38  ;;  %v3852_v32 = vadd.f32 %v17728_v59, %v3819_v57  ;;  %v17729_v54 = vand.u32 4294901760, %v15747_v15  ;;  %v15789_v57 = vand.u32 4294901760, %v8941_v43 }
 0x764   :  { %9067 = vmatpush.xpose.msrb.mxu1 %v9066_v31  ;;  %9215 = vmatpush.xpose.msra.mxu3 %v15650_v49  ;;  %v17727_v31 = vld [vmem:[#allocation28_spill] sm:$0xff] }
 0x765   :  { %9153 = vmatpush.xpose.msra.mxu2 %v15667_v27  ;;  %v3794_v21 = vadd.f32 %v17727_v31, %v3763_v19  ;;  %v15787_v19 = vsub.f32 %v8942_v62, %v15769_v1  ;;  %v7747_v38 = vadd.f32 %v15714_v41, %v7717_v37  ;;  %v3879_v3 = vadd.f32 %v17731_v23, %v3852_v32 }
 0x766   :  { %8700 = vmatmul.f32.gmra.mxu0 %v15635_v51  ;;  %v9083_v51 = vsub.f32 %v15747_v15, %v17729_v54  ;;  %v17732_v62 = vand.u32 4294901760, %v15760_v53 }
 0x767   :  { %8968 = vmatpush.xpose.msrb.mxu0 %v15650_v49  ;;  %v3825_v58 = vadd.f32 %v17730_v40, %v3794_v21  ;;  %v17398_v20 = vand.u32 4294901760, %v15787_v19  ;;  %v15805_v21 = vsub.f32 %v8941_v43, %v15789_v57  ;;  %v8905_v32 = vsel %vm1720_vm0, %v3879_v3, %v15684_v45  ;;  %v8832_v45 = vpop.permute.xlu1 %8831 }
 0x768   :  { %9073 = vmatpush.xpose.msrb.mxu1 %v9072_v7  ;;  %9217 = vmatpush.xpose.msra.mxu3 %v15676_v26  ;;  %v7810_v31 = vpop.f32.mrf.mxu1  ;;  %v8940_v7 = vld [vmem:[#allocation10 + $0x8] sm:$0xff]  ;;  %v9089_v54 = vsub.f32 %v15760_v53, %v17732_v62  ;;  %v9084_v16 = vand.u32 4294901760, %v9083_v51  ;;  %v7722_v40 = vadd.f32 %v7721_v42, %v7691_v28 }
 0x769   :  { %9156 = vmatpush.xpose.msra.mxu2 %v15691_v5  ;;  %v7779_v59 = vpop.f32.mrf.mxu0  ;;  %v15807_v23 = vand.u32 4294901760, %v8940_v7  ;;  %v9100_v3 = vand.u32 4294901760, %v15805_v21 }
 0x76a   :  { %v7780_v63 = vadd.f32 %v7779_v59, %v7747_v38  ;;  %v15800_v41 = vpop.f32.mrf.mxu3  ;;  %v8939_v38 = vld [vmem:[#allocation10] sm:$0xff]  ;;  %v17733_v59 = vld [vmem:[#allocation34_spill] sm:$0xff]  ;;  %v9090_v43 = vand.u32 4294901760, %v9089_v54  ;;  %v7753_v28 = vadd.f32 %v15762_v22, %v7722_v40  ;;  %v8816_v54 = vpop.permute.xlu0 %8815 }
 0x76b   :  { %8970 = vmatpush.xpose.msrb.mxu0 %v15676_v26  ;;  %v3856_v62 = vadd.f32 %v17733_v59, %v3825_v58  ;;  %v15823_v42 = vsub.f32 %v8940_v7, %v15807_v23  ;;  %v9101_v22 = vsub.f32 %v15805_v21, %v9100_v3 }
 0x76c   :  { %9079 = vmatpush.xpose.msrb.mxu1 %v9078_v52  ;;  %9219 = vmatpush.xpose.msra.mxu3 %v15693_v2  ;;  %v7807_v37 = vadd.f32 %v7806_v48, %v7780_v63  ;;  %v8910_v52 = vsel %vm8909_vm9, %v8905_v32, %v15680_v24  ;;  %v9095_v63 = vsub.f32 %v15787_v19, %v17398_v20  ;;  %v15825_v48 = vand.u32 4294901760, %v8939_v38 }
 0x76d   :  { %9159 = vmatpush.xpose.msra.mxu2 %v15706_v56  ;;  %v8915_v24 = vsel %vm8914_vm10, %v8910_v52, %v15733_v25  ;;  %v9106_v40 = vand.u32 4294901760, %v15823_v42 }
 0x76e   :  { %v7843_v51 = vpop.f32.mrf.mxu2  ;;  %8817 = vrot.lane.b32.xlu1 %v7807_v37, %s11912_s27  ;;  %v17734_v37 = vld [vmem:[#allocation30_spill] sm:$0xff]  ;;  %v9096_v25 = vand.u32 4294901760, %v9095_v63  ;;  %v15841_v52 = vsub.f32 %v8939_v38, %v15825_v48 }
 0x76f   :  { %8972 = vmatpush.xpose.msrb.mxu0 %v15693_v2  ;;  %v3883_v7 = vadd.f32 %v17734_v37, %v3856_v62 }
 0x770   :  { %9085 = vmatpush.xpose.msrb.mxu1 %v9084_v16  ;;  %9221 = vmatpush.xpose.msra.mxu3 %v15708_v14  ;;  %v7942_v58 = vpop.f32.mrf.mxu1  ;;  %v8920_v16 = vsel %vm8919_vm11, %v8915_v24, %v15730_v13  ;;  %v9112_v38 = vand.u32 4294901760, %v15841_v52 }
 0x771   :  { %9162 = vmatpush.xpose.msra.mxu2 %v15724_v50  ;;  %v7783_v32 = vpop.f32.mrf.mxu0  ;;  %v8906_v13 = vsel %vm1720_vm0, %v3883_v7, %v8800_v30  ;;  %v8925_v62 = vsel %vm8924_vm12, %v8920_v16, %v15752_v6  ;;  %v9102_v6 = vand.u32 4294901760, %v9101_v22  ;;  %v8880_v7 = vpop.permute.xlu1 %8879 }
 0x772   :  { %v7784_v59 = vadd.f32 %v7783_v32, %v7753_v28  ;;  %v7886_v20 = vpop.f32.mrf.mxu3  ;;  %v8911_v63 = vsel %vm8909_vm9, %v8906_v13, %v8816_v54  ;;  %v8930_v30 = vsel %vm8929_vm13, %v8925_v62, %v15780_v44  ;;  %v7883_v54 = vadd.f32 %v15800_v41, %v7843_v51 }
 0x773   :  { %8974 = vmatpush.xpose.msrb.mxu0 %v15708_v14  ;;  %v8916_v32 = vsel %vm8914_vm10, %v8911_v63, %v8832_v45  ;;  %v8935_v45 = vsel %vm8934_vm14, %v8930_v30, %v15776_v17  ;;  %v9113_v41 = vsub.f32 %v15841_v52, %v9112_v38 }
 0x774   :  { %9091 = vmatpush.xpose.msrb.mxu1 %v9090_v43  ;;  %9223 = vmatpush.xpose.msra.mxu3 %v15726_v46  ;;  %v7811_v24 = vadd.f32 %v7810_v31, %v7784_v59  ;;  %v8848_v43 = vpop.permute.xlu2 %8847  ;;  %v9107_v31 = vsub.f32 %v15823_v42, %v9106_v40  ;;  %v15864_v22 = vand.u32 4294901760, %v8935_v45 }
 0x775   :  { %9165 = vmatpush.xpose.msra.mxu2 %v15747_v15  ;;  %v8921_v44 = vsel %vm8919_vm11, %v8916_v32, %v8848_v43 }
 0x776   :  { %v7851_v28 = vpop.f32.mrf.mxu2  ;;  %8819 = vrot.lane.b32.xlu2 %v7811_v24, %s11912_s27  ;;  %v9108_v17 = vand.u32 4294901760, %v9107_v31  ;;  %v8988_v30 = vsub.f32 %v8935_v45, %v15864_v22 }
 0x777   :  { %8976 = vmatpush.xpose.msrb.mxu0 %v15726_v46 }
 0x778   :  { %9097 = vmatpush.xpose.msrb.mxu1 %v9096_v25  ;;  %9225 = vmatpush.xpose.msra.mxu3 %v15739_v9  ;;  %v7948_v16 = vpop.f32.mrf.mxu1  ;;  %v8864_v25 = vpop.permute.xlu0 %8863 }
 0x779   :  { %9168 = vmatpush.xpose.msra.mxu2 %v15760_v53  ;;  %v7912_v37 = vpop.f32.mrf.mxu0  ;;  %v8926_v51 = vsel %vm8924_vm12, %v8921_v44, %v8864_v25 }
 0x77a   :  { %v7913_v59 = vadd.f32 %v7912_v37, %v7883_v54  ;;  %v8002_v13 = vpop.f32.mrf.mxu3  ;;  %v8931_v24 = vsel %vm8929_vm13, %v8926_v51, %v8880_v7  ;;  %v7887_v54 = vadd.f32 %v7886_v20, %v7851_v28 }
 0x77b   :  { %8978 = vmatpush.xpose.msrb.mxu0 %v15739_v9 }
 0x77c   :  { %9103 = vmatpush.xpose.msrb.mxu1 %v9102_v6  ;;  %9227 = vmatpush.xpose.msra.mxu3 %v15769_v1  ;;  %v7943_v62 = vadd.f32 %v7942_v58, %v7913_v59  ;;  %v8896_v32 = vpop.permute.xlu2 %8895  ;;  %v9114_v6 = vand.u32 4294901760, %v9113_v41  ;;  %v8989_v59 = vand.u32 4294901760, %v8988_v30 }
 0x77d   :  { %9171 = vmatpush.xpose.msra.mxu2 %v15787_v19  ;;  %v8936_v31 = vsel %vm8934_vm14, %v8931_v24, %v8896_v32 }
 0x77e   :  { %v7975_v43 = vpop.f32.mrf.mxu2  ;;  %v15880_v25 = vand.u32 4294901760, %v8936_v31 }
 0x77f   :  { %v7976_v63 = vadd.f32 %v7975_v43, %v7943_v62  ;;  %8980 = vmatpush.xpose.msrb.mxu0 %v15769_v1 }
 0x780   :  { %9109 = vmatpush.xpose.msrb.mxu1 %v9108_v17  ;;  %9229 = vmatpush.xpose.msra.mxu3 %v15789_v57  ;;  %v8078_v58 = vpop.f32.mrf.mxu1  ;;  %v8990_v17 = vsub.f32 %v8988_v30, %v8989_v59  ;;  %v8996_v41 = vsub.f32 %v8936_v31, %v15880_v25  ;;  %v17736_v31 = vand.u32 4294901760, %v15596_v12  ;;  %v17738_v12 = vand.u32 4294901760, %v15627_v33 }
 0x781   :  { %v8003_v44 = vadd.f32 %v8002_v13, %v7976_v63  ;;  %9174 = vmatpush.xpose.msra.mxu2 %v15805_v21  ;;  %v7917_v37 = vpop.f32.mrf.mxu0  ;;  %v17735_v63 = vand.u32 4294901760, %v15590_v61 }
 0x782   :  { %v7918_v7 = vadd.f32 %v7917_v37, %v7887_v54  ;;  %v8006_v45 = vpop.f32.mrf.mxu3  ;;  %v8997_v43 = vand.u32 4294901760, %v8996_v41 }
 0x783   :  { %8982 = vmatpush.xpose.msrb.mxu0 %v15789_v57  ;;  %8833 = vrot.lane.b32.xlu2 %v8003_v44, %s11911_s9 }
 0x784   :  { %9115 = vmatpush.xpose.msrb.mxu1 %v9114_v6  ;;  %9231 = vmatpush.xpose.msra.mxu3 %v15807_v23  ;;  %v7949_v20 = vadd.f32 %v7948_v16, %v7918_v7 }
 0x785   :  { %9177 = vmatpush.xpose.msra.mxu2 %v15823_v42 }
 0x786   :  { %v7979_v28 = vpop.f32.mrf.mxu2 }
 0x787   :  { %9117 = vmatmul.f32.vlgmr.msrb.gmra.mxu1 %v15864_v22  ;;  %v7980_v13 = vadd.f32 %v7979_v28, %v7949_v20  ;;  %8984 = vmatpush.xpose.msrb.mxu0 %v15807_v23 }
 0x788   :  { %9341 = vmatpush.xpose.msra.mxu1 %v15579_v0  ;;  %9233 = vmatpush.xpose.msra.mxu3 %v15825_v48  ;;  %v8082_v62 = vpop.f32.mrf.mxu1  ;;  %v8991_v0 = vand.u32 4294901760, %v8990_v17 }
 0x789   :  { %v8007_v51 = vadd.f32 %v8006_v45, %v7980_v13  ;;  %9180 = vmatpush.xpose.msra.mxu2 %v15841_v52  ;;  %v8039_v16 = vpop.f32.mrf.mxu0  ;;  %v17739_v13 = vand.u32 4294901760, %v15643_v18 }
 0x78a   :  { %v8138_v24 = vpop.f32.mrf.mxu3  ;;  %v8079_v54 = vadd.f32 %v8078_v58, %v8039_v16 }
 0x78b   :  { %9237 = vmatmul.f32.vlgmr.msra.gmra.mxu3 %v8989_v59  ;;  %8986 = vmatpush.xpose.msrb.mxu0 %v15825_v48 }
 0x78c   :  { %9343 = vmatpush.xpose.msra.mxu1 %v15587_v55  ;;  %9183 = vmatmul.f32.vlgmr.msra.gmra.mxu2 %v8988_v30  ;;  %v8998_v55 = vsub.f32 %v8996_v41, %v8997_v43 }
 0x78d   :  { %8835 = vrot.lane.b32.xlu0 %v8007_v51, %s11911_s9 }
 0x78e   :  { %8992 = vmatmul.f32.vlgmr.msrb.gmra.mxu0 %v8991_v0  ;;  %v8108_v32 = vpop.f32.mrf.mxu2  ;;  %v8999_v61 = vand.u32 4294901760, %v8998_v55 }
 0x78f   :  { %9262 = vmatpush.xpose.msra.mxu0 %v17735_v63  ;;  %9121 = vmatmul.f32.gmra.mxu1 %v15880_v25  ;;  %v8109_v37 = vadd.f32 %v8108_v32, %v8079_v54  ;;  %v17743_v63 = vand.u32 4294901760, %v15706_v56  ;;  %v17745_v56 = vand.u32 4294901760, %v15747_v15 }
 0x790   :  { %9345 = vmatpush.xpose.msra.mxu1 %v15601_v36  ;;  %v8198_v6 = vpop.f32.mrf.mxu1  ;;  %v17737_v36 = vand.u32 4294901760, %v15614_v39 }
 0x791   :  { %v8047_v30 = vpop.f32.mrf.mxu0  ;;  %v8139_v59 = vadd.f32 %v8138_v24, %v8109_v37  ;;  %v17747_v37 = vand.u32 4294901760, %v15787_v19 }
 0x792   :  { %v8144_v44 = vpop.f32.mrf.mxu3 }
 0x793   :  { %9266 = vmatpush.xpose.msra.mxu0 %v17736_v31  ;;  %9243 = vmatmul.f32.gmra.mxu3 %v8997_v43 }
 0x794   :  { %9347 = vmatpush.xpose.msra.mxu1 %v15616_v4  ;;  %9188 = vmatmul.f32.gmra.mxu2 %v8996_v41  ;;  %v17741_v41 = vand.u32 4294901760, %v15667_v27 }
 0x796   :  { %9000 = vmatmul.f32.gmra.mxu0 %v8999_v61  ;;  %v8113_v7 = vpop.f32.mrf.mxu2  ;;  %v17746_v61 = vand.u32 4294901760, %v15760_v53 }
 0x797   :  { %9270 = vmatpush.xpose.msra.mxu0 %v17737_v36 }
 0x798   :  { %9349 = vmatpush.xpose.msra.mxu1 %v15629_v35  ;;  %v17740_v35 = vand.u32 4294901760, %v15658_v34 }
 0x799   :  { %v8202_v45 = vpop.f32.mrf.mxu1  ;;  %v8171_v4 = vpop.f32.mrf.mxu0 }
 0x79a   :  { %v8172_v58 = vadd.f32 %v8171_v4, %v8139_v59  ;;  %v8274_v20 = vpop.f32.mrf.mxu3 }
 0x79b   :  { %9274 = vmatpush.xpose.msra.mxu0 %v17738_v12 }
 0x79c   :  { %9351 = vmatpush.xpose.msra.mxu1 %v15645_v11  ;;  %v8199_v28 = vadd.f32 %v8198_v6, %v8172_v58 }
 0x79e   :  { %v8235_v39 = vpop.f32.mrf.mxu2  ;;  %8849 = vrot.lane.b32.xlu0 %v8199_v28, %s11910_s26 }
 0x79f   :  { %9278 = vmatpush.xpose.msra.mxu0 %v17739_v13  ;;  %v8275_v51 = vadd.f32 %v8274_v20, %v8235_v39 }
 0x7a0   :  { %9353 = vmatpush.xpose.msra.mxu1 %v15650_v49  ;;  %v17742_v49 = vand.u32 4294901760, %v15691_v5  ;;  %v17744_v5 = vand.u32 4294901760, %v15724_v50 }
 0x7a1   :  { %v8175_v33 = vpop.f32.mrf.mxu0  ;;  %v8334_v17 = vpop.f32.mrf.mxu1 }
 0x7a3   :  { %9282 = vmatpush.xpose.msra.mxu0 %v17740_v35  ;;  %v8278_v11 = vpop.f32.mrf.mxu3 }
 0x7a4   :  { %9355 = vmatpush.xpose.msra.mxu1 %v15676_v26  ;;  %v8083_v26 = vadd.f32 %v8082_v62, %v8047_v30 }
 0x7a6   :  { %v8243_v18 = vpop.f32.mrf.mxu2 }
 0x7a7   :  { %9286 = vmatpush.xpose.msra.mxu0 %v17741_v41  ;;  %v8279_v19 = vadd.f32 %v8278_v11, %v8243_v18 }
 0x7a8   :  { %9357 = vmatpush.xpose.msra.mxu1 %v15693_v2  ;;  %v8114_v2 = vadd.f32 %v8113_v7, %v8083_v26 }
 0x7a9   :  { %v8304_v16 = vpop.f32.mrf.mxu0 }
 0x7aa   :  { %v8305_v34 = vadd.f32 %v8304_v16, %v8275_v51  ;;  %v8340_v0 = vpop.f32.mrf.mxu1 }
 0x7ab   :  { %9290 = vmatpush.xpose.msra.mxu0 %v17742_v49  ;;  %v8394_v24 = vpop.f32.mrf.mxu3 }
 0x7ac   :  { %9359 = vmatpush.xpose.msra.mxu1 %v15708_v14  ;;  %v8335_v43 = vadd.f32 %v8334_v17, %v8305_v34  ;;  %v8145_v14 = vadd.f32 %v8144_v44, %v8114_v2 }
 0x7ae   :  { %v8367_v27 = vpop.f32.mrf.mxu2  ;;  %v8176_v62 = vadd.f32 %v8175_v33, %v8145_v14 }
 0x7af   :  { %9294 = vmatpush.xpose.msra.mxu0 %v17743_v63  ;;  %v8368_v32 = vadd.f32 %v8367_v27, %v8335_v43 }
 0x7b0   :  { %9361 = vmatpush.xpose.msra.mxu1 %v15726_v46  ;;  %v8203_v54 = vadd.f32 %v8202_v45, %v8176_v62  ;;  %v7295_v62 = vadd.f32 %v15358_v60, %v15343_v10 }
 0x7b1   :  { %v8395_v55 = vadd.f32 %v8394_v24, %v8368_v32  ;;  %v8309_v6 = vpop.f32.mrf.mxu0 }
 0x7b2   :  { %v8310_v12 = vadd.f32 %v8309_v6, %v8279_v19  ;;  %v8804_v6 = vpop.permute.xlu1 %8803  ;;  %v17752_v19 = vld [vmem:[#allocation35_spill] sm:$0xff] }
 0x7b3   :  { %9298 = vmatpush.xpose.msra.mxu0 %v17744_v5  ;;  %v8470_v31 = vpop.f32.mrf.mxu1  ;;  %8865 = vrot.lane.b32.xlu1 %v8395_v55, %s11909_s25  ;;  %v8398_v30 = vpop.f32.mrf.mxu3 }
 0x7b4   :  { %9363 = vmatpush.xpose.msra.mxu1 %v15739_v9  ;;  %v8341_v58 = vadd.f32 %v8340_v0, %v8310_v12 }
 0x7b6   :  { %v8371_v46 = vpop.f32.mrf.mxu2 }
 0x7b7   :  { %9302 = vmatpush.xpose.msra.mxu0 %v17745_v56  ;;  %v8372_v42 = vadd.f32 %v8371_v46, %v8341_v58  ;;  %v7325_v56 = vadd.f32 %v15395_v29, %v7295_v62 }
 0x7b8   :  { %9365 = vmatpush.xpose.msra.mxu1 %v15769_v1 }
 0x7b9   :  { %v8399_v13 = vadd.f32 %v8398_v30, %v8372_v42 }
 0x7bb   :  { %9306 = vmatpush.xpose.msra.mxu0 %v17746_v61  ;;  %v8431_v50 = vpop.f32.mrf.mxu0  ;;  %8851 = vrot.lane.b32.xlu1 %v8203_v54, %s11910_s26  ;;  %v8474_v9 = vpop.f32.mrf.mxu1  ;;  %v7355_v61 = vadd.f32 %v15378_v8, %v7325_v56 }
 0x7bc   :  { %9367 = vmatpush.xpose.msra.mxu1 %v15789_v57  ;;  %v8471_v53 = vadd.f32 %v8470_v31, %v8431_v50  ;;  %v8802_v31 = vpop.permute.xlu0 %8801 }
 0x7bd   :  { %v8530_v44 = vpop.f32.mrf.mxu3  ;;  %v7388_v50 = vadd.f32 %v15417_v47, %v7355_v61  ;;  %v17753_v47 = vld [vmem:[#allocation37_spill] sm:$0xff] }
 0x7be   :  { %v8500_v15 = vpop.f32.mrf.mxu2 }
 0x7bf   :  { %9310 = vmatpush.xpose.msra.mxu0 %v17747_v37  ;;  %v8501_v57 = vadd.f32 %v8500_v15, %v8471_v53  ;;  %v17749_v37 = vld [vmem:[#allocation44_spill] sm:$0xff] }
 0x7c0   :  { %9369 = vmatpush.xpose.msra.mxu1 %v15807_v23 }
 0x7c1   :  { %v8531_v23 = vadd.f32 %v8530_v44, %v8501_v57  ;;  %v17748_v44 = vld [vmem:[#allocation69_spill] sm:$0xff]  ;;  %v17751_v57 = vld [vmem:[#allocation31_spill] sm:$0xff] }
 0x7c2   :  { %v7299_v15 = vadd.f32 %v17749_v37, %v17748_v44 }
 0x7c3   :  { %9314 = vmatpush.xpose.msra.mxu0 %v9100_v3  ;;  %v8439_v1 = vpop.f32.mrf.mxu0  ;;  %v8590_v59 = vpop.f32.mrf.mxu1 }
 0x7c4   :  { %9371 = vmatpush.xpose.msra.mxu1 %v15825_v48  ;;  %v8475_v33 = vadd.f32 %v8474_v9, %v8439_v1  ;;  %v17750_v1 = vld [vmem:[#allocation67_spill] sm:$0xff] }
 0x7c5   :  { %v8536_v36 = vpop.f32.mrf.mxu3 }
 0x7c6   :  { %v8505_v7 = vpop.f32.mrf.mxu2 }
 0x7c7   :  { %9318 = vmatpush.xpose.msra.mxu0 %v9106_v40  ;;  %v8506_v51 = vadd.f32 %v8505_v7, %v8475_v33  ;;  %v7330_v7 = vadd.f32 %v17751_v57, %v7299_v15  ;;  %v11690_v15 = vld [vmem:[#allocation2] sm:$0xff] }
 0x7c9   :  { %v8537_v24 = vadd.f32 %v8536_v36, %v8506_v51  ;;  %v7415_v36 = vadd.f32 %v17750_v1, %v7388_v50 }
 0x7cb   :  { %9322 = vmatpush.xpose.msra.mxu0 %v9112_v38  ;;  %v8563_v45 = vpop.f32.mrf.mxu0  ;;  %v8594_v20 = vpop.f32.mrf.mxu1  ;;  %v8907_v10 = vsel %vm1720_vm0, %v7415_v36, %v8802_v31 }
 0x7cc   :  { %v8564_v21 = vadd.f32 %v8563_v45, %v8531_v23  ;;  %v7361_v23 = vadd.f32 %v17752_v19, %v7330_v7 }
 0x7cd   :  { %v8666_v3 = vpop.f32.mrf.mxu3 }
 0x7ce   :  { %v8591_v4 = vadd.f32 %v8590_v59, %v8564_v21  ;;  %v8627_v48 = vpop.f32.mrf.mxu2  ;;  %v7392_v45 = vadd.f32 %v17753_v47, %v7361_v23  ;;  %v11691_v23 = vld [vmem:[#allocation2 + $0x8] sm:$0xff] }
 0x7cf   :  { %v8667_v52 = vadd.f32 %v8666_v3, %v8627_v48 }
 0x7d0   :  { %8881 = vrot.lane.b32.xlu2 %v8591_v4, %s11908_s24  ;;  %v8820_v30 = vpop.permute.xlu2 %8819 }
 0x7d3   :  { %v8567_v40 = vpop.f32.mrf.mxu0  ;;  %v8726_v38 = vpop.f32.mrf.mxu1 }
 0x7d4   :  { %v8568_v63 = vadd.f32 %v8567_v40, %v8537_v24 }
 0x7d5   :  { %v8670_v28 = vpop.f32.mrf.mxu3 }
 0x7d6   :  { %v8635_v39 = vpop.f32.mrf.mxu2  ;;  %v8595_v5 = vadd.f32 %v8594_v20, %v8568_v63  ;;  %v17754_v20 = vld [vmem:[#allocation32_spill] sm:$0xff] }
 0x7d7   :  { %v8671_v16 = vadd.f32 %v8670_v28, %v8635_v39  ;;  %v7419_v42 = vadd.f32 %v17754_v20, %v7392_v45  ;;  %v11692_v20 = vld [vmem:[#allocation2 + $0x10] sm:$0xff] }
 0x7d8   :  { %8867 = vrot.lane.b32.xlu2 %v8399_v13, %s11909_s25 }
 0x7d9   :  { %v8908_v28 = vsel %vm1720_vm0, %v7419_v42, %v8804_v6 }
 0x7da   :  { %v8913_v39 = vsel %vm8909_vm9, %v8908_v28, %v8820_v30 }
 0x7db   :  { %v8696_v35 = vpop.f32.mrf.mxu0  ;;  %v8732_v43 = vpop.f32.mrf.mxu1 }
 0x7dc   :  { %v8697_v17 = vadd.f32 %v8696_v35, %v8667_v52 }
 0x7dd   :  { %v8786_v18 = vpop.f32.mrf.mxu3  ;;  %v8834_v9 = vpop.permute.xlu2 %8833 }
 0x7de   :  { %v8727_v11 = vadd.f32 %v8726_v38, %v8697_v17  ;;  %v8759_v41 = vpop.f32.mrf.mxu2 }
 0x7e0   :  { %v8760_v49 = vadd.f32 %v8759_v41, %v8727_v11  ;;  %v8818_v46 = vpop.permute.xlu1 %8817 }
 0x7e1   :  { %v8912_v60 = vsel %vm8909_vm9, %v8907_v10, %v8818_v46 }
 0x7e2   :  { %v8787_v34 = vadd.f32 %v8786_v18, %v8760_v49  ;;  %v8917_v8 = vsel %vm8914_vm10, %v8912_v60, %v8834_v9 }
 0x7e3   :  { %v8701_v0 = vpop.f32.mrf.mxu0 }
 0x7e4   :  { %v8702_v26 = vadd.f32 %v8701_v0, %v8671_v16  ;;  %8897 = vrot.lane.b32.xlu0 %v8787_v34, %s11907_s11 }
 0x7e5   :  { %v8790_v55 = vpop.f32.mrf.mxu3 }
 0x7e6   :  { %v8733_v27 = vadd.f32 %v8732_v43, %v8702_v26  ;;  %v8763_v2 = vpop.f32.mrf.mxu2 }
 0x7e8   :  { %v8764_v32 = vadd.f32 %v8763_v2, %v8733_v27 }
 0x7ea   :  { %v8791_v14 = vadd.f32 %v8790_v55, %v8764_v32 }
 0x7ec   :  { %8883 = vrot.lane.b32.xlu0 %v8595_v5, %s11908_s24  ;;  %8899 = vrot.lane.b32.xlu1 %v8791_v14, %s11907_s11 }
 0x7ff   :  { %v8836_v54 = vpop.permute.xlu0 %8835 }
 0x800   :  { %v8918_v38 = vsel %vm8914_vm10, %v8913_v39, %v8836_v54 }
 0x804   :  { %v9118_v63 = vpop.f32.mrf.mxu1 }
 0x80b   :  { %v8993_v27 = vpop.f32.mrf.mxu0 }
 0x80c   :  { %v9122_v2 = vpop.f32.mrf.mxu1  ;;  %v9119_v31 = vadd.f32 %v9118_v63, %v8993_v27  ;;  %v9508_v63 = vld [vmem:[#allocation11 + $0x60] sm:$0xff] }
 0x80e   :  { %v9238_v30 = vpop.f32.mrf.mxu3 }
 0x80f   :  { %v9184_v6 = vpop.f32.mrf.mxu2 }
 0x810   :  { %v8850_v59 = vpop.permute.xlu0 %8849 }
 0x811   :  { %v8922_v12 = vsel %vm8919_vm11, %v8917_v8, %v8850_v59 }
 0x813   :  { %v9001_v32 = vpop.f32.mrf.mxu0 }
 0x814   :  { %v9123_v46 = vadd.f32 %v9122_v2, %v9001_v32 }
 0x816   :  { %v9244_v37 = vpop.f32.mrf.mxu3 }
 0x825   :  { %v8866_v53 = vpop.permute.xlu1 %8865 }
 0x826   :  { %v8927_v21 = vsel %vm8924_vm12, %v8922_v12, %v8866_v53 }
 0x82a   :  { %v8882_v29 = vpop.permute.xlu2 %8881 }
 0x82b   :  { %v8932_v3 = vsel %vm8929_vm13, %v8927_v21, %v8882_v29 }
 0x82d   :  { %v8852_v4 = vpop.permute.xlu1 %8851 }
 0x82e   :  { %v8923_v33 = vsel %vm8919_vm11, %v8918_v38, %v8852_v4 }
 0x832   :  { %v8868_v52 = vpop.permute.xlu2 %8867 }
 0x833   :  { %v8928_v17 = vsel %vm8924_vm12, %v8923_v33, %v8868_v52 }
 0x856   :  { %v8898_v48 = vpop.permute.xlu0 %8897 }
 0x857   :  { %v8937_v58 = vsel %vm8934_vm14, %v8932_v3, %v8898_v48 }
 0x858   :  { %v9003_v40 = vand.u32 4294901760, %v8937_v58 }
 0x85a   :  { %v9004_v13 = vsub.f32 %v8937_v58, %v9003_v40  ;;  %9125 = vmatmul.f32.gmra.mxu1 %v9003_v40 }
 0x85c   :  { %9193 = vmatmul.f32.gmra.mxu2 %v9004_v13  ;;  %v9005_v35 = vand.u32 4294901760, %v9004_v13 }
 0x85e   :  { %v8884_v11 = vpop.permute.xlu0 %8883  ;;  %v8900_v41 = vpop.permute.xlu1 %8899  ;;  %9249 = vmatmul.f32.gmra.mxu3 %v9005_v35  ;;  %v9006_v18 = vsub.f32 %v9004_v13, %v9005_v35  ;;  %v11693_v35 = vld [vmem:[#allocation2 + $0x18] sm:$0xff] }
 0x85f   :  { %v8933_v51 = vsel %vm8929_vm13, %v8928_v17, %v8884_v11  ;;  %v11913_v17 = vmov 128.0  }
 0x860   :  { %v8938_v49 = vsel %vm8934_vm14, %v8933_v51, %v8900_v41  ;;  %v9007_v16 = vand.u32 4294901760, %v9006_v18  ;;  %11656 = vrcp.f32 %v11913_v17  ;;  %v9502_v17 = vld [vmem:[#allocation11 + $0x30] sm:$0xff] }
 0x861   :  { %v9011_v34 = vand.u32 4294901760, %v8938_v49 }
 0x862   :  { %9008 = vmatmul.f32.gmra.mxu0 %v9007_v16  ;;  %v9511_v16 = vld [vmem:[#allocation11 + $0x78] sm:$0xff] }
 0x863   :  { %v9012_v0 = vsub.f32 %v8938_v49, %v9011_v34  ;;  %9129 = vmatmul.f32.gmra.mxu1 %v9011_v34 }
 0x865   :  { %9198 = vmatmul.f32.gmra.mxu2 %v9012_v0  ;;  %v9013_v24 = vand.u32 4294901760, %v9012_v0 }
 0x866   :  { %v11657_v11 = vpop.eup %11656 }
 0x867   :  { %9255 = vmatmul.f32.gmra.mxu3 %v9013_v24  ;;  %v9014_v26 = vsub.f32 %v9012_v0, %v9013_v24  ;;  %v9404_v41 = vmul.f32 128.0, %v11657_v11  ;;  %vm9408_vm0 = vweird.f32 %v11657_v11 }
 0x869   :  { %v9015_v43 = vand.u32 4294901760, %v9014_v26  ;;  %v9405_v18 = vsub.f32 1.0, %v9404_v41  ;;  %v9510_v26 = vld [vmem:[#allocation11 + $0x70] sm:$0xff] }
 0x86a   :  { %v16001_v32 = vand.u32 4294901760, %v9510_v26 }
 0x86b   :  { %9016 = vmatmul.f32.gmra.mxu0 %v9015_v43  ;;  %9373 = vmatmul.f32.vlgmr.msra.gmra.mxu1 %v15864_v22  ;;  %v9406_v51 = vmul.f32 %v11657_v11, %v9405_v18  ;;  %v9509_v43 = vld [vmem:[#allocation11 + $0x68] sm:$0xff] }
 0x86d   :  { %v9407_v49 = vadd.f32 %v11657_v11, %v9406_v51 }
 0x86f   :  { %v15992_v0 = vsel %vm9408_vm0, %v11657_v11, %v9407_v49  ;;  %v16103_v49 = vand.u32 4294901760, %v9502_v17 }
 0x870   :  { %17755 = vst [vmem:[#allocation70_spill] sm:$0xff] %v15992_v0 }
 0x873   :  { %9324 = vmatmul.f32.vlgmr.msra.gmra.mxu0 %v15864_v22  ;;  %9377 = vmatmul.f32.gmra.mxu1 %v15880_v25  ;;  %v9185_v22 = vadd.f32 %v9184_v6, %v9119_v31 }
 0x875   :  { %v9239_v54 = vadd.f32 %v9238_v30, %v9185_v22 }
 0x87b   :  { %9328 = vmatmul.f32.gmra.mxu0 %v15880_v25  ;;  %9381 = vmatmul.f32.gmra.mxu1 %v9003_v40  ;;  %v9189_v25 = vpop.f32.mrf.mxu2 }
 0x87c   :  { %v9190_v9 = vadd.f32 %v9189_v25, %v9123_v46 }
 0x87e   :  { %v9245_v57 = vadd.f32 %v9244_v37, %v9190_v9 }
 0x883   :  { %9332 = vmatmul.f32.gmra.mxu0 %v9003_v40  ;;  %9385 = vmatmul.f32.gmra.mxu1 %v9011_v34 }
 0x88b   :  { %9336 = vmatmul.f32.gmra.mxu0 %v9011_v34  ;;  %v15990_v34 = vand.u32 4294901760, %v9511_v16 }
 0x88d   :  { %v15995_v24 = vsub.f32 %v9511_v16, %v15990_v34  ;;  %9782 = vmatpush.xpose.msrb.mxu1 %v15990_v34  ;;  %9535 = vmatpush.xpose.msrb.mxu2 %v15990_v34  ;;  %v9501_v16 = vld [vmem:[#allocation11 + $0x28] sm:$0xff] }
 0x88f   :  { %v9601_v2 = vand.u32 4294901760, %v15995_v24  ;;  %9714 = vmatpush.xpose.msrb.mxu0 %v15995_v24 }
 0x891   :  { %v9602_v31 = vsub.f32 %v15995_v24, %v9601_v2  ;;  %9784 = vmatpush.xpose.msrb.mxu1 %v16001_v32  ;;  %9537 = vmatpush.xpose.msrb.mxu2 %v16001_v32 }
 0x893   :  { %v9603_v25 = vand.u32 4294901760, %v9602_v31  ;;  %v16116_v31 = vand.u32 4294901760, %v9501_v16 }
 0x895   :  { %9604 = vmatpush.xpose.msrb.mxu3 %v9603_v25 }
 0x8d7   :  { %v9126_v55 = vpop.f32.mrf.mxu1 }
 0x8df   :  { %v9009_v5 = vpop.f32.mrf.mxu0  ;;  %v9194_v7 = vpop.f32.mrf.mxu2 }
 0x8e0   :  { %v9130_v14 = vpop.f32.mrf.mxu1  ;;  %v9127_v36 = vadd.f32 %v9126_v55, %v9009_v5  ;;  %v16003_v55 = vand.u32 4294901760, %v9509_v43  ;;  %v16005_v5 = vand.u32 4294901760, %v9508_v63 }
 0x8e1   :  { %v9250_v19 = vpop.f32.mrf.mxu3 }
 0x8e2   :  { %v9195_v60 = vadd.f32 %v9194_v7, %v9127_v36  ;;  %v16015_v30 = vsub.f32 %v9509_v43, %v16003_v55  ;;  %9786 = vmatpush.xpose.msrb.mxu1 %v16003_v55  ;;  %v9505_v36 = vld [vmem:[#allocation11 + $0x48] sm:$0xff]  ;;  %9539 = vmatpush.xpose.msrb.mxu2 %v16003_v55 }
 0x8e4   :  { %v9251_v47 = vadd.f32 %v9250_v19, %v9195_v60 }
 0x8e6   :  { %9788 = vmatpush.xpose.msrb.mxu1 %v16005_v5  ;;  %9541 = vmatpush.xpose.msrb.mxu2 %v16005_v5 }
 0x8e8   :  { %v9017_v62 = vpop.f32.mrf.mxu0  ;;  %v9374_v56 = vpop.f32.mrf.mxu1 }
 0x8e9   :  { %v9131_v45 = vadd.f32 %v9130_v14, %v9017_v62  ;;  %v9199_v4 = vpop.f32.mrf.mxu2  ;;  %v9507_v14 = vld [vmem:[#allocation11 + $0x58] sm:$0xff]  ;;  %v16012_v62 = vsub.f32 %v9510_v26, %v16001_v32 }
 0x8ea   :  { %v9256_v40 = vpop.f32.mrf.mxu3  ;;  %v16019_v22 = vand.u32 4294901760, %v9507_v14 }
 0x8eb   :  { %v9200_v48 = vadd.f32 %v9199_v4, %v9131_v45  ;;  %9717 = vmatpush.xpose.msrb.mxu0 %v16012_v62  ;;  %v9504_v45 = vld [vmem:[#allocation11 + $0x40] sm:$0xff] }
 0x8ec   :  { %9790 = vmatpush.xpose.msrb.mxu1 %v16019_v22  ;;  %9543 = vmatpush.xpose.msrb.mxu2 %v16019_v22 }
 0x8ed   :  { %v9257_v28 = vadd.f32 %v9256_v40, %v9200_v48  ;;  %v16073_v48 = vand.u32 4294901760, %v9504_v45 }
 0x8ef   :  { %9720 = vmatpush.xpose.msrb.mxu0 %v16015_v30 }
 0x8f0   :  { %v9325_v61 = vpop.f32.mrf.mxu0  ;;  %v9378_v1 = vpop.f32.mrf.mxu1 }
 0x8f1   :  { %v9326_v50 = vadd.f32 %v9325_v61, %v9239_v54  ;;  %v16025_v54 = vsub.f32 %v9508_v63, %v16005_v5  ;;  %v9607_v61 = vand.u32 4294901760, %v16012_v62 }
 0x8f3   :  { %v9375_v44 = vadd.f32 %v9374_v56, %v9326_v50  ;;  %v9506_v56 = vld [vmem:[#allocation11 + $0x50] sm:$0xff]  ;;  %v9613_v50 = vand.u32 4294901760, %v16015_v30  ;;  %v9608_v37 = vsub.f32 %v16012_v62, %v9607_v61  ;;  %9723 = vmatpush.xpose.msrb.mxu0 %v16025_v54 }
 0x8f5   :  { %v15978_v53 = vadd.f32 %v11690_v15, %v9375_v44  ;;  %v16032_v44 = vand.u32 4294901760, %v9506_v56  ;;  %v9614_v15 = vsub.f32 %v16015_v30, %v9613_v50  ;;  %v9609_v7 = vand.u32 4294901760, %v9608_v37 }
 0x8f7   :  { %9395 = vadd.xlane.f32.xlu2 %v15978_v53  ;;  %9610 = vmatpush.xpose.msrb.mxu3 %v9609_v7  ;;  %v9615_v60 = vand.u32 4294901760, %v9614_v15  ;;  %v9499_v7 = vld [vmem:[#allocation11 + $0x18] sm:$0xff] }
 0x8f8   :  { %v9329_v59 = vpop.f32.mrf.mxu0  ;;  %v9382_v12 = vpop.f32.mrf.mxu1  ;;  %9792 = vmatpush.xpose.msrb.mxu1 %v16032_v44  ;;  %9545 = vmatpush.xpose.msrb.mxu2 %v16032_v44 }
 0x8f9   :  { %v9330_v10 = vadd.f32 %v9329_v59, %v9245_v57 }
 0x8fb   :  { %v9379_v29 = vadd.f32 %v9378_v1, %v9330_v10  ;;  %v16043_v1 = vsub.f32 %v9507_v14, %v16019_v22  ;;  %v16048_v10 = vand.u32 4294901760, %v9505_v36  ;;  %9616 = vmatpush.xpose.msrb.mxu3 %v9615_v60  ;;  %v16140_v60 = vand.u32 4294901760, %v9499_v7 }
 0x8fd   :  { %v15981_v8 = vadd.f32 %v11691_v23, %v9379_v29  ;;  %v17411_v19 = vand.u32 4294901760, %v16043_v1  ;;  %v16056_v23 = vsub.f32 %v9506_v56, %v16032_v44  ;;  %9726 = vmatpush.xpose.msrb.mxu0 %v16043_v1  ;;  %9794 = vmatpush.xpose.msrb.mxu1 %v16048_v10  ;;  %v9500_v56 = vld [vmem:[#allocation11 + $0x20] sm:$0xff] }
 0x8fe   :  { %9547 = vmatpush.xpose.msrb.mxu2 %v16048_v10  ;;  %v16125_v37 = vand.u32 4294901760, %v9500_v56 }
 0x8ff   :  { %9397 = vadd.xlane.f32.xlu0 %v15981_v8  ;;  %v9626_v4 = vsub.f32 %v16043_v1, %v17411_v19 }
 0x900   :  { %v9333_v21 = vpop.f32.mrf.mxu0  ;;  %v9386_v52 = vpop.f32.mrf.mxu1 }
 0x901   :  { %v9334_v3 = vadd.f32 %v9333_v21, %v9251_v47  ;;  %v16066_v21 = vsub.f32 %v9505_v36, %v16048_v10  ;;  %9729 = vmatpush.xpose.msrb.mxu0 %v16056_v23  ;;  %9796 = vmatpush.xpose.msrb.mxu1 %v16073_v48 }
 0x902   :  { %9549 = vmatpush.xpose.msrb.mxu2 %v16073_v48 }
 0x903   :  { %v9383_v58 = vadd.f32 %v9382_v12, %v9334_v3 }
 0x905   :  { %v15984_v42 = vadd.f32 %v11692_v20, %v9383_v58  ;;  %v9503_v58 = vld [vmem:[#allocation11 + $0x38] sm:$0xff]  ;;  %9732 = vmatpush.xpose.msrb.mxu0 %v16066_v21 }
 0x907   :  { %9399 = vadd.xlane.f32.xlu1 %v15984_v42 }
 0x908   :  { %v9337_v13 = vpop.f32.mrf.mxu0 }
 0x909   :  { %v9338_v39 = vadd.f32 %v9337_v13, %v9257_v28  ;;  %v17408_v28 = vand.u32 4294901760, %v16066_v21  ;;  %v9627_v13 = vand.u32 4294901760, %v9626_v4  ;;  %v9527_v4 = vld [vmem:[#allocation11 + $0xf8] sm:$0xff] }
 0x90b   :  { %v9387_v38 = vadd.f32 %v9386_v52, %v9338_v39  ;;  %v16084_v52 = vsub.f32 %v9504_v45, %v16073_v48  ;;  %v9638_v41 = vsub.f32 %v16066_v21, %v17408_v28 }
 0x90d   :  { %v15987_v33 = vadd.f32 %v11693_v35, %v9387_v38  ;;  %v16086_v38 = vand.u32 4294901760, %v9503_v58  ;;  %v17406_v51 = vand.u32 4294901760, %v16084_v52  ;;  %v9639_v63 = vand.u32 4294901760, %v9638_v41  ;;  %9735 = vmatpush.xpose.msrb.mxu0 %v16084_v52  ;;  %v9526_v41 = vld [vmem:[#allocation11 + $0xf0] sm:$0xff] }
 0x90f   :  { %9401 = vadd.xlane.f32.xlu2 %v15987_v33  ;;  %9798 = vmatpush.xpose.msrb.mxu1 %v16086_v38 }
 0x910   :  { %9551 = vmatpush.xpose.msrb.mxu2 %v16086_v38 }
 0x913   :  { %9800 = vmatpush.xpose.msrb.mxu1 %v16103_v49 }
 0x914   :  { %9553 = vmatpush.xpose.msrb.mxu2 %v16103_v49 }
 0x917   :  { %9802 = vmatpush.xpose.msrb.mxu1 %v16116_v31 }
 0x918   :  { %9555 = vmatpush.xpose.msrb.mxu2 %v16116_v31 }
 0x91b   :  { %9804 = vmatpush.xpose.msrb.mxu1 %v16125_v37 }
 0x91c   :  { %9557 = vmatpush.xpose.msrb.mxu2 %v16125_v37 }
 0x91f   :  { %9806 = vmatpush.xpose.msrb.mxu1 %v16140_v60 }
 0x920   :  { %9559 = vmatpush.xpose.msrb.mxu2 %v16140_v60 }
 0x96a   :  { %v9396_v27 = vpop.xlane.xlu2 %9395 }
 0x96b   :  { %v9410_v6 = vmul.f32 %v15992_v0, %v9396_v27  ;;  %v9644_v27 = vsub.f32 %v16084_v52, %v17406_v51 }
 0x96d   :  { %v16022_v46 = vsub.f32 %v15978_v53, %v9410_v6  ;;  %v17414_v53 = vand.u32 4294901760, %v16025_v54  ;;  %v16114_v6 = vsub.f32 %v9502_v17, %v16103_v49  ;;  %v9645_v15 = vand.u32 4294901760, %v9644_v27  ;;  %v9497_v17 = vld [vmem:[#allocation11 + $0x8] sm:$0xff]  ;;  %v9496_v27 = vld [vmem:[#allocation11] sm:$0xff] }
 0x96f   :  { %v9418_v9 = vmul.f32 %v16022_v46, %v16022_v46  ;;  %v9620_v29 = vsub.f32 %v16025_v54, %v17414_v53 }
 0x971   :  { %9422 = vadd.xlane.f32.xlu0 %v9418_v9  ;;  %v9621_v3 = vand.u32 4294901760, %v9620_v29 }
 0x972   :  { %v9398_v57 = vpop.xlane.xlu0 %9397 }
 0x973   :  { %v9411_v59 = vmul.f32 %v15992_v0, %v9398_v57  ;;  %9622 = vmatpush.xpose.msrb.mxu3 %v9621_v3  ;;  %v17403_v57 = vand.u32 4294901760, %v16114_v6  ;;  %v9498_v3 = vld [vmem:[#allocation11 + $0x10] sm:$0xff] }
 0x975   :  { %v16059_v47 = vsub.f32 %v15981_v8, %v9411_v59  ;;  %v17409_v8 = vand.u32 4294901760, %v16056_v23  ;;  %v16138_v59 = vsub.f32 %v9500_v56, %v16125_v37  ;;  %v9656_v45 = vsub.f32 %v16114_v6, %v17403_v57 }
 0x977   :  { %v9419_v12 = vmul.f32 %v16059_v47, %v16059_v47  ;;  %v9632_v39 = vsub.f32 %v16056_v23, %v17409_v8  ;;  %9628 = vmatpush.xpose.msrb.mxu3 %v9627_v13 }
 0x979   :  { %9424 = vadd.xlane.f32.xlu1 %v9419_v12  ;;  %v9633_v18 = vand.u32 4294901760, %v9632_v39  ;;  %v16157_v39 = vand.u32 4294901760, %v9498_v3 }
 0x97a   :  { %v9400_v20 = vpop.xlane.xlu1 %9399 }
 0x97b   :  { %v9412_v40 = vmul.f32 %v15992_v0, %v9400_v20  ;;  %9634 = vmatpush.xpose.msrb.mxu3 %v9633_v18  ;;  %v16151_v20 = vsub.f32 %v9499_v7, %v16140_v60  ;;  %9808 = vmatpush.xpose.msrb.mxu1 %v16157_v39 }
 0x97c   :  { %9561 = vmatpush.xpose.msrb.mxu2 %v16157_v39 }
 0x97d   :  { %v16089_v35 = vsub.f32 %v15984_v42, %v9412_v40  ;;  %v16101_v42 = vsub.f32 %v9503_v58, %v16086_v38  ;;  %v17400_v58 = vand.u32 4294901760, %v16138_v59  ;;  %v9657_v40 = vand.u32 4294901760, %v9656_v45 }
 0x97f   :  { %v9420_v11 = vmul.f32 %v16089_v35, %v16089_v35  ;;  %v17404_v14 = vand.u32 4294901760, %v16101_v42  ;;  %9640 = vmatpush.xpose.msrb.mxu3 %v9639_v63  ;;  %9738 = vmatpush.xpose.msrb.mxu0 %v16101_v42  ;;  %v9668_v18 = vsub.f32 %v16138_v59, %v17400_v58  ;;  %v16171_v63 = vand.u32 4294901760, %v9497_v17 }
 0x981   :  { %9426 = vadd.xlane.f32.xlu2 %v9420_v11  ;;  %v9650_v36 = vsub.f32 %v16101_v42, %v17404_v14  ;;  %v16160_v11 = vand.u32 4294901760, %v9527_v4  ;;  %v16186_v45 = vsub.f32 %v9497_v17, %v16171_v63  ;;  %9810 = vmatpush.xpose.msrb.mxu1 %v16171_v63 }
 0x982   :  { %v9402_v26 = vpop.xlane.xlu2 %9401  ;;  %9563 = vmatpush.xpose.msrb.mxu2 %v16171_v63 }
 0x983   :  { %v9413_v43 = vmul.f32 %v15992_v0, %v9402_v26  ;;  %9646 = vmatpush.xpose.msrb.mxu3 %v9645_v15  ;;  %v9651_v29 = vand.u32 4294901760, %v9650_v36  ;;  %9741 = vmatpush.xpose.msrb.mxu0 %v16114_v6  ;;  %v16175_v56 = vsub.f32 %v9527_v4, %v16160_v11  ;;  %v9525_v15 = vld [vmem:[#allocation11 + $0xe8] sm:$0xff]  ;;  %v9669_v36 = vand.u32 4294901760, %v9668_v18  ;;  %v9524_v18 = vld [vmem:[#allocation11 + $0xe0] sm:$0xff] }
 0x984   :  { %v16190_v4 = vand.u32 4294901760, %v9525_v15 }
 0x985   :  { %v16119_v25 = vsub.f32 %v15987_v33, %v9413_v43  ;;  %v16133_v33 = vsub.f32 %v9501_v16, %v16116_v31  ;;  %v17399_v16 = vand.u32 4294901760, %v16151_v20  ;;  %v16169_v43 = vsub.f32 %v9498_v3, %v16157_v39 }
 0x986   :  { %v16188_v3 = vand.u32 4294901760, %v9496_v27 }
 0x987   :  { %v9421_v9 = vmul.f32 %v16119_v25, %v16119_v25  ;;  %v17401_v12 = vand.u32 4294901760, %v16133_v33  ;;  %9652 = vmatpush.xpose.msrb.mxu3 %v9651_v29  ;;  %9744 = vmatpush.xpose.msrb.mxu0 %v16133_v33  ;;  %v9674_v7 = vsub.f32 %v16151_v20, %v17399_v16  ;;  %v17402_v29 = vand.u32 4294901760, %v16169_v43 }
 0x988   :  { %v17407_v16 = vand.u32 4294901760, %v16186_v45  ;;  %v16204_v58 = vsub.f32 %v9496_v27, %v16188_v3  ;;  %9812 = vmatpush.xpose.msrb.mxu1 %v16188_v3  ;;  %9565 = vmatpush.xpose.msrb.mxu2 %v16188_v3 }
 0x989   :  { %9428 = vadd.xlane.f32.xlu0 %v9421_v9  ;;  %v9662_v13 = vsub.f32 %v16133_v33, %v17401_v12  ;;  %v16177_v9 = vand.u32 4294901760, %v9526_v41  ;;  %v9680_v17 = vsub.f32 %v16169_v43, %v17402_v29  ;;  %v16207_v12 = vsub.f32 %v9525_v15, %v16190_v4  ;;  %v9523_v29 = vld [vmem:[#allocation11 + $0xd8] sm:$0xff] }
 0x98a   :  { %v9686_v27 = vsub.f32 %v16186_v45, %v17407_v16  ;;  %v17413_v15 = vand.u32 4294901760, %v16204_v58  ;;  %v9522_v16 = vld [vmem:[#allocation11 + $0xd0] sm:$0xff] }
 0x98b   :  { %9658 = vmatpush.xpose.msrb.mxu3 %v9657_v40  ;;  %v9663_v26 = vand.u32 4294901760, %v9662_v13  ;;  %9747 = vmatpush.xpose.msrb.mxu0 %v16138_v59  ;;  %v17405_v40 = vand.u32 4294901760, %v16175_v56  ;;  %v16195_v13 = vsub.f32 %v9526_v41, %v16177_v9  ;;  %v9681_v57 = vand.u32 4294901760, %v9680_v17 }
 0x98c   :  { %v17412_v14 = vand.u32 4294901760, %v16207_v12  ;;  %v16230_v17 = vand.u32 4294901760, %v9523_v29  ;;  %v9687_v28 = vand.u32 4294901760, %v9686_v27  ;;  %v9692_v8 = vsub.f32 %v16204_v58, %v17413_v15  ;;  %9841 = vmatpush.xpose.msra.mxu2 %v9601_v2  ;;  %v9521_v27 = vld [vmem:[#allocation11 + $0xc8] sm:$0xff] }
 0x98d   :  { %v10036_v41 = vsub.f32 %v16175_v56, %v17405_v40  ;;  %v16258_v53 = vand.u32 4294901760, %v9521_v27 }
 0x98e   :  { %v16243_v19 = vsub.f32 %v9523_v29, %v16230_v17 }
 0x98f   :  { %9664 = vmatpush.xpose.msrb.mxu3 %v9663_v26  ;;  %9750 = vmatpush.xpose.msrb.mxu0 %v16151_v20  ;;  %v9675_v26 = vand.u32 4294901760, %v9674_v7  ;;  %v16214_v7 = vand.u32 4294901760, %v9524_v18  ;;  %v10037_v40 = vand.u32 4294901760, %v10036_v41  ;;  %v10048_v41 = vsub.f32 %v16207_v12, %v17412_v14 }
 0x990   :  { %v10059_v29 = vand.u32 4294901760, %v16243_v19  ;;  %9845 = vmatpush.xpose.msra.mxu2 %v9607_v61 }
 0x991   :  { %10038 = vmatpush.xpose.msra.mxu1 %v10037_v40  ;;  %v9693_v40 = vand.u32 4294901760, %v9692_v8  ;;  %v10049_v14 = vand.u32 4294901760, %v10048_v41 }
 0x992   :  { %v10060_v2 = vsub.f32 %v16243_v19, %v10059_v29 }
 0x993   :  { %9670 = vmatpush.xpose.msrb.mxu3 %v9669_v36  ;;  %v17410_v36 = vand.u32 4294901760, %v16195_v13  ;;  %9753 = vmatpush.xpose.msrb.mxu0 %v16169_v43 }
 0x994   :  { %9849 = vmatpush.xpose.msra.mxu2 %v9613_v50  ;;  %v17757_v50 = vand.u32 4294901760, %v16043_v1  ;;  %v9520_v1 = vld [vmem:[#allocation11 + $0xc0] sm:$0xff] }
 0x995   :  { %v10042_v51 = vsub.f32 %v16195_v13, %v17410_v36  ;;  %v16300_v41 = vand.u32 4294901760, %v9520_v1 }
 0x997   :  { %9676 = vmatpush.xpose.msrb.mxu3 %v9675_v26  ;;  %v16228_v26 = vsub.f32 %v9524_v18, %v16214_v7  ;;  %9756 = vmatpush.xpose.msrb.mxu0 %v16186_v45  ;;  %v10043_v18 = vand.u32 4294901760, %v10042_v51 }
 0x999   :  { %v10053_v36 = vand.u32 4294901760, %v16228_v26  ;;  %10044 = vmatpush.xpose.msra.mxu1 %v10043_v18 }
 0x99b   :  { %9682 = vmatpush.xpose.msrb.mxu3 %v9681_v57  ;;  %v16245_v57 = vand.u32 4294901760, %v9522_v16  ;;  %9759 = vmatpush.xpose.msrb.mxu0 %v16204_v58  ;;  %v10054_v51 = vsub.f32 %v16228_v26, %v10053_v36 }
 0x99d   :  { %v16256_v15 = vsub.f32 %v9522_v16, %v16245_v57  ;;  %10050 = vmatpush.xpose.msra.mxu1 %v10049_v14  ;;  %v10055_v24 = vand.u32 4294901760, %v10054_v51  ;;  %v17756_v14 = vand.u32 4294901760, %v16025_v54  ;;  %v17758_v16 = vand.u32 4294901760, %v16056_v23  ;;  %v9519_v23 = vld [vmem:[#allocation11 + $0xb8] sm:$0xff] }
 0x99f   :  { %9969 = vmatpush.xpose.msra.mxu0 %v16160_v11  ;;  %9688 = vmatpush.xpose.msrb.mxu3 %v9687_v28  ;;  %v10065_v8 = vand.u32 4294901760, %v16256_v15  ;;  %v16269_v28 = vsub.f32 %v9521_v27, %v16258_v53  ;;  %v9518_v27 = vld [vmem:[#allocation11 + $0xb0] sm:$0xff] }
 0x9a0   :  { %9853 = vmatpush.xpose.msra.mxu2 %v17756_v14 }
 0x9a1   :  { %10056 = vmatpush.xpose.msra.mxu1 %v10055_v24  ;;  %v10066_v62 = vsub.f32 %v16256_v15, %v10065_v8  ;;  %v10071_v61 = vand.u32 4294901760, %v16269_v28  ;;  %v16323_v24 = vand.u32 4294901760, %v9518_v27 }
 0x9a3   :  { %9971 = vmatpush.xpose.msra.mxu0 %v16177_v9  ;;  %9694 = vmatpush.xpose.msrb.mxu3 %v9693_v40  ;;  %v10067_v30 = vand.u32 4294901760, %v10066_v62  ;;  %v17762_v40 = vand.u32 4294901760, %v16114_v6  ;;  %v17763_v6 = vand.u32 4294901760, %v16133_v33  ;;  %v17764_v33 = vand.u32 4294901760, %v16138_v59 }
 0x9a4   :  { %9857 = vmatpush.xpose.msra.mxu2 %v17757_v50  ;;  %v9516_v50 = vld [vmem:[#allocation11 + $0xa0] sm:$0xff]  ;;  %v17765_v59 = vand.u32 4294901760, %v16151_v20  ;;  %v17766_v20 = vand.u32 4294901760, %v16169_v43  ;;  %v17767_v43 = vand.u32 4294901760, %v16186_v45  ;;  %v17768_v45 = vand.u32 4294901760, %v16204_v58 }
 0x9a7   :  { %9920 = vmatpush.xpose.msra.mxu3 %v15990_v34  ;;  %9973 = vmatpush.xpose.msra.mxu0 %v16190_v4  ;;  %v10061_v34 = vand.u32 4294901760, %v10060_v2  ;;  %v16330_v2 = vsub.f32 %v9518_v27, %v16323_v24 }
 0x9a8   :  { %9861 = vmatpush.xpose.msra.mxu2 %v17758_v16 }
 0x9a9   :  { %10062 = vmatpush.xpose.msra.mxu1 %v10061_v34  ;;  %v9517_v34 = vld [vmem:[#allocation11 + $0xa8] sm:$0xff]  ;;  %v10089_v14 = vand.u32 4294901760, %v16330_v2 }
 0x9ab   :  { %9922 = vmatpush.xpose.msra.mxu3 %v16001_v32  ;;  %9975 = vmatpush.xpose.msra.mxu0 %v16214_v7  ;;  %v10072_v32 = vsub.f32 %v16269_v28, %v10071_v61 }
 0x9ad   :  { %10068 = vmatpush.xpose.msra.mxu1 %v10067_v30  ;;  %v10073_v54 = vand.u32 4294901760, %v10072_v32  ;;  %v16336_v30 = vand.u32 4294901760, %v9517_v34 }
 0x9af   :  { %9924 = vmatpush.xpose.msra.mxu3 %v16003_v55  ;;  %9977 = vmatpush.xpose.msra.mxu0 %v16230_v17  ;;  %v17759_v55 = vand.u32 4294901760, %v16066_v21  ;;  %v17761_v21 = vand.u32 4294901760, %v16101_v42  ;;  %v16343_v32 = vsub.f32 %v9517_v34, %v16336_v30 }
 0x9b1   :  { %10074 = vmatpush.xpose.msra.mxu1 %v10073_v54  ;;  %9865 = vmatpush.xpose.msra.mxu2 %v17759_v55  ;;  %v10095_v16 = vand.u32 4294901760, %v16343_v32  ;;  %v16349_v55 = vand.u32 4294901760, %v9516_v50 }
 0x9b3   :  { %9926 = vmatpush.xpose.msra.mxu3 %v16005_v5  ;;  %9979 = vmatpush.xpose.msra.mxu0 %v16245_v57  ;;  %v17760_v5 = vand.u32 4294901760, %v16084_v52 }
 0x9b5   :  { %9869 = vmatpush.xpose.msra.mxu2 %v17760_v5  ;;  %v9515_v5 = vld [vmem:[#allocation11 + $0x98] sm:$0xff] }
 0x9b7   :  { %9928 = vmatpush.xpose.msra.mxu3 %v16019_v22  ;;  %9981 = vmatpush.xpose.msra.mxu0 %v16258_v53  ;;  %v16305_v22 = vsub.f32 %v9520_v1, %v16300_v41  ;;  %v16356_v1 = vsub.f32 %v9516_v50, %v16349_v55 }
 0x9b9   :  { %9873 = vmatpush.xpose.msra.mxu2 %v17761_v21  ;;  %v10077_v18 = vand.u32 4294901760, %v16305_v22  ;;  %v17419_v21 = vand.u32 4294901760, %v16356_v1 }
 0x9bb   :  { %9930 = vmatpush.xpose.msra.mxu3 %v16032_v44  ;;  %9983 = vmatpush.xpose.msra.mxu0 %v16300_v41  ;;  %v16310_v44 = vand.u32 4294901760, %v9519_v23  ;;  %v10078_v52 = vsub.f32 %v16305_v22, %v10077_v18 }
 0x9bd   :  { %9877 = vmatpush.xpose.msra.mxu2 %v17762_v40  ;;  %v10079_v42 = vand.u32 4294901760, %v10078_v52  ;;  %v16362_v52 = vand.u32 4294901760, %v9515_v5  ;;  %v9514_v40 = vld [vmem:[#allocation11 + $0x90] sm:$0xff] }
 0x9be   :  { %v16375_v34 = vand.u32 4294901760, %v9514_v40 }
 0x9bf   :  { %9932 = vmatpush.xpose.msra.mxu3 %v16048_v10  ;;  %9985 = vmatpush.xpose.msra.mxu0 %v16310_v44  ;;  %v16318_v10 = vsub.f32 %v9519_v23, %v16310_v44  ;;  %v16369_v27 = vsub.f32 %v9515_v5, %v16362_v52 }
 0x9c0   :  { %10080 = vmatpush.xpose.msra.mxu1 %v10079_v42 }
 0x9c1   :  { %v10083_v51 = vand.u32 4294901760, %v16318_v10  ;;  %9881 = vmatpush.xpose.msra.mxu2 %v17763_v6  ;;  %v16382_v6 = vsub.f32 %v9514_v40, %v16375_v34 }
 0x9c3   :  { %9934 = vmatpush.xpose.msra.mxu3 %v16073_v48  ;;  %v10084_v48 = vsub.f32 %v16318_v10, %v10083_v51  ;;  %9987 = vmatpush.xpose.msra.mxu0 %v16323_v24  ;;  %v17416_v50 = vand.u32 4294901760, %v16382_v6 }
 0x9c5   :  { %v10085_v62 = vand.u32 4294901760, %v10084_v48  ;;  %9885 = vmatpush.xpose.msra.mxu2 %v17764_v33  ;;  %v17418_v48 = vand.u32 4294901760, %v16369_v27 }
 0x9c7   :  { %9936 = vmatpush.xpose.msra.mxu3 %v16086_v38  ;;  %10086 = vmatpush.xpose.msra.mxu1 %v10085_v62  ;;  %v10090_v38 = vsub.f32 %v16330_v2, %v10089_v14  ;;  %v9513_v62 = vld [vmem:[#allocation11 + $0x88] sm:$0xff] }
 0x9c8   :  { %9989 = vmatpush.xpose.msra.mxu0 %v16336_v30  ;;  %v16388_v33 = vand.u32 4294901760, %v9513_v62 }
 0x9c9   :  { %v10091_v54 = vand.u32 4294901760, %v10090_v38  ;;  %9889 = vmatpush.xpose.msra.mxu2 %v17765_v59 }
 0x9cb   :  { %9938 = vmatpush.xpose.msra.mxu3 %v16103_v49  ;;  %10092 = vmatpush.xpose.msra.mxu1 %v10091_v54  ;;  %v10096_v49 = vsub.f32 %v16343_v32, %v10095_v16  ;;  %v16395_v54 = vsub.f32 %v9513_v62, %v16388_v33 }
 0x9cc   :  { %9991 = vmatpush.xpose.msra.mxu0 %v16349_v55 }
 0x9cd   :  { %v10097_v23 = vand.u32 4294901760, %v10096_v49  ;;  %9893 = vmatpush.xpose.msra.mxu2 %v17766_v20  ;;  %v9512_v49 = vld [vmem:[#allocation11 + $0x80] sm:$0xff]  ;;  %v17415_v59 = vand.u32 4294901760, %v16395_v54 }
 0x9cf   :  { %9940 = vmatpush.xpose.msra.mxu3 %v16116_v31  ;;  %10098 = vmatpush.xpose.msra.mxu1 %v10097_v23  ;;  %v10102_v31 = vsub.f32 %v16356_v1, %v17419_v21  ;;  %v16401_v23 = vand.u32 4294901760, %v9512_v49  ;;  %v10120_v40 = vsub.f32 %v16395_v54, %v17415_v59 }
 0x9d0   :  { %9993 = vmatpush.xpose.msra.mxu0 %v16362_v52 }
 0x9d1   :  { %v10103_v42 = vand.u32 4294901760, %v10102_v31  ;;  %9897 = vmatpush.xpose.msra.mxu2 %v17767_v43  ;;  %v16409_v20 = vsub.f32 %v9512_v49, %v16401_v23 }
 0x9d3   :  { %9942 = vmatpush.xpose.msra.mxu3 %v16125_v37  ;;  %10104 = vmatpush.xpose.msra.mxu1 %v10103_v42  ;;  %v10108_v37 = vsub.f32 %v16369_v27, %v17418_v48  ;;  %v10121_v42 = vand.u32 4294901760, %v10120_v40 }
 0x9d4   :  { %9995 = vmatpush.xpose.msra.mxu0 %v16375_v34 }
 0x9d5   :  { %v10109_v38 = vand.u32 4294901760, %v10108_v37  ;;  %9901 = vmatpush.xpose.msra.mxu2 %v17768_v45  ;;  %v17417_v37 = vand.u32 4294901760, %v16409_v20 }
 0x9d7   :  { %9944 = vmatpush.xpose.msra.mxu3 %v16140_v60  ;;  %10110 = vmatpush.xpose.msra.mxu1 %v10109_v38  ;;  %v10114_v60 = vsub.f32 %v16382_v6, %v17416_v50 }
 0x9d8   :  { %9997 = vmatpush.xpose.msra.mxu0 %v16388_v33 }
 0x9d9   :  { %v10115_v5 = vand.u32 4294901760, %v10114_v60 }
 0x9db   :  { %9946 = vmatpush.xpose.msra.mxu3 %v16157_v39  ;;  %10116 = vmatpush.xpose.msra.mxu1 %v10115_v5 }
 0x9dc   :  { %9999 = vmatpush.xpose.msra.mxu0 %v16401_v23 }
 0x9df   :  { %9948 = vmatpush.xpose.msra.mxu3 %v16171_v63  ;;  %10122 = vmatpush.xpose.msra.mxu1 %v10121_v42  ;;  %v10126_v63 = vsub.f32 %v16409_v20, %v17417_v37 }
 0x9e1   :  { %v10127_v62 = vand.u32 4294901760, %v10126_v63 }
 0x9e3   :  { %9950 = vmatpush.xpose.msra.mxu3 %v16188_v3  ;;  %10128 = vmatpush.xpose.msra.mxu1 %v10127_v62  ;;  %v16422_v62 = vld [vmem:[%s17306_s5] ss:$0 sm:$0xff] }
 0x9e4   :  { %v9423_v39 = vpop.xlane.xlu0 %9422 }
 0x9e5   :  { %v9430_v31 = vmul.f32 %v9423_v39, %v15992_v0 }
 0x9e7   :  { %v9434_v58 = vadd.f32 1e-12, %v9430_v31 }
 0x9e9   :  { %11658 = vrsqrt.f32 %v9434_v58  ;;  %vm9444_vm1 = vweird.f32 %v9434_v58 }
 0x9ec   :  { %v9425_v43 = vpop.xlane.xlu1 %9424 }
 0x9ed   :  { %v9431_v38 = vmul.f32 %v9425_v43, %v15992_v0 }
 0x9ef   :  { %v11659_v60 = vpop.eup %11658  ;;  %v9435_v49 = vadd.f32 1e-12, %v9431_v38 }
 0x9f0   :  { %v9439_v45 = vmul.f32 %v11659_v60, %v9434_v58  ;;  %vm9445_vm15 = vweird.f32 %v11659_v60 }
 0x9f1   :  { %11660 = vrsqrt.f32 %v9435_v49  ;;  %vm9446_vm2 = vmor %vm9444_vm1, %vm9445_vm15  ;;  %vm9454_vm4 = vweird.f32 %v9435_v49 }
 0x9f2   :  { %v9440_v5 = vmul.f32 %v11659_v60, %v9439_v45  ;;  %v16427_v45 = vld [vmem:[%s17307_s6] ss:$0 sm:$0xff] }
 0x9f4   :  { %v9441_v39 = vmul.f32 0.5, %v9440_v5  ;;  %v9427_v31 = vpop.xlane.xlu2 %9426 }
 0x9f5   :  { %v9432_v40 = vmul.f32 %v9427_v31, %v15992_v0 }
 0x9f6   :  { %v9442_v3 = vsub.f32 1.5, %v9441_v39 }
 0x9f7   :  { %v11661_v42 = vpop.eup %11660  ;;  %v9436_v59 = vadd.f32 1e-12, %v9432_v40 }
 0x9f8   :  { %v9443_v50 = vmul.f32 %v11659_v60, %v9442_v3  ;;  %v9449_v63 = vmul.f32 %v11661_v42, %v9435_v49  ;;  %vm9455_vm3 = vweird.f32 %v11661_v42 }
 0x9f9   :  { %11662 = vrsqrt.f32 %v9436_v59  ;;  %vm9456_vm5 = vmor %vm9454_vm4, %vm9455_vm3  ;;  %vm9464_vm7 = vweird.f32 %v9436_v59 }
 0x9fa   :  { %v9447_v43 = vsel %vm9446_vm2, %v11659_v60, %v9443_v50  ;;  %v9450_v38 = vmul.f32 %v11661_v42, %v9449_v63 }
 0x9fb   :  { %v9478_v5 = vmul.f32 %v9447_v43, %v16022_v46 }
 0x9fc   :  { %v9451_v39 = vmul.f32 0.5, %v9450_v38  ;;  %v9429_v31 = vpop.xlane.xlu0 %9428 }
 0x9fd   :  { %v9485_v58 = vmul.f32 %v16422_v62, %v9478_v5  ;;  %v9433_v40 = vmul.f32 %v9429_v31, %v15992_v0  ;;  %v10487_v0 = vld [vmem:[#allocation13 + $0x68] sm:$0xff] }
 0x9fe   :  { %v9452_v3 = vsub.f32 1.5, %v9451_v39 }
 0x9ff   :  { %v11663_v37 = vpop.eup %11662  ;;  %v16433_v48 = vadd.f32 %v16427_v45, %v9485_v58  ;;  %v9437_v50 = vadd.f32 1e-12, %v9433_v40 }
 0xa00   :  { %v9453_v60 = vmul.f32 %v11661_v42, %v9452_v3  ;;  %v9459_v63 = vmul.f32 %v11663_v37, %v9436_v59  ;;  %vm9465_vm6 = vweird.f32 %v11663_v37 }
 0xa01   :  { %17769 = vst [vmem:[#allocation43_spill] sm:$0xff] %v16433_v48  ;;  %v16436_v21 = vand.u32 4294901760, %v16433_v48  ;;  %11664 = vrsqrt.f32 %v9437_v50  ;;  %vm9466_vm8 = vmor %vm9464_vm7, %vm9465_vm6  ;;  %vm9474_vm10 = vweird.f32 %v9437_v50 }
 0xa02   :  { %v9457_v46 = vsel %vm9456_vm5, %v11661_v42, %v9453_v60  ;;  %v9460_v43 = vmul.f32 %v11663_v37, %v9459_v63 }
 0xa03   :  { %v9479_v38 = vmul.f32 %v9457_v46, %v16059_v47  ;;  %9696 = vmatmul.f32.vlgmr.msrb.gmra.mxu3 %v16436_v21  ;;  %v16442_v5 = vsub.f32 %v16433_v48, %v16436_v21  ;;  %v17770_v47 = vand.u32 4294901760, %v16175_v56  ;;  %v10483_v48 = vld [vmem:[#allocation13 + $0x48] sm:$0xff] }
 0xa04   :  { %v9461_v39 = vmul.f32 0.5, %v9460_v43  ;;  %10216 = vmatpush.xpose.msrb.mxu3 %v16160_v11 }
 0xa05   :  { %v9486_v49 = vmul.f32 %v16422_v62, %v9479_v38  ;;  %9762 = vmatmul.f32.vlgmr.msrb.gmra.mxu0 %v16442_v5  ;;  %v16448_v31 = vand.u32 4294901760, %v16442_v5 }
 0xa06   :  { %v9462_v42 = vsub.f32 1.5, %v9461_v39  ;;  %10275 = vmatpush.xpose.msrb.mxu0 %v17770_v47 }
 0xa07   :  { %v11665_v58 = vpop.eup %11664  ;;  %v16453_v40 = vadd.f32 %v16427_v45, %v9486_v49  ;;  %9816 = vmatmul.f32.vlgmr.msrb.gmra.mxu1 %v16448_v31  ;;  %v9569_v3 = vsub.f32 %v16442_v5, %v16448_v31  ;;  %v17772_v49 = vand.u32 4294901760, %v16195_v13 }
 0xa08   :  { %v9463_v60 = vmul.f32 %v11663_v37, %v9462_v42  ;;  %v9469_v63 = vmul.f32 %v11665_v58, %v9437_v50  ;;  %10218 = vmatpush.xpose.msrb.mxu3 %v16177_v9  ;;  %10354 = vmatpush.xpose.msrb.mxu1 %v16160_v11  ;;  %vm9475_vm9 = vweird.f32 %v11665_v58 }
 0xa09   :  { %17771 = vst [vmem:[#allocation76_spill] sm:$0xff] %v16453_v40  ;;  %v16461_v46 = vand.u32 4294901760, %v16453_v40  ;;  %v16463_v43 = vand.u32 4294901760, %v9569_v3  ;;  %v17773_v3 = vand.u32 4294901760, %v16207_v12  ;;  %vm9476_vm11 = vmor %vm9474_vm10, %vm9475_vm9 }
 0xa0a   :  { %v9467_v38 = vsel %vm9466_vm8, %v11663_v37, %v9463_v60  ;;  %v9470_v39 = vmul.f32 %v11665_v58, %v9469_v63  ;;  %10279 = vmatpush.xpose.msrb.mxu0 %v17772_v49 }
 0xa0b   :  { %v9480_v47 = vmul.f32 %v9467_v38, %v16089_v35  ;;  %9571 = vmatmul.f32.vlgmr.msrb.gmra.mxu2 %v16463_v43  ;;  %9700 = vmatmul.f32.gmra.mxu3 %v16461_v46  ;;  %v16472_v11 = vsub.f32 %v16453_v40, %v16461_v46 }
 0xa0c   :  { %v9471_v59 = vmul.f32 0.5, %v9470_v39  ;;  %10148 = vmatpush.xpose.msrb.mxu2 %v16175_v56  ;;  %10220 = vmatpush.xpose.msrb.mxu3 %v16190_v4 }
 0xa0d   :  { %v9487_v37 = vmul.f32 %v16422_v62, %v9480_v47  ;;  %10356 = vmatpush.xpose.msrb.mxu1 %v16177_v9  ;;  %9767 = vmatmul.f32.gmra.mxu0 %v16472_v11  ;;  %v16480_v35 = vand.u32 4294901760, %v16472_v11 }
 0xa0e   :  { %v9472_v42 = vsub.f32 1.5, %v9471_v59  ;;  %10283 = vmatpush.xpose.msrb.mxu0 %v17773_v3 }
 0xa0f   :  { %v16485_v60 = vadd.f32 %v16427_v45, %v9487_v37  ;;  %9822 = vmatmul.f32.gmra.mxu1 %v16480_v35  ;;  %v9577_v56 = vsub.f32 %v16472_v11, %v16480_v35 }
 0xa10   :  { %v9473_v63 = vmul.f32 %v11665_v58, %v9472_v42  ;;  %10151 = vmatpush.xpose.msrb.mxu2 %v16195_v13  ;;  %10222 = vmatpush.xpose.msrb.mxu3 %v16214_v7 }
 0xa11   :  { %17774 = vst [vmem:[#allocation39_spill] sm:$0xff] %v16485_v60  ;;  %v16493_v9 = vand.u32 4294901760, %v16485_v60  ;;  %10358 = vmatpush.xpose.msrb.mxu1 %v16190_v4  ;;  %v9578_v38 = vand.u32 4294901760, %v9577_v56 }
 0xa12   :  { %v9477_v39 = vsel %vm9476_vm11, %v11665_v58, %v9473_v63  ;;  %10287 = vmatpush.xpose.msrb.mxu0 %v10053_v36  ;;  %v10490_v63 = vld [vmem:[#allocation13 + $0x80] sm:$0xff] }
 0xa13   :  { %v9481_v49 = vmul.f32 %v9477_v39, %v16119_v25  ;;  %9579 = vmatmul.f32.gmra.mxu2 %v9578_v38  ;;  %9704 = vmatmul.f32.gmra.mxu3 %v16493_v9  ;;  %v16502_v13 = vsub.f32 %v16485_v60, %v16493_v9 }
 0xa14   :  { %10154 = vmatpush.xpose.msrb.mxu2 %v16207_v12  ;;  %10224 = vmatpush.xpose.msrb.mxu3 %v16230_v17 }
 0xa15   :  { %v9488_v4 = vmul.f32 %v16422_v62, %v9481_v49  ;;  %10360 = vmatpush.xpose.msrb.mxu1 %v16214_v7  ;;  %9772 = vmatmul.f32.gmra.mxu0 %v16502_v13  ;;  %v16510_v36 = vand.u32 4294901760, %v16502_v13 }
 0xa16   :  { %10291 = vmatpush.xpose.msrb.mxu0 %v10059_v29 }
 0xa17   :  { %v16515_v25 = vadd.f32 %v16427_v45, %v9488_v4  ;;  %9828 = vmatmul.f32.gmra.mxu1 %v16510_v36  ;;  %v9585_v12 = vsub.f32 %v16502_v13, %v16510_v36 }
 0xa18   :  { %10157 = vmatpush.xpose.msrb.mxu2 %v16228_v26  ;;  %10226 = vmatpush.xpose.msrb.mxu3 %v16245_v57 }
 0xa19   :  { %17775 = vst [vmem:[#allocation41_spill] sm:$0xff] %v16515_v25  ;;  %v16523_v7 = vand.u32 4294901760, %v16515_v25  ;;  %10362 = vmatpush.xpose.msrb.mxu1 %v16230_v17  ;;  %v9586_v62 = vand.u32 4294901760, %v9585_v12 }
 0xa1a   :  { %10295 = vmatpush.xpose.msrb.mxu0 %v10065_v8 }
 0xa1b   :  { %9587 = vmatmul.f32.gmra.mxu2 %v9586_v62  ;;  %9708 = vmatmul.f32.gmra.mxu3 %v16523_v7  ;;  %v16531_v29 = vsub.f32 %v16515_v25, %v16523_v7 }
 0xa1c   :  { %10160 = vmatpush.xpose.msrb.mxu2 %v16243_v19  ;;  %10228 = vmatpush.xpose.msrb.mxu3 %v16258_v53 }
 0xa1d   :  { %10364 = vmatpush.xpose.msrb.mxu1 %v16245_v57  ;;  %9777 = vmatmul.f32.gmra.mxu0 %v16531_v29  ;;  %v16538_v26 = vand.u32 4294901760, %v16531_v29  ;;  %v10502_v57 = vld [vmem:[#allocation13 + $0xe0] sm:$0xff] }
 0xa1e   :  { %10299 = vmatpush.xpose.msrb.mxu0 %v10071_v61  ;;  %v16581_v61 = vand.u32 4294901760, %v10502_v57 }
 0xa1f   :  { %9834 = vmatmul.f32.gmra.mxu1 %v16538_v26  ;;  %v9593_v17 = vsub.f32 %v16531_v29, %v16538_v26 }
 0xa20   :  { %10163 = vmatpush.xpose.msrb.mxu2 %v16256_v15  ;;  %10230 = vmatpush.xpose.msrb.mxu3 %v16300_v41 }
 0xa21   :  { %10366 = vmatpush.xpose.msrb.mxu1 %v16258_v53  ;;  %v9594_v19 = vand.u32 4294901760, %v9593_v17  ;;  %v10504_v53 = vld [vmem:[#allocation13 + $0xf0] sm:$0xff] }
 0xa22   :  { %10303 = vmatpush.xpose.msrb.mxu0 %v10077_v18  ;;  %v16568_v15 = vand.u32 4294901760, %v10504_v53  ;;  %v17777_v18 = vand.u32 4294901760, %v16369_v27 }
 0xa23   :  { %9595 = vmatmul.f32.gmra.mxu2 %v9594_v19  ;;  %9952 = vmatmul.f32.vlgmr.msra.gmra.mxu3 %v16436_v21 }
 0xa24   :  { %10166 = vmatpush.xpose.msrb.mxu2 %v16269_v28  ;;  %10232 = vmatpush.xpose.msrb.mxu3 %v16310_v44  ;;  %v16577_v8 = vsub.f32 %v10504_v53, %v16568_v15  ;;  %v17776_v28 = vand.u32 4294901760, %v16356_v1 }
 0xa25   :  { %10368 = vmatpush.xpose.msrb.mxu1 %v16300_v41  ;;  %10005 = vmatmul.f32.vlgmr.msra.gmra.mxu0 %v16463_v43  ;;  %v10500_v41 = vld [vmem:[#allocation13 + $0xd0] sm:$0xff]  ;;  %v17780_v43 = vand.u32 4294901760, %v16409_v20 }
 0xa26   :  { %10307 = vmatpush.xpose.msrb.mxu0 %v10083_v51  ;;  %v10498_v51 = vld [vmem:[#allocation13 + $0xc0] sm:$0xff] }
 0xa27   :  { %10130 = vmatmul.f32.vlgmr.msra.gmra.mxu1 %v16436_v21 }
 0xa28   :  { %10169 = vmatpush.xpose.msrb.mxu2 %v16305_v22  ;;  %10234 = vmatpush.xpose.msrb.mxu3 %v16323_v24  ;;  %v10577_v22 = vand.u32 4294901760, %v16577_v8 }
 0xa29   :  { %10370 = vmatpush.xpose.msrb.mxu1 %v16310_v44  ;;  %v16592_v44 = vsub.f32 %v10502_v57, %v16581_v61 }
 0xa2a   :  { %10311 = vmatpush.xpose.msrb.mxu0 %v10089_v14  ;;  %v17778_v14 = vand.u32 4294901760, %v16382_v6 }
 0xa2b   :  { %9903 = vmatmul.f32.vlgmr.msra.gmra.mxu2 %v16436_v21  ;;  %9956 = vmatmul.f32.gmra.mxu3 %v16461_v46 }
 0xa2c   :  { %10172 = vmatpush.xpose.msrb.mxu2 %v16318_v10  ;;  %10236 = vmatpush.xpose.msrb.mxu3 %v16336_v30  ;;  %v16594_v10 = vand.u32 4294901760, %v10500_v41 }
 0xa2d   :  { %10372 = vmatpush.xpose.msrb.mxu1 %v16323_v24  ;;  %10013 = vmatmul.f32.gmra.mxu0 %v9578_v38  ;;  %v10578_v24 = vsub.f32 %v16577_v8, %v10577_v22 }
 0xa2e   :  { %10315 = vmatpush.xpose.msrb.mxu0 %v10095_v16  ;;  %v10496_v16 = vld [vmem:[#allocation13 + $0xb0] sm:$0xff] }
 0xa2f   :  { %10134 = vmatmul.f32.gmra.mxu1 %v16461_v46 }
 0xa30   :  { %10175 = vmatpush.xpose.msrb.mxu2 %v16330_v2  ;;  %10238 = vmatpush.xpose.msrb.mxu3 %v16349_v55  ;;  %v16603_v2 = vand.u32 4294901760, %v10498_v51 }
 0xa31   :  { %10374 = vmatpush.xpose.msrb.mxu1 %v16336_v30  ;;  %v10583_v30 = vand.u32 4294901760, %v16592_v44 }
 0xa32   :  { %10319 = vmatpush.xpose.msrb.mxu0 %v17776_v28 }
 0xa33   :  { %9907 = vmatmul.f32.gmra.mxu2 %v16461_v46  ;;  %9960 = vmatmul.f32.gmra.mxu3 %v16493_v9  ;;  %v10584_v45 = vsub.f32 %v16592_v44, %v10583_v30 }
 0xa34   :  { %10178 = vmatpush.xpose.msrb.mxu2 %v16343_v32  ;;  %10240 = vmatpush.xpose.msrb.mxu3 %v16362_v52  ;;  %v16609_v32 = vsub.f32 %v10500_v41, %v16594_v10 }
 0xa35   :  { %10376 = vmatpush.xpose.msrb.mxu1 %v16349_v55  ;;  %10021 = vmatmul.f32.gmra.mxu0 %v9586_v62  ;;  %v10579_v55 = vand.u32 4294901760, %v10578_v24  ;;  %v10585_v47 = vand.u32 4294901760, %v10584_v45 }
 0xa36   :  { %10323 = vmatpush.xpose.msrb.mxu0 %v17777_v18  ;;  %v10589_v50 = vand.u32 4294901760, %v16609_v32 }
 0xa37   :  { %10138 = vmatmul.f32.gmra.mxu1 %v16493_v9 }
 0xa38   :  { %10181 = vmatpush.xpose.msrb.mxu2 %v16356_v1  ;;  %10242 = vmatpush.xpose.msrb.mxu3 %v16375_v34  ;;  %v16617_v1 = vsub.f32 %v10498_v51, %v16603_v2  ;;  %v10590_v59 = vsub.f32 %v16609_v32, %v10589_v50 }
 0xa39   :  { %10378 = vmatpush.xpose.msrb.mxu1 %v16362_v52  ;;  %v17779_v52 = vand.u32 4294901760, %v16395_v54 }
 0xa3a   :  { %10327 = vmatpush.xpose.msrb.mxu0 %v17778_v14  ;;  %v17436_v58 = vand.u32 4294901760, %v16617_v1  ;;  %v10591_v3 = vand.u32 4294901760, %v10590_v59  ;;  %v10482_v14 = vld [vmem:[#allocation13 + $0x40] sm:$0xff] }
 0xa3b   :  { %9911 = vmatmul.f32.gmra.mxu2 %v16493_v9  ;;  %9964 = vmatmul.f32.gmra.mxu3 %v16523_v7 }
 0xa3c   :  { %10184 = vmatpush.xpose.msrb.mxu2 %v16369_v27  ;;  %10244 = vmatpush.xpose.msrb.mxu3 %v16388_v33  ;;  %v16625_v27 = vand.u32 4294901760, %v10496_v16  ;;  %v10596_v42 = vsub.f32 %v16617_v1, %v17436_v58 }
 0xa3d   :  { %10380 = vmatpush.xpose.msrb.mxu1 %v16375_v34  ;;  %10029 = vmatmul.f32.gmra.mxu0 %v9594_v19  ;;  %v10494_v34 = vld [vmem:[#allocation13 + $0xa0] sm:$0xff] }
 0xa3e   :  { %10331 = vmatpush.xpose.msrb.mxu0 %v17779_v52  ;;  %v16638_v37 = vsub.f32 %v10496_v16, %v16625_v27  ;;  %v16717_v16 = vand.u32 4294901760, %v10482_v14 }
 0xa3f   :  { %10142 = vmatmul.f32.gmra.mxu1 %v16523_v7 }
 0xa40   :  { %10187 = vmatpush.xpose.msrb.mxu2 %v16382_v6  ;;  %10246 = vmatpush.xpose.msrb.mxu3 %v16401_v23  ;;  %v16640_v6 = vand.u32 4294901760, %v10494_v34  ;;  %v17434_v56 = vand.u32 4294901760, %v16638_v37 }
 0xa41   :  { %10382 = vmatpush.xpose.msrb.mxu1 %v16388_v33  ;;  %v10492_v33 = vld [vmem:[#allocation13 + $0x90] sm:$0xff] }
 0xa42   :  { %10335 = vmatpush.xpose.msrb.mxu0 %v17780_v43  ;;  %v10602_v38 = vsub.f32 %v16638_v37, %v17434_v56  ;;  %v16733_v43 = vsub.f32 %v10482_v14, %v16717_v16  ;;  %v10491_v56 = vld [vmem:[#allocation13 + $0x88] sm:$0xff] }
 0xa43   :  { %9915 = vmatmul.f32.gmra.mxu2 %v16523_v7  ;;  %10250 = vmatmul.f32.vlgmr.msrb.gmra.mxu3 %v16448_v31  ;;  %v16654_v31 = vsub.f32 %v10494_v34, %v16640_v6 }
 0xa44   :  { %10580 = vmatpush.xpose.msra.mxu3 %v10579_v55  ;;  %10190 = vmatpush.xpose.msrb.mxu2 %v16395_v54  ;;  %v16656_v54 = vand.u32 4294901760, %v10492_v33  ;;  %v10603_v12 = vand.u32 4294901760, %v10602_v38 }
 0xa45   :  { %10384 = vmatpush.xpose.msrb.mxu1 %v16401_v23  ;;  %10337 = vmatmul.f32.vlgmr.msrb.gmra.mxu0 %v16436_v21  ;;  %v10597_v23 = vand.u32 4294901760, %v10596_v42  ;;  %v17433_v39 = vand.u32 4294901760, %v16654_v31  ;;  %v17424_v42 = vand.u32 4294901760, %v16733_v43 }
 0xa46   :  { %10690 = vmatpush.xpose.msra.mxu0 %v16577_v8  ;;  %v16668_v49 = vsub.f32 %v10492_v33, %v16656_v54  ;;  %v10478_v33 = vld [vmem:[#allocation13 + $0x20] sm:$0xff] }
 0xa47   :  { %v10608_v62 = vsub.f32 %v16654_v31, %v17433_v39  ;;  %v16753_v38 = vand.u32 4294901760, %v10478_v33 }
 0xa48   :  { %10586 = vmatpush.xpose.msra.mxu3 %v10585_v47  ;;  %10386 = vmatmul.f32.vlgmr.msrb.gmra.mxu1 %v16436_v21  ;;  %v16670_v21 = vand.u32 4294901760, %v10490_v63  ;;  %v17432_v17 = vand.u32 4294901760, %v16668_v49 }
 0xa49   :  { %10758 = vmatpush.xpose.msra.mxu1 %v16568_v15  ;;  %10193 = vmatpush.xpose.msrb.mxu2 %v16409_v20  ;;  %v10488_v20 = vld [vmem:[#allocation13 + $0x70] sm:$0xff]  ;;  %v10609_v53 = vand.u32 4294901760, %v10608_v62 }
 0xa4a   :  { %10693 = vmatpush.xpose.msra.mxu0 %v16592_v44  ;;  %v16676_v4 = vand.u32 4294901760, %v10488_v20  ;;  %v10614_v57 = vsub.f32 %v16668_v49, %v17432_v17  ;;  %v10489_v44 = vld [vmem:[#allocation13 + $0x78] sm:$0xff] }
 0xa4b   :  { %10256 = vmatmul.f32.gmra.mxu3 %v16480_v35  ;;  %v10486_v35 = vld [vmem:[#allocation13 + $0x60] sm:$0xff] }
 0xa4c   :  { %10592 = vmatpush.xpose.msra.mxu3 %v10591_v3  ;;  %10196 = vmatmul.f32.vlgmr.msrb.gmra.mxu2 %v16442_v5  ;;  %v16684_v5 = vsub.f32 %v10490_v63, %v16670_v21  ;;  %v16690_v19 = vsub.f32 %v10488_v20, %v16676_v4  ;;  %v16697_v41 = vand.u32 4294901760, %v10486_v35  ;;  %v10615_v51 = vand.u32 4294901760, %v10614_v57 }
 0xa4d   :  { %10511 = vmatpush.xpose.msra.mxu2 %v16568_v15  ;;  %10760 = vmatpush.xpose.msra.mxu1 %v16581_v61  ;;  %v10644_v20 = vsub.f32 %v16733_v43, %v17424_v42  ;;  %v10497_v42 = vld [vmem:[#allocation13 + $0xb8] sm:$0xff] }
 0xa4e   :  { %10341 = vmatmul.f32.gmra.mxu0 %v16461_v46  ;;  %v17430_v28 = vand.u32 4294901760, %v16684_v5  ;;  %v17429_v18 = vand.u32 4294901760, %v16690_v19 }
 0xa4f   :  { %10696 = vmatpush.xpose.msra.mxu0 %v16609_v32  ;;  %v10645_v57 = vand.u32 4294901760, %v10644_v20 }
 0xa50   :  { %10598 = vmatpush.xpose.msra.mxu3 %v10597_v23  ;;  %10390 = vmatmul.f32.gmra.mxu1 %v16461_v46  ;;  %v10484_v46 = vld [vmem:[#allocation13 + $0x50] sm:$0xff]  ;;  %v10620_v24 = vsub.f32 %v16684_v5, %v17430_v28  ;;  %v10626_v52 = vsub.f32 %v16690_v19, %v17429_v18 }
 0xa51   :  { %10513 = vmatpush.xpose.msra.mxu2 %v16581_v61  ;;  %10762 = vmatpush.xpose.msra.mxu1 %v16594_v10 }
 0xa52   :  { %v10621_v55 = vand.u32 4294901760, %v10620_v24  ;;  %v10627_v47 = vand.u32 4294901760, %v10626_v52 }
 0xa53   :  { %10262 = vmatmul.f32.gmra.mxu3 %v16510_v36  ;;  %10699 = vmatpush.xpose.msra.mxu0 %v16617_v1  ;;  %v16712_v36 = vand.u32 4294901760, %v10484_v46 }
 0xa54   :  { %10604 = vmatpush.xpose.msra.mxu3 %v10603_v12  ;;  %10201 = vmatmul.f32.gmra.mxu2 %v16472_v11  ;;  %v16710_v11 = vsub.f32 %v10486_v35, %v16697_v41  ;;  %v16764_v35 = vsub.f32 %v10478_v33, %v16753_v38 }
 0xa55   :  { %10515 = vmatpush.xpose.msra.mxu2 %v16594_v10  ;;  %10764 = vmatpush.xpose.msra.mxu1 %v16603_v2  ;;  %v16725_v34 = vsub.f32 %v10484_v46, %v16712_v36 }
 0xa56   :  { %10345 = vmatmul.f32.gmra.mxu0 %v16493_v9  ;;  %v17427_v45 = vand.u32 4294901760, %v16710_v11 }
 0xa57   :  { %10702 = vmatpush.xpose.msra.mxu0 %v16638_v37 }
 0xa58   :  { %10610 = vmatpush.xpose.msra.mxu3 %v10609_v53  ;;  %10394 = vmatmul.f32.gmra.mxu1 %v16493_v9  ;;  %v10480_v9 = vld [vmem:[#allocation13 + $0x30] sm:$0xff] }
 0xa59   :  { %10517 = vmatpush.xpose.msra.mxu2 %v16603_v2  ;;  %10766 = vmatpush.xpose.msra.mxu1 %v16625_v27  ;;  %v16740_v59 = vand.u32 4294901760, %v10480_v9 }
 0xa5b   :  { %10268 = vmatmul.f32.gmra.mxu3 %v16538_v26  ;;  %10705 = vmatpush.xpose.msra.mxu0 %v16654_v31  ;;  %v17426_v26 = vand.u32 4294901760, %v16725_v34  ;;  %v16751_v23 = vsub.f32 %v10480_v9, %v16740_v59 }
 0xa5c   :  { %10616 = vmatpush.xpose.msra.mxu3 %v10615_v51  ;;  %10206 = vmatmul.f32.gmra.mxu2 %v16502_v13  ;;  %v10632_v13 = vsub.f32 %v16710_v11, %v17427_v45  ;;  %v17421_v51 = vand.u32 4294901760, %v16764_v35 }
 0xa5d   :  { %10519 = vmatpush.xpose.msra.mxu2 %v16625_v27  ;;  %10768 = vmatpush.xpose.msra.mxu1 %v16640_v6  ;;  %v10638_v63 = vsub.f32 %v16725_v34, %v17426_v26  ;;  %v17423_v62 = vand.u32 4294901760, %v16751_v23  ;;  %v16839_v26 = vand.u32 4294901760, %v10497_v42 }
 0xa5e   :  { %10349 = vmatmul.f32.gmra.mxu0 %v16523_v7  ;;  %v10633_v3 = vand.u32 4294901760, %v10632_v13  ;;  %v10656_v9 = vsub.f32 %v16764_v35, %v17421_v51  ;;  %v10499_v51 = vld [vmem:[#allocation13 + $0xc8] sm:$0xff] }
 0xa5f   :  { %10708 = vmatpush.xpose.msra.mxu0 %v16668_v49  ;;  %v10639_v12 = vand.u32 4294901760, %v10638_v63  ;;  %v10650_v46 = vsub.f32 %v16751_v23, %v17423_v62 }
 0xa60   :  { %10622 = vmatpush.xpose.msra.mxu3 %v10621_v55  ;;  %10398 = vmatmul.f32.gmra.mxu1 %v16523_v7  ;;  %v10476_v7 = vld [vmem:[#allocation13 + $0x10] sm:$0xff]  ;;  %v10505_v55 = vld [vmem:[#allocation13 + $0xf8] sm:$0xff]  ;;  %v10657_v63 = vand.u32 4294901760, %v10656_v9 }
 0xa61   :  { %10521 = vmatpush.xpose.msra.mxu2 %v16640_v6  ;;  %10770 = vmatpush.xpose.msra.mxu1 %v16656_v54  ;;  %v16766_v53 = vand.u32 4294901760, %v10476_v7  ;;  %v10651_v52 = vand.u32 4294901760, %v10650_v46  ;;  %v16790_v33 = vand.u32 4294901760, %v10505_v55 }
 0xa63   :  { %10711 = vmatpush.xpose.msra.mxu0 %v16684_v5  ;;  %v16776_v24 = vsub.f32 %v10476_v7, %v16766_v53 }
 0xa64   :  { %10628 = vmatpush.xpose.msra.mxu3 %v10627_v47  ;;  %10211 = vmatmul.f32.gmra.mxu2 %v16531_v29  ;;  %v10474_v29 = vld [vmem:[#allocation13] sm:$0xff] }
 0xa65   :  { %10523 = vmatpush.xpose.msra.mxu2 %v16656_v54  ;;  %10772 = vmatpush.xpose.msra.mxu1 %v16670_v21  ;;  %v16778_v14 = vand.u32 4294901760, %v10474_v29  ;;  %v17420_v47 = vand.u32 4294901760, %v16776_v24 }
 0xa67   :  { %10714 = vmatpush.xpose.msra.mxu0 %v16690_v19  ;;  %v16788_v13 = vsub.f32 %v10474_v29, %v16778_v14  ;;  %v10662_v7 = vsub.f32 %v16776_v24, %v17420_v47 }
 0xa68   :  { %10634 = vmatpush.xpose.msra.mxu3 %v10633_v3  ;;  %v10503_v3 = vld [vmem:[#allocation13 + $0xe8] sm:$0xff] }
 0xa69   :  { %10525 = vmatpush.xpose.msra.mxu2 %v16670_v21  ;;  %10774 = vmatpush.xpose.msra.mxu1 %v16676_v4  ;;  %v17422_v20 = vand.u32 4294901760, %v16788_v13  ;;  %v16802_v29 = vand.u32 4294901760, %v10503_v3  ;;  %v10663_v46 = vand.u32 4294901760, %v10662_v7 }
 0xa6b   :  { %10717 = vmatpush.xpose.msra.mxu0 %v16710_v11  ;;  %v16814_v47 = vsub.f32 %v10503_v3, %v16802_v29  ;;  %v16826_v3 = vand.u32 4294901760, %v10499_v51 }
 0xa6c   :  { %10640 = vmatpush.xpose.msra.mxu3 %v10639_v12  ;;  %v16800_v12 = vsub.f32 %v10505_v55, %v16790_v33 }
 0xa6d   :  { %10527 = vmatpush.xpose.msra.mxu2 %v16676_v4  ;;  %10776 = vmatpush.xpose.msra.mxu1 %v16697_v41  ;;  %v17428_v62 = vand.u32 4294901760, %v16814_v47 }
 0xa6e   :  { %v17425_v55 = vand.u32 4294901760, %v16800_v12 }
 0xa6f   :  { %10720 = vmatpush.xpose.msra.mxu0 %v16725_v34 }
 0xa70   :  { %10646 = vmatpush.xpose.msra.mxu3 %v10645_v57  ;;  %v10501_v57 = vld [vmem:[#allocation13 + $0xd8] sm:$0xff] }
 0xa71   :  { %10529 = vmatpush.xpose.msra.mxu2 %v16697_v41  ;;  %10778 = vmatpush.xpose.msra.mxu1 %v16712_v36  ;;  %v16810_v9 = vand.u32 4294901760, %v10501_v57 }
 0xa73   :  { %10723 = vmatpush.xpose.msra.mxu0 %v16733_v43  ;;  %v16820_v7 = vsub.f32 %v10501_v57, %v16810_v9 }
 0xa74   :  { %10652 = vmatpush.xpose.msra.mxu3 %v10651_v52  ;;  %v10668_v52 = vsub.f32 %v16788_v13, %v17422_v20  ;;  %v11012_v20 = vsub.f32 %v16800_v12, %v17425_v55  ;;  %v16837_v55 = vsub.f32 %v10499_v51, %v16826_v3 }
 0xa75   :  { %10531 = vmatpush.xpose.msra.mxu2 %v16712_v36  ;;  %10780 = vmatpush.xpose.msra.mxu1 %v16717_v16 }
 0xa76   :  { %v11013_v57 = vand.u32 4294901760, %v11012_v20  ;;  %v17435_v20 = vand.u32 4294901760, %v16837_v55 }
 0xa77   :  { %10726 = vmatpush.xpose.msra.mxu0 %v16751_v23 }
 0xa78   :  { %10658 = vmatpush.xpose.msra.mxu3 %v10657_v63  ;;  %v10669_v63 = vand.u32 4294901760, %v10668_v52  ;;  %v11018_v52 = vsub.f32 %v16814_v47, %v17428_v62  ;;  %v16852_v62 = vsub.f32 %v10497_v42, %v16839_v26  ;;  %v11030_v42 = vsub.f32 %v16837_v55, %v17435_v20 }
 0xa79   :  { %10533 = vmatpush.xpose.msra.mxu2 %v16717_v16  ;;  %10782 = vmatpush.xpose.msra.mxu1 %v16740_v59 }
 0xa7a   :  { %v11019_v51 = vand.u32 4294901760, %v11018_v52 }
 0xa7b   :  { %10729 = vmatpush.xpose.msra.mxu0 %v16764_v35 }
 0xa7c   :  { %10664 = vmatpush.xpose.msra.mxu3 %v10663_v46  ;;  %v17431_v46 = vand.u32 4294901760, %v16820_v7 }
 0xa7d   :  { %10535 = vmatpush.xpose.msra.mxu2 %v16740_v59  ;;  %10784 = vmatpush.xpose.msra.mxu1 %v16753_v38 }
 0xa7f   :  { %10732 = vmatpush.xpose.msra.mxu0 %v16776_v24 }
 0xa80   :  { %10670 = vmatpush.xpose.msra.mxu3 %v10669_v63  ;;  %v10495_v63 = vld [vmem:[#allocation13 + $0xa8] sm:$0xff] }
 0xa81   :  { %10537 = vmatpush.xpose.msra.mxu2 %v16753_v38  ;;  %10786 = vmatpush.xpose.msra.mxu1 %v16766_v53  ;;  %v16854_v18 = vand.u32 4294901760, %v10495_v63 }
 0xa82   :  { %v16843_v45 = vpop.f32.mrf.mxu0 }
 0xa83   :  { %17781 = vst [vmem:[#allocation47_spill] sm:$0xff] %v16854_v18  ;;  %10735 = vmatpush.xpose.msra.mxu0 %v16788_v13  ;;  %v16871_v52 = vsub.f32 %v10495_v63, %v16854_v18 }
 0xa84   :  { %10896 = vmatpush.xpose.msrb.mxu3 %v16568_v15  ;;  %v11024_v15 = vsub.f32 %v16820_v7, %v17431_v46  ;;  %v16856_v28 = vpop.f32.mrf.mxu1  ;;  %v10493_v46 = vld [vmem:[#allocation13 + $0x98] sm:$0xff] }
 0xa85   :  { %10539 = vmatpush.xpose.msra.mxu2 %v16766_v53  ;;  %10788 = vmatpush.xpose.msra.mxu1 %v16778_v14  ;;  %17782 = vst [vmem:[#allocation66_spill] sm:$0xff] %v16871_v52  ;;  %v16873_v39 = vand.u32 4294901760, %v10493_v46 }
 0xa86   :  { %v16861_v17 = vpop.f32.mrf.mxu3 }
 0xa87   :  { %10945 = vmatpush.xpose.msrb.mxu0 %v16790_v33  ;;  %17783 = vst [vmem:[#allocation68_spill] sm:$0xff] %v16873_v39 }
 0xa88   :  { %10898 = vmatpush.xpose.msrb.mxu3 %v16581_v61  ;;  %v11025_v61 = vand.u32 4294901760, %v11024_v15  ;;  %v17440_v15 = vand.u32 4294901760, %v16871_v52 }
 0xa89   :  { %11014 = vmatpush.xpose.msrb.mxu1 %v11013_v57  ;;  %10541 = vmatpush.xpose.msra.mxu2 %v16778_v14  ;;  %v17437_v57 = vand.u32 4294901760, %v16852_v62 }
 0xa8a   :  { %v16876_v8 = vpop.f32.mrf.mxu0 }
 0xa8b   :  { %10947 = vmatpush.xpose.msrb.mxu0 %v16802_v29  ;;  %v11036_v63 = vsub.f32 %v16852_v62, %v17437_v57  ;;  %v16905_v57 = vand.u32 4294901760, %v10489_v44 }
 0xa8c   :  { %10900 = vmatpush.xpose.msrb.mxu3 %v16594_v10  ;;  %v11031_v10 = vand.u32 4294901760, %v11030_v42  ;;  %v16890_v20 = vpop.f32.mrf.mxu1 }
 0xa8d   :  { %10817 = vmatpush.xpose.msrb.mxu2 %v10577_v22  ;;  %11020 = vmatpush.xpose.msrb.mxu1 %v11019_v51  ;;  %v16880_v22 = vand.u32 4294901760, %v10491_v56  ;;  %v16888_v51 = vsub.f32 %v10493_v46, %v16873_v39  ;;  %v11042_v46 = vsub.f32 %v16871_v52, %v17440_v15  ;;  %v16920_v15 = vand.u32 4294901760, %v10487_v0 }
 0xa8e   :  { %v16893_v58 = vpop.f32.mrf.mxu3 }
 0xa8f   :  { %17784 = vst [vmem:[#allocation72_spill] sm:$0xff] %v16880_v22  ;;  %10949 = vmatpush.xpose.msrb.mxu0 %v16810_v9  ;;  %v17442_v42 = vand.u32 4294901760, %v16888_v51  ;;  %v16935_v60 = vsub.f32 %v10487_v0, %v16920_v15 }
 0xa90   :  { %10902 = vmatpush.xpose.msrb.mxu3 %v16603_v2  ;;  %17785 = vst [vmem:[#allocation73_spill] sm:$0xff] %v16888_v51  ;;  %v16898_v2 = vsub.f32 %v10491_v56, %v16880_v22  ;;  %v11043_v56 = vand.u32 4294901760, %v11042_v46 }
 0xa91   :  { %10821 = vmatpush.xpose.msrb.mxu2 %v10583_v30  ;;  %11026 = vmatpush.xpose.msrb.mxu1 %v11025_v61  ;;  %v9572_v30 = vpop.f32.mrf.mxu2  ;;  %v11037_v61 = vand.u32 4294901760, %v11036_v63  ;;  %v16918_v63 = vsub.f32 %v10489_v44, %v16905_v57  ;;  %17791 = vst [vmem:[#allocation53_spill] sm:$0xff] %v16935_v60 }
 0xa92   :  { %17786 = vst [vmem:[#allocation38_spill] sm:$0xff] %v16898_v2  ;;  %v16908_v32 = vpop.f32.mrf.mxu0 }
 0xa93   :  { %10951 = vmatpush.xpose.msrb.mxu0 %v16826_v3  ;;  %17788 = vst [vmem:[#allocation55_spill] sm:$0xff] %v16918_v63 }
 0xa94   :  { %10904 = vmatpush.xpose.msrb.mxu3 %v16625_v27  ;;  %v16922_v25 = vpop.f32.mrf.mxu1 }
 0xa95   :  { %10825 = vmatpush.xpose.msrb.mxu2 %v10589_v50  ;;  %11032 = vmatpush.xpose.msrb.mxu1 %v11031_v10  ;;  %v17787_v50 = vand.u32 4294901760, %v16617_v1  ;;  %v11048_v10 = vsub.f32 %v16888_v51, %v17442_v42  ;;  %v10485_v1 = vld [vmem:[#allocation13 + $0x58] sm:$0xff]  ;;  %v17450_v42 = vand.u32 4294901760, %v16918_v63 }
 0xa96   :  { %v16925_v27 = vpop.f32.mrf.mxu3  ;;  %v16937_v40 = vand.u32 4294901760, %v10485_v1 }
 0xa97   :  { %10953 = vmatpush.xpose.msrb.mxu0 %v16839_v26  ;;  %v11049_v44 = vand.u32 4294901760, %v11048_v10  ;;  %v11060_v0 = vsub.f32 %v16918_v63, %v17450_v42  ;;  %v17459_v10 = vand.u32 4294901760, %v16935_v60 }
 0xa98   :  { %10906 = vmatpush.xpose.msrb.mxu3 %v16640_v6  ;;  %v17789_v6 = vand.u32 4294901760, %v16638_v37  ;;  %v16943_v37 = vld [vmem:[%s17311_s10] sm:$0x3] }
 0xa99   :  { %10829 = vmatpush.xpose.msrb.mxu2 %v17787_v50  ;;  %11038 = vmatpush.xpose.msrb.mxu1 %v11037_v61  ;;  %v9580_v50 = vpop.f32.mrf.mxu2  ;;  %v17790_v61 = vand.u32 4294901760, %v16898_v2  ;;  %v11066_v63 = vsub.f32 %v16935_v60, %v17459_v10 }
 0xa9b   :  { %v11054_v46 = vsub.f32 %v16898_v2, %v17790_v61  ;;  %10955 = vmatpush.xpose.msrb.mxu0 %v16854_v18  ;;  %v16955_v61 = vsub.f32 %v10485_v1, %v16937_v40  ;;  %v16957_v2 = vand.u32 4294901760, %v10483_v48  ;;  %v11061_v1 = vand.u32 4294901760, %v11060_v0 }
 0xa9c   :  { %10908 = vmatpush.xpose.msrb.mxu3 %v16656_v54  ;;  %v17792_v54 = vand.u32 4294901760, %v16654_v31  ;;  %v16959_v51 = vpop.f32.mrf.mxu1  ;;  %v16962_v31 = vperm.slane %v16943_v37, 0  ;;  %v11067_v0 = vand.u32 4294901760, %v11066_v63 }
 0xa9d   :  { %10833 = vmatpush.xpose.msrb.mxu2 %v17789_v6  ;;  %11044 = vmatpush.xpose.msrb.mxu1 %v11043_v56  ;;  %v16945_v6 = vpop.f32.mrf.mxu0  ;;  %v11055_v56 = vand.u32 4294901760, %v11054_v46  ;;  %17793 = vst [vmem:[#allocation40_spill] sm:$0xff] %v16955_v61  ;;  %v16979_v52 = vsub.f32 %v10483_v48, %v16957_v2 }
 0xa9e   :  { %v9573_v18 = vadd.f32 %v9572_v30, %v16962_v31 }
 0xa9f   :  { %10957 = vmatpush.xpose.msrb.mxu0 %v16873_v39  ;;  %v17464_v39 = vand.u32 4294901760, %v16955_v61  ;;  %v17467_v30 = vand.u32 4294901760, %v16979_v52 }
 0xaa0   :  { %10910 = vmatpush.xpose.msrb.mxu3 %v16670_v21  ;;  %v10481_v21 = vld [vmem:[#allocation13 + $0x38] sm:$0xff] }
 0xaa1   :  { %10837 = vmatpush.xpose.msrb.mxu2 %v17792_v54  ;;  %11050 = vmatpush.xpose.msrb.mxu1 %v11049_v44  ;;  %v16965_v46 = vpop.f32.mrf.mxu2  ;;  %v16967_v44 = vpop.f32.mrf.mxu3  ;;  %v17794_v54 = vand.u32 4294901760, %v16668_v49  ;;  %v16971_v42 = vand.u32 4294901760, %v10481_v21  ;;  %v10479_v49 = vld [vmem:[#allocation13 + $0x28] sm:$0xff]  ;;  %v11072_v48 = vsub.f32 %v16955_v61, %v17464_v39  ;;  %v9581_v61 = vadd.f32 %v9580_v50, %v16962_v31 }
 0xaa2   :  { %v16995_v10 = vand.u32 4294901760, %v10479_v49 }
 0xaa3   :  { %10959 = vmatpush.xpose.msrb.mxu0 %v16880_v22 }
 0xaa4   :  { %10912 = vmatpush.xpose.msrb.mxu3 %v16676_v4  ;;  %v16986_v4 = vsub.f32 %v10481_v21, %v16971_v42  ;;  %v10477_v21 = vld [vmem:[#allocation13 + $0x18] sm:$0xff] }
 0xaa5   :  { %10841 = vmatpush.xpose.msrb.mxu2 %v17794_v54  ;;  %11056 = vmatpush.xpose.msrb.mxu1 %v11055_v56  ;;  %v17795_v54 = vand.u32 4294901760, %v16684_v5  ;;  %v16988_v56 = vpop.f32.mrf.mxu0  ;;  %v9698_v5 = vadd.f32 %v16861_v17, %v9573_v18  ;;  %v11078_v17 = vsub.f32 %v16979_v52, %v17467_v30  ;;  %v17009_v18 = vsub.f32 %v10479_v49, %v16995_v10 }
 0xaa6   :  { %v17468_v63 = vand.u32 4294901760, %v16986_v4  ;;  %v17011_v39 = vand.u32 4294901760, %v10477_v21 }
 0xaa7   :  { %10961 = vmatpush.xpose.msrb.mxu0 %v16905_v57  ;;  %v11079_v49 = vand.u32 4294901760, %v11078_v17 }
 0xaa8   :  { %10914 = vmatpush.xpose.msrb.mxu3 %v16697_v41  ;;  %v17796_v41 = vand.u32 4294901760, %v16690_v19  ;;  %v9764_v19 = vadd.f32 %v16843_v45, %v9698_v5  ;;  %v17024_v50 = vsub.f32 %v10477_v21, %v17011_v39  ;;  %v9702_v5 = vadd.f32 %v16893_v58, %v9581_v61 }
 0xaa9   :  { %10845 = vmatpush.xpose.msrb.mxu2 %v17795_v54  ;;  %11062 = vmatpush.xpose.msrb.mxu1 %v11061_v1  ;;  %v16998_v54 = vpop.f32.mrf.mxu1  ;;  %v9596_v60 = vpop.f32.mrf.mxu2  ;;  %v11073_v1 = vand.u32 4294901760, %v11072_v48  ;;  %v11089_v48 = vand.u32 4294901760, %v17009_v18 }
 0xaaa   :  { %v9953_v22 = vpop.f32.mrf.mxu3  ;;  %v11095_v61 = vand.u32 4294901760, %v17024_v50 }
 0xaab   :  { %10963 = vmatpush.xpose.msrb.mxu0 %v16920_v15  ;;  %v11090_v58 = vsub.f32 %v17009_v18, %v11089_v48 }
 0xaac   :  { %10916 = vmatpush.xpose.msrb.mxu3 %v16712_v36  ;;  %v17797_v36 = vand.u32 4294901760, %v16710_v11  ;;  %v9818_v11 = vadd.f32 %v16856_v28, %v9764_v19 }
 0xaad   :  { %10849 = vmatpush.xpose.msrb.mxu2 %v17796_v41  ;;  %11068 = vmatpush.xpose.msrb.mxu1 %v11067_v0  ;;  %v10475_v41 = vld [vmem:[#allocation13 + $0x8] sm:$0xff]  ;;  %v11084_v0 = vsub.f32 %v16986_v4, %v17468_v63  ;;  %v17029_v30 = vpop.f32.mrf.mxu0 }
 0xaae   :  { %v17026_v45 = vand.u32 4294901760, %v10475_v41 }
 0xaaf   :  { %10965 = vmatpush.xpose.msrb.mxu0 %v16937_v40 }
 0xab0   :  { %10918 = vmatpush.xpose.msrb.mxu3 %v16717_v16  ;;  %v17798_v16 = vand.u32 4294901760, %v16725_v34  ;;  %v17041_v28 = vsub.f32 %v10475_v41, %v17026_v45  ;;  %v9589_v34 = vadd.f32 %v16965_v46, %v16962_v31  ;;  %v11096_v41 = vsub.f32 %v17024_v50, %v11095_v61 }
 0xab1   :  { %10853 = vmatpush.xpose.msrb.mxu2 %v17797_v36  ;;  %11074 = vmatpush.xpose.msrb.mxu1 %v11073_v1  ;;  %v9904_v36 = vpop.f32.mrf.mxu2  ;;  %v11085_v1 = vand.u32 4294901760, %v11084_v0  ;;  %v17043_v21 = vpop.f32.mrf.mxu1  ;;  %v9769_v0 = vadd.f32 %v16876_v8, %v9702_v5 }
 0xab2   :  { %v9957_v63 = vpop.f32.mrf.mxu3  ;;  %v9905_v17 = vadd.f32 %v9904_v36, %v9818_v11  ;;  %v11091_v11 = vand.u32 4294901760, %v11090_v58  ;;  %v11101_v36 = vand.u32 4294901760, %v17041_v28 }
 0xab3   :  { %10967 = vmatpush.xpose.msrb.mxu0 %v16957_v2  ;;  %v9824_v8 = vadd.f32 %v16890_v20, %v9769_v0  ;;  %v9597_v20 = vadd.f32 %v9596_v60, %v16962_v31 }
 0xab4   :  { %10920 = vmatpush.xpose.msrb.mxu3 %v16740_v59  ;;  %v9954_v19 = vadd.f32 %v9953_v22, %v9905_v17  ;;  %v17799_v59 = vand.u32 4294901760, %v16733_v43  ;;  %v9706_v22 = vadd.f32 %v16925_v27, %v9589_v34  ;;  %v11097_v17 = vand.u32 4294901760, %v11096_v41 }
 0xab5   :  { %10857 = vmatpush.xpose.msrb.mxu2 %v17798_v16  ;;  %11080 = vmatpush.xpose.msrb.mxu1 %v11079_v49  ;;  %v17800_v16 = vand.u32 4294901760, %v16751_v23  ;;  %v11102_v27 = vsub.f32 %v17041_v28, %v11101_v36  ;;  %v17065_v58 = vpop.f32.mrf.mxu0 }
 0xab6   :  { %v10410_v49 = vmul.f32 0.044715, %v9954_v19 }
 0xab7   :  { %10969 = vmatpush.xpose.msrb.mxu0 %v16971_v42  ;;  %v11103_v41 = vand.u32 4294901760, %v11102_v27 }
 0xab8   :  { %10922 = vmatpush.xpose.msrb.mxu3 %v16753_v38  ;;  %v10418_v46 = vmul.f32 %v10410_v49, %v9954_v19 }
 0xab9   :  { %10861 = vmatpush.xpose.msrb.mxu2 %v17799_v59  ;;  %11086 = vmatpush.xpose.msrb.mxu1 %v11085_v1  ;;  %v9908_v43 = vpop.f32.mrf.mxu2  ;;  %v9774_v59 = vadd.f32 %v16908_v32, %v9706_v22  ;;  %v17070_v23 = vpop.f32.mrf.mxu1 }
 0xaba   :  { %v9961_v5 = vpop.f32.mrf.mxu3  ;;  %v10426_v38 = vmul.f32 %v10418_v46, %v9954_v19  ;;  %v9909_v1 = vadd.f32 %v9908_v43, %v9824_v8  ;;  %v9710_v46 = vadd.f32 %v16967_v44, %v9597_v20 }
 0xabb   :  { %10971 = vmatpush.xpose.msrb.mxu0 %v16995_v10  ;;  %v9830_v31 = vadd.f32 %v16922_v25, %v9774_v59  ;;  %v17803_v25 = vand.u32 4294901760, %v16788_v13 }
 0xabc   :  { %10924 = vmatpush.xpose.msrb.mxu3 %v16766_v53  ;;  %v10434_v34 = vadd.f32 %v10426_v38, %v9954_v19  ;;  %v9958_v0 = vadd.f32 %v9957_v63, %v9909_v1  ;;  %v17801_v53 = vand.u32 4294901760, %v16764_v35  ;;  %v17802_v63 = vand.u32 4294901760, %v16776_v24 }
 0xabd   :  { %10865 = vmatpush.xpose.msrb.mxu2 %v17800_v16  ;;  %11092 = vmatpush.xpose.msrb.mxu1 %v11091_v11  ;;  %v17084_v44 = vpop.f32.mrf.mxu0 }
 0xabe   :  { %v10442_v49 = vmul.f32 0.7978846, %v10434_v34  ;;  %v10412_v11 = vmul.f32 0.044715, %v9958_v0 }
 0xabf   :  { %10973 = vmatpush.xpose.msrb.mxu0 %v17011_v39 }
 0xac0   :  { %10926 = vmatpush.xpose.msrb.mxu3 %v16778_v14  ;;  %11666 = vtanh.f32 %v10442_v49  ;;  %v10420_v60 = vmul.f32 %v10412_v11, %v9958_v0  ;;  %v9779_v14 = vadd.f32 %v16945_v6, %v9710_v46 }
 0xac1   :  { %10869 = vmatpush.xpose.msrb.mxu2 %v17801_v53  ;;  %11098 = vmatpush.xpose.msrb.mxu1 %v11097_v17  ;;  %v9912_v32 = vpop.f32.mrf.mxu2  ;;  %v10402_v17 = vmul.f32 0.5, %v9954_v19  ;;  %v17089_v27 = vpop.f32.mrf.mxu1 }
 0xac2   :  { %v10428_v35 = vmul.f32 %v10420_v60, %v9958_v0  ;;  %v9913_v22 = vadd.f32 %v9912_v32, %v9830_v31  ;;  %v9965_v8 = vpop.f32.mrf.mxu3  ;;  %v9836_v34 = vadd.f32 %v16959_v51, %v9779_v14 }
 0xac3   :  { %10975 = vmatpush.xpose.msrb.mxu0 %v17026_v45 }
 0xac4   :  { %v17080_v43 = vadd.f32 %v9961_v5, %v9913_v22  ;;  %v10436_v16 = vadd.f32 %v10428_v35, %v9958_v0  ;;  %v17092_v5 = vperm.slane %v16943_v37, 1  ;;  %v10404_v22 = vmul.f32 0.5, %v9958_v0 }
 0xac5   :  { %10873 = vmatpush.xpose.msrb.mxu2 %v17802_v63  ;;  %11104 = vmatpush.xpose.msrb.mxu1 %v11103_v41  ;;  %v10338_v63 = vpop.f32.mrf.mxu0 }
 0xac6   :  { %v11667_v38 = vpop.eup %11666  ;;  %v10414_v24 = vmul.f32 0.044715, %v17080_v43  ;;  %v10444_v1 = vmul.f32 0.7978846, %v10436_v16  ;;  %v10007_v19 = vadd.f32 %v16988_v56, %v17092_v5  ;;  %v17804_v16 = vand.u32 4294901760, %v16800_v12 }
 0xac7   :  { %v10458_v20 = vadd.f32 1.0, %v11667_v38 }
 0xac8   :  { %v10422_v6 = vmul.f32 %v10414_v24, %v17080_v43  ;;  %11668 = vtanh.f32 %v10444_v1 }
 0xac9   :  { %10877 = vmatpush.xpose.msrb.mxu2 %v17803_v25  ;;  %v9916_v59 = vpop.f32.mrf.mxu2  ;;  %v10466_v53 = vmul.f32 %v10458_v20, %v10402_v17  ;;  %v10387_v25 = vpop.f32.mrf.mxu1 }
 0xaca   :  { %v10430_v13 = vmul.f32 %v10422_v6, %v17080_v43  ;;  %v9917_v49 = vadd.f32 %v9916_v59, %v9836_v34  ;;  %v10251_v46 = vpop.f32.mrf.mxu3  ;;  %v10015_v6 = vadd.f32 %v17029_v30, %v17092_v5  ;;  %v17805_v59 = vand.u32 4294901760, %v16814_v47 }
 0xacb   :  { %v17097_v11 = vand.u32 4294901760, %v10466_v53 }
 0xacc   :  { %v17101_v41 = vadd.f32 %v9965_v8, %v9917_v49  ;;  %v10438_v37 = vadd.f32 %v10430_v13, %v17080_v43  ;;  %v10132_v8 = vadd.f32 %v16998_v54, %v10007_v19 }
 0xacd   :  { %10672 = vmatmul.f32.vlgmr.msra.gmra.mxu3 %v17097_v11  ;;  %v10543_v51 = vsub.f32 %v10466_v53, %v17097_v11 }
 0xace   :  { %v11669_v60 = vpop.eup %11668  ;;  %v10416_v31 = vmul.f32 0.044715, %v17101_v41  ;;  %11192 = vmatpush.xpose.msra.mxu3 %v16790_v33  ;;  %v10446_v32 = vmul.f32 0.7978846, %v10438_v37 }
 0xacf   :  { %10738 = vmatmul.f32.vlgmr.msra.gmra.mxu0 %v10543_v51  ;;  %v10544_v35 = vand.u32 4294901760, %v10543_v51  ;;  %v10460_v56 = vadd.f32 1.0, %v11669_v60  ;;  %v10136_v60 = vadd.f32 %v17043_v21, %v10015_v6 }
 0xad0   :  { %v10424_v14 = vmul.f32 %v10416_v31, %v17101_v41  ;;  %11251 = vmatpush.xpose.msra.mxu0 %v17804_v16  ;;  %11670 = vtanh.f32 %v10446_v32  ;;  %v17806_v32 = vand.u32 4294901760, %v16820_v7 }
 0xad1   :  { %v10197_v38 = vpop.f32.mrf.mxu2  ;;  %10792 = vmatmul.f32.vlgmr.msra.gmra.mxu1 %v10544_v35  ;;  %v10545_v24 = vsub.f32 %v10543_v51, %v10544_v35  ;;  %v10468_v1 = vmul.f32 %v10460_v56, %v10404_v22 }
 0xad2   :  { %v10432_v17 = vmul.f32 %v10424_v14, %v17101_v41  ;;  %v10198_v20 = vadd.f32 %v10197_v38, %v10132_v8  ;;  %11194 = vmatpush.xpose.msra.mxu3 %v16802_v29  ;;  %11330 = vmatpush.xpose.msra.mxu1 %v16790_v33  ;;  %v10257_v37 = vpop.f32.mrf.mxu3  ;;  %v10023_v14 = vadd.f32 %v17065_v58, %v17092_v5  ;;  %v17807_v38 = vand.u32 4294901760, %v16837_v55 }
 0xad3   :  { %v10546_v0 = vand.u32 4294901760, %v10545_v24  ;;  %v17115_v54 = vand.u32 4294901760, %v10468_v1 }
 0xad4   :  { %v10252_v34 = vadd.f32 %v10251_v46, %v10198_v20  ;;  %11255 = vmatpush.xpose.msra.mxu0 %v17805_v59  ;;  %v10440_v53 = vadd.f32 %v10432_v17, %v17101_v41  ;;  %v10406_v46 = vmul.f32 0.5, %v17080_v43  ;;  %v10391_v43 = vpop.f32.mrf.mxu1  ;;  %v10408_v17 = vmul.f32 0.5, %v17101_v41  ;;  %v17809_v41 = vld [vmem:[#allocation47_spill] sm:$0xff] }
 0xad5   :  { %10547 = vmatmul.f32.vlgmr.msra.gmra.mxu2 %v10546_v0  ;;  %10676 = vmatmul.f32.gmra.mxu3 %v17115_v54  ;;  %v10551_v13 = vsub.f32 %v10468_v1, %v17115_v54  ;;  %v10140_v0 = vadd.f32 %v17070_v23, %v10023_v14 }
 0xad6   :  { %v11671_v49 = vpop.eup %11670  ;;  %v10339_v19 = vadd.f32 %v10338_v63, %v10252_v34  ;;  %11124 = vmatpush.xpose.msra.mxu2 %v16800_v12  ;;  %11196 = vmatpush.xpose.msra.mxu3 %v16810_v9  ;;  %v10448_v33 = vmul.f32 0.7978846, %v10440_v53  ;;  %v10342_v12 = vpop.f32.mrf.mxu0  ;;  %v17808_v34 = vand.u32 4294901760, %v16852_v62 }
 0xad7   :  { %11332 = vmatpush.xpose.msra.mxu1 %v16802_v29  ;;  %10743 = vmatmul.f32.gmra.mxu0 %v10551_v13  ;;  %v10552_v30 = vand.u32 4294901760, %v10551_v13  ;;  %v10462_v51 = vadd.f32 1.0, %v11671_v49 }
 0xad8   :  { %v17129_v31 = vadd.f32 %v10387_v25, %v10339_v19  ;;  %11259 = vmatpush.xpose.msra.mxu0 %v17806_v32  ;;  %11672 = vtanh.f32 %v10448_v33 }
 0xad9   :  { %v10202_v63 = vpop.f32.mrf.mxu2  ;;  %10798 = vmatmul.f32.gmra.mxu1 %v10552_v30  ;;  %v10553_v35 = vsub.f32 %v10551_v13, %v10552_v30  ;;  %v10470_v22 = vmul.f32 %v10462_v51, %v10406_v46  ;;  %v10031_v46 = vadd.f32 %v17084_v44, %v17092_v5 }
 0xada   :  { %v10411_v29 = vmul.f32 0.044715, %v17129_v31  ;;  %v10203_v56 = vadd.f32 %v10202_v63, %v10136_v60  ;;  %11127 = vmatpush.xpose.msra.mxu2 %v16814_v47  ;;  %11198 = vmatpush.xpose.msra.mxu3 %v16826_v3  ;;  %v10263_v53 = vpop.f32.mrf.mxu3  ;;  %v17810_v60 = vld [vmem:[#allocation66_spill] sm:$0xff] }
 0xadb   :  { %11334 = vmatpush.xpose.msra.mxu1 %v16810_v9  ;;  %v10554_v21 = vand.u32 4294901760, %v10553_v35  ;;  %v17137_v8 = vand.u32 4294901760, %v10470_v22  ;;  %v17811_v32 = vand.u32 4294901760, %v17810_v60  ;;  %v17812_v35 = vld [vmem:[#allocation68_spill] sm:$0xff] }
 0xadc   :  { %v10419_v16 = vmul.f32 %v10411_v29, %v17129_v31  ;;  %v10258_v25 = vadd.f32 %v10257_v37, %v10203_v56  ;;  %11263 = vmatpush.xpose.msra.mxu0 %v17807_v38  ;;  %v17813_v56 = vld [vmem:[#allocation73_spill] sm:$0xff] }
 0xadd   :  { %10555 = vmatmul.f32.gmra.mxu2 %v10554_v21  ;;  %10680 = vmatmul.f32.gmra.mxu3 %v17137_v8  ;;  %v10559_v47 = vsub.f32 %v10470_v22, %v17137_v8  ;;  %v10144_v22 = vadd.f32 %v17089_v27, %v10031_v46 }
 0xade   :  { %v11673_v24 = vpop.eup %11672  ;;  %v10427_v9 = vmul.f32 %v10419_v16, %v17129_v31  ;;  %v10343_v1 = vadd.f32 %v10342_v12, %v10258_v25  ;;  %11130 = vmatpush.xpose.msra.mxu2 %v16820_v7  ;;  %11200 = vmatpush.xpose.msra.mxu3 %v16839_v26  ;;  %v10346_v33 = vpop.f32.mrf.mxu0 }
 0xadf   :  { %11336 = vmatpush.xpose.msra.mxu1 %v16826_v3  ;;  %10748 = vmatmul.f32.gmra.mxu0 %v10559_v47  ;;  %v10560_v58 = vand.u32 4294901760, %v10559_v47  ;;  %v10464_v20 = vadd.f32 1.0, %v11673_v24 }
 0xae0   :  { %v17152_v6 = vadd.f32 %v10391_v43, %v10343_v1  ;;  %11267 = vmatpush.xpose.msra.mxu0 %v17808_v34  ;;  %v10435_v59 = vadd.f32 %v10427_v9, %v17129_v31  ;;  %v17814_v43 = vand.u32 4294901760, %v17813_v56  ;;  %v10403_v1 = vmul.f32 0.5, %v17129_v31 }
 0xae1   :  { %v10207_v7 = vpop.f32.mrf.mxu2  ;;  %10804 = vmatmul.f32.gmra.mxu1 %v10560_v58  ;;  %v10561_v13 = vsub.f32 %v10559_v47, %v10560_v58  ;;  %v10472_v49 = vmul.f32 %v10464_v20, %v10408_v17  ;;  %v17815_v47 = vld [vmem:[#allocation72_spill] sm:$0xff]  ;;  %v17816_v20 = vld [vmem:[#allocation38_spill] sm:$0xff] }
 0xae2   :  { %v10413_v3 = vmul.f32 0.044715, %v17152_v6  ;;  %v10208_v19 = vadd.f32 %v10207_v7, %v10140_v0  ;;  %11133 = vmatpush.xpose.msra.mxu2 %v16837_v55  ;;  %11202 = vmatpush.xpose.msra.mxu3 %v17809_v41  ;;  %v10443_v23 = vmul.f32 0.7978846, %v10435_v59  ;;  %v10395_v55 = vpop.f32.mrf.mxu1  ;;  %v10269_v27 = vpop.f32.mrf.mxu3  ;;  %v17817_v0 = vand.u32 4294901760, %v17816_v20 }
 0xae3   :  { %11338 = vmatpush.xpose.msra.mxu1 %v16839_v26  ;;  %v10562_v37 = vand.u32 4294901760, %v10561_v13  ;;  %v17161_v30 = vand.u32 4294901760, %v10472_v49 }
 0xae4   :  { %v10264_v51 = vadd.f32 %v10263_v53, %v10208_v19  ;;  %11271 = vmatpush.xpose.msra.mxu0 %v17811_v32  ;;  %11674 = vtanh.f32 %v10443_v23  ;;  %v10421_v12 = vmul.f32 %v10413_v3, %v17152_v6  ;;  %v17818_v19 = vld [vmem:[#allocation55_spill] sm:$0xff]  ;;  %v10405_v32 = vmul.f32 0.5, %v17152_v6 }
 0xae5   :  { %10563 = vmatmul.f32.gmra.mxu2 %v10562_v37  ;;  %10684 = vmatmul.f32.gmra.mxu3 %v17161_v30  ;;  %v10567_v63 = vsub.f32 %v10472_v49, %v17161_v30 }
 0xae6   :  { %v10347_v26 = vadd.f32 %v10346_v33, %v10264_v51  ;;  %11136 = vmatpush.xpose.msra.mxu2 %v16852_v62  ;;  %11204 = vmatpush.xpose.msra.mxu3 %v17812_v35  ;;  %v10429_v44 = vmul.f32 %v10421_v12, %v17152_v6  ;;  %v10350_v59 = vpop.f32.mrf.mxu0 }
 0xae7   :  { %11340 = vmatpush.xpose.msra.mxu1 %v17809_v41  ;;  %10753 = vmatmul.f32.gmra.mxu0 %v10567_v63  ;;  %v10568_v5 = vand.u32 4294901760, %v10567_v63  ;;  %v17819_v41 = vand.u32 4294901760, %v17818_v19 }
 0xae8   :  { %v17175_v29 = vadd.f32 %v10395_v55, %v10347_v26  ;;  %11275 = vmatpush.xpose.msra.mxu0 %v17814_v43  ;;  %v10437_v21 = vadd.f32 %v10429_v44, %v17152_v6  ;;  %v17820_v55 = vld [vmem:[#allocation53_spill] sm:$0xff] }
 0xae9   :  { %v10212_v14 = vpop.f32.mrf.mxu2  ;;  %10810 = vmatmul.f32.gmra.mxu1 %v10568_v5  ;;  %v10569_v62 = vsub.f32 %v10567_v63, %v10568_v5  ;;  %v17821_v63 = vand.u32 4294901760, %v17820_v55 }
 0xaea   :  { %v11675_v16 = vpop.eup %11674  ;;  %v10415_v25 = vmul.f32 0.044715, %v17175_v29  ;;  %v10213_v38 = vadd.f32 %v10212_v14, %v10144_v22  ;;  %11139 = vmatpush.xpose.msra.mxu2 %v17810_v60  ;;  %11206 = vmatpush.xpose.msra.mxu3 %v17815_v47  ;;  %v10445_v24 = vmul.f32 0.7978846, %v10437_v21  ;;  %v10399_v13 = vpop.f32.mrf.mxu1  ;;  %v17822_v22 = vld [vmem:[#allocation40_spill] sm:$0xff] }
 0xaeb   :  { %11342 = vmatpush.xpose.msra.mxu1 %v17812_v35  ;;  %v10570_v9 = vand.u32 4294901760, %v10569_v62  ;;  %v10459_v58 = vadd.f32 1.0, %v11675_v16  ;;  %v10407_v62 = vmul.f32 0.5, %v17175_v29 }
 0xaec   :  { %v10270_v17 = vadd.f32 %v10269_v27, %v10213_v38  ;;  %11279 = vmatpush.xpose.msra.mxu0 %v17817_v0  ;;  %11676 = vtanh.f32 %v10445_v24  ;;  %v10423_v34 = vmul.f32 %v10415_v25, %v17175_v29  ;;  %v17824_v25 = vand.u32 4294901760, %v16979_v52 }
 0xaed   :  { %10571 = vmatmul.f32.gmra.mxu2 %v10570_v9  ;;  %10928 = vmatmul.f32.vlgmr.msrb.gmra.mxu3 %v17097_v11  ;;  %v10467_v53 = vmul.f32 %v10459_v58, %v10403_v1 }
 0xaee   :  { %v10351_v7 = vadd.f32 %v10350_v59, %v10270_v17  ;;  %11142 = vmatpush.xpose.msra.mxu2 %v17813_v56  ;;  %11208 = vmatpush.xpose.msra.mxu3 %v16905_v57  ;;  %v10431_v31 = vmul.f32 %v10423_v34, %v17175_v29  ;;  %v17823_v56 = vand.u32 4294901760, %v17822_v22 }
 0xaef   :  { %11344 = vmatpush.xpose.msra.mxu1 %v17815_v47  ;;  %v17193_v49 = vand.u32 4294901760, %v10467_v53 }
 0xaf0   :  { %v10400_v3 = vadd.f32 %v10399_v13, %v10351_v7  ;;  %11283 = vmatpush.xpose.msra.mxu0 %v17819_v41  ;;  %v10439_v23 = vadd.f32 %v10431_v31, %v17175_v29  ;;  %v17825_v29 = vand.u32 4294901760, %v16986_v4 }
 0xaf1   :  { %v17199_v33 = vsub.f32 %v10467_v53, %v17193_v49  ;;  %11106 = vmatmul.f32.vlgmr.msrb.gmra.mxu1 %v17193_v49 }
 0xaf2   :  { %v11677_v37 = vpop.eup %11676  ;;  %v10417_v46 = vmul.f32 0.044715, %v10400_v3  ;;  %11145 = vmatpush.xpose.msra.mxu2 %v17816_v20  ;;  %11210 = vmatpush.xpose.msra.mxu3 %v16920_v15  ;;  %v10447_v51 = vmul.f32 0.7978846, %v10439_v23  ;;  %v10409_v1 = vmul.f32 0.5, %v10400_v3 }
 0xaf3   :  { %11346 = vmatpush.xpose.msra.mxu1 %v16905_v57  ;;  %v10978_v60 = vand.u32 4294901760, %v17199_v33  ;;  %v10461_v12 = vadd.f32 1.0, %v11677_v37 }
 0xaf4   :  { %11287 = vmatpush.xpose.msra.mxu0 %v17821_v63  ;;  %11678 = vtanh.f32 %v10447_v51  ;;  %v10425_v26 = vmul.f32 %v10417_v46, %v10400_v3 }
 0xaf5   :  { %10879 = vmatmul.f32.vlgmr.msrb.gmra.mxu2 %v17097_v11  ;;  %10932 = vmatmul.f32.gmra.mxu3 %v17115_v54  ;;  %v10979_v35 = vsub.f32 %v17199_v33, %v10978_v60  ;;  %v10469_v44 = vmul.f32 %v10461_v12, %v10405_v32 }
 0xaf6   :  { %11148 = vmatpush.xpose.msra.mxu2 %v17818_v19  ;;  %11212 = vmatpush.xpose.msra.mxu3 %v16937_v40  ;;  %v10433_v57 = vmul.f32 %v10425_v26, %v10400_v3 }
 0xaf7   :  { %11348 = vmatpush.xpose.msra.mxu1 %v16920_v15  ;;  %v10980_v6 = vand.u32 4294901760, %v10979_v35  ;;  %v17217_v5 = vand.u32 4294901760, %v10469_v44 }
 0xaf8   :  { %11291 = vmatpush.xpose.msra.mxu0 %v17823_v56  ;;  %v10441_v11 = vadd.f32 %v10433_v57, %v10400_v3 }
 0xaf9   :  { %10981 = vmatmul.f32.vlgmr.msrb.gmra.mxu0 %v10980_v6  ;;  %11110 = vmatmul.f32.gmra.mxu1 %v17217_v5  ;;  %v10985_v43 = vsub.f32 %v10469_v44, %v17217_v5 }
 0xafa   :  { %v11679_v21 = vpop.eup %11678  ;;  %11151 = vmatpush.xpose.msra.mxu2 %v17820_v55  ;;  %11214 = vmatpush.xpose.msra.mxu3 %v16957_v2  ;;  %v10449_v14 = vmul.f32 0.7978846, %v10441_v11 }
 0xafb   :  { %11350 = vmatpush.xpose.msra.mxu1 %v16937_v40  ;;  %v10986_v15 = vand.u32 4294901760, %v10985_v43  ;;  %v10463_v16 = vadd.f32 1.0, %v11679_v21 }
 0xafc   :  { %11295 = vmatpush.xpose.msra.mxu0 %v17824_v25  ;;  %11680 = vtanh.f32 %v10449_v14 }
 0xafd   :  { %10883 = vmatmul.f32.gmra.mxu2 %v17115_v54  ;;  %10936 = vmatmul.f32.gmra.mxu3 %v17137_v8  ;;  %v10987_v38 = vsub.f32 %v10985_v43, %v10986_v15  ;;  %v10471_v47 = vmul.f32 %v10463_v16, %v10407_v62 }
 0xafe   :  { %11154 = vmatpush.xpose.msra.mxu2 %v17822_v22  ;;  %11216 = vmatpush.xpose.msra.mxu3 %v16971_v42 }
 0xaff   :  { %11352 = vmatpush.xpose.msra.mxu1 %v16957_v2  ;;  %v10988_v40 = vand.u32 4294901760, %v10987_v38  ;;  %v10992_v24 = vand.u32 4294901760, %v10471_v47 }
 0xb00   :  { %11299 = vmatpush.xpose.msra.mxu0 %v17825_v29 }
 0xb01   :  { %10989 = vmatmul.f32.gmra.mxu0 %v10988_v40  ;;  %11114 = vmatmul.f32.gmra.mxu1 %v10992_v24  ;;  %v10993_v27 = vsub.f32 %v10471_v47, %v10992_v24 }
 0xb02   :  { %v11681_v9 = vpop.eup %11680  ;;  %11157 = vmatpush.xpose.msra.mxu2 %v16979_v52  ;;  %11218 = vmatpush.xpose.msra.mxu3 %v16995_v10 }
 0xb03   :  { %11354 = vmatpush.xpose.msra.mxu1 %v16971_v42  ;;  %v10994_v54 = vand.u32 4294901760, %v10993_v27  ;;  %v10465_v58 = vadd.f32 1.0, %v11681_v9 }
 0xb04   :  { %11303 = vmatpush.xpose.msra.mxu0 %v11089_v48 }
 0xb05   :  { %10887 = vmatmul.f32.gmra.mxu2 %v17137_v8  ;;  %10940 = vmatmul.f32.gmra.mxu3 %v17161_v30  ;;  %v10995_v2 = vsub.f32 %v10993_v27, %v10994_v54  ;;  %v10473_v17 = vmul.f32 %v10465_v58, %v10409_v1 }
 0xb06   :  { %11160 = vmatpush.xpose.msra.mxu2 %v16986_v4  ;;  %11220 = vmatpush.xpose.msra.mxu3 %v17011_v39 }
 0xb07   :  { %11356 = vmatpush.xpose.msra.mxu1 %v16995_v10  ;;  %v10996_v52 = vand.u32 4294901760, %v10995_v2  ;;  %v11000_v42 = vand.u32 4294901760, %v10473_v17 }
 0xb08   :  { %11307 = vmatpush.xpose.msra.mxu0 %v11095_v61 }
 0xb09   :  { %10997 = vmatmul.f32.gmra.mxu0 %v10996_v52  ;;  %11118 = vmatmul.f32.gmra.mxu1 %v11000_v42  ;;  %v11001_v48 = vsub.f32 %v10473_v17, %v11000_v42 }
 0xb0a   :  { %11163 = vmatpush.xpose.msra.mxu2 %v17009_v18  ;;  %11222 = vmatpush.xpose.msra.mxu3 %v17026_v45 }
 0xb0b   :  { %11358 = vmatpush.xpose.msra.mxu1 %v17011_v39  ;;  %v11002_v8 = vand.u32 4294901760, %v11001_v48 }
 0xb0c   :  { %11311 = vmatpush.xpose.msra.mxu0 %v11101_v36 }
 0xb0d   :  { %10891 = vmatmul.f32.gmra.mxu2 %v17161_v30  ;;  %11226 = vmatmul.f32.vlgmr.msra.gmra.mxu3 %v10978_v60  ;;  %v11003_v10 = vsub.f32 %v11001_v48, %v11002_v8 }
 0xb0e   :  { %11166 = vmatpush.xpose.msra.mxu2 %v17024_v50 }
 0xb0f   :  { %11360 = vmatpush.xpose.msra.mxu1 %v17026_v45  ;;  %v11004_v4 = vand.u32 4294901760, %v11003_v10 }
 0xb11   :  { %11005 = vmatmul.f32.gmra.mxu0 %v11004_v4 }
 0xb12   :  { %11362 = vmatmul.f32.vlgmr.msra.gmra.mxu1 %v17193_v49  ;;  %11169 = vmatpush.xpose.msra.mxu2 %v17041_v28 }
 0xb15   :  { %11172 = vmatmul.f32.vlgmr.msra.gmra.mxu2 %v17199_v33  ;;  %11232 = vmatmul.f32.gmra.mxu3 %v10986_v15  ;;  %v11525_v33 = vld [vmem:[%s17313_s12] ss:$0 sm:$0xff] }
 0xb19   :  { %11313 = vmatmul.f32.vlgmr.msra.gmra.mxu0 %v17193_v49 }
 0xb1a   :  { %11366 = vmatmul.f32.gmra.mxu1 %v17217_v5 }
 0xb1d   :  { %11177 = vmatmul.f32.gmra.mxu2 %v10985_v43  ;;  %11238 = vmatmul.f32.gmra.mxu3 %v10994_v54 }
 0xb21   :  { %11317 = vmatmul.f32.gmra.mxu0 %v17217_v5 }
 0xb22   :  { %11370 = vmatmul.f32.gmra.mxu1 %v10992_v24 }
 0xb25   :  { %11182 = vmatmul.f32.gmra.mxu2 %v10993_v27  ;;  %11244 = vmatmul.f32.gmra.mxu3 %v11002_v8 }
 0xb29   :  { %11321 = vmatmul.f32.gmra.mxu0 %v10992_v24 }
 0xb2a   :  { %11374 = vmatmul.f32.gmra.mxu1 %v11000_v42 }
 0xb2d   :  { %11187 = vmatmul.f32.gmra.mxu2 %v11001_v48 }
 0xb31   :  { %11325 = vmatmul.f32.gmra.mxu0 %v11000_v42 }
 0xb4c   :  { %v10739_v18 = vpop.f32.mrf.mxu0 }
 0xb4e   :  { %v10793_v39 = vpop.f32.mrf.mxu1 }
 0xb50   :  { %v10673_v50 = vpop.f32.mrf.mxu3 }
 0xb54   :  { %v10744_v36 = vpop.f32.mrf.mxu0 }
 0xb56   :  { %v10799_v45 = vpop.f32.mrf.mxu1 }
 0xb58   :  { %v10548_v61 = vpop.f32.mrf.mxu2  ;;  %v10677_v28 = vpop.f32.mrf.mxu3 }
 0xb59   :  { %v10549_v46 = vadd.f32 %v11525_v33, %v10548_v61 }
 0xb5b   :  { %v10674_v12 = vadd.f32 %v10673_v50, %v10549_v46 }
 0xb5c   :  { %v10749_v34 = vpop.f32.mrf.mxu0 }
 0xb5d   :  { %v10740_v26 = vadd.f32 %v10739_v18, %v10674_v12 }
 0xb5e   :  { %v10805_v30 = vpop.f32.mrf.mxu1 }
 0xb5f   :  { %v10794_v6 = vadd.f32 %v10793_v39, %v10740_v26 }
 0xb60   :  { %v10556_v20 = vpop.f32.mrf.mxu2  ;;  %v10681_v0 = vpop.f32.mrf.mxu3 }
 0xb61   :  { %v10557_v63 = vadd.f32 %v11525_v33, %v10556_v20  ;;  %v17826_v20 = vld [vmem:[#allocation43_spill] sm:$0xff] }
 0xb63   :  { %v10678_v57 = vadd.f32 %v10677_v28, %v10557_v63 }
 0xb64   :  { %v10754_v31 = vpop.f32.mrf.mxu0 }
 0xb65   :  { %v10745_v11 = vadd.f32 %v10744_v36, %v10678_v57 }
 0xb66   :  { %v10811_v59 = vpop.f32.mrf.mxu1 }
 0xb67   :  { %v10800_v16 = vadd.f32 %v10799_v45, %v10745_v11 }
 0xb68   :  { %v10564_v53 = vpop.f32.mrf.mxu2  ;;  %v10685_v7 = vpop.f32.mrf.mxu3 }
 0xb69   :  { %v10565_v56 = vadd.f32 %v11525_v33, %v10564_v53 }
 0xb6b   :  { %v10682_v62 = vadd.f32 %v10681_v0, %v10565_v56 }
 0xb6d   :  { %v10750_v24 = vadd.f32 %v10749_v34, %v10682_v62 }
 0xb6e   :  { %v11107_v13 = vpop.f32.mrf.mxu1 }
 0xb6f   :  { %v10806_v2 = vadd.f32 %v10805_v30, %v10750_v24 }
 0xb70   :  { %v10572_v49 = vpop.f32.mrf.mxu2  ;;  %v10929_v3 = vpop.f32.mrf.mxu3 }
 0xb71   :  { %v10573_v40 = vadd.f32 %v11525_v33, %v10572_v49  ;;  %v17827_v33 = vld [vmem:[#allocation76_spill] sm:$0xff] }
 0xb73   :  { %v10686_v58 = vadd.f32 %v10685_v7, %v10573_v40 }
 0xb75   :  { %v10755_v8 = vadd.f32 %v10754_v31, %v10686_v58 }
 0xb76   :  { %v10982_v19 = vpop.f32.mrf.mxu0  ;;  %v11111_v37 = vpop.f32.mrf.mxu1 }
 0xb77   :  { %v10812_v28 = vadd.f32 %v10811_v59, %v10755_v8 }
 0xb78   :  { %v10880_v41 = vpop.f32.mrf.mxu2  ;;  %v10933_v23 = vpop.f32.mrf.mxu3 }
 0xb79   :  { %v10881_v22 = vadd.f32 %v10880_v41, %v10794_v6 }
 0xb7b   :  { %v10930_v14 = vadd.f32 %v10929_v3, %v10881_v22 }
 0xb7d   :  { %v10983_v38 = vadd.f32 %v10982_v19, %v10930_v14  ;;  %v17829_v14 = vld [vmem:[#allocation41_spill] sm:$0xff] }
 0xb7e   :  { %v10990_v51 = vpop.f32.mrf.mxu0  ;;  %v11115_v55 = vpop.f32.mrf.mxu1 }
 0xb7f   :  { %v11108_v9 = vadd.f32 %v11107_v13, %v10983_v38 }
 0xb80   :  { %v10884_v60 = vpop.f32.mrf.mxu2  ;;  %v10937_v32 = vpop.f32.mrf.mxu3 }
 0xb81   :  { %v10885_v25 = vadd.f32 %v10884_v60, %v10800_v16 }
 0xb83   :  { %v10934_v27 = vadd.f32 %v10933_v23, %v10885_v25 }
 0xb85   :  { %v10991_v48 = vadd.f32 %v10990_v51, %v10934_v27 }
 0xb86   :  { %v10998_v35 = vpop.f32.mrf.mxu0  ;;  %v11119_v43 = vpop.f32.mrf.mxu1 }
 0xb87   :  { %v11112_v18 = vadd.f32 %v11111_v37, %v10991_v48 }
 0xb88   :  { %v10888_v44 = vpop.f32.mrf.mxu2  ;;  %v10941_v5 = vpop.f32.mrf.mxu3 }
 0xb89   :  { %v10889_v52 = vadd.f32 %v10888_v44, %v10806_v2 }
 0xb8b   :  { %v10938_v39 = vadd.f32 %v10937_v32, %v10889_v52 }
 0xb8d   :  { %v10999_v30 = vadd.f32 %v10998_v35, %v10938_v39  ;;  %v17828_v35 = vld [vmem:[#allocation39_spill] sm:$0xff] }
 0xb8e   :  { %v11006_v21 = vpop.f32.mrf.mxu0 }
 0xb8f   :  { %v11363_v54 = vpop.f32.mrf.mxu1  ;;  %v11116_v3 = vadd.f32 %v11115_v55, %v10999_v30 }
 0xb90   :  { %v10892_v15 = vpop.f32.mrf.mxu2  ;;  %v11227_v47 = vpop.f32.mrf.mxu3 }
 0xb91   :  { %v10893_v53 = vadd.f32 %v10892_v15, %v10812_v28 }
 0xb93   :  { %v10942_v49 = vadd.f32 %v10941_v5, %v10893_v53 }
 0xb95   :  { %v11007_v59 = vadd.f32 %v11006_v21, %v10942_v49  ;;  %v17830_v21 = vld [vmem:[#allocation70_spill] sm:$0xff] }
 0xb96   :  { %v11314_v29 = vpop.f32.mrf.mxu0 }
 0xb97   :  { %v11367_v34 = vpop.f32.mrf.mxu1  ;;  %v11120_v12 = vadd.f32 %v11119_v43, %v11007_v59 }
 0xb98   :  { %v11173_v1 = vpop.f32.mrf.mxu2  ;;  %v11233_v4 = vpop.f32.mrf.mxu3 }
 0xb99   :  { %v11174_v17 = vadd.f32 %v11173_v1, %v11108_v9 }
 0xb9b   :  { %v11228_v42 = vadd.f32 %v11227_v47, %v11174_v17 }
 0xb9d   :  { %v11315_v10 = vadd.f32 %v11314_v29, %v11228_v42 }
 0xb9e   :  { %v11318_v45 = vpop.f32.mrf.mxu0 }
 0xb9f   :  { %v11364_v50 = vadd.f32 %v11363_v54, %v11315_v10  ;;  %v11371_v60 = vpop.f32.mrf.mxu1 }
 0xba0   :  { %v11178_v61 = vpop.f32.mrf.mxu2  ;;  %v11239_v19 = vpop.f32.mrf.mxu3 }
 0xba1   :  { %v11179_v36 = vadd.f32 %v11178_v61, %v11112_v18  ;;  %v11378_v0 = vadd.f32 %v11364_v50, %v17826_v20 }
 0xba3   :  { %v11234_v7 = vadd.f32 %v11233_v4, %v11179_v36  ;;  %11384 = vadd.xlane.f32.xlu1 %v11378_v0 }
 0xba5   :  { %v11319_v13 = vadd.f32 %v11318_v45, %v11234_v7  ;;  %v11526_v7 = vld [vmem:[%s17308_s7] ss:$0 sm:$0xff]  ;;  %s11914_s7 = smov [#allocation14]  }
 0xba6   :  { %v11322_v46 = vpop.f32.mrf.mxu0 }
 0xba7   :  { %v11368_v31 = vadd.f32 %v11367_v34, %v11319_v13  ;;  %v11375_v56 = vpop.f32.mrf.mxu1 }
 0xba8   :  { %v11183_v41 = vpop.f32.mrf.mxu2  ;;  %v11245_v6 = vpop.f32.mrf.mxu3 }
 0xba9   :  { %v11184_v23 = vadd.f32 %v11183_v41, %v11116_v3  ;;  %v11379_v37 = vadd.f32 %v11368_v31, %v17827_v33  ;;  %v11527_v3 = vld [vmem:[%s17309_s8] ss:$0 sm:$0xff]  ;;  %s11486_s8 = sshll.u32 %s11914_s7, 4  ;;  %s11487_s8 = int_to_ptr.vmem [resolvable:$true] %s11486_s8 }
 0xbab   :  { %v11240_v51 = vadd.f32 %v11239_v19, %v11184_v23  ;;  %11386 = vadd.xlane.f32.xlu2 %v11379_v37 }
 0xbad   :  { %v11323_v32 = vadd.f32 %v11322_v46, %v11240_v51 }
 0xbae   :  { %v11326_v5 = vpop.f32.mrf.mxu0 }
 0xbaf   :  { %v11372_v63 = vadd.f32 %v11371_v60, %v11323_v32 }
 0xbb0   :  { %v11188_v26 = vpop.f32.mrf.mxu2 }
 0xbb1   :  { %v11189_v44 = vadd.f32 %v11188_v26, %v11120_v12  ;;  %v11380_v57 = vadd.f32 %v11372_v63, %v17828_v35 }
 0xbb3   :  { %v11246_v55 = vadd.f32 %v11245_v6, %v11189_v44  ;;  %11388 = vadd.xlane.f32.xlu0 %v11380_v57 }
 0xbb5   :  { %v11327_v22 = vadd.f32 %v11326_v5, %v11246_v55 }
 0xbb7   :  { %v11376_v11 = vadd.f32 %v11375_v56, %v11327_v22 }
 0xbb9   :  { %v11381_v15 = vadd.f32 %v11376_v11, %v17829_v14 }
 0xbbb   :  { %11390 = vadd.xlane.f32.xlu1 %v11381_v15 }
 0xc16   :  { %v11385_v62 = vpop.xlane.xlu1 %11384 }
 0xc17   :  { %v11392_v16 = vmul.f32 %v11385_v62, %v17830_v21 }
 0xc19   :  { %v11396_v25 = vsub.f32 %v11378_v0, %v11392_v16 }
 0xc1b   :  { %v11400_v43 = vmul.f32 %v11396_v25, %v11396_v25 }
 0xc1d   :  { %11404 = vadd.xlane.f32.xlu2 %v11400_v43 }
 0xc1e   :  { %v11387_v38 = vpop.xlane.xlu2 %11386 }
 0xc1f   :  { %v11393_v47 = vmul.f32 %v11387_v38, %v17830_v21 }
 0xc21   :  { %v11397_v40 = vsub.f32 %v11379_v37, %v11393_v47 }
 0xc23   :  { %v11401_v24 = vmul.f32 %v11397_v40, %v11397_v40 }
 0xc25   :  { %11406 = vadd.xlane.f32.xlu0 %v11401_v24 }
 0xc26   :  { %v11389_v29 = vpop.xlane.xlu0 %11388 }
 0xc27   :  { %v11394_v27 = vmul.f32 %v11389_v29, %v17830_v21 }
 0xc29   :  { %v17274_v9 = vsub.f32 %v11380_v57, %v11394_v27 }
 0xc2b   :  { %v11402_v54 = vmul.f32 %v17274_v9, %v17274_v9 }
 0xc2d   :  { %11408 = vadd.xlane.f32.xlu1 %v11402_v54 }
 0xc2e   :  { %v11391_v1 = vpop.xlane.xlu1 %11390 }
 0xc2f   :  { %v11395_v58 = vmul.f32 %v11391_v1, %v17830_v21 }
 0xc31   :  { %v17279_v2 = vsub.f32 %v11381_v15, %v11395_v58 }
 0xc33   :  { %v11403_v17 = vmul.f32 %v17279_v2, %v17279_v2 }
 0xc35   :  { %11410 = vadd.xlane.f32.xlu2 %v11403_v17 }
 0xc90   :  { %v11405_v52 = vpop.xlane.xlu2 %11404 }
 0xc91   :  { %v11412_v42 = vmul.f32 %v11405_v52, %v17830_v21 }
 0xc93   :  { %v11416_v48 = vadd.f32 1e-12, %v11412_v42 }
 0xc95   :  { %11682 = vrsqrt.f32 %v11416_v48  ;;  %vm11426_vm13 = vweird.f32 %v11416_v48 }
 0xc98   :  { %v11407_v8 = vpop.xlane.xlu0 %11406 }
 0xc99   :  { %v11413_v10 = vmul.f32 %v11407_v8, %v17830_v21 }
 0xc9b   :  { %v11683_v4 = vpop.eup %11682  ;;  %v11417_v39 = vadd.f32 1e-12, %v11413_v10 }
 0xc9c   :  { %v11421_v18 = vmul.f32 %v11683_v4, %v11416_v48  ;;  %vm11427_vm12 = vweird.f32 %v11683_v4 }
 0xc9d   :  { %11684 = vrsqrt.f32 %v11417_v39  ;;  %vm11428_vm14 = vmor %vm11426_vm13, %vm11427_vm12  ;;  %vm11436_vm15 = vweird.f32 %v11417_v39 }
 0xc9e   :  { %v11422_v50 = vmul.f32 %v11683_v4, %v11421_v18 }
 0xca0   :  { %v11423_v45 = vmul.f32 0.5, %v11422_v50  ;;  %v11409_v61 = vpop.xlane.xlu1 %11408 }
 0xca1   :  { %v11414_v28 = vmul.f32 %v11409_v61, %v17830_v21 }
 0xca2   :  { %v11424_v36 = vsub.f32 1.5, %v11423_v45 }
 0xca3   :  { %v11685_v20 = vpop.eup %11684  ;;  %v11418_v0 = vadd.f32 1e-12, %v11414_v28 }
 0xca4   :  { %v11425_v34 = vmul.f32 %v11683_v4, %v11424_v36  ;;  %v11431_v53 = vmul.f32 %v11685_v20, %v11417_v39  ;;  %vm11437_vm0 = vweird.f32 %v11685_v20 }
 0xca5   :  { %11686 = vrsqrt.f32 %v11418_v0  ;;  %vm11438_vm1 = vmor %vm11436_vm15, %vm11437_vm0  ;;  %vm11446_vm3 = vweird.f32 %v11418_v0 }
 0xca6   :  { %v11429_v30 = vsel %vm11428_vm14, %v11683_v4, %v11425_v34  ;;  %v11432_v13 = vmul.f32 %v11685_v20, %v11431_v53 }
 0xca7   :  { %v11460_v49 = vmul.f32 %v11429_v30, %v11396_v25 }
 0xca8   :  { %v11433_v31 = vmul.f32 0.5, %v11432_v13  ;;  %v11411_v19 = vpop.xlane.xlu2 %11410 }
 0xca9   :  { %v11467_v41 = vmul.f32 %v11526_v7, %v11460_v49  ;;  %v11415_v23 = vmul.f32 %v11411_v19, %v17830_v21 }
 0xcaa   :  { %v11434_v33 = vsub.f32 1.5, %v11433_v31 }
 0xcab   :  { %v11687_v37 = vpop.eup %11686  ;;  %v11419_v46 = vadd.f32 1e-12, %v11415_v23  ;;  %v11474_v51 = vadd.f32 %v11527_v3, %v11467_v41 }
 0xcac   :  { %v11435_v59 = vmul.f32 %v11685_v20, %v11434_v33  ;;  %v11441_v60 = vmul.f32 %v11687_v37, %v11418_v0  ;;  %vm11447_vm2 = vweird.f32 %v11687_v37 }
 0xcad   :  { %11688 = vrsqrt.f32 %v11419_v46  ;;  %11478 = vst [vmem:[#allocation14] sm:$0xff] %v11474_v51  ;;  %vm11448_vm4 = vmor %vm11446_vm3, %vm11447_vm2  ;;  %vm11456_vm6 = vweird.f32 %v11419_v46 }
 0xcae   :  { %v11439_v32 = vsel %vm11438_vm1, %v11685_v20, %v11435_v59  ;;  %v11442_v12 = vmul.f32 %v11687_v37, %v11441_v60 }
 0xcaf   :  { %v11461_v63 = vmul.f32 %v11439_v32, %v11397_v40 }
 0xcb0   :  { %v11443_v26 = vmul.f32 0.5, %v11442_v12 }
 0xcb1   :  { %v11468_v44 = vmul.f32 %v11526_v7, %v11461_v63 }
 0xcb2   :  { %v11444_v35 = vsub.f32 1.5, %v11443_v26 }
 0xcb3   :  { %v11689_v57 = vpop.eup %11688  ;;  %v11475_v6 = vadd.f32 %v11527_v3, %v11468_v44 }
 0xcb4   :  { %v11445_v55 = vmul.f32 %v11687_v37, %v11444_v35  ;;  %v11451_v5 = vmul.f32 %v11689_v57, %v11419_v46  ;;  %vm11457_vm5 = vweird.f32 %v11689_v57 }
 0xcb5   :  { %11479 = vst [vmem:[#allocation14 + $0x8] sm:$0xff] %v11475_v6  ;;  %vm11458_vm7 = vmor %vm11456_vm6, %vm11457_vm5 }
 0xcb6   :  { %v11449_v22 = vsel %vm11448_vm4, %v11687_v37, %v11445_v55  ;;  %v11452_v56 = vmul.f32 %v11689_v57, %v11451_v5 }
 0xcb7   :  { %v11462_v11 = vmul.f32 %v11449_v22, %v17274_v9 }
 0xcb8   :  { %v11453_v14 = vmul.f32 0.5, %v11452_v56 }
 0xcb9   :  { %v11469_v15 = vmul.f32 %v11526_v7, %v11462_v11 }
 0xcba   :  { %v11454_v62 = vsub.f32 1.5, %v11453_v14 }
 0xcbb   :  { %v11476_v21 = vadd.f32 %v11527_v3, %v11469_v15 }
 0xcbc   :  { %v11455_v16 = vmul.f32 %v11689_v57, %v11454_v62 }
 0xcbd   :  { %11480 = vst [vmem:[#allocation14 + $0x10] sm:$0xff] %v11476_v21 }
 0xcbe   :  { %v11459_v25 = vsel %vm11458_vm7, %v11689_v57, %v11455_v16 }
 0xcbf   :  { %v11463_v43 = vmul.f32 %v11459_v25, %v17279_v2 }
 0xcc1   :  { %v11470_v38 = vmul.f32 %v11526_v7, %v11463_v43 }
 0xcc3   :  { %v11477_v47 = vadd.f32 %v11527_v3, %v11470_v38 }
 0xcc5   :  { %11481 = vst [vmem:[#allocation14 + $0x18] sm:$0xff] %v11477_v47 }
 0xcc6   :  { %11494 = dma.vmem_to_hbm [thread:$0]  %s11487_s8, 512, %s11489_s21, [#allocation4], %s11897_s16, %s11897_s16, %s11898_s17  }
 0xcc7   :  { %11894 = dma.done.wait [#allocation4], 512  }
 0xcc8   :  { %11895 = vsyncadd [#allocation4], 4294966784 }
 0xcc9   :  { %11499 = vsyncpa [#allocation3], 1 }
 0xcca   :  { %11500 = vsyncpa [#allocation6], 1 }
 0xccb   :  { %11501 = vsyncpa [#allocation9], 1 }
 0xccc   :  { %11502 = vsyncpa [#allocation12], 1 }
 0xccd   :  { %11503 = vsyncpa [#allocation4], 1 }

</bundles_post_ra>
